<compile_context>
chip_gen: v5e
topology: v5e:2x2
jax: 0.10.0
libtpu: 0.0.40
codegen_flags: <defaults>
</compile_context>

<pallas_src>
import math

import jax
import jax.numpy as jnp
from jax.experimental import pallas as pl
from jax.experimental.pallas import tpu as pltpu

_LANE = 128
_MiB = 1024 * 1024


def _round_up(x, m):
    return ((x + m - 1) // m) * m


def _sublane(itemsize):
    # second-to-last-dim physical tiling: 8 rows for 32-bit, 16 for 16-bit, ...
    return 8 * max(1, 4 // int(itemsize))


def _tpu_defaults():
    """Returns (block budget bytes, vmem_limit_bytes, #TensorCores)."""
    phys = 64 * _MiB  # conservative default (v7x per-core VMEM)
    try:
        info = pltpu.get_tpu_info()
        phys = int(getattr(info, "vmem_capacity_bytes", phys)) or phys
    except Exception:
        pass
    # ~1/3 of physical VMEM for double-buffered blocks + temporaries,
    # ~1/2 (>=32 MiB when available) handed to the compiler as the scoped limit.
    budget = max(8 * _MiB, phys // 3)
    vmem_limit = min(phys * 3 // 4, max(32 * _MiB, phys // 2))
    vmem_limit = max(vmem_limit, 16 * _MiB)
    num_tc = 1
    try:
        kind = jax.devices()[0].device_kind.lower()
        if ("v7" in kind) or ("v4" in kind) or ("v5p" in kind):
            num_tc = 2
    except Exception:
        pass
    return budget, vmem_limit, num_tc


# --------------------------------------------------------------------------
# Packed (lane-dense) kernel: group axis G lives on the 128-lane axis.
# Blocks: q/k (N, d_k, Gb), v (Nk, d_v, Gb), mask (Nk, Gb),
#         ctx (Nq, d_v, Gb), attn_w (Nq, Nk, Gb); Gb is a multiple of 128.
# --------------------------------------------------------------------------
def _make_packed_kernel(n_q, n_k, inv_sqrt_dk, has_mask, return_weights):
    def kernel(*refs):
        if has_mask:
            q_ref, k_ref, v_ref, m_ref = refs[:4]
            out_refs = refs[4:]
        else:
            q_ref, k_ref, v_ref = refs[:3]
            m_ref = None
            out_refs = refs[3:]
        ctx_ref = out_refs[0]
        w_ref = out_refs[1] if return_weights else None

        f32 = jnp.float32
        mask_rows = None
        if has_mask:
            mask_rows = [m_ref[pl.ds(m, 1), :].astype(f32) for m in range(n_k)]

        for n in range(n_q):
            q_n = q_ref[n].astype(f32)                                  # (d_k, Gb)
            e_rows = []
            for m in range(n_k):
                # per-lane (per-group) dot product over d_k (sublane reduce)
                s = jnp.sum(q_n * k_ref[m].astype(f32), axis=0, keepdims=True)
                e = jnp.exp(s * inv_sqrt_dk)        # un-stabilized: matches torch.exp
                if has_mask:
                    e = e * mask_rows[m]
                e_rows.append(e)                                         # (1, Gb)

            denom = e_rows[0]
            for m in range(1, n_k):
                denom = denom + e_rows[m]
            inv = pl.reciprocal(denom + 1e-8, approx=True)               # EUP vrcp
            w_rows = [e * inv for e in e_rows]                           # (1, Gb) each

            acc = w_rows[0] * v_ref[0].astype(f32)                       # (d_v, Gb)
            for m in range(1, n_k):
                acc = acc + w_rows[m] * v_ref[m].astype(f32)
            ctx_ref[n] = acc.astype(ctx_ref.dtype)                       # dense store
            if return_weights:
                w_ref[n] = jnp.concatenate(w_rows, axis=0).astype(w_ref.dtype)

    return kernel


def _choose_lane_block(G, bytes_per_lane, budget, num_tc, cap=512):
    """Pick (Gb, padded G, steps): Gb multiple of 128, double-buffered blocks
    within budget, minimizing padded work + per-step overhead, preferring a
    step count that is a multiple of the TensorCore count."""
    gp_min = _round_up(max(G, 1), _LANE)
    max_steps = max(1, gp_min // _LANE)
    step_cost = max(1, int(450_000 // max(1, bytes_per_lane)))  # ~0.35us in lane-cols
    best = None
    for steps in range(1, max_steps + 1):
        gb = _round_up(pl.cdiv(gp_min, steps), _LANE)
        if steps < max_steps and (gb > cap or 2 * gb * bytes_per_lane > budget):
            continue
        gp = steps * gb
        cost = gp + step_cost * steps
        if num_tc > 1 and steps % num_tc != 0 and gp_min > _LANE:
            cost += pl.cdiv(gp, steps)          # one TC idles for ~a step
        if best is None or cost < best[0]:
            best = (cost, gb, gp, steps)
    _, gb, gp, steps = best
    return gb, gp, steps


def _packed_attention(q, k, v, mask, out_dtype, inv_sqrt_dk, return_weights,
                      budget, vmem_limit, num_tc):
    G, n_q, d_k = q.shape
    n_k = k.shape[1]
    d_v = v.shape[-1]
    in_isz = jnp.dtype(q.dtype).itemsize
    out_isz = jnp.dtype(out_dtype).itemsize
    s_in, s_out = _sublane(in_isz), _sublane(out_isz)

    # bytes per lane column (per group), with sublane-tile padding; lanes are dense.
    bytes_per_lane = (
        (n_q + n_k) * _round_up(d_k, s_in) * in_isz               # Q, K
        + n_k * _round_up(d_v, s_in) * in_isz                     # V
        + (_round_up(n_k, s_in) * in_isz if mask is not None else 0)
        + n_q * _round_up(d_v, s_out) * out_isz                   # ctx
        + (n_q * _round_up(n_k, s_out) * out_isz if return_weights else 0))
    gb, gp, steps = _choose_lane_block(G, bytes_per_lane, budget, num_tc)

    def pack3(x):  # (G, r, c) -> (r, c, gp), groups on the lane axis
        if gp != G:
            x = jnp.pad(x, ((0, gp - G), (0, 0), (0, 0)))
        return jnp.transpose(x, (1, 2, 0))

    inputs = [pack3(q), pack3(k), pack3(v)]
    in_specs = [
        pl.BlockSpec((n_q, d_k, gb), lambda g: (0, 0, g)),
        pl.BlockSpec((n_k, d_k, gb), lambda g: (0, 0, g)),
        pl.BlockSpec((n_k, d_v, gb), lambda g: (0, 0, g)),
    ]
    has_mask = mask is not None
    if has_mask:
        m2 = mask if gp == G else jnp.pad(mask, ((0, gp - G), (0, 0)))
        inputs.append(jnp.transpose(m2, (1, 0)))                  # (n_k, gp)
        in_specs.append(pl.BlockSpec((n_k, gb), lambda g: (0, g)))

    out_shape = [jax.ShapeDtypeStruct((n_q, d_v, gp), out_dtype)]
    out_specs = [pl.BlockSpec((n_q, d_v, gb), lambda g: (0, 0, g))]
    if return_weights:
        out_shape.append(jax.ShapeDtypeStruct((n_q, n_k, gp), out_dtype))
        out_specs.append(pl.BlockSpec((n_q, n_k, gb), lambda g: (0, 0, g)))

    results = pl.pallas_call(
        _make_packed_kernel(n_q, n_k, inv_sqrt_dk, has_mask, return_weights),
        out_shape=tuple(out_shape),
        grid_spec=pltpu.PrefetchScalarGridSpec(
            num_scalar_prefetch=0,
            grid=(steps,),
            in_specs=in_specs,
            out_specs=tuple(out_specs)),
        compiler_params=pltpu.CompilerParams(
            dimension_semantics=("parallel",),
            vmem_limit_bytes=vmem_limit),
    )(*inputs)
    if not isinstance(results, (list, tuple)):
        results = (results,)

    ctx = jnp.transpose(results[0], (2, 0, 1))[:G]                 # (G, n_q, d_v)
    if return_weights:
        attn_w = jnp.transpose(results[1], (2, 0, 1))[:G]          # (G, n_q, n_k)
        return ctx, attn_w
    return ctx


# --------------------------------------------------------------------------
# Batched MXU kernel (fallback for larger N / d_k / d_v): blocks (Gb, N, d).
# --------------------------------------------------------------------------
def _make_batched_kernel(inv_sqrt_dk, has_mask, return_weights):
    def kernel(*refs):
        if has_mask:
            q_ref, k_ref, v_ref, m_ref = refs[:4]
            out_refs = refs[4:]
        else:
            q_ref, k_ref, v_ref = refs[:3]
            m_ref = None
            out_refs = refs[3:]

        q = q_ref[...]
        k = k_ref[...]
        v = v_ref[...]

        scores = jnp.einsum("gnd,gmd->gnm", q, k,
                            preferred_element_type=jnp.float32)
        scores = jnp.exp(scores * inv_sqrt_dk)        # matches torch.exp (unstabilized)
        if has_mask:
            scores = scores * m_ref[...].astype(jnp.float32)       # (Gb,1,Nk) bcast

        denom = jnp.sum(scores, axis=-1, keepdims=True) + 1e-8
        attn_w = scores * pl.reciprocal(denom, approx=True)

        ctx = jnp.einsum("gnm,gmd->gnd", attn_w.astype(v.dtype), v,
                         preferred_element_type=jnp.float32)
        out_refs[0][...] = ctx.astype(out_refs[0].dtype)
        if return_weights:
            out_refs[1][...] = attn_w.astype(out_refs[1].dtype)

    return kernel


def _choose_group_block(G, per_group_bytes, budget, num_tc, cap=256):
    max_gb = max(1, min(cap, budget // max(1, per_group_bytes), G))
    min_steps = pl.cdiv(G, max_gb)
    step_cost = max(1, int(450_000 // max(1, per_group_bytes)))
    best = None
    for steps in range(min_steps, min_steps + max(num_tc, 1) + 1):
        gb = pl.cdiv(G, steps)
        gp = steps * gb
        cost = gp + step_cost * steps
        if num_tc > 1 and steps % num_tc != 0 and G >= num_tc:
            cost += gb
        if best is None or cost < best[0]:
            best = (cost, gb, gp, steps)
    _, gb, gp, steps = best
    return gb, gp, steps


def _batched_attention(q, k, v, mask, out_dtype, inv_sqrt_dk, return_weights,
                       budget, vmem_limit, num_tc):
    G, n_q, d_k = q.shape
    n_k = k.shape[1]
    d_v = v.shape[-1]
    in_isz = jnp.dtype(q.dtype).itemsize
    out_isz = jnp.dtype(out_dtype).itemsize
    s_in, s_out = _sublane(in_isz), _sublane(out_isz)

    # physically padded, double-buffered block bytes per group ...
    db = (_round_up(n_q, s_in) * _round_up(d_k, _LANE) * in_isz
          + _round_up(n_k, s_in) * (_round_up(d_k, _LANE) + _round_up(d_v, _LANE)) * in_isz
          + (_round_up(1, s_in) * _round_up(n_k, _LANE) * in_isz if mask is not None else 0)
          + _round_up(n_q, s_out) * _round_up(d_v, _LANE) * out_isz
          + (_round_up(n_q, s_out) * _round_up(n_k, _LANE) * out_isz if return_weights else 0))
    # ... plus f32 temporaries (scores, attn_w, f32 ctx), counted once.
    once = _round_up(n_q, 8) * (2 * _round_up(n_k, _LANE) + _round_up(d_v, _LANE)) * 4
    gb, gp, steps = _choose_group_block(G, 2 * db + once, budget, num_tc)

    if gp != G:
        pad3 = ((0, gp - G), (0, 0), (0, 0))
        q = jnp.pad(q, pad3)
        k = jnp.pad(k, pad3)
        v = jnp.pad(v, pad3)
        if mask is not None:
            mask = jnp.pad(mask, ((0, gp - G), (0, 0)))

    inputs = [q, k, v]
    in_specs = [
        pl.BlockSpec((gb, n_q, d_k), lambda g: (g, 0, 0)),
        pl.BlockSpec((gb, n_k, d_k), lambda g: (g, 0, 0)),
        pl.BlockSpec((gb, n_k, d_v), lambda g: (g, 0, 0)),
    ]
    has_mask = mask is not None
    if has_mask:
        inputs.append(mask.reshape(gp, 1, n_k))
        in_specs.append(pl.BlockSpec((gb, 1, n_k), lambda g: (g, 0, 0)))

    out_shape = [jax.ShapeDtypeStruct((gp, n_q, d_v), out_dtype)]
    out_specs = [pl.BlockSpec((gb, n_q, d_v), lambda g: (g, 0, 0))]
    if return_weights:
        out_shape.append(jax.ShapeDtypeStruct((gp, n_q, n_k), out_dtype))
        out_specs.append(pl.BlockSpec((gb, n_q, n_k), lambda g: (g, 0, 0)))

    results = pl.pallas_call(
        _make_batched_kernel(inv_sqrt_dk, has_mask, return_weights),
        out_shape=tuple(out_shape),
        grid_spec=pltpu.PrefetchScalarGridSpec(
            num_scalar_prefetch=0,
            grid=(steps,),
            in_specs=in_specs,
            out_specs=tuple(out_specs)),
        compiler_params=pltpu.CompilerParams(
            dimension_semantics=("parallel",),
            vmem_limit_bytes=vmem_limit),
    )(*inputs)
    if not isinstance(results, (list, tuple)):
        results = (results,)

    ctx = results[0][:G]
    if return_weights:
        return ctx, results[1][:G]
    return ctx


# --------------------------------------------------------------------------
# Public wrapper (same forward semantics as the PyTorch module).
# --------------------------------------------------------------------------
def scaled_dot_product_attention(Q, K, V, attn_mask=None, return_weights=True,
                                 compute_dtype=None, force_path=None):
    """Returns (context, attn_w) when return_weights else context only.

    compute_dtype: optional (e.g. jnp.bfloat16) — casts Q/K/V (and outputs) to
      halve HBM traffic; softmax math stays f32 in-kernel.  Numerics-affecting.
    force_path: None (auto), "packed" or "batched" (testing / override).
    """
    B, H, n_q, d_k = Q.shape
    n_k = K.shape[2]
    d_v = V.shape[-1]
    G = B * H
    inv_sqrt_dk = 1.0 / math.sqrt(d_k)

    out_dtype = (jnp.dtype(compute_dtype) if compute_dtype is not None
                 else jnp.result_type(Q.dtype, K.dtype, V.dtype))
    if compute_dtype is not None:
        Q = Q.astype(compute_dtype)
        K = K.astype(compute_dtype)
        V = V.astype(compute_dtype)

    q = Q.reshape(G, n_q, d_k)
    k = K.reshape(G, n_k, d_k)
    v = V.reshape(G, n_k, d_v)
    mask = None if attn_mask is None else attn_mask.reshape(G, n_k).astype(q.dtype)

    budget, vmem_limit, num_tc = _tpu_defaults()

    if force_path is None:
        use_packed = (n_q <= 16 and n_k <= 16 and d_k <= 64 and d_v <= 64)
    else:
        use_packed = (force_path == "packed")

    fn = _packed_attention if use_packed else _batched_attention
    results = fn(q, k, v, mask, out_dtype, inv_sqrt_dk, return_weights,
                 budget, vmem_limit, num_tc)

    if return_weights:
        ctx, attn_w = results
        return ctx.reshape(B, H, n_q, d_v), attn_w.reshape(B, H, n_q, n_k)
    return results.reshape(B, H, n_q, d_v)


def _reference(Q, K, V, attn_mask=None):
    d_k = Q.shape[-1]
    scores = jnp.einsum("bhqd,bhkd->bhqk", Q, K) / math.sqrt(d_k)
    scores = jnp.exp(scores)
    if attn_mask is not None:
        scores = scores * attn_mask[:, :, None, :]
    attn_w = scores / (jnp.sum(scores, axis=-1, keepdims=True) + 1e-8)
    ctx = jnp.einsum("bhqk,bhkd->bhqd", attn_w, V)
    return ctx, attn_w


if __name__ == "__main__":
    key = jax.random.PRNGKey(0)
    kq, kk, kv, km = jax.random.split(key, 4)

    B, H, N, d_k, d_v = 2, 4, 8, 32, 32
    Q = jax.random.normal(kq, (B, H, N, d_k), jnp.float32)
    K = jax.random.normal(kk, (B, H, N, d_k), jnp.float32)
    V = jax.random.normal(kv, (B, H, N, d_v), jnp.float32)
    attn_mask = (jax.random.uniform(km, (B, H, N)) > 0.3).astype(jnp.float32)

    ctx_ref, w_ref = _reference(Q, K, V, attn_mask)
    ctx_ref_nm, w_ref_nm = _reference(Q, K, V, None)
    TOL = dict(atol=3e-3, rtol=3e-3)   # approx-reciprocal normalization

    # 1) packed (lane-dense) path: mask + weights
    ctx, w = scaled_dot_product_attention(Q, K, V, attn_mask)
    jax.block_until_ready((ctx, w))
    assert jnp.allclose(ctx, ctx_ref, **TOL)
    assert jnp.allclose(w, w_ref, **TOL)

    # 2) packed, no mask (mask DMA / multiply elided)
    ctx2, w2 = scaled_dot_product_attention(Q, K, V, None)
    jax.block_until_ready((ctx2, w2))
    assert jnp.allclose(ctx2, ctx_ref_nm, **TOL)
    assert jnp.allclose(w2, w_ref_nm, **TOL)

    # 3) packed, context only (attn_w HBM writeback elided)
    ctx3 = scaled_dot_product_attention(Q, K, V, attn_mask, return_weights=False)
    jax.block_until_ready(ctx3)
    assert jnp.allclose(ctx3, ctx_ref, **TOL)

    # 4) batched-MXU fallback path (used for larger N / d)
    ctx4, w4 = scaled_dot_product_attention(Q, K, V, attn_mask, force_path="batched")
    jax.block_until_ready((ctx4, w4))
    assert jnp.allclose(ctx4, ctx_ref, **TOL)
    assert jnp.allclose(w4, w_ref, **TOL)

    # 5) multi-step grid + group padding (G = 144 -> padded to a lane multiple)
    B2, H2 = 36, 4
    Q5 = jax.random.normal(kq, (B2, H2, N, d_k), jnp.float32)
    K5 = jax.random.normal(kk, (B2, H2, N, d_k), jnp.float32)
    V5 = jax.random.normal(kv, (B2, H2, N, d_v), jnp.float32)
    M5 = (jax.random.uniform(km, (B2, H2, N)) > 0.3).astype(jnp.float32)
    ctx5, w5 = scaled_dot_product_attention(Q5, K5, V5, M5)
    jax.block_until_ready((ctx5, w5))
    ctx5_ref, w5_ref = _reference(Q5, K5, V5, M5)
    assert jnp.allclose(ctx5, ctx5_ref, **TOL)
    assert jnp.allclose(w5, w5_ref, **TOL)

    # 6) opt-in bf16 HBM/compute path (compared against a bf16-cast reference)
    ctx6, w6 = scaled_dot_product_attention(Q, K, V, attn_mask,
                                            compute_dtype=jnp.bfloat16)
    jax.block_until_ready((ctx6, w6))
    Qb = Q.astype(jnp.bfloat16).astype(jnp.float32)
    Kb = K.astype(jnp.bfloat16).astype(jnp.float32)
    Vb = V.astype(jnp.bfloat16).astype(jnp.float32)
    ctx6_ref, w6_ref = _reference(Qb, Kb, Vb, attn_mask)
    assert jnp.allclose(ctx6.astype(jnp.float32), ctx6_ref, atol=5e-2, rtol=5e-2)
    assert jnp.allclose(w6.astype(jnp.float32), w6_ref, atol=5e-2, rtol=5e-2)

    print("KERNEL_OK")
</pallas_src>

<mosaic_0001>
module attributes {stable_mosaic.version = 11 : i64} {
  func.func @kernel(%arg0: i32, %arg1: memref<8x32x128xf32, #tpu.memory_space<vmem>>, %arg2: memref<8x32x128xf32, #tpu.memory_space<vmem>>, %arg3: memref<8x32x128xf32, #tpu.memory_space<vmem>>, %arg4: memref<8x128xf32, #tpu.memory_space<vmem>>, %arg5: memref<8x32x128xf32, #tpu.memory_space<vmem>>, %arg6: memref<8x8x128xf32, #tpu.memory_space<vmem>>) attributes {dimension_semantics = [#tpu.dimension_semantics<parallel>], iteration_bounds = array<i64: 1>, scalar_prefetch = 0 : i64, scratch_operands = 0 : i64, tpu.core_type = #tpu.core_type<tc>, window_params = [{transform_indices = @transform_0, window_bounds = array<i64: 8, 32, 128>}, {transform_indices = @transform_1, window_bounds = array<i64: 8, 32, 128>}, {transform_indices = @transform_2, window_bounds = array<i64: 8, 32, 128>}, {transform_indices = @transform_3, window_bounds = array<i64: 8, 128>}, {transform_indices = @transform_4, window_bounds = array<i64: 8, 32, 128>}, {transform_indices = @transform_5, window_bounds = array<i64: 8, 8, 128>}]} {
    %c0 = arith.constant 0 : index
    %c0_0 = arith.constant 0 : index
    %0 = vector.load %arg4[%c0, %c0_0] : memref<8x128xf32, #tpu.memory_space<vmem>>, vector<1x128xf32>
    %c1 = arith.constant 1 : index
    %c0_1 = arith.constant 0 : index
    %1 = vector.load %arg4[%c1, %c0_1] : memref<8x128xf32, #tpu.memory_space<vmem>>, vector<1x128xf32>
    %c2 = arith.constant 2 : index
    %c0_2 = arith.constant 0 : index
    %2 = vector.load %arg4[%c2, %c0_2] : memref<8x128xf32, #tpu.memory_space<vmem>>, vector<1x128xf32>
    %c3 = arith.constant 3 : index
    %c0_3 = arith.constant 0 : index
    %3 = vector.load %arg4[%c3, %c0_3] : memref<8x128xf32, #tpu.memory_space<vmem>>, vector<1x128xf32>
    %c4 = arith.constant 4 : index
    %c0_4 = arith.constant 0 : index
    %4 = vector.load %arg4[%c4, %c0_4] : memref<8x128xf32, #tpu.memory_space<vmem>>, vector<1x128xf32>
    %c5 = arith.constant 5 : index
    %c0_5 = arith.constant 0 : index
    %5 = vector.load %arg4[%c5, %c0_5] : memref<8x128xf32, #tpu.memory_space<vmem>>, vector<1x128xf32>
    %c6 = arith.constant 6 : index
    %c0_6 = arith.constant 0 : index
    %6 = vector.load %arg4[%c6, %c0_6] : memref<8x128xf32, #tpu.memory_space<vmem>>, vector<1x128xf32>
    %c7 = arith.constant 7 : index
    %c0_7 = arith.constant 0 : index
    %7 = vector.load %arg4[%c7, %c0_7] : memref<8x128xf32, #tpu.memory_space<vmem>>, vector<1x128xf32>
    %c0_8 = arith.constant 0 : index
    %c0_9 = arith.constant 0 : index
    %c0_10 = arith.constant 0 : index
    %8 = vector.load %arg1[%c0_8, %c0_9, %c0_10] : memref<8x32x128xf32, #tpu.memory_space<vmem>>, vector<1x32x128xf32>
    %9 = vector.shape_cast %8 : vector<1x32x128xf32> to vector<32x128xf32>
    %c0_11 = arith.constant 0 : index
    %c0_12 = arith.constant 0 : index
    %c0_13 = arith.constant 0 : index
    %10 = vector.load %arg2[%c0_11, %c0_12, %c0_13] : memref<8x32x128xf32, #tpu.memory_space<vmem>>, vector<1x32x128xf32>
    %11 = vector.shape_cast %10 : vector<1x32x128xf32> to vector<32x128xf32>
    %12 = arith.mulf %9, %11 : vector<32x128xf32>
    %cst = arith.constant dense<0.000000e+00> : vector<128xf32>
    %13 = vector.multi_reduction <add>, %12, %cst [0] : vector<32x128xf32> to vector<128xf32>
    %14 = vector.shape_cast %13 : vector<128xf32> to vector<1x128xf32>
    %cst_14 = arith.constant 0.176776692 : f32
    %15 = vector.broadcast %cst_14 : f32 to vector<1x128xf32>
    %16 = arith.mulf %14, %15 : vector<1x128xf32>
    %17 = math.exp %16 : vector<1x128xf32>
    %18 = arith.mulf %17, %0 : vector<1x128xf32>
    %c1_15 = arith.constant 1 : index
    %c0_16 = arith.constant 0 : index
    %c0_17 = arith.constant 0 : index
    %19 = vector.load %arg2[%c1_15, %c0_16, %c0_17] : memref<8x32x128xf32, #tpu.memory_space<vmem>>, vector<1x32x128xf32>
    %20 = vector.shape_cast %19 : vector<1x32x128xf32> to vector<32x128xf32>
    %21 = arith.mulf %9, %20 : vector<32x128xf32>
    %cst_18 = arith.constant dense<0.000000e+00> : vector<128xf32>
    %22 = vector.multi_reduction <add>, %21, %cst_18 [0] : vector<32x128xf32> to vector<128xf32>
    %23 = vector.shape_cast %22 : vector<128xf32> to vector<1x128xf32>
    %cst_19 = arith.constant 0.176776692 : f32
    %24 = vector.broadcast %cst_19 : f32 to vector<1x128xf32>
    %25 = arith.mulf %23, %24 : vector<1x128xf32>
    %26 = math.exp %25 : vector<1x128xf32>
    %27 = arith.mulf %26, %1 : vector<1x128xf32>
    %c2_20 = arith.constant 2 : index
    %c0_21 = arith.constant 0 : index
    %c0_22 = arith.constant 0 : index
    %28 = vector.load %arg2[%c2_20, %c0_21, %c0_22] : memref<8x32x128xf32, #tpu.memory_space<vmem>>, vector<1x32x128xf32>
    %29 = vector.shape_cast %28 : vector<1x32x128xf32> to vector<32x128xf32>
    %30 = arith.mulf %9, %29 : vector<32x128xf32>
    %cst_23 = arith.constant dense<0.000000e+00> : vector<128xf32>
    %31 = vector.multi_reduction <add>, %30, %cst_23 [0] : vector<32x128xf32> to vector<128xf32>
    %32 = vector.shape_cast %31 : vector<128xf32> to vector<1x128xf32>
    %cst_24 = arith.constant 0.176776692 : f32
    %33 = vector.broadcast %cst_24 : f32 to vector<1x128xf32>
    %34 = arith.mulf %32, %33 : vector<1x128xf32>
    %35 = math.exp %34 : vector<1x128xf32>
    %36 = arith.mulf %35, %2 : vector<1x128xf32>
    %c3_25 = arith.constant 3 : index
    %c0_26 = arith.constant 0 : index
    %c0_27 = arith.constant 0 : index
    %37 = vector.load %arg2[%c3_25, %c0_26, %c0_27] : memref<8x32x128xf32, #tpu.memory_space<vmem>>, vector<1x32x128xf32>
    %38 = vector.shape_cast %37 : vector<1x32x128xf32> to vector<32x128xf32>
    %39 = arith.mulf %9, %38 : vector<32x128xf32>
    %cst_28 = arith.constant dense<0.000000e+00> : vector<128xf32>
    %40 = vector.multi_reduction <add>, %39, %cst_28 [0] : vector<32x128xf32> to vector<128xf32>
    %41 = vector.shape_cast %40 : vector<128xf32> to vector<1x128xf32>
    %cst_29 = arith.constant 0.176776692 : f32
    %42 = vector.broadcast %cst_29 : f32 to vector<1x128xf32>
    %43 = arith.mulf %41, %42 : vector<1x128xf32>
    %44 = math.exp %43 : vector<1x128xf32>
    %45 = arith.mulf %44, %3 : vector<1x128xf32>
    %c4_30 = arith.constant 4 : index
    %c0_31 = arith.constant 0 : index
    %c0_32 = arith.constant 0 : index
    %46 = vector.load %arg2[%c4_30, %c0_31, %c0_32] : memref<8x32x128xf32, #tpu.memory_space<vmem>>, vector<1x32x128xf32>
    %47 = vector.shape_cast %46 : vector<1x32x128xf32> to vector<32x128xf32>
    %48 = arith.mulf %9, %47 : vector<32x128xf32>
    %cst_33 = arith.constant dense<0.000000e+00> : vector<128xf32>
    %49 = vector.multi_reduction <add>, %48, %cst_33 [0] : vector<32x128xf32> to vector<128xf32>
    %50 = vector.shape_cast %49 : vector<128xf32> to vector<1x128xf32>
    %cst_34 = arith.constant 0.176776692 : f32
    %51 = vector.broadcast %cst_34 : f32 to vector<1x128xf32>
    %52 = arith.mulf %50, %51 : vector<1x128xf32>
    %53 = math.exp %52 : vector<1x128xf32>
    %54 = arith.mulf %53, %4 : vector<1x128xf32>
    %c5_35 = arith.constant 5 : index
    %c0_36 = arith.constant 0 : index
    %c0_37 = arith.constant 0 : index
    %55 = vector.load %arg2[%c5_35, %c0_36, %c0_37] : memref<8x32x128xf32, #tpu.memory_space<vmem>>, vector<1x32x128xf32>
    %56 = vector.shape_cast %55 : vector<1x32x128xf32> to vector<32x128xf32>
    %57 = arith.mulf %9, %56 : vector<32x128xf32>
    %cst_38 = arith.constant dense<0.000000e+00> : vector<128xf32>
    %58 = vector.multi_reduction <add>, %57, %cst_38 [0] : vector<32x128xf32> to vector<128xf32>
    %59 = vector.shape_cast %58 : vector<128xf32> to vector<1x128xf32>
    %cst_39 = arith.constant 0.176776692 : f32
    %60 = vector.broadcast %cst_39 : f32 to vector<1x128xf32>
    %61 = arith.mulf %59, %60 : vector<1x128xf32>
    %62 = math.exp %61 : vector<1x128xf32>
    %63 = arith.mulf %62, %5 : vector<1x128xf32>
    %c6_40 = arith.constant 6 : index
    %c0_41 = arith.constant 0 : index
    %c0_42 = arith.constant 0 : index
    %64 = vector.load %arg2[%c6_40, %c0_41, %c0_42] : memref<8x32x128xf32, #tpu.memory_space<vmem>>, vector<1x32x128xf32>
    %65 = vector.shape_cast %64 : vector<1x32x128xf32> to vector<32x128xf32>
    %66 = arith.mulf %9, %65 : vector<32x128xf32>
    %cst_43 = arith.constant dense<0.000000e+00> : vector<128xf32>
    %67 = vector.multi_reduction <add>, %66, %cst_43 [0] : vector<32x128xf32> to vector<128xf32>
    %68 = vector.shape_cast %67 : vector<128xf32> to vector<1x128xf32>
    %cst_44 = arith.constant 0.176776692 : f32
    %69 = vector.broadcast %cst_44 : f32 to vector<1x128xf32>
    %70 = arith.mulf %68, %69 : vector<1x128xf32>
    %71 = math.exp %70 : vector<1x128xf32>
    %72 = arith.mulf %71, %6 : vector<1x128xf32>
    %c7_45 = arith.constant 7 : index
    %c0_46 = arith.constant 0 : index
    %c0_47 = arith.constant 0 : index
    %73 = vector.load %arg2[%c7_45, %c0_46, %c0_47] : memref<8x32x128xf32, #tpu.memory_space<vmem>>, vector<1x32x128xf32>
    %74 = vector.shape_cast %73 : vector<1x32x128xf32> to vector<32x128xf32>
    %75 = arith.mulf %9, %74 : vector<32x128xf32>
    %cst_48 = arith.constant dense<0.000000e+00> : vector<128xf32>
    %76 = vector.multi_reduction <add>, %75, %cst_48 [0] : vector<32x128xf32> to vector<128xf32>
    %77 = vector.shape_cast %76 : vector<128xf32> to vector<1x128xf32>
    %cst_49 = arith.constant 0.176776692 : f32
    %78 = vector.broadcast %cst_49 : f32 to vector<1x128xf32>
    %79 = arith.mulf %77, %78 : vector<1x128xf32>
    %80 = math.exp %79 : vector<1x128xf32>
    %81 = arith.mulf %80, %7 : vector<1x128xf32>
    %82 = arith.addf %18, %27 : vector<1x128xf32>
    %83 = arith.addf %82, %36 : vector<1x128xf32>
    %84 = arith.addf %83, %45 : vector<1x128xf32>
    %85 = arith.addf %84, %54 : vector<1x128xf32>
    %86 = arith.addf %85, %63 : vector<1x128xf32>
    %87 = arith.addf %86, %72 : vector<1x128xf32>
    %88 = arith.addf %87, %81 : vector<1x128xf32>
    %cst_50 = arith.constant 9.99999993E-9 : f32
    %89 = vector.broadcast %cst_50 : f32 to vector<1x128xf32>
    %90 = arith.addf %88, %89 : vector<1x128xf32>
    %91 = tpu.reciprocal %90 {approx = true} : vector<1x128xf32> -> vector<1x128xf32>
    %92 = arith.mulf %18, %91 : vector<1x128xf32>
    %93 = arith.mulf %27, %91 : vector<1x128xf32>
    %94 = arith.mulf %36, %91 : vector<1x128xf32>
    %95 = arith.mulf %45, %91 : vector<1x128xf32>
    %96 = arith.mulf %54, %91 : vector<1x128xf32>
    %97 = arith.mulf %63, %91 : vector<1x128xf32>
    %98 = arith.mulf %72, %91 : vector<1x128xf32>
    %99 = arith.mulf %81, %91 : vector<1x128xf32>
    %c0_51 = arith.constant 0 : index
    %c0_52 = arith.constant 0 : index
    %c0_53 = arith.constant 0 : index
    %100 = vector.load %arg3[%c0_51, %c0_52, %c0_53] : memref<8x32x128xf32, #tpu.memory_space<vmem>>, vector<1x32x128xf32>
    %101 = vector.shape_cast %100 : vector<1x32x128xf32> to vector<32x128xf32>
    %102 = vector.broadcast %92 : vector<1x128xf32> to vector<32x128xf32>
    %103 = arith.mulf %102, %101 : vector<32x128xf32>
    %c1_54 = arith.constant 1 : index
    %c0_55 = arith.constant 0 : index
    %c0_56 = arith.constant 0 : index
    %104 = vector.load %arg3[%c1_54, %c0_55, %c0_56] : memref<8x32x128xf32, #tpu.memory_space<vmem>>, vector<1x32x128xf32>
    %105 = vector.shape_cast %104 : vector<1x32x128xf32> to vector<32x128xf32>
    %106 = vector.broadcast %93 : vector<1x128xf32> to vector<32x128xf32>
    %107 = arith.mulf %106, %105 : vector<32x128xf32>
    %108 = arith.addf %103, %107 : vector<32x128xf32>
    %c2_57 = arith.constant 2 : index
    %c0_58 = arith.constant 0 : index
    %c0_59 = arith.constant 0 : index
    %109 = vector.load %arg3[%c2_57, %c0_58, %c0_59] : memref<8x32x128xf32, #tpu.memory_space<vmem>>, vector<1x32x128xf32>
    %110 = vector.shape_cast %109 : vector<1x32x128xf32> to vector<32x128xf32>
    %111 = vector.broadcast %94 : vector<1x128xf32> to vector<32x128xf32>
    %112 = arith.mulf %111, %110 : vector<32x128xf32>
    %113 = arith.addf %108, %112 : vector<32x128xf32>
    %c3_60 = arith.constant 3 : index
    %c0_61 = arith.constant 0 : index
    %c0_62 = arith.constant 0 : index
    %114 = vector.load %arg3[%c3_60, %c0_61, %c0_62] : memref<8x32x128xf32, #tpu.memory_space<vmem>>, vector<1x32x128xf32>
    %115 = vector.shape_cast %114 : vector<1x32x128xf32> to vector<32x128xf32>
    %116 = vector.broadcast %95 : vector<1x128xf32> to vector<32x128xf32>
    %117 = arith.mulf %116, %115 : vector<32x128xf32>
    %118 = arith.addf %113, %117 : vector<32x128xf32>
    %c4_63 = arith.constant 4 : index
    %c0_64 = arith.constant 0 : index
    %c0_65 = arith.constant 0 : index
    %119 = vector.load %arg3[%c4_63, %c0_64, %c0_65] : memref<8x32x128xf32, #tpu.memory_space<vmem>>, vector<1x32x128xf32>
    %120 = vector.shape_cast %119 : vector<1x32x128xf32> to vector<32x128xf32>
    %121 = vector.broadcast %96 : vector<1x128xf32> to vector<32x128xf32>
    %122 = arith.mulf %121, %120 : vector<32x128xf32>
    %123 = arith.addf %118, %122 : vector<32x128xf32>
    %c5_66 = arith.constant 5 : index
    %c0_67 = arith.constant 0 : index
    %c0_68 = arith.constant 0 : index
    %124 = vector.load %arg3[%c5_66, %c0_67, %c0_68] : memref<8x32x128xf32, #tpu.memory_space<vmem>>, vector<1x32x128xf32>
    %125 = vector.shape_cast %124 : vector<1x32x128xf32> to vector<32x128xf32>
    %126 = vector.broadcast %97 : vector<1x128xf32> to vector<32x128xf32>
    %127 = arith.mulf %126, %125 : vector<32x128xf32>
    %128 = arith.addf %123, %127 : vector<32x128xf32>
    %c6_69 = arith.constant 6 : index
    %c0_70 = arith.constant 0 : index
    %c0_71 = arith.constant 0 : index
    %129 = vector.load %arg3[%c6_69, %c0_70, %c0_71] : memref<8x32x128xf32, #tpu.memory_space<vmem>>, vector<1x32x128xf32>
    %130 = vector.shape_cast %129 : vector<1x32x128xf32> to vector<32x128xf32>
    %131 = vector.broadcast %98 : vector<1x128xf32> to vector<32x128xf32>
    %132 = arith.mulf %131, %130 : vector<32x128xf32>
    %133 = arith.addf %128, %132 : vector<32x128xf32>
    %c7_72 = arith.constant 7 : index
    %c0_73 = arith.constant 0 : index
    %c0_74 = arith.constant 0 : index
    %134 = vector.load %arg3[%c7_72, %c0_73, %c0_74] : memref<8x32x128xf32, #tpu.memory_space<vmem>>, vector<1x32x128xf32>
    %135 = vector.shape_cast %134 : vector<1x32x128xf32> to vector<32x128xf32>
    %136 = vector.broadcast %99 : vector<1x128xf32> to vector<32x128xf32>
    %137 = arith.mulf %136, %135 : vector<32x128xf32>
    %138 = arith.addf %133, %137 : vector<32x128xf32>
    %c0_75 = arith.constant 0 : index
    %c0_76 = arith.constant 0 : index
    %c0_77 = arith.constant 0 : index
    %139 = vector.load %arg5[%c0_75, %c0_76, %c0_77] : memref<8x32x128xf32, #tpu.memory_space<vmem>>, vector<1x32x128xf32>
    %140 = vector.shape_cast %139 : vector<1x32x128xf32> to vector<32x128xf32>
    %141 = vector.shape_cast %138 : vector<32x128xf32> to vector<1x32x128xf32>
    tpu.vector_store %arg5[%c0_75, %c0_76, %c0_77], %141 {strides = array<i32>} : memref<8x32x128xf32, #tpu.memory_space<vmem>>, vector<1x32x128xf32>,
    %142 = tpu.concatenate %92, %93, %94, %95, %96, %97, %98, %99 in 0 : vector<1x128xf32>, vector<1x128xf32>, vector<1x128xf32>, vector<1x128xf32>, vector<1x128xf32>, vector<1x128xf32>, vector<1x128xf32>, vector<1x128xf32> -> vector<8x128xf32>
    %c0_78 = arith.constant 0 : index
    %c0_79 = arith.constant 0 : index
    %c0_80 = arith.constant 0 : index
    %143 = vector.load %arg6[%c0_78, %c0_79, %c0_80] : memref<8x8x128xf32, #tpu.memory_space<vmem>>, vector<1x8x128xf32>
    %144 = vector.shape_cast %143 : vector<1x8x128xf32> to vector<8x128xf32>
    %145 = vector.shape_cast %142 : vector<8x128xf32> to vector<1x8x128xf32>
    tpu.vector_store %arg6[%c0_78, %c0_79, %c0_80], %145 {strides = array<i32>} : memref<8x8x128xf32, #tpu.memory_space<vmem>>, vector<1x8x128xf32>,
    %c1_81 = arith.constant 1 : index
    %c0_82 = arith.constant 0 : index
    %c0_83 = arith.constant 0 : index
    %146 = vector.load %arg1[%c1_81, %c0_82, %c0_83] : memref<8x32x128xf32, #tpu.memory_space<vmem>>, vector<1x32x128xf32>
    %147 = vector.shape_cast %146 : vector<1x32x128xf32> to vector<32x128xf32>
    %c0_84 = arith.constant 0 : index
    %c0_85 = arith.constant 0 : index
    %c0_86 = arith.constant 0 : index
    %148 = vector.load %arg2[%c0_84, %c0_85, %c0_86] : memref<8x32x128xf32, #tpu.memory_space<vmem>>, vector<1x32x128xf32>
    %149 = vector.shape_cast %148 : vector<1x32x128xf32> to vector<32x128xf32>
    %150 = arith.mulf %147, %149 : vector<32x128xf32>
    %cst_87 = arith.constant dense<0.000000e+00> : vector<128xf32>
    %151 = vector.multi_reduction <add>, %150, %cst_87 [0] : vector<32x128xf32> to vector<128xf32>
    %152 = vector.shape_cast %151 : vector<128xf32> to vector<1x128xf32>
    %cst_88 = arith.constant 0.176776692 : f32
    %153 = vector.broadcast %cst_88 : f32 to vector<1x128xf32>
    %154 = arith.mulf %152, %153 : vector<1x128xf32>
    %155 = math.exp %154 : vector<1x128xf32>
    %156 = arith.mulf %155, %0 : vector<1x128xf32>
    %c1_89 = arith.constant 1 : index
    %c0_90 = arith.constant 0 : index
    %c0_91 = arith.constant 0 : index
    %157 = vector.load %arg2[%c1_89, %c0_90, %c0_91] : memref<8x32x128xf32, #tpu.memory_space<vmem>>, vector<1x32x128xf32>
    %158 = vector.shape_cast %157 : vector<1x32x128xf32> to vector<32x128xf32>
    %159 = arith.mulf %147, %158 : vector<32x128xf32>
    %cst_92 = arith.constant dense<0.000000e+00> : vector<128xf32>
    %160 = vector.multi_reduction <add>, %159, %cst_92 [0] : vector<32x128xf32> to vector<128xf32>
    %161 = vector.shape_cast %160 : vector<128xf32> to vector<1x128xf32>
    %cst_93 = arith.constant 0.176776692 : f32
    %162 = vector.broadcast %cst_93 : f32 to vector<1x128xf32>
    %163 = arith.mulf %161, %162 : vector<1x128xf32>
    %164 = math.exp %163 : vector<1x128xf32>
    %165 = arith.mulf %164, %1 : vector<1x128xf32>
    %c2_94 = arith.constant 2 : index
    %c0_95 = arith.constant 0 : index
    %c0_96 = arith.constant 0 : index
    %166 = vector.load %arg2[%c2_94, %c0_95, %c0_96] : memref<8x32x128xf32, #tpu.memory_space<vmem>>, vector<1x32x128xf32>
    %167 = vector.shape_cast %166 : vector<1x32x128xf32> to vector<32x128xf32>
    %168 = arith.mulf %147, %167 : vector<32x128xf32>
    %cst_97 = arith.constant dense<0.000000e+00> : vector<128xf32>
    %169 = vector.multi_reduction <add>, %168, %cst_97 [0] : vector<32x128xf32> to vector<128xf32>
    %170 = vector.shape_cast %169 : vector<128xf32> to vector<1x128xf32>
    %cst_98 = arith.constant 0.176776692 : f32
    %171 = vector.broadcast %cst_98 : f32 to vector<1x128xf32>
    %172 = arith.mulf %170, %171 : vector<1x128xf32>
    %173 = math.exp %172 : vector<1x128xf32>
    %174 = arith.mulf %173, %2 : vector<1x128xf32>
    %c3_99 = arith.constant 3 : index
    %c0_100 = arith.constant 0 : index
    %c0_101 = arith.constant 0 : index
    %175 = vector.load %arg2[%c3_99, %c0_100, %c0_101] : memref<8x32x128xf32, #tpu.memory_space<vmem>>, vector<1x32x128xf32>
    %176 = vector.shape_cast %175 : vector<1x32x128xf32> to vector<32x128xf32>
    %177 = arith.mulf %147, %176 : vector<32x128xf32>
    %cst_102 = arith.constant dense<0.000000e+00> : vector<128xf32>
    %178 = vector.multi_reduction <add>, %177, %cst_102 [0] : vector<32x128xf32> to vector<128xf32>
    %179 = vector.shape_cast %178 : vector<128xf32> to vector<1x128xf32>
    %cst_103 = arith.constant 0.176776692 : f32
    %180 = vector.broadcast %cst_103 : f32 to vector<1x128xf32>
    %181 = arith.mulf %179, %180 : vector<1x128xf32>
    %182 = math.exp %181 : vector<1x128xf32>
    %183 = arith.mulf %182, %3 : vector<1x128xf32>
    %c4_104 = arith.constant 4 : index
    %c0_105 = arith.constant 0 : index
    %c0_106 = arith.constant 0 : index
    %184 = vector.load %arg2[%c4_104, %c0_105, %c0_106] : memref<8x32x128xf32, #tpu.memory_space<vmem>>, vector<1x32x128xf32>
    %185 = vector.shape_cast %184 : vector<1x32x128xf32> to vector<32x128xf32>
    %186 = arith.mulf %147, %185 : vector<32x128xf32>
    %cst_107 = arith.constant dense<0.000000e+00> : vector<128xf32>
    %187 = vector.multi_reduction <add>, %186, %cst_107 [0] : vector<32x128xf32> to vector<128xf32>
    %188 = vector.shape_cast %187 : vector<128xf32> to vector<1x128xf32>
    %cst_108 = arith.constant 0.176776692 : f32
    %189 = vector.broadcast %cst_108 : f32 to vector<1x128xf32>
    %190 = arith.mulf %188, %189 : vector<1x128xf32>
    %191 = math.exp %190 : vector<1x128xf32>
    %192 = arith.mulf %191, %4 : vector<1x128xf32>
    %c5_109 = arith.constant 5 : index
    %c0_110 = arith.constant 0 : index
    %c0_111 = arith.constant 0 : index
    %193 = vector.load %arg2[%c5_109, %c0_110, %c0_111] : memref<8x32x128xf32, #tpu.memory_space<vmem>>, vector<1x32x128xf32>
    %194 = vector.shape_cast %193 : vector<1x32x128xf32> to vector<32x128xf32>
    %195 = arith.mulf %147, %194 : vector<32x128xf32>
    %cst_112 = arith.constant dense<0.000000e+00> : vector<128xf32>
    %196 = vector.multi_reduction <add>, %195, %cst_112 [0] : vector<32x128xf32> to vector<128xf32>
    %197 = vector.shape_cast %196 : vector<128xf32> to vector<1x128xf32>
    %cst_113 = arith.constant 0.176776692 : f32
    %198 = vector.broadcast %cst_113 : f32 to vector<1x128xf32>
    %199 = arith.mulf %197, %198 : vector<1x128xf32>
    %200 = math.exp %199 : vector<1x128xf32>
    %201 = arith.mulf %200, %5 : vector<1x128xf32>
    %c6_114 = arith.constant 6 : index
    %c0_115 = arith.constant 0 : index
    %c0_116 = arith.constant 0 : index
    %202 = vector.load %arg2[%c6_114, %c0_115, %c0_116] : memref<8x32x128xf32, #tpu.memory_space<vmem>>, vector<1x32x128xf32>
    %203 = vector.shape_cast %202 : vector<1x32x128xf32> to vector<32x128xf32>
    %204 = arith.mulf %147, %203 : vector<32x128xf32>
    %cst_117 = arith.constant dense<0.000000e+00> : vector<128xf32>
    %205 = vector.multi_reduction <add>, %204, %cst_117 [0] : vector<32x128xf32> to vector<128xf32>
    %206 = vector.shape_cast %205 : vector<128xf32> to vector<1x128xf32>
    %cst_118 = arith.constant 0.176776692 : f32
    %207 = vector.broadcast %cst_118 : f32 to vector<1x128xf32>
    %208 = arith.mulf %206, %207 : vector<1x128xf32>
    %209 = math.exp %208 : vector<1x128xf32>
    %210 = arith.mulf %209, %6 : vector<1x128xf32>
    %c7_119 = arith.constant 7 : index
    %c0_120 = arith.constant 0 : index
    %c0_121 = arith.constant 0 : index
    %211 = vector.load %arg2[%c7_119, %c0_120, %c0_121] : memref<8x32x128xf32, #tpu.memory_space<vmem>>, vector<1x32x128xf32>
    %212 = vector.shape_cast %211 : vector<1x32x128xf32> to vector<32x128xf32>
    %213 = arith.mulf %147, %212 : vector<32x128xf32>
    %cst_122 = arith.constant dense<0.000000e+00> : vector<128xf32>
    %214 = vector.multi_reduction <add>, %213, %cst_122 [0] : vector<32x128xf32> to vector<128xf32>
    %215 = vector.shape_cast %214 : vector<128xf32> to vector<1x128xf32>
    %cst_123 = arith.constant 0.176776692 : f32
    %216 = vector.broadcast %cst_123 : f32 to vector<1x128xf32>
    %217 = arith.mulf %215, %216 : vector<1x128xf32>
    %218 = math.exp %217 : vector<1x128xf32>
    %219 = arith.mulf %218, %7 : vector<1x128xf32>
    %220 = arith.addf %156, %165 : vector<1x128xf32>
    %221 = arith.addf %220, %174 : vector<1x128xf32>
    %222 = arith.addf %221, %183 : vector<1x128xf32>
    %223 = arith.addf %222, %192 : vector<1x128xf32>
    %224 = arith.addf %223, %201 : vector<1x128xf32>
    %225 = arith.addf %224, %210 : vector<1x128xf32>
    %226 = arith.addf %225, %219 : vector<1x128xf32>
    %cst_124 = arith.constant 9.99999993E-9 : f32
    %227 = vector.broadcast %cst_124 : f32 to vector<1x128xf32>
    %228 = arith.addf %226, %227 : vector<1x128xf32>
    %229 = tpu.reciprocal %228 {approx = true} : vector<1x128xf32> -> vector<1x128xf32>
    %230 = arith.mulf %156, %229 : vector<1x128xf32>
    %231 = arith.mulf %165, %229 : vector<1x128xf32>
    %232 = arith.mulf %174, %229 : vector<1x128xf32>
    %233 = arith.mulf %183, %229 : vector<1x128xf32>
    %234 = arith.mulf %192, %229 : vector<1x128xf32>
    %235 = arith.mulf %201, %229 : vector<1x128xf32>
    %236 = arith.mulf %210, %229 : vector<1x128xf32>
    %237 = arith.mulf %219, %229 : vector<1x128xf32>
    %c0_125 = arith.constant 0 : index
    %c0_126 = arith.constant 0 : index
    %c0_127 = arith.constant 0 : index
    %238 = vector.load %arg3[%c0_125, %c0_126, %c0_127] : memref<8x32x128xf32, #tpu.memory_space<vmem>>, vector<1x32x128xf32>
    %239 = vector.shape_cast %238 : vector<1x32x128xf32> to vector<32x128xf32>
    %240 = vector.broadcast %230 : vector<1x128xf32> to vector<32x128xf32>
    %241 = arith.mulf %240, %239 : vector<32x128xf32>
    %c1_128 = arith.constant 1 : index
    %c0_129 = arith.constant 0 : index
    %c0_130 = arith.constant 0 : index
    %242 = vector.load %arg3[%c1_128, %c0_129, %c0_130] : memref<8x32x128xf32, #tpu.memory_space<vmem>>, vector<1x32x128xf32>
    %243 = vector.shape_cast %242 : vector<1x32x128xf32> to vector<32x128xf32>
    %244 = vector.broadcast %231 : vector<1x128xf32> to vector<32x128xf32>
    %245 = arith.mulf %244, %243 : vector<32x128xf32>
    %246 = arith.addf %241, %245 : vector<32x128xf32>
    %c2_131 = arith.constant 2 : index
    %c0_132 = arith.constant 0 : index
    %c0_133 = arith.constant 0 : index
    %247 = vector.load %arg3[%c2_131, %c0_132, %c0_133] : memref<8x32x128xf32, #tpu.memory_space<vmem>>, vector<1x32x128xf32>
    %248 = vector.shape_cast %247 : vector<1x32x128xf32> to vector<32x128xf32>
    %249 = vector.broadcast %232 : vector<1x128xf32> to vector<32x128xf32>
    %250 = arith.mulf %249, %248 : vector<32x128xf32>
    %251 = arith.addf %246, %250 : vector<32x128xf32>
    %c3_134 = arith.constant 3 : index
    %c0_135 = arith.constant 0 : index
    %c0_136 = arith.constant 0 : index
    %252 = vector.load %arg3[%c3_134, %c0_135, %c0_136] : memref<8x32x128xf32, #tpu.memory_space<vmem>>, vector<1x32x128xf32>
    %253 = vector.shape_cast %252 : vector<1x32x128xf32> to vector<32x128xf32>
    %254 = vector.broadcast %233 : vector<1x128xf32> to vector<32x128xf32>
    %255 = arith.mulf %254, %253 : vector<32x128xf32>
    %256 = arith.addf %251, %255 : vector<32x128xf32>
    %c4_137 = arith.constant 4 : index
    %c0_138 = arith.constant 0 : index
    %c0_139 = arith.constant 0 : index
    %257 = vector.load %arg3[%c4_137, %c0_138, %c0_139] : memref<8x32x128xf32, #tpu.memory_space<vmem>>, vector<1x32x128xf32>
    %258 = vector.shape_cast %257 : vector<1x32x128xf32> to vector<32x128xf32>
    %259 = vector.broadcast %234 : vector<1x128xf32> to vector<32x128xf32>
    %260 = arith.mulf %259, %258 : vector<32x128xf32>
    %261 = arith.addf %256, %260 : vector<32x128xf32>
    %c5_140 = arith.constant 5 : index
    %c0_141 = arith.constant 0 : index
    %c0_142 = arith.constant 0 : index
    %262 = vector.load %arg3[%c5_140, %c0_141, %c0_142] : memref<8x32x128xf32, #tpu.memory_space<vmem>>, vector<1x32x128xf32>
    %263 = vector.shape_cast %262 : vector<1x32x128xf32> to vector<32x128xf32>
    %264 = vector.broadcast %235 : vector<1x128xf32> to vector<32x128xf32>
    %265 = arith.mulf %264, %263 : vector<32x128xf32>
    %266 = arith.addf %261, %265 : vector<32x128xf32>
    %c6_143 = arith.constant 6 : index
    %c0_144 = arith.constant 0 : index
    %c0_145 = arith.constant 0 : index
    %267 = vector.load %arg3[%c6_143, %c0_144, %c0_145] : memref<8x32x128xf32, #tpu.memory_space<vmem>>, vector<1x32x128xf32>
    %268 = vector.shape_cast %267 : vector<1x32x128xf32> to vector<32x128xf32>
    %269 = vector.broadcast %236 : vector<1x128xf32> to vector<32x128xf32>
    %270 = arith.mulf %269, %268 : vector<32x128xf32>
    %271 = arith.addf %266, %270 : vector<32x128xf32>
    %c7_146 = arith.constant 7 : index
    %c0_147 = arith.constant 0 : index
    %c0_148 = arith.constant 0 : index
    %272 = vector.load %arg3[%c7_146, %c0_147, %c0_148] : memref<8x32x128xf32, #tpu.memory_space<vmem>>, vector<1x32x128xf32>
    %273 = vector.shape_cast %272 : vector<1x32x128xf32> to vector<32x128xf32>
    %274 = vector.broadcast %237 : vector<1x128xf32> to vector<32x128xf32>
    %275 = arith.mulf %274, %273 : vector<32x128xf32>
    %276 = arith.addf %271, %275 : vector<32x128xf32>
    %c1_149 = arith.constant 1 : index
    %c0_150 = arith.constant 0 : index
    %c0_151 = arith.constant 0 : index
    %277 = vector.load %arg5[%c1_149, %c0_150, %c0_151] : memref<8x32x128xf32, #tpu.memory_space<vmem>>, vector<1x32x128xf32>
    %278 = vector.shape_cast %277 : vector<1x32x128xf32> to vector<32x128xf32>
    %279 = vector.shape_cast %276 : vector<32x128xf32> to vector<1x32x128xf32>
    tpu.vector_store %arg5[%c1_149, %c0_150, %c0_151], %279 {strides = array<i32>} : memref<8x32x128xf32, #tpu.memory_space<vmem>>, vector<1x32x128xf32>,
    %280 = tpu.concatenate %230, %231, %232, %233, %234, %235, %236, %237 in 0 : vector<1x128xf32>, vector<1x128xf32>, vector<1x128xf32>, vector<1x128xf32>, vector<1x128xf32>, vector<1x128xf32>, vector<1x128xf32>, vector<1x128xf32> -> vector<8x128xf32>
    %c1_152 = arith.constant 1 : index
    %c0_153 = arith.constant 0 : index
    %c0_154 = arith.constant 0 : index
    %281 = vector.load %arg6[%c1_152, %c0_153, %c0_154] : memref<8x8x128xf32, #tpu.memory_space<vmem>>, vector<1x8x128xf32>
    %282 = vector.shape_cast %281 : vector<1x8x128xf32> to vector<8x128xf32>
    %283 = vector.shape_cast %280 : vector<8x128xf32> to vector<1x8x128xf32>
    tpu.vector_store %arg6[%c1_152, %c0_153, %c0_154], %283 {strides = array<i32>} : memref<8x8x128xf32, #tpu.memory_space<vmem>>, vector<1x8x128xf32>,
    %c2_155 = arith.constant 2 : index
    %c0_156 = arith.constant 0 : index
    %c0_157 = arith.constant 0 : index
    %284 = vector.load %arg1[%c2_155, %c0_156, %c0_157] : memref<8x32x128xf32, #tpu.memory_space<vmem>>, vector<1x32x128xf32>
    %285 = vector.shape_cast %284 : vector<1x32x128xf32> to vector<32x128xf32>
    %c0_158 = arith.constant 0 : index
    %c0_159 = arith.constant 0 : index
    %c0_160 = arith.constant 0 : index
    %286 = vector.load %arg2[%c0_158, %c0_159, %c0_160] : memref<8x32x128xf32, #tpu.memory_space<vmem>>, vector<1x32x128xf32>
    %287 = vector.shape_cast %286 : vector<1x32x128xf32> to vector<32x128xf32>
    %288 = arith.mulf %285, %287 : vector<32x128xf32>
    %cst_161 = arith.constant dense<0.000000e+00> : vector<128xf32>
    %289 = vector.multi_reduction <add>, %288, %cst_161 [0] : vector<32x128xf32> to vector<128xf32>
    %290 = vector.shape_cast %289 : vector<128xf32> to vector<1x128xf32>
    %cst_162 = arith.constant 0.176776692 : f32
    %291 = vector.broadcast %cst_162 : f32 to vector<1x128xf32>
    %292 = arith.mulf %290, %291 : vector<1x128xf32>
    %293 = math.exp %292 : vector<1x128xf32>
    %294 = arith.mulf %293, %0 : vector<1x128xf32>
    %c1_163 = arith.constant 1 : index
    %c0_164 = arith.constant 0 : index
    %c0_165 = arith.constant 0 : index
    %295 = vector.load %arg2[%c1_163, %c0_164, %c0_165] : memref<8x32x128xf32, #tpu.memory_space<vmem>>, vector<1x32x128xf32>
    %296 = vector.shape_cast %295 : vector<1x32x128xf32> to vector<32x128xf32>
    %297 = arith.mulf %285, %296 : vector<32x128xf32>
    %cst_166 = arith.constant dense<0.000000e+00> : vector<128xf32>
    %298 = vector.multi_reduction <add>, %297, %cst_166 [0] : vector<32x128xf32> to vector<128xf32>
    %299 = vector.shape_cast %298 : vector<128xf32> to vector<1x128xf32>
    %cst_167 = arith.constant 0.176776692 : f32
    %300 = vector.broadcast %cst_167 : f32 to vector<1x128xf32>
    %301 = arith.mulf %299, %300 : vector<1x128xf32>
    %302 = math.exp %301 : vector<1x128xf32>
    %303 = arith.mulf %302, %1 : vector<1x128xf32>
    %c2_168 = arith.constant 2 : index
    %c0_169 = arith.constant 0 : index
    %c0_170 = arith.constant 0 : index
    %304 = vector.load %arg2[%c2_168, %c0_169, %c0_170] : memref<8x32x128xf32, #tpu.memory_space<vmem>>, vector<1x32x128xf32>
    %305 = vector.shape_cast %304 : vector<1x32x128xf32> to vector<32x128xf32>
    %306 = arith.mulf %285, %305 : vector<32x128xf32>
    %cst_171 = arith.constant dense<0.000000e+00> : vector<128xf32>
    %307 = vector.multi_reduction <add>, %306, %cst_171 [0] : vector<32x128xf32> to vector<128xf32>
    %308 = vector.shape_cast %307 : vector<128xf32> to vector<1x128xf32>
    %cst_172 = arith.constant 0.176776692 : f32
    %309 = vector.broadcast %cst_172 : f32 to vector<1x128xf32>
    %310 = arith.mulf %308, %309 : vector<1x128xf32>
    %311 = math.exp %310 : vector<1x128xf32>
    %312 = arith.mulf %311, %2 : vector<1x128xf32>
    %c3_173 = arith.constant 3 : index
    %c0_174 = arith.constant 0 : index
    %c0_175 = arith.constant 0 : index
    %313 = vector.load %arg2[%c3_173, %c0_174, %c0_175] : memref<8x32x128xf32, #tpu.memory_space<vmem>>, vector<1x32x128xf32>
    %314 = vector.shape_cast %313 : vector<1x32x128xf32> to vector<32x128xf32>
    %315 = arith.mulf %285, %314 : vector<32x128xf32>
    %cst_176 = arith.constant dense<0.000000e+00> : vector<128xf32>
    %316 = vector.multi_reduction <add>, %315, %cst_176 [0] : vector<32x128xf32> to vector<128xf32>
    %317 = vector.shape_cast %316 : vector<128xf32> to vector<1x128xf32>
    %cst_177 = arith.constant 0.176776692 : f32
    %318 = vector.broadcast %cst_177 : f32 to vector<1x128xf32>
    %319 = arith.mulf %317, %318 : vector<1x128xf32>
    %320 = math.exp %319 : vector<1x128xf32>
    %321 = arith.mulf %320, %3 : vector<1x128xf32>
    %c4_178 = arith.constant 4 : index
    %c0_179 = arith.constant 0 : index
    %c0_180 = arith.constant 0 : index
    %322 = vector.load %arg2[%c4_178, %c0_179, %c0_180] : memref<8x32x128xf32, #tpu.memory_space<vmem>>, vector<1x32x128xf32>
    %323 = vector.shape_cast %322 : vector<1x32x128xf32> to vector<32x128xf32>
    %324 = arith.mulf %285, %323 : vector<32x128xf32>
    %cst_181 = arith.constant dense<0.000000e+00> : vector<128xf32>
    %325 = vector.multi_reduction <add>, %324, %cst_181 [0] : vector<32x128xf32> to vector<128xf32>
    %326 = vector.shape_cast %325 : vector<128xf32> to vector<1x128xf32>
    %cst_182 = arith.constant 0.176776692 : f32
    %327 = vector.broadcast %cst_182 : f32 to vector<1x128xf32>
    %328 = arith.mulf %326, %327 : vector<1x128xf32>
    %329 = math.exp %328 : vector<1x128xf32>
    %330 = arith.mulf %329, %4 : vector<1x128xf32>
    %c5_183 = arith.constant 5 : index
    %c0_184 = arith.constant 0 : index
    %c0_185 = arith.constant 0 : index
    %331 = vector.load %arg2[%c5_183, %c0_184, %c0_185] : memref<8x32x128xf32, #tpu.memory_space<vmem>>, vector<1x32x128xf32>
    %332 = vector.shape_cast %331 : vector<1x32x128xf32> to vector<32x128xf32>
    %333 = arith.mulf %285, %332 : vector<32x128xf32>
    %cst_186 = arith.constant dense<0.000000e+00> : vector<128xf32>
    %334 = vector.multi_reduction <add>, %333, %cst_186 [0] : vector<32x128xf32> to vector<128xf32>
    %335 = vector.shape_cast %334 : vector<128xf32> to vector<1x128xf32>
    %cst_187 = arith.constant 0.176776692 : f32
    %336 = vector.broadcast %cst_187 : f32 to vector<1x128xf32>
    %337 = arith.mulf %335, %336 : vector<1x128xf32>
    %338 = math.exp %337 : vector<1x128xf32>
    %339 = arith.mulf %338, %5 : vector<1x128xf32>
    %c6_188 = arith.constant 6 : index
    %c0_189 = arith.constant 0 : index
    %c0_190 = arith.constant 0 : index
    %340 = vector.load %arg2[%c6_188, %c0_189, %c0_190] : memref<8x32x128xf32, #tpu.memory_space<vmem>>, vector<1x32x128xf32>
    %341 = vector.shape_cast %340 : vector<1x32x128xf32> to vector<32x128xf32>
    %342 = arith.mulf %285, %341 : vector<32x128xf32>
    %cst_191 = arith.constant dense<0.000000e+00> : vector<128xf32>
    %343 = vector.multi_reduction <add>, %342, %cst_191 [0] : vector<32x128xf32> to vector<128xf32>
    %344 = vector.shape_cast %343 : vector<128xf32> to vector<1x128xf32>
    %cst_192 = arith.constant 0.176776692 : f32
    %345 = vector.broadcast %cst_192 : f32 to vector<1x128xf32>
    %346 = arith.mulf %344, %345 : vector<1x128xf32>
    %347 = math.exp %346 : vector<1x128xf32>
    %348 = arith.mulf %347, %6 : vector<1x128xf32>
    %c7_193 = arith.constant 7 : index
    %c0_194 = arith.constant 0 : index
    %c0_195 = arith.constant 0 : index
    %349 = vector.load %arg2[%c7_193, %c0_194, %c0_195] : memref<8x32x128xf32, #tpu.memory_space<vmem>>, vector<1x32x128xf32>
    %350 = vector.shape_cast %349 : vector<1x32x128xf32> to vector<32x128xf32>
    %351 = arith.mulf %285, %350 : vector<32x128xf32>
    %cst_196 = arith.constant dense<0.000000e+00> : vector<128xf32>
    %352 = vector.multi_reduction <add>, %351, %cst_196 [0] : vector<32x128xf32> to vector<128xf32>
    %353 = vector.shape_cast %352 : vector<128xf32> to vector<1x128xf32>
    %cst_197 = arith.constant 0.176776692 : f32
    %354 = vector.broadcast %cst_197 : f32 to vector<1x128xf32>
    %355 = arith.mulf %353, %354 : vector<1x128xf32>
    %356 = math.exp %355 : vector<1x128xf32>
    %357 = arith.mulf %356, %7 : vector<1x128xf32>
    %358 = arith.addf %294, %303 : vector<1x128xf32>
    %359 = arith.addf %358, %312 : vector<1x128xf32>
    %360 = arith.addf %359, %321 : vector<1x128xf32>
    %361 = arith.addf %360, %330 : vector<1x128xf32>
    %362 = arith.addf %361, %339 : vector<1x128xf32>
    %363 = arith.addf %362, %348 : vector<1x128xf32>
    %364 = arith.addf %363, %357 : vector<1x128xf32>
    %cst_198 = arith.constant 9.99999993E-9 : f32
    %365 = vector.broadcast %cst_198 : f32 to vector<1x128xf32>
    %366 = arith.addf %364, %365 : vector<1x128xf32>
    %367 = tpu.reciprocal %366 {approx = true} : vector<1x128xf32> -> vector<1x128xf32>
    %368 = arith.mulf %294, %367 : vector<1x128xf32>
    %369 = arith.mulf %303, %367 : vector<1x128xf32>
    %370 = arith.mulf %312, %367 : vector<1x128xf32>
    %371 = arith.mulf %321, %367 : vector<1x128xf32>
    %372 = arith.mulf %330, %367 : vector<1x128xf32>
    %373 = arith.mulf %339, %367 : vector<1x128xf32>
    %374 = arith.mulf %348, %367 : vector<1x128xf32>
    %375 = arith.mulf %357, %367 : vector<1x128xf32>
    %c0_199 = arith.constant 0 : index
    %c0_200 = arith.constant 0 : index
    %c0_201 = arith.constant 0 : index
    %376 = vector.load %arg3[%c0_199, %c0_200, %c0_201] : memref<8x32x128xf32, #tpu.memory_space<vmem>>, vector<1x32x128xf32>
    %377 = vector.shape_cast %376 : vector<1x32x128xf32> to vector<32x128xf32>
    %378 = vector.broadcast %368 : vector<1x128xf32> to vector<32x128xf32>
    %379 = arith.mulf %378, %377 : vector<32x128xf32>
    %c1_202 = arith.constant 1 : index
    %c0_203 = arith.constant 0 : index
    %c0_204 = arith.constant 0 : index
    %380 = vector.load %arg3[%c1_202, %c0_203, %c0_204] : memref<8x32x128xf32, #tpu.memory_space<vmem>>, vector<1x32x128xf32>
    %381 = vector.shape_cast %380 : vector<1x32x128xf32> to vector<32x128xf32>
    %382 = vector.broadcast %369 : vector<1x128xf32> to vector<32x128xf32>
    %383 = arith.mulf %382, %381 : vector<32x128xf32>
    %384 = arith.addf %379, %383 : vector<32x128xf32>
    %c2_205 = arith.constant 2 : index
    %c0_206 = arith.constant 0 : index
    %c0_207 = arith.constant 0 : index
    %385 = vector.load %arg3[%c2_205, %c0_206, %c0_207] : memref<8x32x128xf32, #tpu.memory_space<vmem>>, vector<1x32x128xf32>
    %386 = vector.shape_cast %385 : vector<1x32x128xf32> to vector<32x128xf32>
    %387 = vector.broadcast %370 : vector<1x128xf32> to vector<32x128xf32>
    %388 = arith.mulf %387, %386 : vector<32x128xf32>
    %389 = arith.addf %384, %388 : vector<32x128xf32>
    %c3_208 = arith.constant 3 : index
    %c0_209 = arith.constant 0 : index
    %c0_210 = arith.constant 0 : index
    %390 = vector.load %arg3[%c3_208, %c0_209, %c0_210] : memref<8x32x128xf32, #tpu.memory_space<vmem>>, vector<1x32x128xf32>
    %391 = vector.shape_cast %390 : vector<1x32x128xf32> to vector<32x128xf32>
    %392 = vector.broadcast %371 : vector<1x128xf32> to vector<32x128xf32>
    %393 = arith.mulf %392, %391 : vector<32x128xf32>
    %394 = arith.addf %389, %393 : vector<32x128xf32>
    %c4_211 = arith.constant 4 : index
    %c0_212 = arith.constant 0 : index
    %c0_213 = arith.constant 0 : index
    %395 = vector.load %arg3[%c4_211, %c0_212, %c0_213] : memref<8x32x128xf32, #tpu.memory_space<vmem>>, vector<1x32x128xf32>
    %396 = vector.shape_cast %395 : vector<1x32x128xf32> to vector<32x128xf32>
    %397 = vector.broadcast %372 : vector<1x128xf32> to vector<32x128xf32>
    %398 = arith.mulf %397, %396 : vector<32x128xf32>
    %399 = arith.addf %394, %398 : vector<32x128xf32>
    %c5_214 = arith.constant 5 : index
    %c0_215 = arith.constant 0 : index
    %c0_216 = arith.constant 0 : index
    %400 = vector.load %arg3[%c5_214, %c0_215, %c0_216] : memref<8x32x128xf32, #tpu.memory_space<vmem>>, vector<1x32x128xf32>
    %401 = vector.shape_cast %400 : vector<1x32x128xf32> to vector<32x128xf32>
    %402 = vector.broadcast %373 : vector<1x128xf32> to vector<32x128xf32>
    %403 = arith.mulf %402, %401 : vector<32x128xf32>
    %404 = arith.addf %399, %403 : vector<32x128xf32>
    %c6_217 = arith.constant 6 : index
    %c0_218 = arith.constant 0 : index
    %c0_219 = arith.constant 0 : index
    %405 = vector.load %arg3[%c6_217, %c0_218, %c0_219] : memref<8x32x128xf32, #tpu.memory_space<vmem>>, vector<1x32x128xf32>
    %406 = vector.shape_cast %405 : vector<1x32x128xf32> to vector<32x128xf32>
    %407 = vector.broadcast %374 : vector<1x128xf32> to vector<32x128xf32>
    %408 = arith.mulf %407, %406 : vector<32x128xf32>
    %409 = arith.addf %404, %408 : vector<32x128xf32>
    %c7_220 = arith.constant 7 : index
    %c0_221 = arith.constant 0 : index
    %c0_222 = arith.constant 0 : index
    %410 = vector.load %arg3[%c7_220, %c0_221, %c0_222] : memref<8x32x128xf32, #tpu.memory_space<vmem>>, vector<1x32x128xf32>
    %411 = vector.shape_cast %410 : vector<1x32x128xf32> to vector<32x128xf32>
    %412 = vector.broadcast %375 : vector<1x128xf32> to vector<32x128xf32>
    %413 = arith.mulf %412, %411 : vector<32x128xf32>
    %414 = arith.addf %409, %413 : vector<32x128xf32>
    %c2_223 = arith.constant 2 : index
    %c0_224 = arith.constant 0 : index
    %c0_225 = arith.constant 0 : index
    %415 = vector.load %arg5[%c2_223, %c0_224, %c0_225] : memref<8x32x128xf32, #tpu.memory_space<vmem>>, vector<1x32x128xf32>
    %416 = vector.shape_cast %415 : vector<1x32x128xf32> to vector<32x128xf32>
    %417 = vector.shape_cast %414 : vector<32x128xf32> to vector<1x32x128xf32>
    tpu.vector_store %arg5[%c2_223, %c0_224, %c0_225], %417 {strides = array<i32>} : memref<8x32x128xf32, #tpu.memory_space<vmem>>, vector<1x32x128xf32>,
    %418 = tpu.concatenate %368, %369, %370, %371, %372, %373, %374, %375 in 0 : vector<1x128xf32>, vector<1x128xf32>, vector<1x128xf32>, vector<1x128xf32>, vector<1x128xf32>, vector<1x128xf32>, vector<1x128xf32>, vector<1x128xf32> -> vector<8x128xf32>
    %c2_226 = arith.constant 2 : index
    %c0_227 = arith.constant 0 : index
    %c0_228 = arith.constant 0 : index
    %419 = vector.load %arg6[%c2_226, %c0_227, %c0_228] : memref<8x8x128xf32, #tpu.memory_space<vmem>>, vector<1x8x128xf32>
    %420 = vector.shape_cast %419 : vector<1x8x128xf32> to vector<8x128xf32>
    %421 = vector.shape_cast %418 : vector<8x128xf32> to vector<1x8x128xf32>
    tpu.vector_store %arg6[%c2_226, %c0_227, %c0_228], %421 {strides = array<i32>} : memref<8x8x128xf32, #tpu.memory_space<vmem>>, vector<1x8x128xf32>,
    %c3_229 = arith.constant 3 : index
    %c0_230 = arith.constant 0 : index
    %c0_231 = arith.constant 0 : index
    %422 = vector.load %arg1[%c3_229, %c0_230, %c0_231] : memref<8x32x128xf32, #tpu.memory_space<vmem>>, vector<1x32x128xf32>
    %423 = vector.shape_cast %422 : vector<1x32x128xf32> to vector<32x128xf32>
    %c0_232 = arith.constant 0 : index
    %c0_233 = arith.constant 0 : index
    %c0_234 = arith.constant 0 : index
    %424 = vector.load %arg2[%c0_232, %c0_233, %c0_234] : memref<8x32x128xf32, #tpu.memory_space<vmem>>, vector<1x32x128xf32>
    %425 = vector.shape_cast %424 : vector<1x32x128xf32> to vector<32x128xf32>
    %426 = arith.mulf %423, %425 : vector<32x128xf32>
    %cst_235 = arith.constant dense<0.000000e+00> : vector<128xf32>
    %427 = vector.multi_reduction <add>, %426, %cst_235 [0] : vector<32x128xf32> to vector<128xf32>
    %428 = vector.shape_cast %427 : vector<128xf32> to vector<1x128xf32>
    %cst_236 = arith.constant 0.176776692 : f32
    %429 = vector.broadcast %cst_236 : f32 to vector<1x128xf32>
    %430 = arith.mulf %428, %429 : vector<1x128xf32>
    %431 = math.exp %430 : vector<1x128xf32>
    %432 = arith.mulf %431, %0 : vector<1x128xf32>
    %c1_237 = arith.constant 1 : index
    %c0_238 = arith.constant 0 : index
    %c0_239 = arith.constant 0 : index
    %433 = vector.load %arg2[%c1_237, %c0_238, %c0_239] : memref<8x32x128xf32, #tpu.memory_space<vmem>>, vector<1x32x128xf32>
    %434 = vector.shape_cast %433 : vector<1x32x128xf32> to vector<32x128xf32>
    %435 = arith.mulf %423, %434 : vector<32x128xf32>
    %cst_240 = arith.constant dense<0.000000e+00> : vector<128xf32>
    %436 = vector.multi_reduction <add>, %435, %cst_240 [0] : vector<32x128xf32> to vector<128xf32>
    %437 = vector.shape_cast %436 : vector<128xf32> to vector<1x128xf32>
    %cst_241 = arith.constant 0.176776692 : f32
    %438 = vector.broadcast %cst_241 : f32 to vector<1x128xf32>
    %439 = arith.mulf %437, %438 : vector<1x128xf32>
    %440 = math.exp %439 : vector<1x128xf32>
    %441 = arith.mulf %440, %1 : vector<1x128xf32>
    %c2_242 = arith.constant 2 : index
    %c0_243 = arith.constant 0 : index
    %c0_244 = arith.constant 0 : index
    %442 = vector.load %arg2[%c2_242, %c0_243, %c0_244] : memref<8x32x128xf32, #tpu.memory_space<vmem>>, vector<1x32x128xf32>
    %443 = vector.shape_cast %442 : vector<1x32x128xf32> to vector<32x128xf32>
    %444 = arith.mulf %423, %443 : vector<32x128xf32>
    %cst_245 = arith.constant dense<0.000000e+00> : vector<128xf32>
    %445 = vector.multi_reduction <add>, %444, %cst_245 [0] : vector<32x128xf32> to vector<128xf32>
    %446 = vector.shape_cast %445 : vector<128xf32> to vector<1x128xf32>
    %cst_246 = arith.constant 0.176776692 : f32
    %447 = vector.broadcast %cst_246 : f32 to vector<1x128xf32>
    %448 = arith.mulf %446, %447 : vector<1x128xf32>
    %449 = math.exp %448 : vector<1x128xf32>
    %450 = arith.mulf %449, %2 : vector<1x128xf32>
    %c3_247 = arith.constant 3 : index
    %c0_248 = arith.constant 0 : index
    %c0_249 = arith.constant 0 : index
    %451 = vector.load %arg2[%c3_247, %c0_248, %c0_249] : memref<8x32x128xf32, #tpu.memory_space<vmem>>, vector<1x32x128xf32>
    %452 = vector.shape_cast %451 : vector<1x32x128xf32> to vector<32x128xf32>
    %453 = arith.mulf %423, %452 : vector<32x128xf32>
    %cst_250 = arith.constant dense<0.000000e+00> : vector<128xf32>
    %454 = vector.multi_reduction <add>, %453, %cst_250 [0] : vector<32x128xf32> to vector<128xf32>
    %455 = vector.shape_cast %454 : vector<128xf32> to vector<1x128xf32>
    %cst_251 = arith.constant 0.176776692 : f32
    %456 = vector.broadcast %cst_251 : f32 to vector<1x128xf32>
    %457 = arith.mulf %455, %456 : vector<1x128xf32>
    %458 = math.exp %457 : vector<1x128xf32>
    %459 = arith.mulf %458, %3 : vector<1x128xf32>
    %c4_252 = arith.constant 4 : index
    %c0_253 = arith.constant 0 : index
    %c0_254 = arith.constant 0 : index
    %460 = vector.load %arg2[%c4_252, %c0_253, %c0_254] : memref<8x32x128xf32, #tpu.memory_space<vmem>>, vector<1x32x128xf32>
    %461 = vector.shape_cast %460 : vector<1x32x128xf32> to vector<32x128xf32>
    %462 = arith.mulf %423, %461 : vector<32x128xf32>
    %cst_255 = arith.constant dense<0.000000e+00> : vector<128xf32>
    %463 = vector.multi_reduction <add>, %462, %cst_255 [0] : vector<32x128xf32> to vector<128xf32>
    %464 = vector.shape_cast %463 : vector<128xf32> to vector<1x128xf32>
    %cst_256 = arith.constant 0.176776692 : f32
    %465 = vector.broadcast %cst_256 : f32 to vector<1x128xf32>
    %466 = arith.mulf %464, %465 : vector<1x128xf32>
    %467 = math.exp %466 : vector<1x128xf32>
    %468 = arith.mulf %467, %4 : vector<1x128xf32>
    %c5_257 = arith.constant 5 : index
    %c0_258 = arith.constant 0 : index
    %c0_259 = arith.constant 0 : index
    %469 = vector.load %arg2[%c5_257, %c0_258, %c0_259] : memref<8x32x128xf32, #tpu.memory_space<vmem>>, vector<1x32x128xf32>
    %470 = vector.shape_cast %469 : vector<1x32x128xf32> to vector<32x128xf32>
    %471 = arith.mulf %423, %470 : vector<32x128xf32>
    %cst_260 = arith.constant dense<0.000000e+00> : vector<128xf32>
    %472 = vector.multi_reduction <add>, %471, %cst_260 [0] : vector<32x128xf32> to vector<128xf32>
    %473 = vector.shape_cast %472 : vector<128xf32> to vector<1x128xf32>
    %cst_261 = arith.constant 0.176776692 : f32
    %474 = vector.broadcast %cst_261 : f32 to vector<1x128xf32>
    %475 = arith.mulf %473, %474 : vector<1x128xf32>
    %476 = math.exp %475 : vector<1x128xf32>
    %477 = arith.mulf %476, %5 : vector<1x128xf32>
    %c6_262 = arith.constant 6 : index
    %c0_263 = arith.constant 0 : index
    %c0_264 = arith.constant 0 : index
    %478 = vector.load %arg2[%c6_262, %c0_263, %c0_264] : memref<8x32x128xf32, #tpu.memory_space<vmem>>, vector<1x32x128xf32>
    %479 = vector.shape_cast %478 : vector<1x32x128xf32> to vector<32x128xf32>
    %480 = arith.mulf %423, %479 : vector<32x128xf32>
    %cst_265 = arith.constant dense<0.000000e+00> : vector<128xf32>
    %481 = vector.multi_reduction <add>, %480, %cst_265 [0] : vector<32x128xf32> to vector<128xf32>
    %482 = vector.shape_cast %481 : vector<128xf32> to vector<1x128xf32>
    %cst_266 = arith.constant 0.176776692 : f32
    %483 = vector.broadcast %cst_266 : f32 to vector<1x128xf32>
    %484 = arith.mulf %482, %483 : vector<1x128xf32>
    %485 = math.exp %484 : vector<1x128xf32>
    %486 = arith.mulf %485, %6 : vector<1x128xf32>
    %c7_267 = arith.constant 7 : index
    %c0_268 = arith.constant 0 : index
    %c0_269 = arith.constant 0 : index
    %487 = vector.load %arg2[%c7_267, %c0_268, %c0_269] : memref<8x32x128xf32, #tpu.memory_space<vmem>>, vector<1x32x128xf32>
    %488 = vector.shape_cast %487 : vector<1x32x128xf32> to vector<32x128xf32>
    %489 = arith.mulf %423, %488 : vector<32x128xf32>
    %cst_270 = arith.constant dense<0.000000e+00> : vector<128xf32>
    %490 = vector.multi_reduction <add>, %489, %cst_270 [0] : vector<32x128xf32> to vector<128xf32>
    %491 = vector.shape_cast %490 : vector<128xf32> to vector<1x128xf32>
    %cst_271 = arith.constant 0.176776692 : f32
    %492 = vector.broadcast %cst_271 : f32 to vector<1x128xf32>
    %493 = arith.mulf %491, %492 : vector<1x128xf32>
    %494 = math.exp %493 : vector<1x128xf32>
    %495 = arith.mulf %494, %7 : vector<1x128xf32>
    %496 = arith.addf %432, %441 : vector<1x128xf32>
    %497 = arith.addf %496, %450 : vector<1x128xf32>
    %498 = arith.addf %497, %459 : vector<1x128xf32>
    %499 = arith.addf %498, %468 : vector<1x128xf32>
    %500 = arith.addf %499, %477 : vector<1x128xf32>
    %501 = arith.addf %500, %486 : vector<1x128xf32>
    %502 = arith.addf %501, %495 : vector<1x128xf32>
    %cst_272 = arith.constant 9.99999993E-9 : f32
    %503 = vector.broadcast %cst_272 : f32 to vector<1x128xf32>
    %504 = arith.addf %502, %503 : vector<1x128xf32>
    %505 = tpu.reciprocal %504 {approx = true} : vector<1x128xf32> -> vector<1x128xf32>
    %506 = arith.mulf %432, %505 : vector<1x128xf32>
    %507 = arith.mulf %441, %505 : vector<1x128xf32>
    %508 = arith.mulf %450, %505 : vector<1x128xf32>
    %509 = arith.mulf %459, %505 : vector<1x128xf32>
    %510 = arith.mulf %468, %505 : vector<1x128xf32>
    %511 = arith.mulf %477, %505 : vector<1x128xf32>
    %512 = arith.mulf %486, %505 : vector<1x128xf32>
    %513 = arith.mulf %495, %505 : vector<1x128xf32>
    %c0_273 = arith.constant 0 : index
    %c0_274 = arith.constant 0 : index
    %c0_275 = arith.constant 0 : index
    %514 = vector.load %arg3[%c0_273, %c0_274, %c0_275] : memref<8x32x128xf32, #tpu.memory_space<vmem>>, vector<1x32x128xf32>
    %515 = vector.shape_cast %514 : vector<1x32x128xf32> to vector<32x128xf32>
    %516 = vector.broadcast %506 : vector<1x128xf32> to vector<32x128xf32>
    %517 = arith.mulf %516, %515 : vector<32x128xf32>
    %c1_276 = arith.constant 1 : index
    %c0_277 = arith.constant 0 : index
    %c0_278 = arith.constant 0 : index
    %518 = vector.load %arg3[%c1_276, %c0_277, %c0_278] : memref<8x32x128xf32, #tpu.memory_space<vmem>>, vector<1x32x128xf32>
    %519 = vector.shape_cast %518 : vector<1x32x128xf32> to vector<32x128xf32>
    %520 = vector.broadcast %507 : vector<1x128xf32> to vector<32x128xf32>
    %521 = arith.mulf %520, %519 : vector<32x128xf32>
    %522 = arith.addf %517, %521 : vector<32x128xf32>
    %c2_279 = arith.constant 2 : index
    %c0_280 = arith.constant 0 : index
    %c0_281 = arith.constant 0 : index
    %523 = vector.load %arg3[%c2_279, %c0_280, %c0_281] : memref<8x32x128xf32, #tpu.memory_space<vmem>>, vector<1x32x128xf32>
    %524 = vector.shape_cast %523 : vector<1x32x128xf32> to vector<32x128xf32>
    %525 = vector.broadcast %508 : vector<1x128xf32> to vector<32x128xf32>
    %526 = arith.mulf %525, %524 : vector<32x128xf32>
    %527 = arith.addf %522, %526 : vector<32x128xf32>
    %c3_282 = arith.constant 3 : index
    %c0_283 = arith.constant 0 : index
    %c0_284 = arith.constant 0 : index
    %528 = vector.load %arg3[%c3_282, %c0_283, %c0_284] : memref<8x32x128xf32, #tpu.memory_space<vmem>>, vector<1x32x128xf32>
    %529 = vector.shape_cast %528 : vector<1x32x128xf32> to vector<32x128xf32>
    %530 = vector.broadcast %509 : vector<1x128xf32> to vector<32x128xf32>
    %531 = arith.mulf %530, %529 : vector<32x128xf32>
    %532 = arith.addf %527, %531 : vector<32x128xf32>
    %c4_285 = arith.constant 4 : index
    %c0_286 = arith.constant 0 : index
    %c0_287 = arith.constant 0 : index
    %533 = vector.load %arg3[%c4_285, %c0_286, %c0_287] : memref<8x32x128xf32, #tpu.memory_space<vmem>>, vector<1x32x128xf32>
    %534 = vector.shape_cast %533 : vector<1x32x128xf32> to vector<32x128xf32>
    %535 = vector.broadcast %510 : vector<1x128xf32> to vector<32x128xf32>
    %536 = arith.mulf %535, %534 : vector<32x128xf32>
    %537 = arith.addf %532, %536 : vector<32x128xf32>
    %c5_288 = arith.constant 5 : index
    %c0_289 = arith.constant 0 : index
    %c0_290 = arith.constant 0 : index
    %538 = vector.load %arg3[%c5_288, %c0_289, %c0_290] : memref<8x32x128xf32, #tpu.memory_space<vmem>>, vector<1x32x128xf32>
    %539 = vector.shape_cast %538 : vector<1x32x128xf32> to vector<32x128xf32>
    %540 = vector.broadcast %511 : vector<1x128xf32> to vector<32x128xf32>
    %541 = arith.mulf %540, %539 : vector<32x128xf32>
    %542 = arith.addf %537, %541 : vector<32x128xf32>
    %c6_291 = arith.constant 6 : index
    %c0_292 = arith.constant 0 : index
    %c0_293 = arith.constant 0 : index
    %543 = vector.load %arg3[%c6_291, %c0_292, %c0_293] : memref<8x32x128xf32, #tpu.memory_space<vmem>>, vector<1x32x128xf32>
    %544 = vector.shape_cast %543 : vector<1x32x128xf32> to vector<32x128xf32>
    %545 = vector.broadcast %512 : vector<1x128xf32> to vector<32x128xf32>
    %546 = arith.mulf %545, %544 : vector<32x128xf32>
    %547 = arith.addf %542, %546 : vector<32x128xf32>
    %c7_294 = arith.constant 7 : index
    %c0_295 = arith.constant 0 : index
    %c0_296 = arith.constant 0 : index
    %548 = vector.load %arg3[%c7_294, %c0_295, %c0_296] : memref<8x32x128xf32, #tpu.memory_space<vmem>>, vector<1x32x128xf32>
    %549 = vector.shape_cast %548 : vector<1x32x128xf32> to vector<32x128xf32>
    %550 = vector.broadcast %513 : vector<1x128xf32> to vector<32x128xf32>
    %551 = arith.mulf %550, %549 : vector<32x128xf32>
    %552 = arith.addf %547, %551 : vector<32x128xf32>
    %c3_297 = arith.constant 3 : index
    %c0_298 = arith.constant 0 : index
    %c0_299 = arith.constant 0 : index
    %553 = vector.load %arg5[%c3_297, %c0_298, %c0_299] : memref<8x32x128xf32, #tpu.memory_space<vmem>>, vector<1x32x128xf32>
    %554 = vector.shape_cast %553 : vector<1x32x128xf32> to vector<32x128xf32>
    %555 = vector.shape_cast %552 : vector<32x128xf32> to vector<1x32x128xf32>
    tpu.vector_store %arg5[%c3_297, %c0_298, %c0_299], %555 {strides = array<i32>} : memref<8x32x128xf32, #tpu.memory_space<vmem>>, vector<1x32x128xf32>,
    %556 = tpu.concatenate %506, %507, %508, %509, %510, %511, %512, %513 in 0 : vector<1x128xf32>, vector<1x128xf32>, vector<1x128xf32>, vector<1x128xf32>, vector<1x128xf32>, vector<1x128xf32>, vector<1x128xf32>, vector<1x128xf32> -> vector<8x128xf32>
    %c3_300 = arith.constant 3 : index
    %c0_301 = arith.constant 0 : index
    %c0_302 = arith.constant 0 : index
    %557 = vector.load %arg6[%c3_300, %c0_301, %c0_302] : memref<8x8x128xf32, #tpu.memory_space<vmem>>, vector<1x8x128xf32>
    %558 = vector.shape_cast %557 : vector<1x8x128xf32> to vector<8x128xf32>
    %559 = vector.shape_cast %556 : vector<8x128xf32> to vector<1x8x128xf32>
    tpu.vector_store %arg6[%c3_300, %c0_301, %c0_302], %559 {strides = array<i32>} : memref<8x8x128xf32, #tpu.memory_space<vmem>>, vector<1x8x128xf32>,
    %c4_303 = arith.constant 4 : index
    %c0_304 = arith.constant 0 : index
    %c0_305 = arith.constant 0 : index
    %560 = vector.load %arg1[%c4_303, %c0_304, %c0_305] : memref<8x32x128xf32, #tpu.memory_space<vmem>>, vector<1x32x128xf32>
    %561 = vector.shape_cast %560 : vector<1x32x128xf32> to vector<32x128xf32>
    %c0_306 = arith.constant 0 : index
    %c0_307 = arith.constant 0 : index
    %c0_308 = arith.constant 0 : index
    %562 = vector.load %arg2[%c0_306, %c0_307, %c0_308] : memref<8x32x128xf32, #tpu.memory_space<vmem>>, vector<1x32x128xf32>
    %563 = vector.shape_cast %562 : vector<1x32x128xf32> to vector<32x128xf32>
    %564 = arith.mulf %561, %563 : vector<32x128xf32>
    %cst_309 = arith.constant dense<0.000000e+00> : vector<128xf32>
    %565 = vector.multi_reduction <add>, %564, %cst_309 [0] : vector<32x128xf32> to vector<128xf32>
    %566 = vector.shape_cast %565 : vector<128xf32> to vector<1x128xf32>
    %cst_310 = arith.constant 0.176776692 : f32
    %567 = vector.broadcast %cst_310 : f32 to vector<1x128xf32>
    %568 = arith.mulf %566, %567 : vector<1x128xf32>
    %569 = math.exp %568 : vector<1x128xf32>
    %570 = arith.mulf %569, %0 : vector<1x128xf32>
    %c1_311 = arith.constant 1 : index
    %c0_312 = arith.constant 0 : index
    %c0_313 = arith.constant 0 : index
    %571 = vector.load %arg2[%c1_311, %c0_312, %c0_313] : memref<8x32x128xf32, #tpu.memory_space<vmem>>, vector<1x32x128xf32>
    %572 = vector.shape_cast %571 : vector<1x32x128xf32> to vector<32x128xf32>
    %573 = arith.mulf %561, %572 : vector<32x128xf32>
    %cst_314 = arith.constant dense<0.000000e+00> : vector<128xf32>
    %574 = vector.multi_reduction <add>, %573, %cst_314 [0] : vector<32x128xf32> to vector<128xf32>
    %575 = vector.shape_cast %574 : vector<128xf32> to vector<1x128xf32>
    %cst_315 = arith.constant 0.176776692 : f32
    %576 = vector.broadcast %cst_315 : f32 to vector<1x128xf32>
    %577 = arith.mulf %575, %576 : vector<1x128xf32>
    %578 = math.exp %577 : vector<1x128xf32>
    %579 = arith.mulf %578, %1 : vector<1x128xf32>
    %c2_316 = arith.constant 2 : index
    %c0_317 = arith.constant 0 : index
    %c0_318 = arith.constant 0 : index
    %580 = vector.load %arg2[%c2_316, %c0_317, %c0_318] : memref<8x32x128xf32, #tpu.memory_space<vmem>>, vector<1x32x128xf32>
    %581 = vector.shape_cast %580 : vector<1x32x128xf32> to vector<32x128xf32>
    %582 = arith.mulf %561, %581 : vector<32x128xf32>
    %cst_319 = arith.constant dense<0.000000e+00> : vector<128xf32>
    %583 = vector.multi_reduction <add>, %582, %cst_319 [0] : vector<32x128xf32> to vector<128xf32>
    %584 = vector.shape_cast %583 : vector<128xf32> to vector<1x128xf32>
    %cst_320 = arith.constant 0.176776692 : f32
    %585 = vector.broadcast %cst_320 : f32 to vector<1x128xf32>
    %586 = arith.mulf %584, %585 : vector<1x128xf32>
    %587 = math.exp %586 : vector<1x128xf32>
    %588 = arith.mulf %587, %2 : vector<1x128xf32>
    %c3_321 = arith.constant 3 : index
    %c0_322 = arith.constant 0 : index
    %c0_323 = arith.constant 0 : index
    %589 = vector.load %arg2[%c3_321, %c0_322, %c0_323] : memref<8x32x128xf32, #tpu.memory_space<vmem>>, vector<1x32x128xf32>
    %590 = vector.shape_cast %589 : vector<1x32x128xf32> to vector<32x128xf32>
    %591 = arith.mulf %561, %590 : vector<32x128xf32>
    %cst_324 = arith.constant dense<0.000000e+00> : vector<128xf32>
    %592 = vector.multi_reduction <add>, %591, %cst_324 [0] : vector<32x128xf32> to vector<128xf32>
    %593 = vector.shape_cast %592 : vector<128xf32> to vector<1x128xf32>
    %cst_325 = arith.constant 0.176776692 : f32
    %594 = vector.broadcast %cst_325 : f32 to vector<1x128xf32>
    %595 = arith.mulf %593, %594 : vector<1x128xf32>
    %596 = math.exp %595 : vector<1x128xf32>
    %597 = arith.mulf %596, %3 : vector<1x128xf32>
    %c4_326 = arith.constant 4 : index
    %c0_327 = arith.constant 0 : index
    %c0_328 = arith.constant 0 : index
    %598 = vector.load %arg2[%c4_326, %c0_327, %c0_328] : memref<8x32x128xf32, #tpu.memory_space<vmem>>, vector<1x32x128xf32>
    %599 = vector.shape_cast %598 : vector<1x32x128xf32> to vector<32x128xf32>
    %600 = arith.mulf %561, %599 : vector<32x128xf32>
    %cst_329 = arith.constant dense<0.000000e+00> : vector<128xf32>
    %601 = vector.multi_reduction <add>, %600, %cst_329 [0] : vector<32x128xf32> to vector<128xf32>
    %602 = vector.shape_cast %601 : vector<128xf32> to vector<1x128xf32>
    %cst_330 = arith.constant 0.176776692 : f32
    %603 = vector.broadcast %cst_330 : f32 to vector<1x128xf32>
    %604 = arith.mulf %602, %603 : vector<1x128xf32>
    %605 = math.exp %604 : vector<1x128xf32>
    %606 = arith.mulf %605, %4 : vector<1x128xf32>
    %c5_331 = arith.constant 5 : index
    %c0_332 = arith.constant 0 : index
    %c0_333 = arith.constant 0 : index
    %607 = vector.load %arg2[%c5_331, %c0_332, %c0_333] : memref<8x32x128xf32, #tpu.memory_space<vmem>>, vector<1x32x128xf32>
    %608 = vector.shape_cast %607 : vector<1x32x128xf32> to vector<32x128xf32>
    %609 = arith.mulf %561, %608 : vector<32x128xf32>
    %cst_334 = arith.constant dense<0.000000e+00> : vector<128xf32>
    %610 = vector.multi_reduction <add>, %609, %cst_334 [0] : vector<32x128xf32> to vector<128xf32>
    %611 = vector.shape_cast %610 : vector<128xf32> to vector<1x128xf32>
    %cst_335 = arith.constant 0.176776692 : f32
    %612 = vector.broadcast %cst_335 : f32 to vector<1x128xf32>
    %613 = arith.mulf %611, %612 : vector<1x128xf32>
    %614 = math.exp %613 : vector<1x128xf32>
    %615 = arith.mulf %614, %5 : vector<1x128xf32>
    %c6_336 = arith.constant 6 : index
    %c0_337 = arith.constant 0 : index
    %c0_338 = arith.constant 0 : index
    %616 = vector.load %arg2[%c6_336, %c0_337, %c0_338] : memref<8x32x128xf32, #tpu.memory_space<vmem>>, vector<1x32x128xf32>
    %617 = vector.shape_cast %616 : vector<1x32x128xf32> to vector<32x128xf32>
    %618 = arith.mulf %561, %617 : vector<32x128xf32>
    %cst_339 = arith.constant dense<0.000000e+00> : vector<128xf32>
    %619 = vector.multi_reduction <add>, %618, %cst_339 [0] : vector<32x128xf32> to vector<128xf32>
    %620 = vector.shape_cast %619 : vector<128xf32> to vector<1x128xf32>
    %cst_340 = arith.constant 0.176776692 : f32
    %621 = vector.broadcast %cst_340 : f32 to vector<1x128xf32>
    %622 = arith.mulf %620, %621 : vector<1x128xf32>
    %623 = math.exp %622 : vector<1x128xf32>
    %624 = arith.mulf %623, %6 : vector<1x128xf32>
    %c7_341 = arith.constant 7 : index
    %c0_342 = arith.constant 0 : index
    %c0_343 = arith.constant 0 : index
    %625 = vector.load %arg2[%c7_341, %c0_342, %c0_343] : memref<8x32x128xf32, #tpu.memory_space<vmem>>, vector<1x32x128xf32>
    %626 = vector.shape_cast %625 : vector<1x32x128xf32> to vector<32x128xf32>
    %627 = arith.mulf %561, %626 : vector<32x128xf32>
    %cst_344 = arith.constant dense<0.000000e+00> : vector<128xf32>
    %628 = vector.multi_reduction <add>, %627, %cst_344 [0] : vector<32x128xf32> to vector<128xf32>
    %629 = vector.shape_cast %628 : vector<128xf32> to vector<1x128xf32>
    %cst_345 = arith.constant 0.176776692 : f32
    %630 = vector.broadcast %cst_345 : f32 to vector<1x128xf32>
    %631 = arith.mulf %629, %630 : vector<1x128xf32>
    %632 = math.exp %631 : vector<1x128xf32>
    %633 = arith.mulf %632, %7 : vector<1x128xf32>
    %634 = arith.addf %570, %579 : vector<1x128xf32>
    %635 = arith.addf %634, %588 : vector<1x128xf32>
    %636 = arith.addf %635, %597 : vector<1x128xf32>
    %637 = arith.addf %636, %606 : vector<1x128xf32>
    %638 = arith.addf %637, %615 : vector<1x128xf32>
    %639 = arith.addf %638, %624 : vector<1x128xf32>
    %640 = arith.addf %639, %633 : vector<1x128xf32>
    %cst_346 = arith.constant 9.99999993E-9 : f32
    %641 = vector.broadcast %cst_346 : f32 to vector<1x128xf32>
    %642 = arith.addf %640, %641 : vector<1x128xf32>
    %643 = tpu.reciprocal %642 {approx = true} : vector<1x128xf32> -> vector<1x128xf32>
    %644 = arith.mulf %570, %643 : vector<1x128xf32>
    %645 = arith.mulf %579, %643 : vector<1x128xf32>
    %646 = arith.mulf %588, %643 : vector<1x128xf32>
    %647 = arith.mulf %597, %643 : vector<1x128xf32>
    %648 = arith.mulf %606, %643 : vector<1x128xf32>
    %649 = arith.mulf %615, %643 : vector<1x128xf32>
    %650 = arith.mulf %624, %643 : vector<1x128xf32>
    %651 = arith.mulf %633, %643 : vector<1x128xf32>
    %c0_347 = arith.constant 0 : index
    %c0_348 = arith.constant 0 : index
    %c0_349 = arith.constant 0 : index
    %652 = vector.load %arg3[%c0_347, %c0_348, %c0_349] : memref<8x32x128xf32, #tpu.memory_space<vmem>>, vector<1x32x128xf32>
    %653 = vector.shape_cast %652 : vector<1x32x128xf32> to vector<32x128xf32>
    %654 = vector.broadcast %644 : vector<1x128xf32> to vector<32x128xf32>
    %655 = arith.mulf %654, %653 : vector<32x128xf32>
    %c1_350 = arith.constant 1 : index
    %c0_351 = arith.constant 0 : index
    %c0_352 = arith.constant 0 : index
    %656 = vector.load %arg3[%c1_350, %c0_351, %c0_352] : memref<8x32x128xf32, #tpu.memory_space<vmem>>, vector<1x32x128xf32>
    %657 = vector.shape_cast %656 : vector<1x32x128xf32> to vector<32x128xf32>
    %658 = vector.broadcast %645 : vector<1x128xf32> to vector<32x128xf32>
    %659 = arith.mulf %658, %657 : vector<32x128xf32>
    %660 = arith.addf %655, %659 : vector<32x128xf32>
    %c2_353 = arith.constant 2 : index
    %c0_354 = arith.constant 0 : index
    %c0_355 = arith.constant 0 : index
    %661 = vector.load %arg3[%c2_353, %c0_354, %c0_355] : memref<8x32x128xf32, #tpu.memory_space<vmem>>, vector<1x32x128xf32>
    %662 = vector.shape_cast %661 : vector<1x32x128xf32> to vector<32x128xf32>
    %663 = vector.broadcast %646 : vector<1x128xf32> to vector<32x128xf32>
    %664 = arith.mulf %663, %662 : vector<32x128xf32>
    %665 = arith.addf %660, %664 : vector<32x128xf32>
    %c3_356 = arith.constant 3 : index
    %c0_357 = arith.constant 0 : index
    %c0_358 = arith.constant 0 : index
    %666 = vector.load %arg3[%c3_356, %c0_357, %c0_358] : memref<8x32x128xf32, #tpu.memory_space<vmem>>, vector<1x32x128xf32>
    %667 = vector.shape_cast %666 : vector<1x32x128xf32> to vector<32x128xf32>
    %668 = vector.broadcast %647 : vector<1x128xf32> to vector<32x128xf32>
    %669 = arith.mulf %668, %667 : vector<32x128xf32>
    %670 = arith.addf %665, %669 : vector<32x128xf32>
    %c4_359 = arith.constant 4 : index
    %c0_360 = arith.constant 0 : index
    %c0_361 = arith.constant 0 : index
    %671 = vector.load %arg3[%c4_359, %c0_360, %c0_361] : memref<8x32x128xf32, #tpu.memory_space<vmem>>, vector<1x32x128xf32>
    %672 = vector.shape_cast %671 : vector<1x32x128xf32> to vector<32x128xf32>
    %673 = vector.broadcast %648 : vector<1x128xf32> to vector<32x128xf32>
    %674 = arith.mulf %673, %672 : vector<32x128xf32>
    %675 = arith.addf %670, %674 : vector<32x128xf32>
    %c5_362 = arith.constant 5 : index
    %c0_363 = arith.constant 0 : index
    %c0_364 = arith.constant 0 : index
    %676 = vector.load %arg3[%c5_362, %c0_363, %c0_364] : memref<8x32x128xf32, #tpu.memory_space<vmem>>, vector<1x32x128xf32>
    %677 = vector.shape_cast %676 : vector<1x32x128xf32> to vector<32x128xf32>
    %678 = vector.broadcast %649 : vector<1x128xf32> to vector<32x128xf32>
    %679 = arith.mulf %678, %677 : vector<32x128xf32>
    %680 = arith.addf %675, %679 : vector<32x128xf32>
    %c6_365 = arith.constant 6 : index
    %c0_366 = arith.constant 0 : index
    %c0_367 = arith.constant 0 : index
    %681 = vector.load %arg3[%c6_365, %c0_366, %c0_367] : memref<8x32x128xf32, #tpu.memory_space<vmem>>, vector<1x32x128xf32>
    %682 = vector.shape_cast %681 : vector<1x32x128xf32> to vector<32x128xf32>
    %683 = vector.broadcast %650 : vector<1x128xf32> to vector<32x128xf32>
    %684 = arith.mulf %683, %682 : vector<32x128xf32>
    %685 = arith.addf %680, %684 : vector<32x128xf32>
    %c7_368 = arith.constant 7 : index
    %c0_369 = arith.constant 0 : index
    %c0_370 = arith.constant 0 : index
    %686 = vector.load %arg3[%c7_368, %c0_369, %c0_370] : memref<8x32x128xf32, #tpu.memory_space<vmem>>, vector<1x32x128xf32>
    %687 = vector.shape_cast %686 : vector<1x32x128xf32> to vector<32x128xf32>
    %688 = vector.broadcast %651 : vector<1x128xf32> to vector<32x128xf32>
    %689 = arith.mulf %688, %687 : vector<32x128xf32>
    %690 = arith.addf %685, %689 : vector<32x128xf32>
    %c4_371 = arith.constant 4 : index
    %c0_372 = arith.constant 0 : index
    %c0_373 = arith.constant 0 : index
    %691 = vector.load %arg5[%c4_371, %c0_372, %c0_373] : memref<8x32x128xf32, #tpu.memory_space<vmem>>, vector<1x32x128xf32>
    %692 = vector.shape_cast %691 : vector<1x32x128xf32> to vector<32x128xf32>
    %693 = vector.shape_cast %690 : vector<32x128xf32> to vector<1x32x128xf32>
    tpu.vector_store %arg5[%c4_371, %c0_372, %c0_373], %693 {strides = array<i32>} : memref<8x32x128xf32, #tpu.memory_space<vmem>>, vector<1x32x128xf32>,
    %694 = tpu.concatenate %644, %645, %646, %647, %648, %649, %650, %651 in 0 : vector<1x128xf32>, vector<1x128xf32>, vector<1x128xf32>, vector<1x128xf32>, vector<1x128xf32>, vector<1x128xf32>, vector<1x128xf32>, vector<1x128xf32> -> vector<8x128xf32>
    %c4_374 = arith.constant 4 : index
    %c0_375 = arith.constant 0 : index
    %c0_376 = arith.constant 0 : index
    %695 = vector.load %arg6[%c4_374, %c0_375, %c0_376] : memref<8x8x128xf32, #tpu.memory_space<vmem>>, vector<1x8x128xf32>
    %696 = vector.shape_cast %695 : vector<1x8x128xf32> to vector<8x128xf32>
    %697 = vector.shape_cast %694 : vector<8x128xf32> to vector<1x8x128xf32>
    tpu.vector_store %arg6[%c4_374, %c0_375, %c0_376], %697 {strides = array<i32>} : memref<8x8x128xf32, #tpu.memory_space<vmem>>, vector<1x8x128xf32>,
    %c5_377 = arith.constant 5 : index
    %c0_378 = arith.constant 0 : index
    %c0_379 = arith.constant 0 : index
    %698 = vector.load %arg1[%c5_377, %c0_378, %c0_379] : memref<8x32x128xf32, #tpu.memory_space<vmem>>, vector<1x32x128xf32>
    %699 = vector.shape_cast %698 : vector<1x32x128xf32> to vector<32x128xf32>
    %c0_380 = arith.constant 0 : index
    %c0_381 = arith.constant 0 : index
    %c0_382 = arith.constant 0 : index
    %700 = vector.load %arg2[%c0_380, %c0_381, %c0_382] : memref<8x32x128xf32, #tpu.memory_space<vmem>>, vector<1x32x128xf32>
    %701 = vector.shape_cast %700 : vector<1x32x128xf32> to vector<32x128xf32>
    %702 = arith.mulf %699, %701 : vector<32x128xf32>
    %cst_383 = arith.constant dense<0.000000e+00> : vector<128xf32>
    %703 = vector.multi_reduction <add>, %702, %cst_383 [0] : vector<32x128xf32> to vector<128xf32>
    %704 = vector.shape_cast %703 : vector<128xf32> to vector<1x128xf32>
    %cst_384 = arith.constant 0.176776692 : f32
    %705 = vector.broadcast %cst_384 : f32 to vector<1x128xf32>
    %706 = arith.mulf %704, %705 : vector<1x128xf32>
    %707 = math.exp %706 : vector<1x128xf32>
    %708 = arith.mulf %707, %0 : vector<1x128xf32>
    %c1_385 = arith.constant 1 : index
    %c0_386 = arith.constant 0 : index
    %c0_387 = arith.constant 0 : index
    %709 = vector.load %arg2[%c1_385, %c0_386, %c0_387] : memref<8x32x128xf32, #tpu.memory_space<vmem>>, vector<1x32x128xf32>
    %710 = vector.shape_cast %709 : vector<1x32x128xf32> to vector<32x128xf32>
    %711 = arith.mulf %699, %710 : vector<32x128xf32>
    %cst_388 = arith.constant dense<0.000000e+00> : vector<128xf32>
    %712 = vector.multi_reduction <add>, %711, %cst_388 [0] : vector<32x128xf32> to vector<128xf32>
    %713 = vector.shape_cast %712 : vector<128xf32> to vector<1x128xf32>
    %cst_389 = arith.constant 0.176776692 : f32
    %714 = vector.broadcast %cst_389 : f32 to vector<1x128xf32>
    %715 = arith.mulf %713, %714 : vector<1x128xf32>
    %716 = math.exp %715 : vector<1x128xf32>
    %717 = arith.mulf %716, %1 : vector<1x128xf32>
    %c2_390 = arith.constant 2 : index
    %c0_391 = arith.constant 0 : index
    %c0_392 = arith.constant 0 : index
    %718 = vector.load %arg2[%c2_390, %c0_391, %c0_392] : memref<8x32x128xf32, #tpu.memory_space<vmem>>, vector<1x32x128xf32>
    %719 = vector.shape_cast %718 : vector<1x32x128xf32> to vector<32x128xf32>
    %720 = arith.mulf %699, %719 : vector<32x128xf32>
    %cst_393 = arith.constant dense<0.000000e+00> : vector<128xf32>
    %721 = vector.multi_reduction <add>, %720, %cst_393 [0] : vector<32x128xf32> to vector<128xf32>
    %722 = vector.shape_cast %721 : vector<128xf32> to vector<1x128xf32>
    %cst_394 = arith.constant 0.176776692 : f32
    %723 = vector.broadcast %cst_394 : f32 to vector<1x128xf32>
    %724 = arith.mulf %722, %723 : vector<1x128xf32>
    %725 = math.exp %724 : vector<1x128xf32>
    %726 = arith.mulf %725, %2 : vector<1x128xf32>
    %c3_395 = arith.constant 3 : index
    %c0_396 = arith.constant 0 : index
    %c0_397 = arith.constant 0 : index
    %727 = vector.load %arg2[%c3_395, %c0_396, %c0_397] : memref<8x32x128xf32, #tpu.memory_space<vmem>>, vector<1x32x128xf32>
    %728 = vector.shape_cast %727 : vector<1x32x128xf32> to vector<32x128xf32>
    %729 = arith.mulf %699, %728 : vector<32x128xf32>
    %cst_398 = arith.constant dense<0.000000e+00> : vector<128xf32>
    %730 = vector.multi_reduction <add>, %729, %cst_398 [0] : vector<32x128xf32> to vector<128xf32>
    %731 = vector.shape_cast %730 : vector<128xf32> to vector<1x128xf32>
    %cst_399 = arith.constant 0.176776692 : f32
    %732 = vector.broadcast %cst_399 : f32 to vector<1x128xf32>
    %733 = arith.mulf %731, %732 : vector<1x128xf32>
    %734 = math.exp %733 : vector<1x128xf32>
    %735 = arith.mulf %734, %3 : vector<1x128xf32>
    %c4_400 = arith.constant 4 : index
    %c0_401 = arith.constant 0 : index
    %c0_402 = arith.constant 0 : index
    %736 = vector.load %arg2[%c4_400, %c0_401, %c0_402] : memref<8x32x128xf32, #tpu.memory_space<vmem>>, vector<1x32x128xf32>
    %737 = vector.shape_cast %736 : vector<1x32x128xf32> to vector<32x128xf32>
    %738 = arith.mulf %699, %737 : vector<32x128xf32>
    %cst_403 = arith.constant dense<0.000000e+00> : vector<128xf32>
    %739 = vector.multi_reduction <add>, %738, %cst_403 [0] : vector<32x128xf32> to vector<128xf32>
    %740 = vector.shape_cast %739 : vector<128xf32> to vector<1x128xf32>
    %cst_404 = arith.constant 0.176776692 : f32
    %741 = vector.broadcast %cst_404 : f32 to vector<1x128xf32>
    %742 = arith.mulf %740, %741 : vector<1x128xf32>
    %743 = math.exp %742 : vector<1x128xf32>
    %744 = arith.mulf %743, %4 : vector<1x128xf32>
    %c5_405 = arith.constant 5 : index
    %c0_406 = arith.constant 0 : index
    %c0_407 = arith.constant 0 : index
    %745 = vector.load %arg2[%c5_405, %c0_406, %c0_407] : memref<8x32x128xf32, #tpu.memory_space<vmem>>, vector<1x32x128xf32>
    %746 = vector.shape_cast %745 : vector<1x32x128xf32> to vector<32x128xf32>
    %747 = arith.mulf %699, %746 : vector<32x128xf32>
    %cst_408 = arith.constant dense<0.000000e+00> : vector<128xf32>
    %748 = vector.multi_reduction <add>, %747, %cst_408 [0] : vector<32x128xf32> to vector<128xf32>
    %749 = vector.shape_cast %748 : vector<128xf32> to vector<1x128xf32>
    %cst_409 = arith.constant 0.176776692 : f32
    %750 = vector.broadcast %cst_409 : f32 to vector<1x128xf32>
    %751 = arith.mulf %749, %750 : vector<1x128xf32>
    %752 = math.exp %751 : vector<1x128xf32>
    %753 = arith.mulf %752, %5 : vector<1x128xf32>
    %c6_410 = arith.constant 6 : index
    %c0_411 = arith.constant 0 : index
    %c0_412 = arith.constant 0 : index
    %754 = vector.load %arg2[%c6_410, %c0_411, %c0_412] : memref<8x32x128xf32, #tpu.memory_space<vmem>>, vector<1x32x128xf32>
    %755 = vector.shape_cast %754 : vector<1x32x128xf32> to vector<32x128xf32>
    %756 = arith.mulf %699, %755 : vector<32x128xf32>
    %cst_413 = arith.constant dense<0.000000e+00> : vector<128xf32>
    %757 = vector.multi_reduction <add>, %756, %cst_413 [0] : vector<32x128xf32> to vector<128xf32>
    %758 = vector.shape_cast %757 : vector<128xf32> to vector<1x128xf32>
    %cst_414 = arith.constant 0.176776692 : f32
    %759 = vector.broadcast %cst_414 : f32 to vector<1x128xf32>
    %760 = arith.mulf %758, %759 : vector<1x128xf32>
    %761 = math.exp %760 : vector<1x128xf32>
    %762 = arith.mulf %761, %6 : vector<1x128xf32>
    %c7_415 = arith.constant 7 : index
    %c0_416 = arith.constant 0 : index
    %c0_417 = arith.constant 0 : index
    %763 = vector.load %arg2[%c7_415, %c0_416, %c0_417] : memref<8x32x128xf32, #tpu.memory_space<vmem>>, vector<1x32x128xf32>
    %764 = vector.shape_cast %763 : vector<1x32x128xf32> to vector<32x128xf32>
    %765 = arith.mulf %699, %764 : vector<32x128xf32>
    %cst_418 = arith.constant dense<0.000000e+00> : vector<128xf32>
    %766 = vector.multi_reduction <add>, %765, %cst_418 [0] : vector<32x128xf32> to vector<128xf32>
    %767 = vector.shape_cast %766 : vector<128xf32> to vector<1x128xf32>
    %cst_419 = arith.constant 0.176776692 : f32
    %768 = vector.broadcast %cst_419 : f32 to vector<1x128xf32>
    %769 = arith.mulf %767, %768 : vector<1x128xf32>
    %770 = math.exp %769 : vector<1x128xf32>
    %771 = arith.mulf %770, %7 : vector<1x128xf32>
    %772 = arith.addf %708, %717 : vector<1x128xf32>
    %773 = arith.addf %772, %726 : vector<1x128xf32>
    %774 = arith.addf %773, %735 : vector<1x128xf32>
    %775 = arith.addf %774, %744 : vector<1x128xf32>
    %776 = arith.addf %775, %753 : vector<1x128xf32>
    %777 = arith.addf %776, %762 : vector<1x128xf32>
    %778 = arith.addf %777, %771 : vector<1x128xf32>
    %cst_420 = arith.constant 9.99999993E-9 : f32
    %779 = vector.broadcast %cst_420 : f32 to vector<1x128xf32>
    %780 = arith.addf %778, %779 : vector<1x128xf32>
    %781 = tpu.reciprocal %780 {approx = true} : vector<1x128xf32> -> vector<1x128xf32>
    %782 = arith.mulf %708, %781 : vector<1x128xf32>
    %783 = arith.mulf %717, %781 : vector<1x128xf32>
    %784 = arith.mulf %726, %781 : vector<1x128xf32>
    %785 = arith.mulf %735, %781 : vector<1x128xf32>
    %786 = arith.mulf %744, %781 : vector<1x128xf32>
    %787 = arith.mulf %753, %781 : vector<1x128xf32>
    %788 = arith.mulf %762, %781 : vector<1x128xf32>
    %789 = arith.mulf %771, %781 : vector<1x128xf32>
    %c0_421 = arith.constant 0 : index
    %c0_422 = arith.constant 0 : index
    %c0_423 = arith.constant 0 : index
    %790 = vector.load %arg3[%c0_421, %c0_422, %c0_423] : memref<8x32x128xf32, #tpu.memory_space<vmem>>, vector<1x32x128xf32>
    %791 = vector.shape_cast %790 : vector<1x32x128xf32> to vector<32x128xf32>
    %792 = vector.broadcast %782 : vector<1x128xf32> to vector<32x128xf32>
    %793 = arith.mulf %792, %791 : vector<32x128xf32>
    %c1_424 = arith.constant 1 : index
    %c0_425 = arith.constant 0 : index
    %c0_426 = arith.constant 0 : index
    %794 = vector.load %arg3[%c1_424, %c0_425, %c0_426] : memref<8x32x128xf32, #tpu.memory_space<vmem>>, vector<1x32x128xf32>
    %795 = vector.shape_cast %794 : vector<1x32x128xf32> to vector<32x128xf32>
    %796 = vector.broadcast %783 : vector<1x128xf32> to vector<32x128xf32>
    %797 = arith.mulf %796, %795 : vector<32x128xf32>
    %798 = arith.addf %793, %797 : vector<32x128xf32>
    %c2_427 = arith.constant 2 : index
    %c0_428 = arith.constant 0 : index
    %c0_429 = arith.constant 0 : index
    %799 = vector.load %arg3[%c2_427, %c0_428, %c0_429] : memref<8x32x128xf32, #tpu.memory_space<vmem>>, vector<1x32x128xf32>
    %800 = vector.shape_cast %799 : vector<1x32x128xf32> to vector<32x128xf32>
    %801 = vector.broadcast %784 : vector<1x128xf32> to vector<32x128xf32>
    %802 = arith.mulf %801, %800 : vector<32x128xf32>
    %803 = arith.addf %798, %802 : vector<32x128xf32>
    %c3_430 = arith.constant 3 : index
    %c0_431 = arith.constant 0 : index
    %c0_432 = arith.constant 0 : index
    %804 = vector.load %arg3[%c3_430, %c0_431, %c0_432] : memref<8x32x128xf32, #tpu.memory_space<vmem>>, vector<1x32x128xf32>
    %805 = vector.shape_cast %804 : vector<1x32x128xf32> to vector<32x128xf32>
    %806 = vector.broadcast %785 : vector<1x128xf32> to vector<32x128xf32>
    %807 = arith.mulf %806, %805 : vector<32x128xf32>
    %808 = arith.addf %803, %807 : vector<32x128xf32>
    %c4_433 = arith.constant 4 : index
    %c0_434 = arith.constant 0 : index
    %c0_435 = arith.constant 0 : index
    %809 = vector.load %arg3[%c4_433, %c0_434, %c0_435] : memref<8x32x128xf32, #tpu.memory_space<vmem>>, vector<1x32x128xf32>
    %810 = vector.shape_cast %809 : vector<1x32x128xf32> to vector<32x128xf32>
    %811 = vector.broadcast %786 : vector<1x128xf32> to vector<32x128xf32>
    %812 = arith.mulf %811, %810 : vector<32x128xf32>
    %813 = arith.addf %808, %812 : vector<32x128xf32>
    %c5_436 = arith.constant 5 : index
    %c0_437 = arith.constant 0 : index
    %c0_438 = arith.constant 0 : index
    %814 = vector.load %arg3[%c5_436, %c0_437, %c0_438] : memref<8x32x128xf32, #tpu.memory_space<vmem>>, vector<1x32x128xf32>
    %815 = vector.shape_cast %814 : vector<1x32x128xf32> to vector<32x128xf32>
    %816 = vector.broadcast %787 : vector<1x128xf32> to vector<32x128xf32>
    %817 = arith.mulf %816, %815 : vector<32x128xf32>
    %818 = arith.addf %813, %817 : vector<32x128xf32>
    %c6_439 = arith.constant 6 : index
    %c0_440 = arith.constant 0 : index
    %c0_441 = arith.constant 0 : index
    %819 = vector.load %arg3[%c6_439, %c0_440, %c0_441] : memref<8x32x128xf32, #tpu.memory_space<vmem>>, vector<1x32x128xf32>
    %820 = vector.shape_cast %819 : vector<1x32x128xf32> to vector<32x128xf32>
    %821 = vector.broadcast %788 : vector<1x128xf32> to vector<32x128xf32>
    %822 = arith.mulf %821, %820 : vector<32x128xf32>
    %823 = arith.addf %818, %822 : vector<32x128xf32>
    %c7_442 = arith.constant 7 : index
    %c0_443 = arith.constant 0 : index
    %c0_444 = arith.constant 0 : index
    %824 = vector.load %arg3[%c7_442, %c0_443, %c0_444] : memref<8x32x128xf32, #tpu.memory_space<vmem>>, vector<1x32x128xf32>
    %825 = vector.shape_cast %824 : vector<1x32x128xf32> to vector<32x128xf32>
    %826 = vector.broadcast %789 : vector<1x128xf32> to vector<32x128xf32>
    %827 = arith.mulf %826, %825 : vector<32x128xf32>
    %828 = arith.addf %823, %827 : vector<32x128xf32>
    %c5_445 = arith.constant 5 : index
    %c0_446 = arith.constant 0 : index
    %c0_447 = arith.constant 0 : index
    %829 = vector.load %arg5[%c5_445, %c0_446, %c0_447] : memref<8x32x128xf32, #tpu.memory_space<vmem>>, vector<1x32x128xf32>
    %830 = vector.shape_cast %829 : vector<1x32x128xf32> to vector<32x128xf32>
    %831 = vector.shape_cast %828 : vector<32x128xf32> to vector<1x32x128xf32>
    tpu.vector_store %arg5[%c5_445, %c0_446, %c0_447], %831 {strides = array<i32>} : memref<8x32x128xf32, #tpu.memory_space<vmem>>, vector<1x32x128xf32>,
    %832 = tpu.concatenate %782, %783, %784, %785, %786, %787, %788, %789 in 0 : vector<1x128xf32>, vector<1x128xf32>, vector<1x128xf32>, vector<1x128xf32>, vector<1x128xf32>, vector<1x128xf32>, vector<1x128xf32>, vector<1x128xf32> -> vector<8x128xf32>
    %c5_448 = arith.constant 5 : index
    %c0_449 = arith.constant 0 : index
    %c0_450 = arith.constant 0 : index
    %833 = vector.load %arg6[%c5_448, %c0_449, %c0_450] : memref<8x8x128xf32, #tpu.memory_space<vmem>>, vector<1x8x128xf32>
    %834 = vector.shape_cast %833 : vector<1x8x128xf32> to vector<8x128xf32>
    %835 = vector.shape_cast %832 : vector<8x128xf32> to vector<1x8x128xf32>
    tpu.vector_store %arg6[%c5_448, %c0_449, %c0_450], %835 {strides = array<i32>} : memref<8x8x128xf32, #tpu.memory_space<vmem>>, vector<1x8x128xf32>,
    %c6_451 = arith.constant 6 : index
    %c0_452 = arith.constant 0 : index
    %c0_453 = arith.constant 0 : index
    %836 = vector.load %arg1[%c6_451, %c0_452, %c0_453] : memref<8x32x128xf32, #tpu.memory_space<vmem>>, vector<1x32x128xf32>
    %837 = vector.shape_cast %836 : vector<1x32x128xf32> to vector<32x128xf32>
    %c0_454 = arith.constant 0 : index
    %c0_455 = arith.constant 0 : index
    %c0_456 = arith.constant 0 : index
    %838 = vector.load %arg2[%c0_454, %c0_455, %c0_456] : memref<8x32x128xf32, #tpu.memory_space<vmem>>, vector<1x32x128xf32>
    %839 = vector.shape_cast %838 : vector<1x32x128xf32> to vector<32x128xf32>
    %840 = arith.mulf %837, %839 : vector<32x128xf32>
    %cst_457 = arith.constant dense<0.000000e+00> : vector<128xf32>
    %841 = vector.multi_reduction <add>, %840, %cst_457 [0] : vector<32x128xf32> to vector<128xf32>
    %842 = vector.shape_cast %841 : vector<128xf32> to vector<1x128xf32>
    %cst_458 = arith.constant 0.176776692 : f32
    %843 = vector.broadcast %cst_458 : f32 to vector<1x128xf32>
    %844 = arith.mulf %842, %843 : vector<1x128xf32>
    %845 = math.exp %844 : vector<1x128xf32>
    %846 = arith.mulf %845, %0 : vector<1x128xf32>
    %c1_459 = arith.constant 1 : index
    %c0_460 = arith.constant 0 : index
    %c0_461 = arith.constant 0 : index
    %847 = vector.load %arg2[%c1_459, %c0_460, %c0_461] : memref<8x32x128xf32, #tpu.memory_space<vmem>>, vector<1x32x128xf32>
    %848 = vector.shape_cast %847 : vector<1x32x128xf32> to vector<32x128xf32>
    %849 = arith.mulf %837, %848 : vector<32x128xf32>
    %cst_462 = arith.constant dense<0.000000e+00> : vector<128xf32>
    %850 = vector.multi_reduction <add>, %849, %cst_462 [0] : vector<32x128xf32> to vector<128xf32>
    %851 = vector.shape_cast %850 : vector<128xf32> to vector<1x128xf32>
    %cst_463 = arith.constant 0.176776692 : f32
    %852 = vector.broadcast %cst_463 : f32 to vector<1x128xf32>
    %853 = arith.mulf %851, %852 : vector<1x128xf32>
    %854 = math.exp %853 : vector<1x128xf32>
    %855 = arith.mulf %854, %1 : vector<1x128xf32>
    %c2_464 = arith.constant 2 : index
    %c0_465 = arith.constant 0 : index
    %c0_466 = arith.constant 0 : index
    %856 = vector.load %arg2[%c2_464, %c0_465, %c0_466] : memref<8x32x128xf32, #tpu.memory_space<vmem>>, vector<1x32x128xf32>
    %857 = vector.shape_cast %856 : vector<1x32x128xf32> to vector<32x128xf32>
    %858 = arith.mulf %837, %857 : vector<32x128xf32>
    %cst_467 = arith.constant dense<0.000000e+00> : vector<128xf32>
    %859 = vector.multi_reduction <add>, %858, %cst_467 [0] : vector<32x128xf32> to vector<128xf32>
    %860 = vector.shape_cast %859 : vector<128xf32> to vector<1x128xf32>
    %cst_468 = arith.constant 0.176776692 : f32
    %861 = vector.broadcast %cst_468 : f32 to vector<1x128xf32>
    %862 = arith.mulf %860, %861 : vector<1x128xf32>
    %863 = math.exp %862 : vector<1x128xf32>
    %864 = arith.mulf %863, %2 : vector<1x128xf32>
    %c3_469 = arith.constant 3 : index
    %c0_470 = arith.constant 0 : index
    %c0_471 = arith.constant 0 : index
    %865 = vector.load %arg2[%c3_469, %c0_470, %c0_471] : memref<8x32x128xf32, #tpu.memory_space<vmem>>, vector<1x32x128xf32>
    %866 = vector.shape_cast %865 : vector<1x32x128xf32> to vector<32x128xf32>
    %867 = arith.mulf %837, %866 : vector<32x128xf32>
    %cst_472 = arith.constant dense<0.000000e+00> : vector<128xf32>
    %868 = vector.multi_reduction <add>, %867, %cst_472 [0] : vector<32x128xf32> to vector<128xf32>
    %869 = vector.shape_cast %868 : vector<128xf32> to vector<1x128xf32>
    %cst_473 = arith.constant 0.176776692 : f32
    %870 = vector.broadcast %cst_473 : f32 to vector<1x128xf32>
    %871 = arith.mulf %869, %870 : vector<1x128xf32>
    %872 = math.exp %871 : vector<1x128xf32>
    %873 = arith.mulf %872, %3 : vector<1x128xf32>
    %c4_474 = arith.constant 4 : index
    %c0_475 = arith.constant 0 : index
    %c0_476 = arith.constant 0 : index
    %874 = vector.load %arg2[%c4_474, %c0_475, %c0_476] : memref<8x32x128xf32, #tpu.memory_space<vmem>>, vector<1x32x128xf32>
    %875 = vector.shape_cast %874 : vector<1x32x128xf32> to vector<32x128xf32>
    %876 = arith.mulf %837, %875 : vector<32x128xf32>
    %cst_477 = arith.constant dense<0.000000e+00> : vector<128xf32>
    %877 = vector.multi_reduction <add>, %876, %cst_477 [0] : vector<32x128xf32> to vector<128xf32>
    %878 = vector.shape_cast %877 : vector<128xf32> to vector<1x128xf32>
    %cst_478 = arith.constant 0.176776692 : f32
    %879 = vector.broadcast %cst_478 : f32 to vector<1x128xf32>
    %880 = arith.mulf %878, %879 : vector<1x128xf32>
    %881 = math.exp %880 : vector<1x128xf32>
    %882 = arith.mulf %881, %4 : vector<1x128xf32>
    %c5_479 = arith.constant 5 : index
    %c0_480 = arith.constant 0 : index
    %c0_481 = arith.constant 0 : index
    %883 = vector.load %arg2[%c5_479, %c0_480, %c0_481] : memref<8x32x128xf32, #tpu.memory_space<vmem>>, vector<1x32x128xf32>
    %884 = vector.shape_cast %883 : vector<1x32x128xf32> to vector<32x128xf32>
    %885 = arith.mulf %837, %884 : vector<32x128xf32>
    %cst_482 = arith.constant dense<0.000000e+00> : vector<128xf32>
    %886 = vector.multi_reduction <add>, %885, %cst_482 [0] : vector<32x128xf32> to vector<128xf32>
    %887 = vector.shape_cast %886 : vector<128xf32> to vector<1x128xf32>
    %cst_483 = arith.constant 0.176776692 : f32
    %888 = vector.broadcast %cst_483 : f32 to vector<1x128xf32>
    %889 = arith.mulf %887, %888 : vector<1x128xf32>
    %890 = math.exp %889 : vector<1x128xf32>
    %891 = arith.mulf %890, %5 : vector<1x128xf32>
    %c6_484 = arith.constant 6 : index
    %c0_485 = arith.constant 0 : index
    %c0_486 = arith.constant 0 : index
    %892 = vector.load %arg2[%c6_484, %c0_485, %c0_486] : memref<8x32x128xf32, #tpu.memory_space<vmem>>, vector<1x32x128xf32>
    %893 = vector.shape_cast %892 : vector<1x32x128xf32> to vector<32x128xf32>
    %894 = arith.mulf %837, %893 : vector<32x128xf32>
    %cst_487 = arith.constant dense<0.000000e+00> : vector<128xf32>
    %895 = vector.multi_reduction <add>, %894, %cst_487 [0] : vector<32x128xf32> to vector<128xf32>
    %896 = vector.shape_cast %895 : vector<128xf32> to vector<1x128xf32>
    %cst_488 = arith.constant 0.176776692 : f32
    %897 = vector.broadcast %cst_488 : f32 to vector<1x128xf32>
    %898 = arith.mulf %896, %897 : vector<1x128xf32>
    %899 = math.exp %898 : vector<1x128xf32>
    %900 = arith.mulf %899, %6 : vector<1x128xf32>
    %c7_489 = arith.constant 7 : index
    %c0_490 = arith.constant 0 : index
    %c0_491 = arith.constant 0 : index
    %901 = vector.load %arg2[%c7_489, %c0_490, %c0_491] : memref<8x32x128xf32, #tpu.memory_space<vmem>>, vector<1x32x128xf32>
    %902 = vector.shape_cast %901 : vector<1x32x128xf32> to vector<32x128xf32>
    %903 = arith.mulf %837, %902 : vector<32x128xf32>
    %cst_492 = arith.constant dense<0.000000e+00> : vector<128xf32>
    %904 = vector.multi_reduction <add>, %903, %cst_492 [0] : vector<32x128xf32> to vector<128xf32>
    %905 = vector.shape_cast %904 : vector<128xf32> to vector<1x128xf32>
    %cst_493 = arith.constant 0.176776692 : f32
    %906 = vector.broadcast %cst_493 : f32 to vector<1x128xf32>
    %907 = arith.mulf %905, %906 : vector<1x128xf32>
    %908 = math.exp %907 : vector<1x128xf32>
    %909 = arith.mulf %908, %7 : vector<1x128xf32>
    %910 = arith.addf %846, %855 : vector<1x128xf32>
    %911 = arith.addf %910, %864 : vector<1x128xf32>
    %912 = arith.addf %911, %873 : vector<1x128xf32>
    %913 = arith.addf %912, %882 : vector<1x128xf32>
    %914 = arith.addf %913, %891 : vector<1x128xf32>
    %915 = arith.addf %914, %900 : vector<1x128xf32>
    %916 = arith.addf %915, %909 : vector<1x128xf32>
    %cst_494 = arith.constant 9.99999993E-9 : f32
    %917 = vector.broadcast %cst_494 : f32 to vector<1x128xf32>
    %918 = arith.addf %916, %917 : vector<1x128xf32>
    %919 = tpu.reciprocal %918 {approx = true} : vector<1x128xf32> -> vector<1x128xf32>
    %920 = arith.mulf %846, %919 : vector<1x128xf32>
    %921 = arith.mulf %855, %919 : vector<1x128xf32>
    %922 = arith.mulf %864, %919 : vector<1x128xf32>
    %923 = arith.mulf %873, %919 : vector<1x128xf32>
    %924 = arith.mulf %882, %919 : vector<1x128xf32>
    %925 = arith.mulf %891, %919 : vector<1x128xf32>
    %926 = arith.mulf %900, %919 : vector<1x128xf32>
    %927 = arith.mulf %909, %919 : vector<1x128xf32>
    %c0_495 = arith.constant 0 : index
    %c0_496 = arith.constant 0 : index
    %c0_497 = arith.constant 0 : index
    %928 = vector.load %arg3[%c0_495, %c0_496, %c0_497] : memref<8x32x128xf32, #tpu.memory_space<vmem>>, vector<1x32x128xf32>
    %929 = vector.shape_cast %928 : vector<1x32x128xf32> to vector<32x128xf32>
    %930 = vector.broadcast %920 : vector<1x128xf32> to vector<32x128xf32>
    %931 = arith.mulf %930, %929 : vector<32x128xf32>
    %c1_498 = arith.constant 1 : index
    %c0_499 = arith.constant 0 : index
    %c0_500 = arith.constant 0 : index
    %932 = vector.load %arg3[%c1_498, %c0_499, %c0_500] : memref<8x32x128xf32, #tpu.memory_space<vmem>>, vector<1x32x128xf32>
    %933 = vector.shape_cast %932 : vector<1x32x128xf32> to vector<32x128xf32>
    %934 = vector.broadcast %921 : vector<1x128xf32> to vector<32x128xf32>
    %935 = arith.mulf %934, %933 : vector<32x128xf32>
    %936 = arith.addf %931, %935 : vector<32x128xf32>
    %c2_501 = arith.constant 2 : index
    %c0_502 = arith.constant 0 : index
    %c0_503 = arith.constant 0 : index
    %937 = vector.load %arg3[%c2_501, %c0_502, %c0_503] : memref<8x32x128xf32, #tpu.memory_space<vmem>>, vector<1x32x128xf32>
    %938 = vector.shape_cast %937 : vector<1x32x128xf32> to vector<32x128xf32>
    %939 = vector.broadcast %922 : vector<1x128xf32> to vector<32x128xf32>
    %940 = arith.mulf %939, %938 : vector<32x128xf32>
    %941 = arith.addf %936, %940 : vector<32x128xf32>
    %c3_504 = arith.constant 3 : index
    %c0_505 = arith.constant 0 : index
    %c0_506 = arith.constant 0 : index
    %942 = vector.load %arg3[%c3_504, %c0_505, %c0_506] : memref<8x32x128xf32, #tpu.memory_space<vmem>>, vector<1x32x128xf32>
    %943 = vector.shape_cast %942 : vector<1x32x128xf32> to vector<32x128xf32>
    %944 = vector.broadcast %923 : vector<1x128xf32> to vector<32x128xf32>
    %945 = arith.mulf %944, %943 : vector<32x128xf32>
    %946 = arith.addf %941, %945 : vector<32x128xf32>
    %c4_507 = arith.constant 4 : index
    %c0_508 = arith.constant 0 : index
    %c0_509 = arith.constant 0 : index
    %947 = vector.load %arg3[%c4_507, %c0_508, %c0_509] : memref<8x32x128xf32, #tpu.memory_space<vmem>>, vector<1x32x128xf32>
    %948 = vector.shape_cast %947 : vector<1x32x128xf32> to vector<32x128xf32>
    %949 = vector.broadcast %924 : vector<1x128xf32> to vector<32x128xf32>
    %950 = arith.mulf %949, %948 : vector<32x128xf32>
    %951 = arith.addf %946, %950 : vector<32x128xf32>
    %c5_510 = arith.constant 5 : index
    %c0_511 = arith.constant 0 : index
    %c0_512 = arith.constant 0 : index
    %952 = vector.load %arg3[%c5_510, %c0_511, %c0_512] : memref<8x32x128xf32, #tpu.memory_space<vmem>>, vector<1x32x128xf32>
    %953 = vector.shape_cast %952 : vector<1x32x128xf32> to vector<32x128xf32>
    %954 = vector.broadcast %925 : vector<1x128xf32> to vector<32x128xf32>
    %955 = arith.mulf %954, %953 : vector<32x128xf32>
    %956 = arith.addf %951, %955 : vector<32x128xf32>
    %c6_513 = arith.constant 6 : index
    %c0_514 = arith.constant 0 : index
    %c0_515 = arith.constant 0 : index
    %957 = vector.load %arg3[%c6_513, %c0_514, %c0_515] : memref<8x32x128xf32, #tpu.memory_space<vmem>>, vector<1x32x128xf32>
    %958 = vector.shape_cast %957 : vector<1x32x128xf32> to vector<32x128xf32>
    %959 = vector.broadcast %926 : vector<1x128xf32> to vector<32x128xf32>
    %960 = arith.mulf %959, %958 : vector<32x128xf32>
    %961 = arith.addf %956, %960 : vector<32x128xf32>
    %c7_516 = arith.constant 7 : index
    %c0_517 = arith.constant 0 : index
    %c0_518 = arith.constant 0 : index
    %962 = vector.load %arg3[%c7_516, %c0_517, %c0_518] : memref<8x32x128xf32, #tpu.memory_space<vmem>>, vector<1x32x128xf32>
    %963 = vector.shape_cast %962 : vector<1x32x128xf32> to vector<32x128xf32>
    %964 = vector.broadcast %927 : vector<1x128xf32> to vector<32x128xf32>
    %965 = arith.mulf %964, %963 : vector<32x128xf32>
    %966 = arith.addf %961, %965 : vector<32x128xf32>
    %c6_519 = arith.constant 6 : index
    %c0_520 = arith.constant 0 : index
    %c0_521 = arith.constant 0 : index
    %967 = vector.load %arg5[%c6_519, %c0_520, %c0_521] : memref<8x32x128xf32, #tpu.memory_space<vmem>>, vector<1x32x128xf32>
    %968 = vector.shape_cast %967 : vector<1x32x128xf32> to vector<32x128xf32>
    %969 = vector.shape_cast %966 : vector<32x128xf32> to vector<1x32x128xf32>
    tpu.vector_store %arg5[%c6_519, %c0_520, %c0_521], %969 {strides = array<i32>} : memref<8x32x128xf32, #tpu.memory_space<vmem>>, vector<1x32x128xf32>,
    %970 = tpu.concatenate %920, %921, %922, %923, %924, %925, %926, %927 in 0 : vector<1x128xf32>, vector<1x128xf32>, vector<1x128xf32>, vector<1x128xf32>, vector<1x128xf32>, vector<1x128xf32>, vector<1x128xf32>, vector<1x128xf32> -> vector<8x128xf32>
    %c6_522 = arith.constant 6 : index
    %c0_523 = arith.constant 0 : index
    %c0_524 = arith.constant 0 : index
    %971 = vector.load %arg6[%c6_522, %c0_523, %c0_524] : memref<8x8x128xf32, #tpu.memory_space<vmem>>, vector<1x8x128xf32>
    %972 = vector.shape_cast %971 : vector<1x8x128xf32> to vector<8x128xf32>
    %973 = vector.shape_cast %970 : vector<8x128xf32> to vector<1x8x128xf32>
    tpu.vector_store %arg6[%c6_522, %c0_523, %c0_524], %973 {strides = array<i32>} : memref<8x8x128xf32, #tpu.memory_space<vmem>>, vector<1x8x128xf32>,
    %c7_525 = arith.constant 7 : index
    %c0_526 = arith.constant 0 : index
    %c0_527 = arith.constant 0 : index
    %974 = vector.load %arg1[%c7_525, %c0_526, %c0_527] : memref<8x32x128xf32, #tpu.memory_space<vmem>>, vector<1x32x128xf32>
    %975 = vector.shape_cast %974 : vector<1x32x128xf32> to vector<32x128xf32>
    %c0_528 = arith.constant 0 : index
    %c0_529 = arith.constant 0 : index
    %c0_530 = arith.constant 0 : index
    %976 = vector.load %arg2[%c0_528, %c0_529, %c0_530] : memref<8x32x128xf32, #tpu.memory_space<vmem>>, vector<1x32x128xf32>
    %977 = vector.shape_cast %976 : vector<1x32x128xf32> to vector<32x128xf32>
    %978 = arith.mulf %975, %977 : vector<32x128xf32>
    %cst_531 = arith.constant dense<0.000000e+00> : vector<128xf32>
    %979 = vector.multi_reduction <add>, %978, %cst_531 [0] : vector<32x128xf32> to vector<128xf32>
    %980 = vector.shape_cast %979 : vector<128xf32> to vector<1x128xf32>
    %cst_532 = arith.constant 0.176776692 : f32
    %981 = vector.broadcast %cst_532 : f32 to vector<1x128xf32>
    %982 = arith.mulf %980, %981 : vector<1x128xf32>
    %983 = math.exp %982 : vector<1x128xf32>
    %984 = arith.mulf %983, %0 : vector<1x128xf32>
    %c1_533 = arith.constant 1 : index
    %c0_534 = arith.constant 0 : index
    %c0_535 = arith.constant 0 : index
    %985 = vector.load %arg2[%c1_533, %c0_534, %c0_535] : memref<8x32x128xf32, #tpu.memory_space<vmem>>, vector<1x32x128xf32>
    %986 = vector.shape_cast %985 : vector<1x32x128xf32> to vector<32x128xf32>
    %987 = arith.mulf %975, %986 : vector<32x128xf32>
    %cst_536 = arith.constant dense<0.000000e+00> : vector<128xf32>
    %988 = vector.multi_reduction <add>, %987, %cst_536 [0] : vector<32x128xf32> to vector<128xf32>
    %989 = vector.shape_cast %988 : vector<128xf32> to vector<1x128xf32>
    %cst_537 = arith.constant 0.176776692 : f32
    %990 = vector.broadcast %cst_537 : f32 to vector<1x128xf32>
    %991 = arith.mulf %989, %990 : vector<1x128xf32>
    %992 = math.exp %991 : vector<1x128xf32>
    %993 = arith.mulf %992, %1 : vector<1x128xf32>
    %c2_538 = arith.constant 2 : index
    %c0_539 = arith.constant 0 : index
    %c0_540 = arith.constant 0 : index
    %994 = vector.load %arg2[%c2_538, %c0_539, %c0_540] : memref<8x32x128xf32, #tpu.memory_space<vmem>>, vector<1x32x128xf32>
    %995 = vector.shape_cast %994 : vector<1x32x128xf32> to vector<32x128xf32>
    %996 = arith.mulf %975, %995 : vector<32x128xf32>
    %cst_541 = arith.constant dense<0.000000e+00> : vector<128xf32>
    %997 = vector.multi_reduction <add>, %996, %cst_541 [0] : vector<32x128xf32> to vector<128xf32>
    %998 = vector.shape_cast %997 : vector<128xf32> to vector<1x128xf32>
    %cst_542 = arith.constant 0.176776692 : f32
    %999 = vector.broadcast %cst_542 : f32 to vector<1x128xf32>
    %1000 = arith.mulf %998, %999 : vector<1x128xf32>
    %1001 = math.exp %1000 : vector<1x128xf32>
    %1002 = arith.mulf %1001, %2 : vector<1x128xf32>
    %c3_543 = arith.constant 3 : index
    %c0_544 = arith.constant 0 : index
    %c0_545 = arith.constant 0 : index
    %1003 = vector.load %arg2[%c3_543, %c0_544, %c0_545] : memref<8x32x128xf32, #tpu.memory_space<vmem>>, vector<1x32x128xf32>
    %1004 = vector.shape_cast %1003 : vector<1x32x128xf32> to vector<32x128xf32>
    %1005 = arith.mulf %975, %1004 : vector<32x128xf32>
    %cst_546 = arith.constant dense<0.000000e+00> : vector<128xf32>
    %1006 = vector.multi_reduction <add>, %1005, %cst_546 [0] : vector<32x128xf32> to vector<128xf32>
    %1007 = vector.shape_cast %1006 : vector<128xf32> to vector<1x128xf32>
    %cst_547 = arith.constant 0.176776692 : f32
    %1008 = vector.broadcast %cst_547 : f32 to vector<1x128xf32>
    %1009 = arith.mulf %1007, %1008 : vector<1x128xf32>
    %1010 = math.exp %1009 : vector<1x128xf32>
    %1011 = arith.mulf %1010, %3 : vector<1x128xf32>
    %c4_548 = arith.constant 4 : index
    %c0_549 = arith.constant 0 : index
    %c0_550 = arith.constant 0 : index
    %1012 = vector.load %arg2[%c4_548, %c0_549, %c0_550] : memref<8x32x128xf32, #tpu.memory_space<vmem>>, vector<1x32x128xf32>
    %1013 = vector.shape_cast %1012 : vector<1x32x128xf32> to vector<32x128xf32>
    %1014 = arith.mulf %975, %1013 : vector<32x128xf32>
    %cst_551 = arith.constant dense<0.000000e+00> : vector<128xf32>
    %1015 = vector.multi_reduction <add>, %1014, %cst_551 [0] : vector<32x128xf32> to vector<128xf32>
    %1016 = vector.shape_cast %1015 : vector<128xf32> to vector<1x128xf32>
    %cst_552 = arith.constant 0.176776692 : f32
    %1017 = vector.broadcast %cst_552 : f32 to vector<1x128xf32>
    %1018 = arith.mulf %1016, %1017 : vector<1x128xf32>
    %1019 = math.exp %1018 : vector<1x128xf32>
    %1020 = arith.mulf %1019, %4 : vector<1x128xf32>
    %c5_553 = arith.constant 5 : index
    %c0_554 = arith.constant 0 : index
    %c0_555 = arith.constant 0 : index
    %1021 = vector.load %arg2[%c5_553, %c0_554, %c0_555] : memref<8x32x128xf32, #tpu.memory_space<vmem>>, vector<1x32x128xf32>
    %1022 = vector.shape_cast %1021 : vector<1x32x128xf32> to vector<32x128xf32>
    %1023 = arith.mulf %975, %1022 : vector<32x128xf32>
    %cst_556 = arith.constant dense<0.000000e+00> : vector<128xf32>
    %1024 = vector.multi_reduction <add>, %1023, %cst_556 [0] : vector<32x128xf32> to vector<128xf32>
    %1025 = vector.shape_cast %1024 : vector<128xf32> to vector<1x128xf32>
    %cst_557 = arith.constant 0.176776692 : f32
    %1026 = vector.broadcast %cst_557 : f32 to vector<1x128xf32>
    %1027 = arith.mulf %1025, %1026 : vector<1x128xf32>
    %1028 = math.exp %1027 : vector<1x128xf32>
    %1029 = arith.mulf %1028, %5 : vector<1x128xf32>
    %c6_558 = arith.constant 6 : index
    %c0_559 = arith.constant 0 : index
    %c0_560 = arith.constant 0 : index
    %1030 = vector.load %arg2[%c6_558, %c0_559, %c0_560] : memref<8x32x128xf32, #tpu.memory_space<vmem>>, vector<1x32x128xf32>
    %1031 = vector.shape_cast %1030 : vector<1x32x128xf32> to vector<32x128xf32>
    %1032 = arith.mulf %975, %1031 : vector<32x128xf32>
    %cst_561 = arith.constant dense<0.000000e+00> : vector<128xf32>
    %1033 = vector.multi_reduction <add>, %1032, %cst_561 [0] : vector<32x128xf32> to vector<128xf32>
    %1034 = vector.shape_cast %1033 : vector<128xf32> to vector<1x128xf32>
    %cst_562 = arith.constant 0.176776692 : f32
    %1035 = vector.broadcast %cst_562 : f32 to vector<1x128xf32>
    %1036 = arith.mulf %1034, %1035 : vector<1x128xf32>
    %1037 = math.exp %1036 : vector<1x128xf32>
    %1038 = arith.mulf %1037, %6 : vector<1x128xf32>
    %c7_563 = arith.constant 7 : index
    %c0_564 = arith.constant 0 : index
    %c0_565 = arith.constant 0 : index
    %1039 = vector.load %arg2[%c7_563, %c0_564, %c0_565] : memref<8x32x128xf32, #tpu.memory_space<vmem>>, vector<1x32x128xf32>
    %1040 = vector.shape_cast %1039 : vector<1x32x128xf32> to vector<32x128xf32>
    %1041 = arith.mulf %975, %1040 : vector<32x128xf32>
    %cst_566 = arith.constant dense<0.000000e+00> : vector<128xf32>
    %1042 = vector.multi_reduction <add>, %1041, %cst_566 [0] : vector<32x128xf32> to vector<128xf32>
    %1043 = vector.shape_cast %1042 : vector<128xf32> to vector<1x128xf32>
    %cst_567 = arith.constant 0.176776692 : f32
    %1044 = vector.broadcast %cst_567 : f32 to vector<1x128xf32>
    %1045 = arith.mulf %1043, %1044 : vector<1x128xf32>
    %1046 = math.exp %1045 : vector<1x128xf32>
    %1047 = arith.mulf %1046, %7 : vector<1x128xf32>
    %1048 = arith.addf %984, %993 : vector<1x128xf32>
    %1049 = arith.addf %1048, %1002 : vector<1x128xf32>
    %1050 = arith.addf %1049, %1011 : vector<1x128xf32>
    %1051 = arith.addf %1050, %1020 : vector<1x128xf32>
    %1052 = arith.addf %1051, %1029 : vector<1x128xf32>
    %1053 = arith.addf %1052, %1038 : vector<1x128xf32>
    %1054 = arith.addf %1053, %1047 : vector<1x128xf32>
    %cst_568 = arith.constant 9.99999993E-9 : f32
    %1055 = vector.broadcast %cst_568 : f32 to vector<1x128xf32>
    %1056 = arith.addf %1054, %1055 : vector<1x128xf32>
    %1057 = tpu.reciprocal %1056 {approx = true} : vector<1x128xf32> -> vector<1x128xf32>
    %1058 = arith.mulf %984, %1057 : vector<1x128xf32>
    %1059 = arith.mulf %993, %1057 : vector<1x128xf32>
    %1060 = arith.mulf %1002, %1057 : vector<1x128xf32>
    %1061 = arith.mulf %1011, %1057 : vector<1x128xf32>
    %1062 = arith.mulf %1020, %1057 : vector<1x128xf32>
    %1063 = arith.mulf %1029, %1057 : vector<1x128xf32>
    %1064 = arith.mulf %1038, %1057 : vector<1x128xf32>
    %1065 = arith.mulf %1047, %1057 : vector<1x128xf32>
    %c0_569 = arith.constant 0 : index
    %c0_570 = arith.constant 0 : index
    %c0_571 = arith.constant 0 : index
    %1066 = vector.load %arg3[%c0_569, %c0_570, %c0_571] : memref<8x32x128xf32, #tpu.memory_space<vmem>>, vector<1x32x128xf32>
    %1067 = vector.shape_cast %1066 : vector<1x32x128xf32> to vector<32x128xf32>
    %1068 = vector.broadcast %1058 : vector<1x128xf32> to vector<32x128xf32>
    %1069 = arith.mulf %1068, %1067 : vector<32x128xf32>
    %c1_572 = arith.constant 1 : index
    %c0_573 = arith.constant 0 : index
    %c0_574 = arith.constant 0 : index
    %1070 = vector.load %arg3[%c1_572, %c0_573, %c0_574] : memref<8x32x128xf32, #tpu.memory_space<vmem>>, vector<1x32x128xf32>
    %1071 = vector.shape_cast %1070 : vector<1x32x128xf32> to vector<32x128xf32>
    %1072 = vector.broadcast %1059 : vector<1x128xf32> to vector<32x128xf32>
    %1073 = arith.mulf %1072, %1071 : vector<32x128xf32>
    %1074 = arith.addf %1069, %1073 : vector<32x128xf32>
    %c2_575 = arith.constant 2 : index
    %c0_576 = arith.constant 0 : index
    %c0_577 = arith.constant 0 : index
    %1075 = vector.load %arg3[%c2_575, %c0_576, %c0_577] : memref<8x32x128xf32, #tpu.memory_space<vmem>>, vector<1x32x128xf32>
    %1076 = vector.shape_cast %1075 : vector<1x32x128xf32> to vector<32x128xf32>
    %1077 = vector.broadcast %1060 : vector<1x128xf32> to vector<32x128xf32>
    %1078 = arith.mulf %1077, %1076 : vector<32x128xf32>
    %1079 = arith.addf %1074, %1078 : vector<32x128xf32>
    %c3_578 = arith.constant 3 : index
    %c0_579 = arith.constant 0 : index
    %c0_580 = arith.constant 0 : index
    %1080 = vector.load %arg3[%c3_578, %c0_579, %c0_580] : memref<8x32x128xf32, #tpu.memory_space<vmem>>, vector<1x32x128xf32>
    %1081 = vector.shape_cast %1080 : vector<1x32x128xf32> to vector<32x128xf32>
    %1082 = vector.broadcast %1061 : vector<1x128xf32> to vector<32x128xf32>
    %1083 = arith.mulf %1082, %1081 : vector<32x128xf32>
    %1084 = arith.addf %1079, %1083 : vector<32x128xf32>
    %c4_581 = arith.constant 4 : index
    %c0_582 = arith.constant 0 : index
    %c0_583 = arith.constant 0 : index
    %1085 = vector.load %arg3[%c4_581, %c0_582, %c0_583] : memref<8x32x128xf32, #tpu.memory_space<vmem>>, vector<1x32x128xf32>
    %1086 = vector.shape_cast %1085 : vector<1x32x128xf32> to vector<32x128xf32>
    %1087 = vector.broadcast %1062 : vector<1x128xf32> to vector<32x128xf32>
    %1088 = arith.mulf %1087, %1086 : vector<32x128xf32>
    %1089 = arith.addf %1084, %1088 : vector<32x128xf32>
    %c5_584 = arith.constant 5 : index
    %c0_585 = arith.constant 0 : index
    %c0_586 = arith.constant 0 : index
    %1090 = vector.load %arg3[%c5_584, %c0_585, %c0_586] : memref<8x32x128xf32, #tpu.memory_space<vmem>>, vector<1x32x128xf32>
    %1091 = vector.shape_cast %1090 : vector<1x32x128xf32> to vector<32x128xf32>
    %1092 = vector.broadcast %1063 : vector<1x128xf32> to vector<32x128xf32>
    %1093 = arith.mulf %1092, %1091 : vector<32x128xf32>
    %1094 = arith.addf %1089, %1093 : vector<32x128xf32>
    %c6_587 = arith.constant 6 : index
    %c0_588 = arith.constant 0 : index
    %c0_589 = arith.constant 0 : index
    %1095 = vector.load %arg3[%c6_587, %c0_588, %c0_589] : memref<8x32x128xf32, #tpu.memory_space<vmem>>, vector<1x32x128xf32>
    %1096 = vector.shape_cast %1095 : vector<1x32x128xf32> to vector<32x128xf32>
    %1097 = vector.broadcast %1064 : vector<1x128xf32> to vector<32x128xf32>
    %1098 = arith.mulf %1097, %1096 : vector<32x128xf32>
    %1099 = arith.addf %1094, %1098 : vector<32x128xf32>
    %c7_590 = arith.constant 7 : index
    %c0_591 = arith.constant 0 : index
    %c0_592 = arith.constant 0 : index
    %1100 = vector.load %arg3[%c7_590, %c0_591, %c0_592] : memref<8x32x128xf32, #tpu.memory_space<vmem>>, vector<1x32x128xf32>
    %1101 = vector.shape_cast %1100 : vector<1x32x128xf32> to vector<32x128xf32>
    %1102 = vector.broadcast %1065 : vector<1x128xf32> to vector<32x128xf32>
    %1103 = arith.mulf %1102, %1101 : vector<32x128xf32>
    %1104 = arith.addf %1099, %1103 : vector<32x128xf32>
    %c7_593 = arith.constant 7 : index
    %c0_594 = arith.constant 0 : index
    %c0_595 = arith.constant 0 : index
    %1105 = vector.load %arg5[%c7_593, %c0_594, %c0_595] : memref<8x32x128xf32, #tpu.memory_space<vmem>>, vector<1x32x128xf32>
    %1106 = vector.shape_cast %1105 : vector<1x32x128xf32> to vector<32x128xf32>
    %1107 = vector.shape_cast %1104 : vector<32x128xf32> to vector<1x32x128xf32>
    tpu.vector_store %arg5[%c7_593, %c0_594, %c0_595], %1107 {strides = array<i32>} : memref<8x32x128xf32, #tpu.memory_space<vmem>>, vector<1x32x128xf32>,
    %1108 = tpu.concatenate %1058, %1059, %1060, %1061, %1062, %1063, %1064, %1065 in 0 : vector<1x128xf32>, vector<1x128xf32>, vector<1x128xf32>, vector<1x128xf32>, vector<1x128xf32>, vector<1x128xf32>, vector<1x128xf32>, vector<1x128xf32> -> vector<8x128xf32>
    %c7_596 = arith.constant 7 : index
    %c0_597 = arith.constant 0 : index
    %c0_598 = arith.constant 0 : index
    %1109 = vector.load %arg6[%c7_596, %c0_597, %c0_598] : memref<8x8x128xf32, #tpu.memory_space<vmem>>, vector<1x8x128xf32>
    %1110 = vector.shape_cast %1109 : vector<1x8x128xf32> to vector<8x128xf32>
    %1111 = vector.shape_cast %1108 : vector<8x128xf32> to vector<1x8x128xf32>
    tpu.vector_store %arg6[%c7_596, %c0_597, %c0_598], %1111 {strides = array<i32>} : memref<8x8x128xf32, #tpu.memory_space<vmem>>, vector<1x8x128xf32>,
    return
  }
  func.func @transform_0(%arg0: i32) -> (i32, i32, i32) {
    %c0_i32 = arith.constant 0 : i32
    %c0_i32_0 = arith.constant 0 : i32
    %c0_i32_1 = arith.constant 0 : i32
    return %c0_i32, %c0_i32_0, %arg0 : i32, i32, i32
  }
  func.func @transform_1(%arg0: i32) -> (i32, i32, i32) {
    %c0_i32 = arith.constant 0 : i32
    %c0_i32_0 = arith.constant 0 : i32
    %c0_i32_1 = arith.constant 0 : i32
    return %c0_i32, %c0_i32_0, %arg0 : i32, i32, i32
  }
  func.func @transform_2(%arg0: i32) -> (i32, i32, i32) {
    %c0_i32 = arith.constant 0 : i32
    %c0_i32_0 = arith.constant 0 : i32
    %c0_i32_1 = arith.constant 0 : i32
    return %c0_i32, %c0_i32_0, %arg0 : i32, i32, i32
  }
  func.func @transform_3(%arg0: i32) -> (i32, i32) {
    %c0_i32 = arith.constant 0 : i32
    %c0_i32_0 = arith.constant 0 : i32
    return %c0_i32, %arg0 : i32, i32
  }
  func.func @transform_4(%arg0: i32) -> (i32, i32, i32) {
    %c0_i32 = arith.constant 0 : i32
    %c0_i32_0 = arith.constant 0 : i32
    %c0_i32_1 = arith.constant 0 : i32
    return %c0_i32, %c0_i32_0, %arg0 : i32, i32, i32
  }
  func.func @transform_5(%arg0: i32) -> (i32, i32, i32) {
    %c0_i32 = arith.constant 0 : i32
    %c0_i32_0 = arith.constant 0 : i32
    %c0_i32_1 = arith.constant 0 : i32
    return %c0_i32, %c0_i32_0, %arg0 : i32, i32, i32
  }
}

</mosaic_0001>

<bundles_post_ra>
// kernel: tpu_custom_call.1
= control target key start
LH: loop header
LB: loop body
LE: loop exit
PB: predicated region body
PF: predicated region fallthrough
CT: control target
= control target key end

     0   :  { %11 = vsyncpa [#allocation3], 0  ;;  %s5573_s0 = inlined_call_operand.hbm [shape: f32[8,32,128], index: 0, kind: input, shape index: {}]   ;;  %s5574_s1 = inlined_call_operand.hbm [shape: f32[8,32,128], index: 1, kind: input, shape index: {}]   ;;  %s5575_s2 = inlined_call_operand.hbm [shape: f32[8,32,128], index: 2, kind: input, shape index: {}]   ;;  %s5576_s3 = inlined_call_operand.hbm [shape: f32[8,128], index: 3, kind: input, shape index: {}]   ;;  %s5577_s4 = inlined_call_operand.hbm [shape: f32[8,32,128], index: 4, kind: output, shape index: {0}]   ;;  %s5578_s5 = inlined_call_operand.hbm [shape: f32[8,8,128], index: 5, kind: output, shape index: {1}]  }
   0x1   :  { %12 = vsyncpa [#allocation6], 0 }
   0x2   :  { %13 = vsyncpa [#allocation9], 0 }
   0x3   :  { %14 = vsyncpa [#allocation4], 0 }
   0x4   :  { %15 = vsyncpa [#allocation12], 0  ;;  %s33_s20 = sshll.u32 %s5574_s1, 4  ;;  %s3077_s21 = smov [#allocation5]   ;;  %s34_s20 = int_to_ptr.hbm [resolvable:$true] %s33_s20 }
   0x5   :  { %s35_s22 = sshll.u32 %s3077_s21, 4  ;;  %s20_s25 = sshll.u32 %s5573_s0, 4  ;;  %s36_s22 = int_to_ptr.vmem [resolvable:$true] %s35_s22  ;;  %s21_s25 = int_to_ptr.hbm [resolvable:$true] %s20_s25 }
   0x6   :  { %s3078_s26 = smov 128   ;;  %s3079_s27 = smov 8  }
   0x7   :  { %41 = dma.hbm_to_vmem [thread:$0]  %s34_s20, 4096, %s36_s22, [#allocation6], %s3078_s26, %s3078_s26, %s3079_s27  }
   0x8   :  { %s3080_s28 = smov [#allocation2]   ;;  %s46_s1 = sshll.u32 %s5575_s2, 4  ;;  %s47_s1 = int_to_ptr.hbm [resolvable:$true] %s46_s1 }
   0x9   :  { %s22_s29 = sshll.u32 %s3080_s28, 4  ;;  %s60_s8 = sshll.u32 %s5576_s3, 4  ;;  %s23_s29 = int_to_ptr.vmem [resolvable:$true] %s22_s29  ;;  %s61_s8 = int_to_ptr.hbm [resolvable:$true] %s60_s8 }
   0xa   :  { %28 = dma.hbm_to_vmem [thread:$0]  %s21_s25, 4096, %s23_s29, [#allocation3], %s3078_s26, %s3078_s26, %s3079_s27  }
   0xb   :  { %s3081_s9 = smov [#allocation7]   ;;  %s3082_s11 = smov [#allocation8]  }
   0xc   :  { %s48_s10 = sshll.u32 %s3081_s9, 4  ;;  %s62_s2 = sshll.u32 %s3082_s11, 4  ;;  %s49_s10 = int_to_ptr.vmem [resolvable:$true] %s48_s10  ;;  %s63_s2 = int_to_ptr.vmem [resolvable:$true] %s62_s2 }
   0xd   :  { %54 = dma.hbm_to_vmem [thread:$0]  %s47_s1, 4096, %s49_s10, [#allocation6], %s3078_s26, %s3078_s26, %s3079_s27  }
   0xe   :  { %65 = dma.hbm_to_vmem [thread:$0]  %s61_s8, 128, %s63_s2, [#allocation9]  }
   0xf   :  { %3067 = dma.done.wait [#allocation3], 4096  }
  0x10   :  { %3068 = vsyncadd [#allocation3], 4294963200 }
  0x11   :  { %3069 = dma.done.wait [#allocation6], 8192  }
  0x12   :  { %3070 = vsyncadd [#allocation6], 4294959104 }
  0x13   :  { %3071 = dma.done.wait [#allocation9], 128  }
  0x14   :  { %3072 = vsyncadd [#allocation9], 4294967168  ;;  %v3136_v0 = vld [vmem:[#allocation2] sm:$0xff]  ;;  %v3138_v1 = vld [vmem:[#allocation2 + $0x8] sm:$0xff]  ;;  %vm418_vm0 = vcmask 1040384   ;;  %vm420_vm1 = vcmask 1041408  }
  0x15   :  { %v3140_v2 = vld [vmem:[#allocation2 + $0x10] sm:$0xff]  ;;  %v3142_v3 = vld [vmem:[#allocation2 + $0x18] sm:$0xff]  ;;  %v3144_v4 = vld [vmem:[#allocation5] sm:$0xff]  ;;  %vm422_vm2 = vcmask 1042432   ;;  %vm424_vm3 = vcmask 1043456   ;;  %vm426_vm4 = vcmask 1044480  }
  0x16   :  { %v3146_v5 = vld [vmem:[#allocation5 + $0x8] sm:$0xff]  ;;  %v3148_v6 = vld [vmem:[#allocation5 + $0x10] sm:$0xff]  ;;  %v3150_v7 = vld [vmem:[#allocation5 + $0x18] sm:$0xff]  ;;  %v98_v8 = vmul.f32 %v3144_v4, %v3136_v0  ;;  %vm428_vm5 = vcmask 1045504   ;;  %vm430_vm6 = vcmask 1046528   ;;  %s3083_s3 = smov [#allocation11]  }
  0x17   :  { %v99_v9 = vmul.f32 %v3146_v5, %v3138_v1  ;;  %v100_v10 = vmul.f32 %v3148_v6, %v3140_v2  ;;  %v3158_v11 = vld [vmem:[#allocation5 + $0x20] sm:$0xff]  ;;  %v3160_v12 = vld [vmem:[#allocation5 + $0x28] sm:$0xff]  ;;  %v101_v13 = vmul.f32 %v3150_v7, %v3142_v3  ;;  %v3164_v14 = vld [vmem:[#allocation5 + $0x30] sm:$0xff]  ;;  %s2725_s12 = sshll.u32 %s3083_s3, 4  ;;  %s2727_s15 = sshll.u32 %s5578_s5, 4  ;;  %s2726_s12 = int_to_ptr.vmem [resolvable:$true] %s2725_s12  ;;  %s2728_s15 = int_to_ptr.hbm [resolvable:$true] %s2727_s15 }
  0x18   :  { %v3166_v15 = vld [vmem:[#allocation5 + $0x38] sm:$0xff]  ;;  %v120_v16 = vmul.f32 %v3158_v11, %v3136_v0  ;;  %v121_v17 = vmul.f32 %v3160_v12, %v3138_v1  ;;  %v3172_v18 = vld [vmem:[#allocation5 + $0x40] sm:$0xff]  ;;  %v122_v20 = vmul.f32 %v3164_v14, %v3140_v2  ;;  %v3178_v22 = vld [vmem:[#allocation5 + $0x48] sm:$0xff]  ;;  %s3084_s16 = smov [#allocation10]   ;;  %s2714_s20 = sshll.u32 %s5577_s4, 4  ;;  %s2715_s20 = int_to_ptr.hbm [resolvable:$true] %s2714_s20 }
  0x19   :  { %v102_v19 = vadd.f32 %v99_v9, %v98_v8  ;;  %v123_v21 = vmul.f32 %v3166_v15, %v3142_v3  ;;  %v3180_v23 = vld [vmem:[#allocation5 + $0x50] sm:$0xff]  ;;  %v3182_v24 = vld [vmem:[#allocation5 + $0x58] sm:$0xff]  ;;  %v142_v25 = vmul.f32 %v3172_v18, %v3136_v0  ;;  %v143_v27 = vmul.f32 %v3178_v22, %v3138_v1  ;;  %v3192_v30 = vld [vmem:[#allocation5 + $0x60] sm:$0xff]  ;;  %s2712_s17 = sshll.u32 %s3084_s16, 4  ;;  %s2713_s17 = int_to_ptr.vmem [resolvable:$true] %s2712_s17 }
  0x1a   :  { %v124_v26 = vadd.f32 %v121_v17, %v120_v16  ;;  %v144_v28 = vmul.f32 %v3180_v23, %v3140_v2  ;;  %v145_v29 = vmul.f32 %v3182_v24, %v3142_v3  ;;  %v3194_v31 = vld [vmem:[#allocation5 + $0x68] sm:$0xff]  ;;  %v3196_v32 = vld [vmem:[#allocation5 + $0x70] sm:$0xff]  ;;  %v3198_v34 = vld [vmem:[#allocation5 + $0x78] sm:$0xff]  ;;  %v164_v35 = vmul.f32 %v3192_v30, %v3136_v0 }
  0x1b   :  { %v103_v33 = vadd.f32 %v102_v19, %v100_v10  ;;  %v165_v36 = vmul.f32 %v3194_v31, %v3138_v1  ;;  %v166_v37 = vmul.f32 %v3196_v32, %v3140_v2  ;;  %v3206_v38 = vld [vmem:[#allocation5 + $0x80] sm:$0xff]  ;;  %v3208_v39 = vld [vmem:[#allocation5 + $0x88] sm:$0xff]  ;;  %v146_v41 = vadd.f32 %v143_v27, %v142_v25  ;;  %v3212_v43 = vld [vmem:[#allocation5 + $0x90] sm:$0xff] }
  0x1c   :  { %v125_v40 = vadd.f32 %v124_v26, %v122_v20  ;;  %v167_v42 = vmul.f32 %v3198_v34, %v3142_v3  ;;  %v3214_v44 = vld [vmem:[#allocation5 + $0x98] sm:$0xff]  ;;  %v186_v45 = vmul.f32 %v3206_v38, %v3136_v0  ;;  %v3218_v46 = vld [vmem:[#allocation5 + $0xa0] sm:$0xff]  ;;  %v187_v49 = vmul.f32 %v3208_v39, %v3138_v1  ;;  %v3224_v51 = vld [vmem:[#allocation5 + $0xa8] sm:$0xff] }
  0x1d   :  { %v104_v47 = vadd.f32 %v103_v33, %v101_v13  ;;  %v168_v48 = vadd.f32 %v165_v36, %v164_v35  ;;  %v188_v50 = vmul.f32 %v3212_v43, %v3140_v2  ;;  %v3226_v52 = vld [vmem:[#allocation5 + $0xb0] sm:$0xff]  ;;  %v3228_v53 = vld [vmem:[#allocation5 + $0xb8] sm:$0xff]  ;;  %v147_v55 = vadd.f32 %v146_v41, %v144_v28  ;;  %v3236_v62 = vld [vmem:[#allocation5 + $0xc0] sm:$0xff] }
  0x1e   :  { %v126_v54 = vadd.f32 %v125_v40, %v123_v21  ;;  %v189_v56 = vmul.f32 %v3214_v44, %v3142_v3  ;;  %v208_v57 = vmul.f32 %v3218_v46, %v3136_v0  ;;  %v190_v60 = vadd.f32 %v187_v49, %v186_v45  ;;  %v3238_v63 = vld [vmem:[#allocation5 + $0xc8] sm:$0xff]  ;;  %v3244_v21 = vld [vmem:[#allocation5 + $0xd0] sm:$0xff]  ;;  %v3246_v25 = vld [vmem:[#allocation5 + $0xd8] sm:$0xff] }
  0x1f   :  { %v105_v58 = vrot.slane %v104_v47, 4  ;;  %v169_v59 = vadd.f32 %v168_v48, %v166_v37  ;;  %v209_v61 = vmul.f32 %v3224_v51, %v3138_v1  ;;  %v148_v9 = vadd.f32 %v147_v55, %v145_v29  ;;  %v3252_v40 = vld [vmem:[#allocation5 + $0xe0] sm:$0xff]  ;;  %v3258_v55 = vld [vmem:[#allocation5 + $0xe8] sm:$0xff] }
  0x20   :  { %v127_v8 = vrot.slane %v126_v54, 4  ;;  %v210_v10 = vmul.f32 %v3226_v52, %v3140_v2  ;;  %v211_v13 = vmul.f32 %v3228_v53, %v3142_v3  ;;  %v191_v19 = vadd.f32 %v190_v60, %v188_v50 }
  0x21   :  { %v106_v16 = vadd.f32 %v105_v58, %v104_v47  ;;  %v170_v17 = vadd.f32 %v169_v59, %v167_v42  ;;  %v212_v20 = vadd.f32 %v209_v61, %v208_v57  ;;  %v149_v27 = vrot.slane %v148_v9, 4 }
  0x22   :  { %v128_v26 = vadd.f32 %v127_v8, %v126_v54  ;;  %v230_v28 = vmul.f32 %v3236_v62, %v3136_v0  ;;  %v231_v29 = vmul.f32 %v3238_v63, %v3138_v1  ;;  %v192_v36 = vadd.f32 %v191_v19, %v189_v56 }
  0x23   :  { %v107_v33 = vrot.slane %v106_v16, 2  ;;  %v171_v35 = vrot.slane %v170_v17, 4  ;;  %v213_v37 = vadd.f32 %v212_v20, %v210_v10  ;;  %v150_v42 = vadd.f32 %v149_v27, %v148_v9  ;;  %v3262_v10 = vld [vmem:[#allocation5 + $0xf0] sm:$0xff] }
  0x24   :  { %v129_v41 = vrot.slane %v128_v26, 2  ;;  %v232_v45 = vmul.f32 %v3244_v21, %v3140_v2  ;;  %v233_v47 = vmul.f32 %v3246_v25, %v3142_v3  ;;  %v193_v50 = vrot.slane %v192_v36, 4 }
  0x25   :  { %v108_v48 = vadd.f32 %v107_v33, %v106_v16  ;;  %v172_v49 = vadd.f32 %v171_v35, %v170_v17  ;;  %v214_v54 = vadd.f32 %v213_v37, %v211_v13  ;;  %v151_v58 = vrot.slane %v150_v42, 2 }
  0x26   :  { %v130_v57 = vadd.f32 %v129_v41, %v128_v26  ;;  %v234_v56 = vadd.f32 %v231_v29, %v230_v28  ;;  %v252_v59 = vmul.f32 %v3252_v40, %v3136_v0  ;;  %v194_v8 = vadd.f32 %v193_v50, %v192_v36  ;;  %v3266_v28 = vld [vmem:[#allocation5 + $0xf8] sm:$0xff] }
  0x27   :  { %v109_v60 = vrot.slane %v108_v48, 1  ;;  %v173_v61 = vrot.slane %v172_v49, 2  ;;  %v215_v9 = vrot.slane %v214_v54, 4  ;;  %v152_v20 = vadd.f32 %v151_v58, %v150_v42 }
  0x28   :  { %v131_v19 = vrot.slane %v130_v57, 1  ;;  %v235_v16 = vadd.f32 %v234_v56, %v232_v45  ;;  %v253_v13 = vmul.f32 %v3258_v55, %v3138_v1  ;;  %v195_v26 = vrot.slane %v194_v8, 2 }
  0x29   :  { %v110_v17 = vadd.f32 %v109_v60, %v108_v48  ;;  %v174_v27 = vadd.f32 %v173_v61, %v172_v49  ;;  %v216_v33 = vadd.f32 %v215_v9, %v214_v54  ;;  %v153_v0 = vrot.slane %v152_v20, 1 }
  0x2a   :  { %v132_v29 = vadd.f32 %v131_v19, %v130_v57  ;;  %v236_v35 = vadd.f32 %v235_v16, %v233_v47  ;;  %v254_v36 = vmul.f32 %v3262_v10, %v3140_v2  ;;  %v196_v50 = vadd.f32 %v195_v26, %v194_v8  ;;  %v3272_v19 = vld [vmem:[#allocation2 + $0x20] sm:$0xff] }
  0x2b   :  { %v111_v37 = vmul.f32 0.17677669, %v110_v17  ;;  %v175_v41 = vrot.slane %v174_v27, 1  ;;  %v217_v42 = vrot.slane %v216_v33, 2  ;;  %v154_v58 = vadd.f32 %v153_v0, %v152_v20  ;;  %v3274_v17 = vld [vmem:[#allocation2 + $0x28] sm:$0xff] }
  0x2c   :  { %v133_v45 = vmul.f32 0.17677669, %v132_v29  ;;  %v237_v56 = vrot.slane %v236_v35, 4  ;;  %v255_v1 = vmul.f32 %v3266_v28, %v3142_v3  ;;  %v197_v54 = vrot.slane %v196_v50, 1  ;;  %v3276_v29 = vld [vmem:[#allocation2 + $0x30] sm:$0xff] }
  0x2d   :  { %v112_v48 = vmul.f32 1.442695, %v111_v37  ;;  %v176_v49 = vadd.f32 %v175_v41, %v174_v27  ;;  %v218_v60 = vadd.f32 %v217_v42, %v216_v33  ;;  %v155_v61 = vmul.f32 0.17677669, %v154_v58  ;;  %v3278_v37 = vld [vmem:[#allocation2 + $0x38] sm:$0xff] }
  0x2e   :  { %v134_v57 = vmul.f32 1.442695, %v133_v45  ;;  %v238_v47 = vadd.f32 %v237_v56, %v236_v35  ;;  %v256_v9 = vadd.f32 %v253_v13, %v252_v59  ;;  %v198_v8 = vadd.f32 %v197_v54, %v196_v50  ;;  %v3284_v50 = vld [vmem:[#allocation8] sm:$0x1]  ;;  %v3288_v58 = vld [vmem:[#allocation8 + $0x1] sm:$0x1] }
  0x2f   :  { %2755 = vpow2.f32 %v112_v48  ;;  %v177_v2 = vmul.f32 0.17677669, %v176_v49  ;;  %v219_v16 = vrot.slane %v218_v60, 1  ;;  %v156_v20 = vmul.f32 1.442695, %v155_v61  ;;  %5837 = vst [vmem:[#allocation18_spill] sm:$0xff] %v3284_v50 }
  0x30   :  { %2757 = vpow2.f32 %v134_v57  ;;  %v239_v26 = vrot.slane %v238_v47, 2  ;;  %v257_v3 = vadd.f32 %v256_v9, %v254_v36  ;;  %v199_v33 = vmul.f32 0.17677669, %v198_v8  ;;  %5838 = vst [vmem:[#allocation19_spill] sm:$0xff] %v3288_v58  ;;  %v3296_v61 = vld [vmem:[#allocation8 + $0x2] sm:$0x1] }
  0x31   :  { %v178_v27 = vmul.f32 1.442695, %v177_v2  ;;  %v220_v0 = vadd.f32 %v219_v16, %v218_v60  ;;  %v442_v59 = vmul.f32 %v3272_v19, %v3144_v4  ;;  %2759 = vpow2.f32 %v156_v20 }
  0x32   :  { %v240_v13 = vadd.f32 %v239_v26, %v238_v47  ;;  %v258_v35 = vadd.f32 %v257_v3, %v255_v1  ;;  %v443_v41 = vmul.f32 %v3274_v17, %v3146_v5  ;;  %v200_v36 = vmul.f32 1.442695, %v199_v33 }
  0x33   :  { %2761 = vpow2.f32 %v178_v27  ;;  %v221_v42 = vmul.f32 0.17677669, %v220_v0  ;;  %v444_v45 = vmul.f32 %v3276_v29, %v3148_v6  ;;  %v445_v4 = vmul.f32 %v3278_v37, %v3150_v7  ;;  %v3301_v7 = vld [vmem:[#allocation8 + $0x3] sm:$0x1]  ;;  %v3310_v0 = vld [vmem:[#allocation8 + $0x4] sm:$0x1] }
  0x34   :  { %v241_v56 = vrot.slane %v240_v13, 1  ;;  %v259_v48 = vrot.slane %v258_v35, 4  ;;  %v446_v49 = vadd.f32 %v443_v41, %v442_v59  ;;  %2763 = vpow2.f32 %v200_v36  ;;  %5839 = vst [vmem:[#allocation20_spill] sm:$0xff] %v3310_v0 }
  0x35   :  { %v2756_v1 = vpop.eup %2755  ;;  %v222_v54 = vmul.f32 1.442695, %v221_v42  ;;  %v463_v5 = vmul.f32 %v3272_v19, %v3158_v11  ;;  %v464_v60 = vmul.f32 %v3274_v17, %v3160_v12  ;;  %v465_v11 = vmul.f32 %v3276_v29, %v3164_v14 }
  0x36   :  { %v2758_v57 = vpop.eup %2757  ;;  %v3299_v6 = vmul.f32 %v2756_v1, %v3284_v50  ;;  %v242_v47 = vadd.f32 %v241_v56, %v240_v13  ;;  %v260_v9 = vadd.f32 %v259_v48, %v258_v35  ;;  %v447_v2 = vadd.f32 %v446_v49, %v444_v45  ;;  %v3324_v56 = vld [vmem:[#allocation8 + $0x5] sm:$0x1] }
  0x37   :  { %v3304_v8 = vmul.f32 %v2758_v57, %v3288_v58  ;;  %2765 = vpow2.f32 %v222_v54  ;;  %v466_v12 = vmul.f32 %v3278_v37, %v3166_v15  ;;  %v2760_v16 = vpop.eup %2759  ;;  %v467_v27 = vadd.f32 %v464_v60, %v463_v5  ;;  %5840 = vst [vmem:[#allocation21_spill] sm:$0xff] %v3324_v56 }
  0x38   :  { %v243_v20 = vmul.f32 0.17677669, %v242_v47  ;;  %v261_v26 = vrot.slane %v260_v9, 2  ;;  %v448_v3 = vadd.f32 %v447_v2, %v445_v4  ;;  %v3313_v59 = vmul.f32 %v2760_v16, %v3296_v61 }
  0x39   :  { %v2762_v33 = vpop.eup %2761  ;;  %v269_v13 = vadd.f32 %v3304_v8, %v3299_v6  ;;  %v484_v14 = vmul.f32 %v3272_v19, %v3172_v18  ;;  %v485_v15 = vmul.f32 %v3274_v17, %v3178_v22  ;;  %v468_v4 = vadd.f32 %v467_v27, %v465_v11 }
  0x3a   :  { %v3322_v35 = vmul.f32 %v2762_v33, %v3301_v7  ;;  %v244_v41 = vmul.f32 1.442695, %v243_v20  ;;  %v262_v36 = vadd.f32 %v261_v26, %v260_v9  ;;  %v449_v42 = vrot.slane %v448_v3, 4  ;;  %v2764_v45 = vpop.eup %2763 }
  0x3b   :  { %v270_v48 = vadd.f32 %v269_v13, %v3313_v59  ;;  %v486_v49 = vmul.f32 %v3276_v29, %v3180_v23  ;;  %v487_v18 = vmul.f32 %v3278_v37, %v3182_v24  ;;  %v3332_v22 = vmul.f32 %v2764_v45, %v3310_v0  ;;  %v3347_v13 = vld [vmem:[#allocation8 + $0x6] sm:$0x1]  ;;  %v3573_v0 = vld [vmem:[#allocation7 + $0x18] sm:$0xff] }
  0x3c   :  { %2767 = vpow2.f32 %v244_v41  ;;  %v263_v1 = vrot.slane %v262_v36, 1  ;;  %v450_v54 = vadd.f32 %v449_v42, %v448_v3  ;;  %v469_v57 = vadd.f32 %v468_v4, %v466_v12  ;;  %5841 = vst [vmem:[#allocation22_spill] sm:$0xff] %v3347_v13 }
  0x3d   :  { %v2766_v5 = vpop.eup %2765  ;;  %v271_v60 = vadd.f32 %v270_v48, %v3322_v35  ;;  %v488_v47 = vadd.f32 %v485_v15, %v484_v14  ;;  %v505_v9 = vmul.f32 %v3272_v19, %v3192_v30  ;;  %v506_v24 = vmul.f32 %v3274_v17, %v3194_v31  ;;  %5874 = vst [vmem:[#allocation55_spill] sm:$0xff] %v3573_v0 }
  0x3e   :  { %v3338_v2 = vmul.f32 %v2766_v5, %v3324_v56  ;;  %v264_v23 = vadd.f32 %v263_v1, %v262_v36  ;;  %v451_v11 = vrot.slane %v450_v54, 2  ;;  %v470_v20 = vrot.slane %v469_v57, 4 }
  0x3f   :  { %v272_v16 = vadd.f32 %v271_v60, %v3332_v22  ;;  %v489_v26 = vadd.f32 %v488_v47, %v486_v49  ;;  %v507_v3 = vmul.f32 %v3276_v29, %v3196_v32  ;;  %v508_v30 = vmul.f32 %v3278_v37, %v3198_v34 }
  0x40   :  { %v265_v12 = vmul.f32 0.17677669, %v264_v23  ;;  %v452_v27 = vadd.f32 %v451_v11, %v450_v54  ;;  %v509_v33 = vadd.f32 %v506_v24, %v505_v9  ;;  %v471_v14 = vadd.f32 %v470_v20, %v469_v57  ;;  %v3367_v20 = vld [vmem:[#allocation8 + $0x7] sm:$0x1] }
  0x41   :  { %v490_v15 = vadd.f32 %v489_v26, %v487_v18  ;;  %v526_v31 = vmul.f32 %v3272_v19, %v3206_v38  ;;  %v527_v32 = vmul.f32 %v3274_v17, %v3208_v39  ;;  %v273_v48 = vadd.f32 %v272_v16, %v3338_v2  ;;  %5842 = vst [vmem:[#allocation23_spill] sm:$0xff] %v3367_v20 }
  0x42   :  { %v2768_v41 = vpop.eup %2767  ;;  %v266_v36 = vmul.f32 1.442695, %v265_v12  ;;  %v453_v42 = vrot.slane %v452_v27, 1  ;;  %v510_v45 = vadd.f32 %v509_v33, %v507_v3  ;;  %v472_v4 = vrot.slane %v471_v14, 2 }
  0x43   :  { %v491_v49 = vrot.slane %v490_v15, 4  ;;  %v528_v34 = vmul.f32 %v3276_v29, %v3212_v43  ;;  %v3357_v1 = vmul.f32 %v2768_v41, %v3347_v13  ;;  %v529_v60 = vmul.f32 %v3278_v37, %v3214_v44 }
  0x44   :  { %2769 = vpow2.f32 %v266_v36  ;;  %v454_v18 = vadd.f32 %v453_v42, %v452_v27  ;;  %v511_v38 = vadd.f32 %v510_v45, %v508_v30  ;;  %v473_v54 = vadd.f32 %v472_v4, %v471_v14 }
  0x45   :  { %v492_v5 = vadd.f32 %v491_v49, %v490_v15  ;;  %v530_v57 = vadd.f32 %v527_v32, %v526_v31  ;;  %v547_v9 = vmul.f32 %v3272_v19, %v3218_v46  ;;  %v548_v43 = vmul.f32 %v3274_v17, %v3224_v51 }
  0x46   :  { %v455_v39 = vmul.f32 0.17677669, %v454_v18  ;;  %v512_v47 = vrot.slane %v511_v38, 4  ;;  %v474_v23 = vrot.slane %v473_v54, 1  ;;  %v549_v16 = vmul.f32 %v3276_v29, %v3226_v52 }
  0x47   :  { %v493_v11 = vrot.slane %v492_v5, 2  ;;  %v531_v24 = vadd.f32 %v530_v57, %v528_v34  ;;  %v550_v44 = vmul.f32 %v3278_v37, %v3228_v53  ;;  %v551_v12 = vadd.f32 %v548_v43, %v547_v9 }
  0x48   :  { %v456_v26 = vmul.f32 1.442695, %v455_v39  ;;  %v513_v3 = vadd.f32 %v512_v47, %v511_v38  ;;  %v274_v27 = vadd.f32 %v273_v48, %v3357_v1  ;;  %v475_v46 = vadd.f32 %v474_v23, %v473_v54 }
  0x49   :  { %v494_v30 = vadd.f32 %v493_v11, %v492_v5  ;;  %v532_v33 = vadd.f32 %v531_v24, %v529_v60  ;;  %v552_v15 = vadd.f32 %v551_v12, %v549_v16  ;;  %v568_v18 = vmul.f32 %v3272_v19, %v3236_v62  ;;  %v3385_v16 = vld [vmem:[#allocation2 + $0x40] sm:$0xff]  ;;  %v3393_v12 = vld [vmem:[#allocation2 + $0x48] sm:$0xff] }
  0x4a   :  { %v2770_v51 = vpop.eup %2769  ;;  %2771 = vpow2.f32 %v456_v26  ;;  %v514_v14 = vrot.slane %v513_v3, 2  ;;  %v476_v52 = vmul.f32 0.17677669, %v475_v46  ;;  %v569_v5 = vmul.f32 %v3274_v17, %v3238_v63  ;;  %5843 = vst [vmem:[#allocation24_spill] sm:$0xff] %v3385_v16  ;;  %v3387_v26 = vld [vmem:[#allocation5] sm:$0xff] }
  0x4b   :  { %v3373_v31 = vmul.f32 %v2770_v51, %v3367_v20  ;;  %v495_v41 = vrot.slane %v494_v30, 1  ;;  %v533_v42 = vrot.slane %v532_v33, 4  ;;  %v553_v45 = vadd.f32 %v552_v15, %v550_v44  ;;  %5844 = vst [vmem:[#allocation25_spill] sm:$0xff] %v3387_v26  ;;  %v3401_v51 = vld [vmem:[#allocation5 + $0x8] sm:$0xff] }
  0x4c   :  { %v515_v36 = vadd.f32 %v514_v14, %v513_v3  ;;  %v477_v32 = vmul.f32 1.442695, %v476_v52  ;;  %v570_v62 = vmul.f32 %v3276_v29, %v3244_v21  ;;  %v571_v63 = vmul.f32 %v3278_v37, %v3246_v25  ;;  %5845 = vst [vmem:[#allocation26_spill] sm:$0xff] %v3393_v12  ;;  %v3403_v14 = vld [vmem:[#allocation5 + $0x10] sm:$0xff] }
  0x4d   :  { %v275_v53 = vadd.f32 %v274_v27, %v3373_v31  ;;  %v496_v4 = vadd.f32 %v495_v41, %v494_v30  ;;  %v534_v49 = vadd.f32 %v533_v42, %v532_v33  ;;  %v554_v34 = vrot.slane %v553_v45, 4  ;;  %v3399_v33 = vld [vmem:[#allocation2 + $0x50] sm:$0xff]  ;;  %5847 = vst [vmem:[#allocation28_spill] sm:$0xff] %v3401_v51 }
  0x4e   :  { %v516_v48 = vrot.slane %v515_v36, 1  ;;  %2773 = vpow2.f32 %v477_v32  ;;  %v572_v3 = vadd.f32 %v569_v5, %v568_v18  ;;  %v589_v44 = vmul.f32 %v3272_v19, %v3252_v40  ;;  %5846 = vst [vmem:[#allocation27_spill] sm:$0xff] %v3399_v33  ;;  %v3467_v18 = vld [vmem:[#allocation7 + $0x60] sm:$0xff]  ;;  %v3473_v5 = vld [vmem:[#allocation7 + $0x8] sm:$0xff] }
  0x4f   :  { %v276_v38 = vadd.f32 1e-08, %v275_v53  ;;  %v497_v54 = vmul.f32 0.17677669, %v496_v4  ;;  %v535_v39 = vrot.slane %v534_v49, 2  ;;  %v555_v47 = vadd.f32 %v554_v34, %v553_v45  ;;  %5848 = vst [vmem:[#allocation29_spill] sm:$0xff] %v3403_v14 }
  0x50   :  { %v2772_v60 = vpop.eup %2771  ;;  %v517_v57 = vadd.f32 %v516_v48, %v515_v36  ;;  %v590_v21 = vmul.f32 %v3274_v17, %v3258_v55  ;;  %v573_v15 = vadd.f32 %v572_v3, %v570_v62  ;;  %v3407_v40 = vmul.f32 %v3276_v29, %v3262_v10  ;;  %v3447_v4 = vld [vmem:[#allocation7] sm:$0xff]  ;;  %5853 = vst [vmem:[#allocation34_spill] sm:$0xff] %v3467_v18  ;;  %v3507_v62 = vld [vmem:[#allocation7 + $0x68] sm:$0xff] }
  0x51   :  { %2775 = vrcp.f32 %v276_v38  ;;  %v3381_v9 = vmul.f32 %v2772_v60, %v3284_v50  ;;  %v498_v43 = vmul.f32 1.442695, %v497_v54  ;;  %v536_v11 = vadd.f32 %v535_v39, %v534_v49  ;;  %5850 = vst [vmem:[#allocation31_spill] sm:$0xff] %v3447_v4  ;;  %v3449_v48 = vld [vmem:[#allocation7 + $0x20] sm:$0xff]  ;;  %v3475_v60 = vld [vmem:[#allocation7 + $0x28] sm:$0xff] }
  0x52   :  { %v518_v23 = vmul.f32 0.17677669, %v517_v57  ;;  %v556_v24 = vrot.slane %v555_v47, 2  ;;  %v3411_v19 = vmul.f32 %v3278_v37, %v3266_v28  ;;  %v3415_v52 = vmul.f32 %v3387_v26, %v3385_v16  ;;  %5851 = vst [vmem:[#allocation32_spill] sm:$0xff] %v3449_v48  ;;  %v3451_v49 = vld [vmem:[#allocation7 + $0x40] sm:$0xff]  ;;  %v3553_v26 = vld [vmem:[#allocation7 + $0x90] sm:$0xff] }
  0x53   :  { %2777 = vpow2.f32 %v498_v43  ;;  %v537_v46 = vrot.slane %v536_v11, 1  ;;  %v3423_v42 = vadd.f32 %v573_v15, %v571_v63  ;;  %v3425_v10 = vadd.f32 %v590_v21, %v589_v44  ;;  %5852 = vst [vmem:[#allocation33_spill] sm:$0xff] %v3451_v49  ;;  %v3469_v38 = vld [vmem:[#allocation7 + $0x80] sm:$0xff]  ;;  %v3519_v21 = vld [vmem:[#allocation7 + $0x88] sm:$0xff] }
  0x54   :  { %v519_v27 = vmul.f32 1.442695, %v518_v23  ;;  %v3395_v30 = vadd.f32 %v556_v24, %v555_v47  ;;  %v2774_v25 = vpop.eup %2773  ;;  %v3429_v28 = vmul.f32 %v3401_v51, %v3393_v12  ;;  %v3433_v29 = vmul.f32 %v3403_v14, %v3399_v33  ;;  %5854 = vst [vmem:[#allocation35_spill] sm:$0xff] %v3469_v38  ;;  %v3471_v54 = vld [vmem:[#allocation7 + $0xa0] sm:$0xff]  ;;  %v3505_v24 = vld [vmem:[#allocation7 + $0x48] sm:$0xff]  ;;  %v3549_v51 = vld [vmem:[#allocation7 + $0x50] sm:$0xff] }
  0x55   :  { %v3418_v55 = vmul.f32 %v2774_v25, %v3288_v58  ;;  %v3420_v17 = vadd.f32 %v537_v46, %v536_v11  ;;  %5855 = vst [vmem:[#allocation36_spill] sm:$0xff] %v3471_v54  ;;  %v3489_v57 = vld [vmem:[#allocation7 + $0xc0] sm:$0xff]  ;;  %v3521_v25 = vld [vmem:[#allocation7 + $0xa8] sm:$0xff]  ;;  %v3541_v58 = vld [vmem:[#allocation7 + $0x30] sm:$0xff] }
  0x56   :  { %2779 = vpow2.f32 %v519_v27  ;;  %5849 = vst [vmem:[#allocation30_spill] sm:$0xff] %v3433_v29  ;;  %v3491_v39 = vld [vmem:[#allocation7 + $0xe0] sm:$0xff]  ;;  %v3523_v15 = vld [vmem:[#allocation7 + $0xc8] sm:$0xff]  ;;  %v3595_v12 = vld [vmem:[#allocation7 + $0xb8] sm:$0xff] }
  0x57   :  { %v2776_v36 = vpop.eup %2775  ;;  %5856 = vst [vmem:[#allocation37_spill] sm:$0xff] %v3473_v5 }
  0x58   :  { %v3436_v37 = vmul.f32 %v2776_v36, %v3299_v6  ;;  %v3439_v45 = vmul.f32 %v2776_v36, %v3304_v8  ;;  %v3442_v53 = vmul.f32 %v2776_v36, %v3313_v59  ;;  %v3445_v32 = vmul.f32 %v2776_v36, %v3322_v35  ;;  %5857 = vst [vmem:[#allocation38_spill] sm:$0xff] %v3475_v60 }
  0x59   :  { %v3453_v34 = vpop.eup %2777  ;;  %v3456_v6 = vmul.f32 %v2776_v36, %v3332_v22  ;;  %v3459_v8 = vmul.f32 %v2776_v36, %v3338_v2  ;;  %v3462_v59 = vmul.f32 %v2776_v36, %v3357_v1  ;;  %v3465_v35 = vmul.f32 %v2776_v36, %v3373_v31  ;;  %5858 = vst [vmem:[#allocation39_spill] sm:$0xff] %v3489_v57 }
  0x5a   :  { %v3478_v22 = vperm.slane %v3436_v37, 0  ;;  %v3481_v2 = vperm.slane %v3439_v45, 0  ;;  %v3484_v1 = vperm.slane %v3442_v53, 0  ;;  %v3487_v31 = vperm.slane %v3445_v32, 0  ;;  %5859 = vst [vmem:[#allocation40_spill] sm:$0xff] %v3491_v39 }
  0x5b   :  { %v3494_v47 = vperm.slane %v3456_v6, 0  ;;  %v3497_v43 = vperm.slane %v3459_v8, 0  ;;  %v3500_v23 = vperm.slane %v3462_v59, 0  ;;  %v3503_v11 = vperm.slane %v3465_v35, 0  ;;  %5860 = vst [vmem:[#allocation41_spill] sm:$0xff] %v3505_v24 }
  0x5c   :  { %5861 = vst [vmem:[#allocation42_spill] sm:$0xff] %v3507_v62  ;;  %v3509_v63 = vpop.eup %2779  ;;  %v291_v3 = vmul.f32 %v3478_v22, %v3447_v4  ;;  %v301_v44 = vmul.f32 %v3481_v2, %v3449_v48  ;;  %v315_v27 = vmul.f32 %v3484_v1, %v3451_v49  ;;  %v329_v46 = vmul.f32 %v3487_v31, %v3467_v18  ;;  %v3537_v18 = vld [vmem:[#allocation7 + $0xe8] sm:$0xff]  ;;  %v3539_v4 = vld [vmem:[#allocation7 + $0x10] sm:$0xff] }
  0x5d   :  { %5862 = vst [vmem:[#allocation43_spill] sm:$0xff] %v3519_v21  ;;  %v343_v36 = vmul.f32 %v3494_v47, %v3469_v38  ;;  %v357_v41 = vmul.f32 %v3497_v43, %v3471_v54  ;;  %v3531_v48 = vmul.f32 %v3500_v23, %v3489_v57  ;;  %v3535_v49 = vmul.f32 %v3503_v11, %v3491_v39  ;;  %v3551_v39 = vld [vmem:[#allocation7 + $0x70] sm:$0xff] }
  0x5e   :  { %5863 = vst [vmem:[#allocation44_spill] sm:$0xff] %v3521_v25  ;;  %v305_v14 = vadd.f32 %v301_v44, %v291_v3  ;;  %v292_v38 = vmul.f32 %v3478_v22, %v3473_v5  ;;  %v302_v54 = vmul.f32 %v3481_v2, %v3475_v60  ;;  %v316_v57 = vmul.f32 %v3484_v1, %v3505_v24  ;;  %v3563_v5 = vld [vmem:[#allocation7 + $0xb0] sm:$0xff] }
  0x5f   :  { %5864 = vst [vmem:[#allocation45_spill] sm:$0xff] %v3523_v15  ;;  %v330_v50 = vmul.f32 %v3487_v31, %v3507_v62  ;;  %v344_v3 = vmul.f32 %v3494_v47, %v3519_v21  ;;  %v358_v44 = vmul.f32 %v3497_v43, %v3521_v25  ;;  %v372_v60 = vmul.f32 %v3500_v23, %v3523_v15  ;;  %v3565_v24 = vld [vmem:[#allocation7 + $0xd0] sm:$0xff]  ;;  %v3575_v25 = vld [vmem:[#allocation7 + $0x38] sm:$0xff] }
  0x60   :  { %5865 = vst [vmem:[#allocation46_spill] sm:$0xff] %v3537_v18  ;;  %v319_v20 = vadd.f32 %v315_v27, %v305_v14  ;;  %v306_v13 = vadd.f32 %v302_v54, %v292_v38  ;;  %v386_v56 = vmul.f32 %v3503_v11, %v3537_v18  ;;  %v293_v62 = vmul.f32 %v3478_v22, %v3539_v4  ;;  %v3571_v21 = vld [vmem:[#allocation7 + $0xf0] sm:$0xff]  ;;  %v3585_v27 = vld [vmem:[#allocation7 + $0x58] sm:$0xff] }
  0x61   :  { %5866 = vst [vmem:[#allocation47_spill] sm:$0xff] %v3539_v4  ;;  %v303_v15 = vmul.f32 %v3481_v2, %v3541_v58  ;;  %v317_v14 = vmul.f32 %v3484_v1, %v3549_v51  ;;  %v331_v38 = vmul.f32 %v3487_v31, %v3551_v39  ;;  %v345_v54 = vmul.f32 %v3494_v47, %v3553_v26  ;;  %v3587_v4 = vld [vmem:[#allocation7 + $0x78] sm:$0xff] }
  0x62   :  { %5867 = vst [vmem:[#allocation48_spill] sm:$0xff] %v3541_v58  ;;  %v333_v18 = vadd.f32 %v329_v46, %v319_v20  ;;  %v320_v29 = vadd.f32 %v316_v57, %v306_v13  ;;  %v359_v33 = vmul.f32 %v3497_v43, %v3563_v5  ;;  %v373_v58 = vmul.f32 %v3500_v23, %v3565_v24  ;;  %v3603_v20 = vld [vmem:[#allocation7 + $0xd8] sm:$0xff] }
  0x63   :  { %5868 = vst [vmem:[#allocation49_spill] sm:$0xff] %v3549_v51  ;;  %v3593_v51 = vld [vmem:[#allocation7 + $0x98] sm:$0xff]  ;;  %v294_v16 = vmul.f32 %v3478_v22, %v3573_v0  ;;  %v304_v13 = vmul.f32 %v3481_v2, %v3575_v25  ;;  %v360_v2 = vmul.f32 %v3497_v43, %v3595_v12  ;;  %v404_v43 = vrot.slane %v3445_v32, 5 }
  0x64   :  { %5869 = vst [vmem:[#allocation50_spill] sm:$0xff] %v3551_v39  ;;  %v307_v39 = vadd.f32 %v303_v15, %v293_v62  ;;  %v3605_v57 = vld [vmem:[#allocation7 + $0xf8] sm:$0xff]  ;;  %v347_v46 = vadd.f32 %v343_v36, %v333_v18  ;;  %v332_v62 = vmul.f32 %v3487_v31, %v3587_v4  ;;  %v346_v22 = vmul.f32 %v3494_v47, %v3593_v51 }
  0x65   :  { %5870 = vst [vmem:[#allocation51_spill] sm:$0xff] %v3553_v26  ;;  %v387_v26 = vmul.f32 %v3503_v11, %v3571_v21  ;;  %v398_v31 = vrot.slane %v3439_v45, 7  ;;  %v416_v45 = vrot.slane %v3465_v35, 1  ;;  %v539_v35 = vmul.f32 0.17677669, %v3420_v17  ;;  %v3651_v17 = vld [vmem:[#allocation5 + $0x18] sm:$0xff] }
  0x66   :  { %5871 = vst [vmem:[#allocation52_spill] sm:$0xff] %v3563_v5  ;;  %v318_v5 = vmul.f32 %v3484_v1, %v3585_v27  ;;  %v321_v15 = vadd.f32 %v317_v14, %v307_v39 }
  0x67   :  { %5872 = vst [vmem:[#allocation53_spill] sm:$0xff] %v3565_v24  ;;  %v334_v24 = vadd.f32 %v330_v50, %v320_v29  ;;  %v374_v50 = vmul.f32 %v3500_v23, %v3603_v20  ;;  %v388_v29 = vmul.f32 %v3503_v11, %v3605_v57  ;;  %v410_v23 = vrot.slane %v3459_v8, 3 }
  0x68   :  { %5873 = vst [vmem:[#allocation54_spill] sm:$0xff] %v3571_v21  ;;  %v308_v21 = vadd.f32 %v304_v13, %v294_v16  ;;  %v335_v18 = vadd.f32 %v331_v38, %v321_v15  ;;  %v401_v16 = vrot.slane %v3442_v53, 6  ;;  %v419_v53 = vsel %vm418_vm0, %v3436_v37, %v398_v31  ;;  %v3654_v13 = vld [vmem:[#allocation5 + $0x20] sm:$0xff]  ;;  %v3659_v15 = vld [vmem:[#allocation5 + $0x28] sm:$0xff] }
  0x69   :  { %5875 = vst [vmem:[#allocation56_spill] sm:$0xff] %v3575_v25  ;;  %v361_v25 = vadd.f32 %v357_v41, %v347_v46  ;;  %v348_v0 = vadd.f32 %v344_v3, %v334_v24  ;;  %v407_v41 = vrot.slane %v3456_v6, 4  ;;  %v413_v3 = vrot.slane %v3462_v59, 2 }
  0x6a   :  { %v322_v1 = vadd.f32 %v318_v5, %v308_v21  ;;  %v349_v24 = vadd.f32 %v345_v54, %v335_v18  ;;  %v421_v32 = vsel %vm420_vm1, %v419_v53, %v401_v16  ;;  %v3633_v6 = vmul.f32 %v3453_v34, %v3296_v61  ;;  %v3673_v16 = vld [vmem:[#allocation5 + $0x40] sm:$0xff] }
  0x6b   :  { %v375_v39 = vadd.f32 %v3531_v48, %v361_v25  ;;  %v362_v47 = vadd.f32 %v358_v44, %v348_v0  ;;  %v423_v59 = vsel %vm422_vm2, %v421_v32, %v404_v43  ;;  %v5876_v21 = vrot.slane %v3395_v30, 1  ;;  %v3694_v32 = vld [vmem:[#allocation5 + $0x60] sm:$0xff] }
  0x6c   :  { %v336_v36 = vadd.f32 %v332_v62, %v322_v1  ;;  %v363_v48 = vadd.f32 %v359_v33, %v349_v24  ;;  %v425_v33 = vsel %vm424_vm3, %v423_v59, %v407_v41  ;;  %v575_v44 = vrot.slane %v3423_v42, 4  ;;  %v5879_v1 = vld [vmem:[#allocation24_spill] sm:$0xff]  ;;  %v5883_v41 = vld [vmem:[#allocation27_spill] sm:$0xff] }
  0x6d   :  { %v389_v11 = vadd.f32 %v3535_v49, %v375_v39  ;;  %v376_v5 = vadd.f32 %v372_v60, %v362_v47  ;;  %v3638_v49 = vmul.f32 %v3509_v63, %v3301_v7  ;;  %v559_v25 = vadd.f32 %v5876_v21, %v3395_v30  ;;  %v3649_v63 = vld [vmem:[#allocation2 + $0x58] sm:$0xff]  ;;  %5880 = vst [vmem:[#allocation24_spill] sm:$0xff] %v3673_v16  ;;  %v5882_v47 = vld [vmem:[#allocation26_spill] sm:$0xff] }
  0x6e   :  { %v350_v0 = vadd.f32 %v346_v22, %v336_v36  ;;  %v377_v60 = vadd.f32 %v373_v58, %v363_v48  ;;  %v427_v34 = vsel %vm426_vm4, %v425_v33, %v410_v23  ;;  %v594_v7 = vadd.f32 %v3425_v10, %v3407_v40  ;;  %v3661_v40 = vld [vmem:[#allocation5 + $0x30] sm:$0xff]  ;;  %v5885_v23 = vld [vmem:[#allocation30_spill] sm:$0xff]  ;;  %v5889_v21 = vld [vmem:[#allocation20_spill] sm:$0xff] }
  0x6f   :  { %393 = vst [vmem:[#allocation10] sm:$0xff] %v389_v11  ;;  %v390_v8 = vadd.f32 %v386_v56, %v376_v5  ;;  %v540_v56 = vmul.f32 1.442695, %v539_v35  ;;  %v429_v38 = vsel %vm428_vm5, %v427_v34, %v413_v3  ;;  %v560_v54 = vmul.f32 0.17677669, %v559_v25  ;;  %v3682_v36 = vld [vmem:[#allocation5 + $0x50] sm:$0xff] }
  0x70   :  { %v364_v37 = vadd.f32 %v360_v2, %v350_v0  ;;  %v391_v58 = vadd.f32 %v387_v26, %v377_v60  ;;  %v431_v30 = vsel %vm430_vm6, %v429_v38, %v416_v45  ;;  %v576_v46 = vadd.f32 %v575_v44, %v3423_v42  ;;  %5877 = vst [vmem:[#allocation57_spill] sm:$0xff] %v3661_v40  ;;  %v3687_v5 = vld [vmem:[#allocation5 + $0x58] sm:$0xff]  ;;  %v3698_v33 = vld [vmem:[#allocation5 + $0x68] sm:$0xff]  ;;  %v3705_v38 = vld [vmem:[#allocation5 + $0x70] sm:$0xff] }
  0x71   :  { %394 = vst [vmem:[#allocation10 + $0x8] sm:$0xff] %v390_v8  ;;  %2781 = vpow2.f32 %v540_v56  ;;  %v595_v62 = vadd.f32 %v594_v7, %v3411_v19  ;;  %v561_v26 = vmul.f32 1.442695, %v560_v54  ;;  %v606_v22 = vadd.f32 %v3418_v55, %v3381_v9  ;;  %v3707_v54 = vld [vmem:[#allocation5 + $0x78] sm:$0xff] }
  0x72   :  { %v378_v14 = vadd.f32 %v374_v50, %v364_v37  ;;  %395 = vst [vmem:[#allocation10 + $0x10] sm:$0xff] %v391_v58  ;;  %v770_v2 = vmul.f32 %v3651_v17, %v3649_v63  ;;  %v3667_v50 = vld [vmem:[#allocation5 + $0x38] sm:$0xff]  ;;  %v577_v18 = vrot.slane %v576_v46, 2  ;;  %v771_v19 = vadd.f32 %v3429_v28, %v3415_v52 }
  0x73   :  { %5878 = vst [vmem:[#allocation58_spill] sm:$0xff] %v3667_v50  ;;  %v596_v42 = vrot.slane %v595_v62, 4  ;;  %v788_v31 = vmul.f32 %v3654_v13, %v5879_v1  ;;  %2783 = vpow2.f32 %v561_v26  ;;  %v607_v39 = vadd.f32 %v606_v22, %v3633_v6 }
  0x74   :  { %v392_v10 = vadd.f32 %v388_v29, %v378_v14  ;;  %432 = vst [vmem:[#allocation11] sm:$0xff] %v431_v30  ;;  %v3675_v29 = vld [vmem:[#allocation5 + $0x48] sm:$0xff]  ;;  %v789_v43 = vmul.f32 %v3659_v15, %v5882_v47  ;;  %v790_v24 = vmul.f32 %v3661_v40, %v5883_v41  ;;  %v578_v52 = vadd.f32 %v577_v18, %v576_v46 }
  0x75   :  { %5881 = vst [vmem:[#allocation59_spill] sm:$0xff] %v3675_v29  ;;  %v597_v28 = vadd.f32 %v596_v42, %v595_v62  ;;  %v772_v3 = vadd.f32 %v771_v19, %v5885_v23  ;;  %v791_v11 = vmul.f32 %v3667_v50, %v3649_v63  ;;  %v608_v45 = vadd.f32 %v607_v39, %v3638_v49  ;;  %v3717_v39 = vld [vmem:[#allocation5 + $0x80] sm:$0xff]  ;;  %v3723_v23 = vld [vmem:[#allocation5 + $0x88] sm:$0xff] }
  0x76   :  { %396 = vst [vmem:[#allocation10 + $0x18] sm:$0xff] %v392_v10  ;;  %v792_v53 = vadd.f32 %v789_v43, %v788_v31  ;;  %v809_v48 = vmul.f32 %v3673_v16, %v5879_v1  ;;  %v810_v0 = vmul.f32 %v3675_v29, %v5882_v47  ;;  %v579_v59 = vrot.slane %v578_v52, 1  ;;  %v5945_v50 = vld [vmem:[#allocation50_spill] sm:$0xff] }
  0x77   :  { %5884 = vst [vmem:[#allocation26_spill] sm:$0xff] %v3682_v36  ;;  %v2782_v8 = vpop.eup %2781  ;;  %v598_v35 = vrot.slane %v597_v28, 2  ;;  %v773_v60 = vadd.f32 %v772_v3, %v770_v2  ;;  %v811_v37 = vmul.f32 %v3682_v36, %v5883_v41  ;;  %v812_v56 = vmul.f32 %v3687_v5, %v3649_v63  ;;  %v5892_v2 = vld [vmem:[#allocation21_spill] sm:$0xff] }
  0x78   :  { %5886 = vst [vmem:[#allocation27_spill] sm:$0xff] %v3687_v5  ;;  %v3701_v25 = vmul.f32 %v2782_v8, %v5889_v21  ;;  %v793_v34 = vadd.f32 %v792_v53, %v790_v24  ;;  %v813_v44 = vadd.f32 %v810_v0, %v809_v48  ;;  %v580_v7 = vadd.f32 %v579_v59, %v578_v52  ;;  %v3726_v48 = vld [vmem:[#allocation5 + $0x90] sm:$0xff] }
  0x79   :  { %5887 = vst [vmem:[#allocation30_spill] sm:$0xff] %v3694_v32  ;;  %v599_v58 = vadd.f32 %v598_v35, %v597_v28  ;;  %v774_v14 = vrot.slane %v773_v60, 4  ;;  %v830_v30 = vmul.f32 %v3694_v32, %v5879_v1  ;;  %v2784_v46 = vpop.eup %2783  ;;  %v831_v22 = vmul.f32 %v3698_v33, %v5882_v47  ;;  %v3728_v35 = vld [vmem:[#allocation5 + $0x98] sm:$0xff]  ;;  %v5935_v32 = vld [vmem:[#allocation38_spill] sm:$0xff] }
  0x7a   :  { %5888 = vst [vmem:[#allocation60_spill] sm:$0xff] %v3698_v33  ;;  %v609_v62 = vadd.f32 %v608_v45, %v3701_v25  ;;  %v794_v10 = vadd.f32 %v793_v34, %v791_v11  ;;  %v814_v26 = vadd.f32 %v813_v44, %v811_v37  ;;  %v3715_v18 = vmul.f32 %v2784_v46, %v5892_v2 }
  0x7b   :  { %5890 = vst [vmem:[#allocation20_spill] sm:$0xff] %v3705_v38  ;;  %v581_v42 = vmul.f32 0.17677669, %v580_v7  ;;  %v600_v19 = vrot.slane %v599_v58, 1  ;;  %v775_v31 = vadd.f32 %v774_v14, %v773_v60  ;;  %v832_v52 = vmul.f32 %v3705_v38, %v5883_v41  ;;  %v5934_v38 = vld [vmem:[#allocation37_spill] sm:$0xff] }
  0x7c   :  { %5891 = vst [vmem:[#allocation61_spill] sm:$0xff] %v3707_v54  ;;  %v795_v43 = vrot.slane %v794_v10, 4  ;;  %v815_v24 = vadd.f32 %v814_v26, %v812_v56  ;;  %v833_v28 = vmul.f32 %v3707_v54, %v3649_v63  ;;  %v610_v45 = vadd.f32 %v609_v62, %v3715_v18  ;;  %v3734_v56 = vld [vmem:[#allocation5 + $0xa0] sm:$0xff] }
  0x7d   :  { %5893 = vst [vmem:[#allocation21_spill] sm:$0xff] %v3717_v39  ;;  %v582_v3 = vmul.f32 1.442695, %v581_v42  ;;  %v601_v11 = vadd.f32 %v600_v19, %v599_v58  ;;  %v776_v53 = vrot.slane %v775_v31, 2  ;;  %v834_v59 = vadd.f32 %v831_v22, %v830_v30  ;;  %v3738_v30 = vld [vmem:[#allocation5 + $0xa8] sm:$0xff]  ;;  %v3742_v22 = vld [vmem:[#allocation5 + $0xb0] sm:$0xff] }
  0x7e   :  { %5894 = vst [vmem:[#allocation62_spill] sm:$0xff] %v3723_v23  ;;  %v796_v0 = vadd.f32 %v795_v43, %v794_v10  ;;  %v816_v8 = vrot.slane %v815_v24, 4  ;;  %v851_v60 = vmul.f32 %v3717_v39, %v5879_v1  ;;  %v852_v34 = vmul.f32 %v3723_v23, %v5882_v47  ;;  %v5933_v23 = vld [vmem:[#allocation40_spill] sm:$0xff] }
  0x7f   :  { %5895 = vst [vmem:[#allocation63_spill] sm:$0xff] %v3726_v48  ;;  %2785 = vpow2.f32 %v582_v3  ;;  %v602_v37 = vmul.f32 0.17677669, %v601_v11  ;;  %v777_v21 = vadd.f32 %v776_v53, %v775_v31  ;;  %v835_v58 = vadd.f32 %v834_v59, %v832_v52  ;;  %v3744_v31 = vld [vmem:[#allocation5 + $0xb8] sm:$0xff] }
  0x80   :  { %5896 = vst [vmem:[#allocation64_spill] sm:$0xff] %v3728_v35  ;;  %v797_v44 = vrot.slane %v796_v0, 2  ;;  %v817_v7 = vadd.f32 %v816_v8, %v815_v24  ;;  %v853_v14 = vmul.f32 %v3726_v48, %v5883_v41  ;;  %v854_v10 = vmul.f32 %v3728_v35, %v3649_v63  ;;  %v5932_v35 = vld [vmem:[#allocation39_spill] sm:$0xff] }
  0x81   :  { %5897 = vst [vmem:[#allocation65_spill] sm:$0xff] %v3734_v56  ;;  %v603_v46 = vmul.f32 1.442695, %v602_v37  ;;  %v778_v62 = vrot.slane %v777_v21, 1  ;;  %v855_v26 = vadd.f32 %v852_v34, %v851_v60  ;;  %v836_v19 = vadd.f32 %v835_v58, %v833_v28 }
  0x82   :  { %5898 = vst [vmem:[#allocation66_spill] sm:$0xff] %v3738_v30  ;;  %v798_v2 = vadd.f32 %v797_v44, %v796_v0  ;;  %v818_v42 = vrot.slane %v817_v7, 2  ;;  %v872_v43 = vmul.f32 %v3734_v56, %v5879_v1  ;;  %v873_v3 = vmul.f32 %v3738_v30, %v5882_v47  ;;  %v3752_v0 = vld [vmem:[#allocation5 + $0xc0] sm:$0xff] }
  0x83   :  { %5899 = vst [vmem:[#allocation67_spill] sm:$0xff] %v3742_v22  ;;  %2787 = vpow2.f32 %v603_v46  ;;  %v779_v24 = vadd.f32 %v778_v62, %v777_v21  ;;  %v856_v52 = vadd.f32 %v855_v26, %v853_v14  ;;  %v837_v8 = vrot.slane %v836_v19, 4  ;;  %v5902_v21 = vld [vmem:[#allocation22_spill] sm:$0xff] }
  0x84   :  { %5900 = vst [vmem:[#allocation68_spill] sm:$0xff] %v3744_v31  ;;  %v799_v11 = vrot.slane %v798_v2, 1  ;;  %v819_v53 = vadd.f32 %v818_v42, %v817_v7  ;;  %v874_v59 = vmul.f32 %v3742_v22, %v5883_v41  ;;  %v875_v34 = vmul.f32 %v3744_v31, %v3649_v63  ;;  %v3759_v7 = vld [vmem:[#allocation5 + $0xc8] sm:$0xff] }
  0x85   :  { %5901 = vst [vmem:[#allocation69_spill] sm:$0xff] %v3752_v0  ;;  %v2786_v28 = vpop.eup %2785  ;;  %v780_v60 = vmul.f32 0.17677669, %v779_v24  ;;  %v857_v37 = vadd.f32 %v856_v52, %v854_v10  ;;  %v876_v44 = vadd.f32 %v873_v3, %v872_v43  ;;  %v838_v62 = vadd.f32 %v837_v8, %v836_v19  ;;  %v3764_v43 = vld [vmem:[#allocation5 + $0xd0] sm:$0xff]  ;;  %v3766_v3 = vld [vmem:[#allocation5 + $0xd8] sm:$0xff] }
  0x86   :  { %v3757_v58 = vmul.f32 %v2786_v28, %v5902_v21  ;;  %v800_v14 = vadd.f32 %v799_v11, %v798_v2  ;;  %v820_v46 = vrot.slane %v819_v53, 1  ;;  %5903 = vst [vmem:[#allocation22_spill] sm:$0xff] %v3759_v7  ;;  %v893_v30 = vmul.f32 %v3752_v0, %v5879_v1  ;;  %v3773_v21 = vld [vmem:[#allocation5 + $0xe0] sm:$0xff] }
  0x87   :  { %v781_v26 = vmul.f32 1.442695, %v780_v60  ;;  %v858_v42 = vrot.slane %v857_v37, 4  ;;  %v877_v22 = vadd.f32 %v876_v44, %v874_v59  ;;  %v839_v31 = vrot.slane %v838_v62, 2  ;;  %5904 = vst [vmem:[#allocation70_spill] sm:$0xff] %v3764_v43  ;;  %v5906_v59 = vld [vmem:[#allocation23_spill] sm:$0xff] }
  0x88   :  { %v611_v10 = vadd.f32 %v610_v45, %v3757_v58  ;;  %v801_v24 = vmul.f32 0.17677669, %v800_v14  ;;  %v821_v52 = vadd.f32 %v820_v46, %v819_v53  ;;  %5905 = vst [vmem:[#allocation71_spill] sm:$0xff] %v3766_v3  ;;  %v894_v8 = vmul.f32 %v3759_v7, %v5882_v47 }
  0x89   :  { %v2788_v2 = vpop.eup %2787  ;;  %2789 = vpow2.f32 %v781_v26  ;;  %v859_v19 = vadd.f32 %v858_v42, %v857_v37  ;;  %v878_v11 = vadd.f32 %v877_v22, %v875_v34  ;;  %v840_v45 = vadd.f32 %v839_v31, %v838_v62  ;;  %5907 = vst [vmem:[#allocation23_spill] sm:$0xff] %v3773_v21  ;;  %v3779_v22 = vld [vmem:[#allocation5 + $0xe8] sm:$0xff] }
  0x8a   :  { %v3771_v28 = vmul.f32 %v2788_v2, %v5906_v59  ;;  %v802_v60 = vmul.f32 1.442695, %v801_v24  ;;  %v822_v44 = vmul.f32 0.17677669, %v821_v52  ;;  %v895_v46 = vmul.f32 %v3764_v43, %v5883_v41  ;;  %5908 = vst [vmem:[#allocation72_spill] sm:$0xff] %v3779_v22  ;;  %v3782_v24 = vld [vmem:[#allocation5 + $0xf0] sm:$0xff] }
  0x8b   :  { %v860_v53 = vrot.slane %v859_v19, 2  ;;  %v879_v14 = vrot.slane %v878_v11, 4  ;;  %v896_v37 = vmul.f32 %v3766_v3, %v3649_v63  ;;  %v841_v42 = vrot.slane %v840_v45, 1  ;;  %5909 = vst [vmem:[#allocation73_spill] sm:$0xff] %v3782_v24  ;;  %v3784_v2 = vld [vmem:[#allocation5 + $0xf8] sm:$0xff] }
  0x8c   :  { %v612_v34 = vadd.f32 %v611_v10, %v3771_v28  ;;  %2791 = vpow2.f32 %v802_v60  ;;  %v823_v26 = vmul.f32 1.442695, %v822_v44  ;;  %v897_v52 = vadd.f32 %v894_v8, %v893_v30  ;;  %5910 = vst [vmem:[#allocation74_spill] sm:$0xff] %v3784_v2  ;;  %v3794_v30 = vld [vmem:[#allocation2 + $0x68] sm:$0xff]  ;;  %v3796_v8 = vld [vmem:[#allocation2 + $0x70] sm:$0xff] }
  0x8d   :  { %v861_v31 = vadd.f32 %v860_v53, %v859_v19  ;;  %v880_v62 = vadd.f32 %v879_v14, %v878_v11  ;;  %v914_v59 = vmul.f32 %v3773_v21, %v5879_v1  ;;  %v842_v3 = vadd.f32 %v841_v42, %v840_v45  ;;  %v3792_v11 = vld [vmem:[#allocation2 + $0x60] sm:$0xff]  ;;  %5912 = vst [vmem:[#allocation76_spill] sm:$0xff] %v3794_v30  ;;  %v5914_v1 = vld [vmem:[#allocation18_spill] sm:$0xff]  ;;  %v3803_v42 = vld [vmem:[#allocation2 + $0x78] sm:$0xff] }
  0x8e   :  { %v613_v43 = vadd.f32 1e-08, %v612_v34  ;;  %2793 = vpow2.f32 %v823_v26  ;;  %v915_v7 = vmul.f32 %v3779_v22, %v5882_v47  ;;  %v898_v0 = vadd.f32 %v897_v52, %v895_v46  ;;  %5911 = vst [vmem:[#allocation75_spill] sm:$0xff] %v3792_v11  ;;  %v5917_v21 = vld [vmem:[#allocation28_spill] sm:$0xff] }
  0x8f   :  { %v2790_v10 = vpop.eup %2789  ;;  %v862_v60 = vrot.slane %v861_v31, 1  ;;  %v881_v44 = vrot.slane %v880_v62, 2  ;;  %v916_v19 = vmul.f32 %v3782_v24, %v5883_v41  ;;  %5913 = vst [vmem:[#allocation77_spill] sm:$0xff] %v3796_v8  ;;  %v843_v45 = vmul.f32 0.17677669, %v842_v3  ;;  %v5916_v24 = vld [vmem:[#allocation25_spill] sm:$0xff] }
  0x90   :  { %2795 = vrcp.f32 %v613_v43  ;;  %v3799_v53 = vmul.f32 %v2790_v10, %v5914_v1  ;;  %v917_v47 = vmul.f32 %v3784_v2, %v3649_v63  ;;  %v899_v46 = vadd.f32 %v898_v0, %v896_v37  ;;  %5915 = vst [vmem:[#allocation18_spill] sm:$0xff] %v3803_v42  ;;  %v5918_v10 = vld [vmem:[#allocation29_spill] sm:$0xff]  ;;  %v5919_v1 = vld [vmem:[#allocation19_spill] sm:$0xff] }
  0x91   :  { %v863_v14 = vadd.f32 %v862_v60, %v861_v31  ;;  %v882_v34 = vadd.f32 %v881_v44, %v880_v62  ;;  %v918_v26 = vadd.f32 %v915_v7, %v914_v59  ;;  %v844_v52 = vmul.f32 1.442695, %v843_v45 }
  0x92   :  { %v2792_v41 = vpop.eup %2791  ;;  %v1092_v22 = vmul.f32 %v3792_v11, %v5916_v24  ;;  %v1093_v43 = vmul.f32 %v3794_v30, %v5917_v21  ;;  %v1094_v3 = vmul.f32 %v3796_v8, %v5918_v10  ;;  %v900_v0 = vrot.slane %v899_v46, 4  ;;  %v5946_v8 = vld [vmem:[#allocation51_spill] sm:$0xff] }
  0x93   :  { %v3812_v56 = vmul.f32 %v2792_v41, %v5919_v1  ;;  %v864_v63 = vmul.f32 0.17677669, %v863_v14  ;;  %v883_v31 = vrot.slane %v882_v34, 1  ;;  %2797 = vpow2.f32 %v844_v52 }
  0x94   :  { %v2794_v7 = vpop.eup %2793  ;;  %v919_v37 = vadd.f32 %v918_v26, %v916_v19  ;;  %v3816_v62 = vmul.f32 %v3803_v42, %v3651_v17  ;;  %v1096_v24 = vadd.f32 %v1093_v43, %v1092_v22  ;;  %v3825_v44 = vadd.f32 %v900_v0, %v899_v46  ;;  %v5929_v0 = vld [vmem:[#allocation34_spill] sm:$0xff]  ;;  %v5944_v42 = vld [vmem:[#allocation49_spill] sm:$0xff] }
  0x95   :  { %5920 = vst [vmem:[#allocation25_spill] sm:$0xff] %v3812_v56  ;;  %v3819_v59 = vmul.f32 %v2794_v7, %v3296_v61  ;;  %v3821_v21 = vmul.f32 1.442695, %v864_v63  ;;  %v3823_v60 = vadd.f32 %v883_v31, %v882_v34  ;;  %v3833_v19 = vmul.f32 %v3792_v11, %v3654_v13  ;;  %v5928_v63 = vld [vmem:[#allocation33_spill] sm:$0xff] }
  0x96   :  { %5921 = vst [vmem:[#allocation28_spill] sm:$0xff] %v3816_v62  ;;  %v2796_v45 = vpop.eup %2795  ;;  %v3827_v14 = vadd.f32 %v919_v37, %v917_v47  ;;  %v3829_v41 = vadd.f32 %v1096_v24, %v1094_v3  ;;  %v3837_v17 = vmul.f32 %v3794_v30, %v3659_v15  ;;  %v5927_v3 = vld [vmem:[#allocation32_spill] sm:$0xff]  ;;  %v5930_v37 = vld [vmem:[#allocation35_spill] sm:$0xff]  ;;  %v5948_v62 = vld [vmem:[#allocation53_spill] sm:$0xff] }
  0x97   :  { %5922 = vst [vmem:[#allocation29_spill] sm:$0xff] %v3819_v59  ;;  %v3840_v61 = vmul.f32 %v2796_v45, %v3381_v9  ;;  %v3843_v22 = vmul.f32 %v2796_v45, %v3418_v55  ;;  %v3846_v34 = vmul.f32 %v2796_v45, %v3633_v6  ;;  %v3849_v47 = vmul.f32 %v2796_v45, %v3638_v49 }
  0x98   :  { %5923 = vst [vmem:[#allocation19_spill] sm:$0xff] %v3829_v41  ;;  %v3852_v46 = vmul.f32 %v2796_v45, %v3701_v25  ;;  %v3855_v13 = vmul.f32 %v2796_v45, %v3715_v18  ;;  %v3858_v15 = vmul.f32 %v2796_v45, %v3757_v58  ;;  %v3861_v9 = vmul.f32 %v2796_v45, %v3771_v28  ;;  %v5926_v28 = vld [vmem:[#allocation31_spill] sm:$0xff]  ;;  %v5931_v45 = vld [vmem:[#allocation36_spill] sm:$0xff] }
  0x99   :  { %5924 = vst [vmem:[#allocation78_spill] sm:$0xff] %v3833_v19  ;;  %v627_v55 = vperm.slane %v3840_v61, 0  ;;  %v636_v6 = vperm.slane %v3843_v22, 0  ;;  %v649_v26 = vperm.slane %v3846_v34, 0  ;;  %v662_v49 = vperm.slane %v3849_v47, 0  ;;  %v3867_v52 = vpop.eup %2797  ;;  %v5947_v41 = vld [vmem:[#allocation52_spill] sm:$0xff] }
  0x9a   :  { %5925 = vst [vmem:[#allocation79_spill] sm:$0xff] %v3837_v17  ;;  %v675_v25 = vperm.slane %v3852_v46, 0  ;;  %v688_v18 = vperm.slane %v3855_v13, 0  ;;  %v701_v58 = vperm.slane %v3858_v15, 0  ;;  %v714_v43 = vperm.slane %v3861_v9, 0 }
  0x9b   :  { %v628_v10 = vmul.f32 %v627_v55, %v5926_v28  ;;  %v637_v1 = vmul.f32 %v636_v6, %v5927_v3  ;;  %v650_v31 = vmul.f32 %v649_v26, %v5928_v63  ;;  %v663_v7 = vmul.f32 %v662_v49, %v5929_v0  ;;  %v5936_v28 = vld [vmem:[#allocation41_spill] sm:$0xff]  ;;  %v5937_v3 = vld [vmem:[#allocation42_spill] sm:$0xff]  ;;  %v5938_v63 = vld [vmem:[#allocation43_spill] sm:$0xff] }
  0x9c   :  { %v676_v24 = vmul.f32 %v675_v25, %v5930_v37  ;;  %v689_v2 = vmul.f32 %v688_v18, %v5931_v45  ;;  %v702_v48 = vmul.f32 %v701_v58, %v5932_v35  ;;  %v715_v39 = vmul.f32 %v714_v43, %v5933_v23  ;;  %v5939_v0 = vld [vmem:[#allocation44_spill] sm:$0xff]  ;;  %v5940_v37 = vld [vmem:[#allocation45_spill] sm:$0xff]  ;;  %v5941_v35 = vld [vmem:[#allocation46_spill] sm:$0xff] }
  0x9d   :  { %v641_v54 = vadd.f32 %v637_v1, %v628_v10  ;;  %v629_v33 = vmul.f32 %v627_v55, %v5934_v38  ;;  %v638_v5 = vmul.f32 %v636_v6, %v5935_v32  ;;  %v651_v36 = vmul.f32 %v649_v26, %v5936_v28  ;;  %v5942_v23 = vld [vmem:[#allocation47_spill] sm:$0xff]  ;;  %v5943_v1 = vld [vmem:[#allocation48_spill] sm:$0xff] }
  0x9e   :  { %v664_v30 = vmul.f32 %v662_v49, %v5937_v3  ;;  %v677_v29 = vmul.f32 %v675_v25, %v5938_v63  ;;  %v690_v11 = vmul.f32 %v688_v18, %v5939_v0  ;;  %v703_v16 = vmul.f32 %v701_v58, %v5940_v37 }
  0x9f   :  { %v654_v45 = vadd.f32 %v650_v31, %v641_v54  ;;  %v642_v17 = vadd.f32 %v638_v5, %v629_v33  ;;  %v716_v19 = vmul.f32 %v714_v43, %v5941_v35  ;;  %v630_v10 = vmul.f32 %v627_v55, %v5942_v23  ;;  %v5949_v5 = vld [vmem:[#allocation54_spill] sm:$0xff]  ;;  %v5950_v31 = vld [vmem:[#allocation55_spill] sm:$0xff]  ;;  %v5951_v23 = vld [vmem:[#allocation56_spill] sm:$0xff] }
  0xa0   :  { %v639_v38 = vmul.f32 %v636_v6, %v5943_v1  ;;  %v652_v32 = vmul.f32 %v649_v26, %v5944_v42  ;;  %v665_v28 = vmul.f32 %v662_v49, %v5945_v50  ;;  %v678_v3 = vmul.f32 %v675_v25, %v5946_v8 }
  0xa1   :  { %v667_v40 = vadd.f32 %v663_v7, %v654_v45  ;;  %v655_v63 = vadd.f32 %v651_v36, %v642_v17  ;;  %v691_v0 = vmul.f32 %v688_v18, %v5947_v41  ;;  %v704_v37 = vmul.f32 %v701_v58, %v5948_v62 }
  0xa2   :  { %v643_v54 = vadd.f32 %v639_v38, %v630_v10  ;;  %v717_v33 = vmul.f32 %v714_v43, %v5949_v5  ;;  %v631_v35 = vmul.f32 %v627_v55, %v5950_v31  ;;  %v640_v59 = vmul.f32 %v636_v6, %v5951_v23  ;;  %v5956_v31 = vld [vmem:[#allocation57_spill] sm:$0xff] }
  0xa3   :  { %v680_v1 = vadd.f32 %v676_v24, %v667_v40  ;;  %v668_v56 = vadd.f32 %v664_v30, %v655_v63  ;;  %v653_v42 = vmul.f32 %v649_v26, %v3585_v27  ;;  %v666_v50 = vmul.f32 %v662_v49, %v3587_v4 }
  0xa4   :  { %v656_v8 = vadd.f32 %v652_v32, %v643_v54  ;;  %v644_v7 = vadd.f32 %v640_v59, %v631_v35  ;;  %v679_v36 = vmul.f32 %v675_v25, %v3593_v51  ;;  %v692_v41 = vmul.f32 %v688_v18, %v3595_v12  ;;  %v5955_v54 = vld [vmem:[#allocation19_spill] sm:$0xff] }
  0xa5   :  { %v693_v62 = vadd.f32 %v689_v2, %v680_v1  ;;  %v681_v17 = vadd.f32 %v677_v29, %v668_v56  ;;  %v705_v45 = vmul.f32 %v701_v58, %v3603_v20  ;;  %v718_v55 = vmul.f32 %v714_v43, %v3605_v57 }
  0xa6   :  { %v669_v10 = vadd.f32 %v665_v28, %v656_v8  ;;  %v657_v6 = vadd.f32 %v653_v42, %v644_v7  ;;  %v729_v40 = vrot.slane %v3843_v22, 7  ;;  %v732_v27 = vrot.slane %v3846_v34, 6  ;;  %v5953_v28 = vld [vmem:[#allocation29_spill] sm:$0xff]  ;;  %v5958_v42 = vld [vmem:[#allocation58_spill] sm:$0xff]  ;;  %v5961_v7 = vld [vmem:[#allocation79_spill] sm:$0xff] }
  0xa7   :  { %v706_v30 = vadd.f32 %v702_v48, %v693_v62  ;;  %v694_v4 = vadd.f32 %v690_v11, %v681_v17  ;;  %v735_v59 = vrot.slane %v3849_v47, 5  ;;  %v738_v51 = vrot.slane %v3852_v46, 4  ;;  %v3915_v47 = vld [vmem:[#allocation8 + $0x3] sm:$0x1] }
  0xa8   :  { %v682_v26 = vadd.f32 %v678_v3, %v669_v10  ;;  %v670_v12 = vadd.f32 %v666_v50, %v657_v6  ;;  %v741_v29 = vrot.slane %v3855_v13, 3  ;;  %v744_v20 = vrot.slane %v3858_v15, 2  ;;  %v5959_v50 = vld [vmem:[#allocation18_spill] sm:$0xff]  ;;  %v5964_v10 = vld [vmem:[#allocation75_spill] sm:$0xff] }
  0xa9   :  { %v719_v56 = vadd.f32 %v715_v39, %v706_v30  ;;  %v707_v57 = vadd.f32 %v703_v16, %v694_v4  ;;  %v747_v2 = vrot.slane %v3861_v9, 1  ;;  %v749_v22 = vsel %vm418_vm0, %v3840_v61, %v729_v40  ;;  %v5965_v30 = vld [vmem:[#allocation59_spill] sm:$0xff]  ;;  %v5966_v4 = vld [vmem:[#allocation76_spill] sm:$0xff] }
  0xaa   :  { %v695_v34 = vadd.f32 %v691_v0, %v682_v26  ;;  %v683_v48 = vadd.f32 %v679_v36, %v670_v12  ;;  %v750_v11 = vsel %vm420_vm1, %v749_v22, %v732_v27  ;;  %v3919_v46 = vmul.f32 %v3915_v47, %v3867_v52 }
  0xab   :  { %724 = vst [vmem:[#allocation10 + $0x20] sm:$0xff] %v719_v56  ;;  %v720_v13 = vadd.f32 %v716_v19, %v707_v57  ;;  %v751_v39 = vsel %vm422_vm2, %v750_v11, %v735_v59  ;;  %2799 = vpow2.f32 %v3821_v21  ;;  %v885_v16 = vmul.f32 0.17677669, %v3823_v60  ;;  %v5952_v19 = vld [vmem:[#allocation25_spill] sm:$0xff]  ;;  %v5968_v56 = vld [vmem:[#allocation27_spill] sm:$0xff]  ;;  %v5969_v11 = vld [vmem:[#allocation30_spill] sm:$0xff] }
  0xac   :  { %v708_v15 = vadd.f32 %v704_v37, %v695_v34  ;;  %v696_v61 = vadd.f32 %v692_v41, %v683_v48  ;;  %v752_v9 = vsel %vm424_vm3, %v751_v39, %v738_v51  ;;  %v902_v49 = vrot.slane %v3825_v44, 2  ;;  %v5954_v37 = vld [vmem:[#allocation28_spill] sm:$0xff]  ;;  %v3944_v41 = vld [vmem:[#allocation8 + $0x4] sm:$0x1]  ;;  %v5967_v51 = vld [vmem:[#allocation26_spill] sm:$0xff] }
  0xad   :  { %725 = vst [vmem:[#allocation10 + $0x28] sm:$0xff] %v720_v13  ;;  %v753_v25 = vsel %vm426_vm4, %v752_v9, %v741_v29  ;;  %v886_v18 = vmul.f32 1.442695, %v885_v16  ;;  %v921_v52 = vrot.slane %v3827_v14, 4  ;;  %v931_v58 = vadd.f32 %v5952_v19, %v3799_v53  ;;  %v3960_v39 = vld [vmem:[#allocation8 + $0x5] sm:$0x1] }
  0xae   :  { %v721_v43 = vadd.f32 %v717_v33, %v708_v15  ;;  %v709_v24 = vadd.f32 %v705_v45, %v696_v61  ;;  %v754_v21 = vsel %vm428_vm5, %v753_v25, %v744_v20  ;;  %v903_v60 = vadd.f32 %v902_v49, %v3825_v44  ;;  %v5957_v33 = vld [vmem:[#allocation77_spill] sm:$0xff]  ;;  %5962 = vst [vmem:[#allocation31_spill] sm:$0xff] %v3944_v41  ;;  %v5971_v9 = vld [vmem:[#allocation60_spill] sm:$0xff] }
  0xaf   :  { %v755_v38 = vsel %vm430_vm6, %v754_v21, %v747_v2  ;;  %2801 = vpow2.f32 %v886_v18  ;;  %v922_v32 = vadd.f32 %v921_v52, %v3827_v14  ;;  %v932_v3 = vadd.f32 %v931_v58, %v5953_v28  ;;  %v5960_v14 = vld [vmem:[#allocation78_spill] sm:$0xff]  ;;  %5970 = vst [vmem:[#allocation32_spill] sm:$0xff] %v3960_v39  ;;  %v5972_v58 = vld [vmem:[#allocation20_spill] sm:$0xff] }
  0xb0   :  { %726 = vst [vmem:[#allocation10 + $0x30] sm:$0xff] %v721_v43  ;;  %v722_v63 = vadd.f32 %v718_v55, %v709_v24  ;;  %v904_v0 = vrot.slane %v903_v60, 1  ;;  %v1098_v5 = vadd.f32 %v5955_v54, %v5954_v37  ;;  %v1115_v35 = vmul.f32 %v5957_v33, %v5956_v31  ;;  %v5963_v55 = vld [vmem:[#allocation24_spill] sm:$0xff]  ;;  %v5974_v54 = vld [vmem:[#allocation21_spill] sm:$0xff]  ;;  %v5975_v31 = vld [vmem:[#allocation62_spill] sm:$0xff] }
  0xb1   :  { %v2800_v23 = vpop.eup %2799  ;;  %757 = vst [vmem:[#allocation11 + $0x8] sm:$0xff] %v755_v38  ;;  %v923_v1 = vrot.slane %v922_v32, 2  ;;  %v933_v44 = vadd.f32 %v932_v3, %v3919_v46  ;;  %v1116_v8 = vmul.f32 %v5959_v50, %v5958_v42  ;;  %v1117_v36 = vadd.f32 %v5961_v7, %v5960_v14 }
  0xb2   :  { %727 = vst [vmem:[#allocation10 + $0x38] sm:$0xff] %v722_v63  ;;  %v3947_v62 = vmul.f32 %v3944_v41, %v2800_v23  ;;  %v905_v17 = vadd.f32 %v904_v0, %v903_v60  ;;  %v1099_v45 = vrot.slane %v1098_v5, 4  ;;  %v1134_v6 = vmul.f32 %v5964_v10, %v5963_v55  ;;  %v5973_v60 = vld [vmem:[#allocation61_spill] sm:$0xff]  ;;  %v5976_v23 = vld [vmem:[#allocation63_spill] sm:$0xff] }
  0xb3   :  { %v924_v40 = vadd.f32 %v923_v1, %v922_v32  ;;  %v1118_v27 = vadd.f32 %v1117_v36, %v1115_v35  ;;  %v1135_v59 = vmul.f32 %v5966_v4, %v5965_v30  ;;  %v1136_v26 = vmul.f32 %v5957_v33, %v5967_v51  ;;  %v5977_v36 = vld [vmem:[#allocation64_spill] sm:$0xff]  ;;  %v5978_v55 = vld [vmem:[#allocation65_spill] sm:$0xff] }
  0xb4   :  { %v906_v12 = vmul.f32 0.17677669, %v905_v17  ;;  %v934_v29 = vadd.f32 %v933_v44, %v3947_v62  ;;  %v1100_v20 = vadd.f32 %v1099_v45, %v1098_v5  ;;  %v1137_v57 = vmul.f32 %v5959_v50, %v5968_v56 }
  0xb5   :  { %v2802_v2 = vpop.eup %2801  ;;  %v925_v22 = vrot.slane %v924_v40, 1  ;;  %v1119_v34 = vadd.f32 %v1118_v27, %v1116_v8  ;;  %v1138_v48 = vadd.f32 %v1135_v59, %v1134_v6  ;;  %v1155_v13 = vmul.f32 %v5964_v10, %v5969_v11 }
  0xb6   :  { %v3963_v16 = vmul.f32 %v3960_v39, %v2802_v2  ;;  %v907_v15 = vmul.f32 1.442695, %v906_v12  ;;  %v1101_v61 = vrot.slane %v1100_v20, 2  ;;  %v1156_v49 = vmul.f32 %v5966_v4, %v5971_v9  ;;  %v5979_v12 = vld [vmem:[#allocation66_spill] sm:$0xff] }
  0xb7   :  { %v926_v25 = vadd.f32 %v925_v22, %v924_v40  ;;  %v1120_v18 = vrot.slane %v1119_v34, 4  ;;  %v1139_v52 = vadd.f32 %v1138_v48, %v1136_v26  ;;  %v1157_v43 = vmul.f32 %v5957_v33, %v5972_v58 }
  0xb8   :  { %2803 = vpow2.f32 %v907_v15  ;;  %v935_v24 = vadd.f32 %v934_v29, %v3963_v16  ;;  %v1102_v21 = vadd.f32 %v1101_v61, %v1100_v20  ;;  %v1158_v38 = vmul.f32 %v5959_v50, %v5973_v60  ;;  %v5980_v20 = vld [vmem:[#allocation67_spill] sm:$0xff]  ;;  %v5982_v15 = vld [vmem:[#allocation68_spill] sm:$0xff] }
  0xb9   :  { %v927_v32 = vmul.f32 0.17677669, %v926_v25  ;;  %v1121_v3 = vadd.f32 %v1120_v18, %v1119_v34  ;;  %v1140_v63 = vadd.f32 %v1139_v52, %v1137_v57  ;;  %v1159_v0 = vadd.f32 %v1156_v49, %v1155_v13  ;;  %v3986_v57 = vld [vmem:[#allocation8 + $0x6] sm:$0x1] }
  0xba   :  { %v1103_v37 = vrot.slane %v1102_v21, 1  ;;  %v1176_v5 = vmul.f32 %v5964_v10, %v5974_v54  ;;  %v1177_v35 = vmul.f32 %v5966_v4, %v5975_v31  ;;  %v1178_v1 = vmul.f32 %v5957_v33, %v5976_v23  ;;  %5981 = vst [vmem:[#allocation33_spill] sm:$0xff] %v3986_v57  ;;  %v3998_v54 = vld [vmem:[#allocation8 + $0x7] sm:$0x1] }
  0xbb   :  { %v928_v44 = vmul.f32 1.442695, %v927_v32  ;;  %v1122_v42 = vrot.slane %v1121_v3, 2  ;;  %v1141_v8 = vrot.slane %v1140_v63, 4  ;;  %v1160_v14 = vadd.f32 %v1159_v0, %v1157_v43  ;;  %v5984_v0 = vld [vmem:[#allocation22_spill] sm:$0xff]  ;;  %5985 = vst [vmem:[#allocation34_spill] sm:$0xff] %v3998_v54 }
  0xbc   :  { %v1104_v7 = vadd.f32 %v1103_v37, %v1102_v21  ;;  %v1179_v17 = vmul.f32 %v5959_v50, %v5977_v36  ;;  %v1180_v45 = vadd.f32 %v1177_v35, %v1176_v5  ;;  %v1197_v6 = vmul.f32 %v5964_v10, %v5978_v55  ;;  %v5983_v21 = vld [vmem:[#allocation69_spill] sm:$0xff]  ;;  %v5986_v35 = vld [vmem:[#allocation70_spill] sm:$0xff] }
  0xbd   :  { %2805 = vpow2.f32 %v928_v44  ;;  %v1123_v40 = vadd.f32 %v1122_v42, %v1121_v3  ;;  %v1142_v27 = vadd.f32 %v1141_v8, %v1140_v63  ;;  %v1161_v30 = vadd.f32 %v1160_v14, %v1158_v38  ;;  %v5987_v8 = vld [vmem:[#allocation71_spill] sm:$0xff] }
  0xbe   :  { %v2804_v59 = vpop.eup %2803  ;;  %v1105_v51 = vmul.f32 0.17677669, %v1104_v7  ;;  %v1181_v26 = vadd.f32 %v1180_v45, %v1178_v1  ;;  %v1198_v29 = vmul.f32 %v5966_v4, %v5979_v12  ;;  %v1199_v56 = vmul.f32 %v5957_v33, %v5980_v20 }
  0xbf   :  { %v3989_v2 = vmul.f32 %v3986_v57, %v2804_v59  ;;  %v1124_v22 = vrot.slane %v1123_v40, 1  ;;  %v1143_v34 = vrot.slane %v1142_v27, 2  ;;  %v1162_v48 = vrot.slane %v1161_v30, 4 }
  0xc0   :  { %v1106_v11 = vmul.f32 1.442695, %v1105_v51  ;;  %v1182_v13 = vadd.f32 %v1181_v26, %v1179_v17  ;;  %v1200_v61 = vmul.f32 %v5959_v50, %v5982_v15  ;;  %v1201_v9 = vadd.f32 %v1198_v29, %v1197_v6  ;;  %v4010_v29 = vld [vmem:[#allocation8] sm:$0x1] }
  0xc1   :  { %v936_v49 = vadd.f32 %v935_v24, %v3989_v2  ;;  %v1125_v25 = vadd.f32 %v1124_v22, %v1123_v40  ;;  %v1144_v18 = vadd.f32 %v1143_v34, %v1142_v27  ;;  %v1163_v52 = vadd.f32 %v1162_v48, %v1161_v30  ;;  %v5988_v40 = vld [vmem:[#allocation23_spill] sm:$0xff]  ;;  %5989 = vst [vmem:[#allocation35_spill] sm:$0xff] %v4010_v29  ;;  %v5990_v34 = vld [vmem:[#allocation72_spill] sm:$0xff] }
  0xc2   :  { %2807 = vpow2.f32 %v1106_v11  ;;  %v1183_v58 = vrot.slane %v1182_v13, 4  ;;  %v1202_v43 = vadd.f32 %v1201_v9, %v1199_v56  ;;  %v1218_v60 = vmul.f32 %v5964_v10, %v5983_v21  ;;  %v4017_v11 = vld [vmem:[#allocation2 + $0x80] sm:$0xff] }
  0xc3   :  { %v2806_v38 = vpop.eup %2805  ;;  %v1126_v32 = vmul.f32 0.17677669, %v1125_v25  ;;  %v1145_v3 = vrot.slane %v1144_v18, 1  ;;  %v1164_v63 = vrot.slane %v1163_v52, 2  ;;  %v1219_v37 = vmul.f32 %v5966_v4, %v5984_v0  ;;  %5991 = vst [vmem:[#allocation36_spill] sm:$0xff] %v4017_v11  ;;  %v4025_v25 = vld [vmem:[#allocation5 + $0x8] sm:$0xff] }
  0xc4   :  { %v4001_v24 = vmul.f32 %v3998_v54, %v2806_v38  ;;  %v1184_v5 = vadd.f32 %v1183_v58, %v1182_v13  ;;  %v1203_v31 = vadd.f32 %v1202_v43, %v1200_v61  ;;  %v1220_v23 = vmul.f32 %v5957_v33, %v5986_v35  ;;  %v4019_v13 = vld [vmem:[#allocation2 + $0x88] sm:$0xff]  ;;  %5994 = vst [vmem:[#allocation37_spill] sm:$0xff] %v4025_v25  ;;  %v5996_v58 = vld [vmem:[#allocation73_spill] sm:$0xff]  ;;  %v4037_v0 = vld [vmem:[#allocation5 + $0x18] sm:$0xff] }
  0xc5   :  { %v1127_v1 = vmul.f32 1.442695, %v1126_v32  ;;  %v1146_v44 = vadd.f32 %v1145_v3, %v1144_v18  ;;  %v1165_v42 = vadd.f32 %v1164_v63, %v1163_v52  ;;  %v1221_v14 = vmul.f32 %v5959_v50, %v5987_v8  ;;  %v4027_v18 = vld [vmem:[#allocation5 + $0x10] sm:$0xff]  ;;  %v5997_v43 = vld [vmem:[#allocation74_spill] sm:$0xff]  ;;  %v4035_v63 = vld [vmem:[#allocation2 + $0x98] sm:$0xff]  ;;  %5999 = vst [vmem:[#allocation42_spill] sm:$0xff] %v4037_v0 }
  0xc6   :  { %v937_v7 = vadd.f32 %v936_v49, %v4001_v24  ;;  %v1185_v36 = vrot.slane %v1184_v5, 2  ;;  %v1204_v17 = vrot.slane %v1203_v31, 4  ;;  %v1222_v45 = vadd.f32 %v1219_v37, %v1218_v60  ;;  %v4023_v49 = vld [vmem:[#allocation5] sm:$0xff]  ;;  %5995 = vst [vmem:[#allocation38_spill] sm:$0xff] %v4027_v18 }
  0xc7   :  { %2809 = vpow2.f32 %v1127_v1  ;;  %v1147_v55 = vmul.f32 0.17677669, %v1146_v44  ;;  %v1166_v6 = vrot.slane %v1165_v42, 1  ;;  %v1239_v27 = vmul.f32 %v5964_v10, %v5988_v40  ;;  %v4021_v10 = vld [vmem:[#allocation2 + $0x90] sm:$0xff]  ;;  %5993 = vst [vmem:[#allocation40_spill] sm:$0xff] %v4023_v49  ;;  %v4047_v35 = vld [vmem:[#allocation5 + $0x20] sm:$0xff] }
  0xc8   :  { %v2808_v30 = vpop.eup %2807  ;;  %v938_v59 = vadd.f32 1e-08, %v937_v7  ;;  %v1186_v51 = vadd.f32 %v1185_v36, %v1184_v5  ;;  %v1205_v26 = vadd.f32 %v1204_v17, %v1203_v31  ;;  %v1223_v12 = vadd.f32 %v1222_v45, %v1220_v23  ;;  %5992 = vst [vmem:[#allocation39_spill] sm:$0xff] %v4021_v10  ;;  %v4049_v23 = vld [vmem:[#allocation8 + $0x1] sm:$0x1] }
  0xc9   :  { %v4013_v20 = vmul.f32 %v4010_v29, %v2808_v30  ;;  %v1148_v56 = vmul.f32 1.442695, %v1147_v55  ;;  %v1167_v22 = vadd.f32 %v1166_v6, %v1165_v42  ;;  %v1240_v48 = vmul.f32 %v5966_v4, %v5990_v34  ;;  %5998 = vst [vmem:[#allocation41_spill] sm:$0xff] %v4035_v63  ;;  %v4155_v6 = vld [vmem:[#allocation7 + $0xc8] sm:$0xff] }
  0xca   :  { %2811 = vrcp.f32 %v938_v59  ;;  %v1187_v15 = vrot.slane %v1186_v51, 1  ;;  %v1206_v61 = vrot.slane %v1205_v26, 2  ;;  %v1224_v9 = vadd.f32 %v1223_v12, %v1221_v14  ;;  %6000 = vst [vmem:[#allocation43_spill] sm:$0xff] %v4047_v35  ;;  %v4087_v12 = vld [vmem:[#allocation7] sm:$0xff] }
  0xcb   :  { %2813 = vpow2.f32 %v1148_v56  ;;  %v1168_v52 = vmul.f32 0.17677669, %v1167_v22  ;;  %v1241_v4 = vmul.f32 %v5957_v33, %v5996_v58  ;;  %v4033_v21 = vmul.f32 %v5959_v50, %v5997_v43  ;;  %6001 = vst [vmem:[#allocation44_spill] sm:$0xff] %v4049_v23  ;;  %v4089_v56 = vld [vmem:[#allocation7 + $0x20] sm:$0xff] }
  0xcc   :  { %v1188_v60 = vadd.f32 %v1187_v15, %v1186_v51  ;;  %v1207_v38 = vadd.f32 %v1206_v61, %v1205_v26  ;;  %v1225_v32 = vrot.slane %v1224_v9, 4  ;;  %v1243_v3 = vadd.f32 %v1240_v48, %v1239_v27  ;;  %6004 = vst [vmem:[#allocation47_spill] sm:$0xff] %v4087_v12  ;;  %v4091_v22 = vld [vmem:[#allocation7 + $0x40] sm:$0xff]  ;;  %v4111_v61 = vld [vmem:[#allocation7 + $0x8] sm:$0xff] }
  0xcd   :  { %v2810_v37 = vpop.eup %2809  ;;  %v1169_v5 = vmul.f32 1.442695, %v1168_v52  ;;  %v1417_v31 = vmul.f32 %v4023_v49, %v4017_v11  ;;  %v1418_v33 = vmul.f32 %v4025_v25, %v4019_v13  ;;  %v4045_v50 = vmul.f32 %v4027_v18, %v4021_v10  ;;  %6005 = vst [vmem:[#allocation48_spill] sm:$0xff] %v4089_v56  ;;  %v4107_v48 = vld [vmem:[#allocation7 + $0x80] sm:$0xff]  ;;  %v4177_v49 = vld [vmem:[#allocation7 + $0x50] sm:$0xff] }
  0xce   :  { %v4052_v1 = vmul.f32 %v4049_v23, %v2810_v37  ;;  %v1189_v44 = vmul.f32 0.17677669, %v1188_v60  ;;  %v1208_v42 = vrot.slane %v1207_v38, 1  ;;  %v4054_v8 = vadd.f32 %v1225_v32, %v1224_v9  ;;  %6006 = vst [vmem:[#allocation49_spill] sm:$0xff] %v4091_v22  ;;  %v4109_v15 = vld [vmem:[#allocation7 + $0xa0] sm:$0xff]  ;;  %v4113_v9 = vld [vmem:[#allocation7 + $0x28] sm:$0xff] }
  0xcf   :  { %2815 = vpow2.f32 %v1169_v5  ;;  %v4056_v14 = vadd.f32 %v1243_v3, %v1241_v4  ;;  %v4060_v7 = vmul.f32 %v4037_v0, %v4035_v63  ;;  %v4062_v36 = vadd.f32 %v1418_v33, %v1417_v31  ;;  %6008 = vst [vmem:[#allocation51_spill] sm:$0xff] %v4107_v48  ;;  %v4123_v52 = vld [vmem:[#allocation7 + $0xc0] sm:$0xff]  ;;  %v4139_v32 = vld [vmem:[#allocation7 + $0x48] sm:$0xff]  ;;  %v4169_v0 = vld [vmem:[#allocation7 + $0x10] sm:$0xff] }
  0xd0   :  { %v2812_v17 = vpop.eup %2811  ;;  %v4064_v45 = vmul.f32 1.442695, %v1189_v44  ;;  %v4066_v55 = vadd.f32 %v1208_v42, %v1207_v38  ;;  %v4071_v40 = vmul.f32 %v4047_v35, %v4017_v11  ;;  %6009 = vst [vmem:[#allocation52_spill] sm:$0xff] %v4109_v15  ;;  %v4125_v58 = vld [vmem:[#allocation7 + $0xe0] sm:$0xff]  ;;  %v4141_v3 = vld [vmem:[#allocation7 + $0x68] sm:$0xff]  ;;  %v4171_v23 = vld [vmem:[#allocation7 + $0x30] sm:$0xff] }
  0xd1   :  { %6002 = vst [vmem:[#allocation45_spill] sm:$0xff] %v4060_v7  ;;  %v4073_v27 = vpop.eup %2813  ;;  %v4076_v30 = vmul.f32 %v2812_v17, %v3799_v53  ;;  %v4079_v59 = vmul.f32 %v2812_v17, %v5952_v19  ;;  %v4082_v51 = vmul.f32 %v2812_v17, %v5953_v28  ;;  %v4085_v26 = vmul.f32 %v2812_v17, %v3919_v46  ;;  %v4105_v46 = vld [vmem:[#allocation7 + $0x60] sm:$0xff]  ;;  %v4151_v42 = vld [vmem:[#allocation7 + $0x88] sm:$0xff]  ;;  %v4198_v11 = vld [vmem:[#allocation7 + $0xf0] sm:$0xff] }
  0xd2   :  { %6003 = vst [vmem:[#allocation46_spill] sm:$0xff] %v4071_v40  ;;  %v4094_v34 = vmul.f32 %v2812_v17, %v3947_v62  ;;  %v4097_v53 = vmul.f32 %v2812_v17, %v3963_v16  ;;  %v4100_v19 = vmul.f32 %v2812_v17, %v3989_v2  ;;  %v4103_v28 = vmul.f32 %v2812_v17, %v4001_v24  ;;  %v4153_v17 = vld [vmem:[#allocation7 + $0xa8] sm:$0xff]  ;;  %v4202_v40 = vld [vmem:[#allocation7 + $0x38] sm:$0xff] }
  0xd3   :  { %6007 = vst [vmem:[#allocation50_spill] sm:$0xff] %v4105_v46  ;;  %v952_v62 = vperm.slane %v4076_v30, 0  ;;  %v961_v16 = vperm.slane %v4079_v59, 0  ;;  %v4118_v2 = vperm.slane %v4082_v51, 0  ;;  %v4121_v24 = vperm.slane %v4085_v26, 0  ;;  %v4219_v7 = vld [vmem:[#allocation7 + $0x98] sm:$0xff] }
  0xd4   :  { %6010 = vst [vmem:[#allocation53_spill] sm:$0xff] %v4111_v61  ;;  %v4128_v4 = vperm.slane %v4094_v34, 0  ;;  %v4131_v43 = vperm.slane %v4097_v53, 0  ;;  %v4134_v60 = vperm.slane %v4100_v19, 0  ;;  %v4137_v38 = vperm.slane %v4103_v28, 0 }
  0xd5   :  { %6011 = vst [vmem:[#allocation54_spill] sm:$0xff] %v4113_v9  ;;  %v4143_v37 = vpop.eup %2815  ;;  %v953_v5 = vmul.f32 %v952_v62, %v4087_v12  ;;  %v962_v31 = vmul.f32 %v961_v16, %v4089_v56  ;;  %v975_v33 = vmul.f32 %v4118_v2, %v4091_v22  ;;  %v988_v44 = vmul.f32 %v4121_v24, %v4105_v46  ;;  %v4167_v46 = vld [vmem:[#allocation7 + $0xe8] sm:$0xff] }
  0xd6   :  { %6012 = vst [vmem:[#allocation55_spill] sm:$0xff] %v4123_v52  ;;  %v1001_v35 = vmul.f32 %v4128_v4, %v4107_v48  ;;  %v1014_v12 = vmul.f32 %v4131_v43, %v4109_v15  ;;  %v1027_v56 = vmul.f32 %v4134_v60, %v4123_v52  ;;  %v4165_v22 = vmul.f32 %v4137_v38, %v4125_v58  ;;  %v4179_v52 = vld [vmem:[#allocation7 + $0x70] sm:$0xff] }
  0xd7   :  { %6013 = vst [vmem:[#allocation56_spill] sm:$0xff] %v4125_v58  ;;  %v966_v18 = vadd.f32 %v962_v31, %v953_v5  ;;  %v954_v25 = vmul.f32 %v952_v62, %v4111_v61  ;;  %v963_v48 = vmul.f32 %v961_v16, %v4113_v9  ;;  %v976_v15 = vmul.f32 %v4118_v2, %v4139_v32  ;;  %v4181_v58 = vld [vmem:[#allocation7 + $0x90] sm:$0xff] }
  0xd8   :  { %6014 = vst [vmem:[#allocation25_spill] sm:$0xff] %v4139_v32  ;;  %v989_v29 = vmul.f32 %v4121_v24, %v4141_v3  ;;  %v1002_v54 = vmul.f32 %v4128_v4, %v4151_v42  ;;  %v1015_v5 = vmul.f32 %v4131_v43, %v4153_v17  ;;  %v1028_v31 = vmul.f32 %v4134_v60, %v4155_v6  ;;  %v4191_v9 = vld [vmem:[#allocation7 + $0xb0] sm:$0xff] }
  0xd9   :  { %6015 = vst [vmem:[#allocation29_spill] sm:$0xff] %v4141_v3  ;;  %v4193_v32 = vld [vmem:[#allocation7 + $0xd0] sm:$0xff]  ;;  %v979_v61 = vadd.f32 %v975_v33, %v966_v18  ;;  %v967_v57 = vadd.f32 %v963_v48, %v954_v25  ;;  %v1041_v39 = vmul.f32 %v4137_v38, %v4167_v46  ;;  %v955_v3 = vmul.f32 %v952_v62, %v4169_v0  ;;  %v4211_v48 = vld [vmem:[#allocation7 + $0x58] sm:$0xff] }
  0xda   :  { %6016 = vst [vmem:[#allocation28_spill] sm:$0xff] %v4151_v42  ;;  %v4200_v42 = vld [vmem:[#allocation7 + $0x18] sm:$0xff]  ;;  %v990_v18 = vmul.f32 %v4121_v24, %v4179_v52  ;;  %v1003_v25 = vmul.f32 %v4128_v4, %v4181_v58  ;;  %v1016_v63 = vmul.f32 %v4131_v43, %v4191_v9  ;;  %v965_v10 = vmul.f32 %v961_v16, %v4202_v40 }
  0xdb   :  { %6017 = vst [vmem:[#allocation19_spill] sm:$0xff] %v4153_v17  ;;  %v964_v17 = vmul.f32 %v961_v16, %v4171_v23  ;;  %v4213_v33 = vld [vmem:[#allocation7 + $0x78] sm:$0xff]  ;;  %v956_v41 = vmul.f32 %v952_v62, %v4200_v42  ;;  %2817 = vpow2.f32 %v4064_v45  ;;  %v4276_v45 = vld [vmem:[#allocation5 + $0x28] sm:$0xff] }
  0xdc   :  { %6018 = vst [vmem:[#allocation57_spill] sm:$0xff] %v4155_v6  ;;  %v977_v6 = vmul.f32 %v4118_v2, %v4177_v49 }
  0xdd   :  { %6019 = vst [vmem:[#allocation77_spill] sm:$0xff] %v4167_v46  ;;  %v980_v46 = vadd.f32 %v976_v15, %v967_v57  ;;  %v4229_v57 = vld [vmem:[#allocation7 + $0xf8] sm:$0xff] }
  0xde   :  { %6020 = vst [vmem:[#allocation58_spill] sm:$0xff] %v4169_v0  ;;  %v992_v0 = vadd.f32 %v988_v44, %v979_v61  ;;  %v4227_v61 = vld [vmem:[#allocation7 + $0xd8] sm:$0xff] }
  0xdf   :  { %6021 = vst [vmem:[#allocation18_spill] sm:$0xff] %v4171_v23  ;;  %v1029_v23 = vmul.f32 %v4134_v60, %v4193_v32  ;;  %v993_v44 = vadd.f32 %v989_v29, %v980_v46  ;;  %v1043_v29 = vmul.f32 %v4137_v38, %v4229_v57 }
  0xe0   :  { %6022 = vst [vmem:[#allocation78_spill] sm:$0xff] %v4177_v49  ;;  %v4221_v49 = vld [vmem:[#allocation7 + $0xb8] sm:$0xff]  ;;  %v1005_v15 = vadd.f32 %v1001_v35, %v992_v0  ;;  %v1030_v0 = vmul.f32 %v4134_v60, %v4227_v61 }
  0xe1   :  { %6023 = vst [vmem:[#allocation79_spill] sm:$0xff] %v4179_v52  ;;  %v968_v52 = vadd.f32 %v964_v17, %v955_v3  ;;  %v969_v17 = vadd.f32 %v965_v10, %v956_v41  ;;  %v1017_v62 = vmul.f32 %v4131_v43, %v4221_v49  ;;  %v1057_v41 = vrot.slane %v4082_v51, 6 }
  0xe2   :  { %6024 = vst [vmem:[#allocation24_spill] sm:$0xff] %v4181_v58  ;;  %v1042_v58 = vmul.f32 %v4137_v38, %v4198_v11  ;;  %v1018_v16 = vadd.f32 %v1014_v12, %v1005_v15  ;;  %v1069_v43 = vrot.slane %v4100_v19, 2  ;;  %v4263_v19 = vmul.f32 %v3915_v47, %v4143_v37 }
  0xe3   :  { %6025 = vst [vmem:[#allocation75_spill] sm:$0xff] %v4191_v9  ;;  %v991_v9 = vmul.f32 %v4121_v24, %v4213_v33  ;;  %v981_v3 = vadd.f32 %v977_v6, %v968_v52  ;;  %v1060_v24 = vrot.slane %v4085_v26, 5  ;;  %v1063_v52 = vrot.slane %v4094_v34, 4 }
  0xe4   :  { %6026 = vst [vmem:[#allocation59_spill] sm:$0xff] %v4193_v32  ;;  %v978_v32 = vmul.f32 %v4118_v2, %v4211_v48  ;;  %v1054_v2 = vrot.slane %v4079_v59, 7  ;;  %v1031_v10 = vadd.f32 %v1027_v56, %v1018_v16  ;;  %v4254_v56 = vld [vmem:[#allocation8 + $0x2] sm:$0x1]  ;;  %v1256_v47 = vadd.f32 %v4052_v1, %v4013_v20  ;;  %v2818_v16 = vpop.eup %2817 }
  0xe5   :  { %6027 = vst [vmem:[#allocation76_spill] sm:$0xff] %v4198_v11  ;;  %v1004_v11 = vmul.f32 %v4128_v4, %v4219_v7  ;;  %v994_v35 = vadd.f32 %v990_v18, %v981_v3  ;;  %v1066_v4 = vrot.slane %v4097_v53, 3  ;;  %v4258_v34 = vmul.f32 %v4254_v56, %v4073_v27  ;;  %v4279_v18 = vld [vmem:[#allocation5 + $0x30] sm:$0xff]  ;;  %v4283_v3 = vld [vmem:[#allocation5 + $0x38] sm:$0xff] }
  0xe6   :  { %6028 = vst [vmem:[#allocation26_spill] sm:$0xff] %v4202_v40  ;;  %v1006_v40 = vadd.f32 %v1002_v54, %v993_v44  ;;  %v982_v46 = vadd.f32 %v978_v32, %v969_v17  ;;  %v1044_v60 = vadd.f32 %v4165_v22, %v1031_v10  ;;  %v1072_v32 = vrot.slane %v4103_v28, 1  ;;  %v4289_v17 = vld [vmem:[#allocation5 + $0x40] sm:$0xff] }
  0xe7   :  { %v1007_v12 = vadd.f32 %v1003_v25, %v994_v35  ;;  %v1074_v59 = vsel %vm418_vm0, %v4076_v30, %v1054_v2  ;;  %v1210_v28 = vmul.f32 0.17677669, %v4066_v55  ;;  %6030 = vst [vmem:[#allocation27_spill] sm:$0xff] %v4279_v18  ;;  %v6034_v2 = vld [vmem:[#allocation39_spill] sm:$0xff]  ;;  %v6037_v10 = vld [vmem:[#allocation45_spill] sm:$0xff] }
  0xe8   :  { %v1019_v6 = vadd.f32 %v1015_v5, %v1006_v40  ;;  %v995_v54 = vadd.f32 %v991_v9, %v982_v46  ;;  %v1075_v26 = vsel %vm420_vm1, %v1074_v59, %v1057_v41  ;;  %1049 = vst [vmem:[#allocation10 + $0x40] sm:$0xff] %v1044_v60  ;;  %v1245_v5 = vadd.f32 %v4056_v14, %v4033_v21  ;;  %v4296_v41 = vld [vmem:[#allocation5 + $0x50] sm:$0xff] }
  0xe9   :  { %v1020_v51 = vadd.f32 %v1016_v63, %v1007_v12  ;;  %v1076_v22 = vsel %vm422_vm2, %v1075_v26, %v1060_v24  ;;  %v1211_v55 = vmul.f32 1.442695, %v1210_v28  ;;  %6031 = vst [vmem:[#allocation30_spill] sm:$0xff] %v4283_v3  ;;  %v1422_v14 = vadd.f32 %v4062_v36, %v4045_v50  ;;  %v6036_v50 = vld [vmem:[#allocation31_spill] sm:$0xff]  ;;  %v6038_v24 = vld [vmem:[#allocation41_spill] sm:$0xff]  ;;  %v6039_v12 = vld [vmem:[#allocation46_spill] sm:$0xff] }
  0xea   :  { %v1032_v38 = vadd.f32 %v1028_v31, %v1019_v6  ;;  %v1008_v40 = vadd.f32 %v1004_v11, %v995_v54  ;;  %v1077_v30 = vsel %vm424_vm3, %v1076_v22, %v1063_v52  ;;  %v1246_v44 = vrot.slane %v1245_v5, 4  ;;  %6032 = vst [vmem:[#allocation60_spill] sm:$0xff] %v4289_v17 }
  0xeb   :  { %v1033_v63 = vadd.f32 %v1029_v23, %v1020_v51  ;;  %v1078_v27 = vsel %vm426_vm4, %v1077_v30, %v1066_v4  ;;  %2819 = vpow2.f32 %v1211_v55  ;;  %6035 = vst [vmem:[#allocation61_spill] sm:$0xff] %v4296_v41  ;;  %v4299_v36 = vmul.f32 %v6036_v50, %v2818_v16  ;;  %v4305_v4 = vld [vmem:[#allocation5 + $0x58] sm:$0xff]  ;;  %v4311_v51 = vld [vmem:[#allocation5 + $0x60] sm:$0xff] }
  0xec   :  { %v1045_v53 = vadd.f32 %v1041_v39, %v1032_v38  ;;  %v1021_v11 = vadd.f32 %v1017_v62, %v1008_v40  ;;  %v6029_v39 = vrot.slane %v4054_v8, 2  ;;  %v1079_v31 = vsel %vm428_vm5, %v1078_v27, %v1069_v43  ;;  %v4291_v62 = vld [vmem:[#allocation5 + $0x48] sm:$0xff]  ;;  %6040 = vst [vmem:[#allocation21_spill] sm:$0xff] %v4305_v4  ;;  %v6041_v38 = vld [vmem:[#allocation36_spill] sm:$0xff] }
  0xed   :  { %v1046_v23 = vadd.f32 %v1042_v58, %v1033_v63  ;;  %v1080_v25 = vsel %vm430_vm6, %v1079_v31, %v1072_v32  ;;  %v1439_v58 = vmul.f32 %v4276_v45, %v4019_v13  ;;  %6033 = vst [vmem:[#allocation20_spill] sm:$0xff] %v4291_v62  ;;  %v1247_v35 = vadd.f32 %v1246_v44, %v1245_v5  ;;  %v4313_v40 = vld [vmem:[#allocation5 + $0x68] sm:$0xff]  ;;  %v6046_v55 = vld [vmem:[#allocation32_spill] sm:$0xff] }
  0xee   :  { %1050 = vst [vmem:[#allocation10 + $0x48] sm:$0xff] %v1045_v53  ;;  %v1228_v9 = vadd.f32 %v6029_v39, %v4054_v8  ;;  %v1034_v37 = vadd.f32 %v1030_v0, %v1021_v11  ;;  %v1257_v8 = vadd.f32 %v1256_v47, %v4258_v34  ;;  %v1423_v6 = vadd.f32 %v1422_v14, %v6037_v10  ;;  %v4320_v39 = vld [vmem:[#allocation5 + $0x70] sm:$0xff] }
  0xef   :  { %1051 = vst [vmem:[#allocation10 + $0x50] sm:$0xff] %v1046_v23  ;;  %v1441_v52 = vmul.f32 %v4283_v3, %v6038_v24  ;;  %v1442_v54 = vadd.f32 %v1439_v58, %v6039_v12  ;;  %v1248_v60 = vrot.slane %v1247_v35, 2  ;;  %v1459_v32 = vmul.f32 %v4289_v17, %v6041_v38  ;;  %v6100_v3 = vld [vmem:[#allocation78_spill] sm:$0xff] }
  0xf0   :  { %v1229_v15 = vrot.slane %v1228_v9, 1  ;;  %v1047_v21 = vadd.f32 %v1043_v29, %v1034_v37  ;;  %1082 = vst [vmem:[#allocation11 + $0x10] sm:$0xff] %v1080_v25  ;;  %v1258_v46 = vadd.f32 %v1257_v8, %v4263_v19  ;;  %v1440_v29 = vmul.f32 %v4279_v18, %v6034_v2  ;;  %v4331_v8 = vld [vmem:[#allocation5 + $0x80] sm:$0xff]  ;;  %v6102_v18 = vld [vmem:[#allocation24_spill] sm:$0xff] }
  0xf1   :  { %v1460_v59 = vmul.f32 %v4291_v62, %v4019_v13  ;;  %6042 = vst [vmem:[#allocation62_spill] sm:$0xff] %v4311_v51  ;;  %v1424_v53 = vrot.slane %v1423_v6, 4  ;;  %v1461_v63 = vmul.f32 %v4296_v41, %v6034_v2  ;;  %v1249_v30 = vadd.f32 %v1248_v60, %v1247_v35  ;;  %v2820_v5 = vpop.eup %2819  ;;  %v4339_v35 = vld [vmem:[#allocation5 + $0x90] sm:$0xff]  ;;  %v4348_v60 = vld [vmem:[#allocation5 + $0xa0] sm:$0xff] }
  0xf2   :  { %v1230_v0 = vadd.f32 %v1229_v15, %v1228_v9  ;;  %1052 = vst [vmem:[#allocation10 + $0x58] sm:$0xff] %v1047_v21  ;;  %v1259_v26 = vadd.f32 %v1258_v46, %v4299_v36  ;;  %v1443_v22 = vadd.f32 %v1442_v54, %v1440_v29  ;;  %v1462_v28 = vmul.f32 %v4305_v4, %v6038_v24  ;;  %v4322_v9 = vld [vmem:[#allocation5 + $0x78] sm:$0xff]  ;;  %v4333_v21 = vld [vmem:[#allocation5 + $0x88] sm:$0xff] }
  0xf3   :  { %6043 = vst [vmem:[#allocation63_spill] sm:$0xff] %v4313_v40  ;;  %v1463_v27 = vadd.f32 %v1460_v59, %v1459_v32  ;;  %v1425_v47 = vadd.f32 %v1424_v53, %v1423_v6  ;;  %v1480_v37 = vmul.f32 %v4311_v51, %v6041_v38  ;;  %v1481_v31 = vmul.f32 %v4313_v40, %v4019_v13  ;;  %v4342_v6 = vld [vmem:[#allocation5 + $0x98] sm:$0xff]  ;;  %v6090_v40 = vld [vmem:[#allocation53_spill] sm:$0xff] }
  0xf4   :  { %v1231_v43 = vmul.f32 0.17677669, %v1230_v0  ;;  %6044 = vst [vmem:[#allocation64_spill] sm:$0xff] %v4320_v39  ;;  %v1444_v23 = vadd.f32 %v1443_v22, %v1441_v52  ;;  %v4329_v25 = vmul.f32 %v6046_v55, %v2820_v5  ;;  %v1250_v15 = vrot.slane %v1249_v30, 1 }
  0xf5   :  { %6045 = vst [vmem:[#allocation65_spill] sm:$0xff] %v4322_v9  ;;  %v1464_v44 = vadd.f32 %v1463_v27, %v1461_v63  ;;  %v1426_v14 = vrot.slane %v1425_v47, 2  ;;  %v1482_v16 = vmul.f32 %v4320_v39, %v6034_v2  ;;  %v1483_v0 = vmul.f32 %v4322_v9, %v6038_v24 }
  0xf6   :  { %v1232_v11 = vmul.f32 1.442695, %v1231_v43  ;;  %6047 = vst [vmem:[#allocation66_spill] sm:$0xff] %v4331_v8  ;;  %v1445_v58 = vrot.slane %v1444_v23, 4  ;;  %v1251_v46 = vadd.f32 %v1250_v15, %v1249_v30  ;;  %v1260_v29 = vadd.f32 %v1259_v26, %v4329_v25 }
  0xf7   :  { %6048 = vst [vmem:[#allocation67_spill] sm:$0xff] %v4333_v21  ;;  %v1465_v50 = vadd.f32 %v1464_v44, %v1462_v28  ;;  %v1484_v10 = vadd.f32 %v1481_v31, %v1480_v37  ;;  %v1427_v52 = vadd.f32 %v1426_v14, %v1425_v47  ;;  %v1501_v54 = vmul.f32 %v4331_v8, %v6041_v38  ;;  %v4354_v28 = vld [vmem:[#allocation5 + $0xa8] sm:$0xff]  ;;  %v6053_v31 = vld [vmem:[#allocation33_spill] sm:$0xff]  ;;  %v6089_v8 = vld [vmem:[#allocation56_spill] sm:$0xff] }
  0xf8   :  { %2821 = vpow2.f32 %v1232_v11  ;;  %6049 = vst [vmem:[#allocation68_spill] sm:$0xff] %v4339_v35  ;;  %v1446_v12 = vadd.f32 %v1445_v58, %v1444_v23  ;;  %v1502_v43 = vmul.f32 %v4333_v21, %v4019_v13  ;;  %v1252_v32 = vmul.f32 0.17677669, %v1251_v46  ;;  %v4361_v58 = vld [vmem:[#allocation5 + $0xb0] sm:$0xff] }
  0xf9   :  { %6050 = vst [vmem:[#allocation69_spill] sm:$0xff] %v4342_v6  ;;  %v1466_v59 = vrot.slane %v1465_v50, 4  ;;  %v1485_v53 = vadd.f32 %v1484_v10, %v1482_v16  ;;  %v1503_v26 = vmul.f32 %v4339_v35, %v6034_v2  ;;  %v1428_v22 = vrot.slane %v1427_v52, 1  ;;  %v4363_v16 = vld [vmem:[#allocation5 + $0xb8] sm:$0xff]  ;;  %v6088_v35 = vld [vmem:[#allocation55_spill] sm:$0xff] }
  0xfa   :  { %6051 = vst [vmem:[#allocation22_spill] sm:$0xff] %v4348_v60  ;;  %v1447_v63 = vrot.slane %v1446_v12, 2  ;;  %v1504_v11 = vmul.f32 %v4342_v6, %v6038_v24  ;;  %v1505_v30 = vadd.f32 %v1502_v43, %v1501_v54  ;;  %v1253_v5 = vmul.f32 1.442695, %v1252_v32 }
  0xfb   :  { %6052 = vst [vmem:[#allocation70_spill] sm:$0xff] %v4354_v28  ;;  %v1467_v47 = vadd.f32 %v1466_v59, %v1465_v50  ;;  %v1486_v23 = vadd.f32 %v1485_v53, %v1483_v0  ;;  %v1522_v37 = vmul.f32 %v4348_v60, %v6041_v38  ;;  %v1429_v15 = vadd.f32 %v1428_v22, %v1427_v52  ;;  %v4368_v59 = vld [vmem:[#allocation5 + $0xc0] sm:$0xff]  ;;  %v4370_v52 = vld [vmem:[#allocation5 + $0xc8] sm:$0xff]  ;;  %v6087_v60 = vld [vmem:[#allocation52_spill] sm:$0xff] }
  0xfc   :  { %v1448_v44 = vadd.f32 %v1447_v63, %v1446_v12  ;;  %v1506_v14 = vadd.f32 %v1505_v30, %v1503_v26  ;;  %6054 = vst [vmem:[#allocation71_spill] sm:$0xff] %v4361_v58  ;;  %2823 = vpow2.f32 %v1253_v5  ;;  %v1523_v50 = vmul.f32 %v4354_v28, %v4019_v13 }
  0xfd   :  { %6055 = vst [vmem:[#allocation23_spill] sm:$0xff] %v4363_v16  ;;  %v1468_v46 = vrot.slane %v1467_v47, 2  ;;  %v1487_v10 = vrot.slane %v1486_v23, 4  ;;  %v1430_v54 = vmul.f32 0.17677669, %v1429_v15  ;;  %v1524_v26 = vmul.f32 %v4361_v58, %v6034_v2  ;;  %v6061_v58 = vld [vmem:[#allocation34_spill] sm:$0xff] }
  0xfe   :  { %v2822_v27 = vpop.eup %2821  ;;  %v1449_v43 = vrot.slane %v1448_v44, 1  ;;  %v1507_v32 = vadd.f32 %v1506_v14, %v1504_v11  ;;  %6056 = vst [vmem:[#allocation72_spill] sm:$0xff] %v4368_v59  ;;  %v1525_v22 = vmul.f32 %v4363_v16, %v6038_v24  ;;  %v1526_v5 = vadd.f32 %v1523_v50, %v1522_v37 }
  0xff   :  { %v4359_v55 = vmul.f32 %v6053_v31, %v2822_v27  ;;  %6057 = vst [vmem:[#allocation73_spill] sm:$0xff] %v4370_v52  ;;  %v1469_v12 = vadd.f32 %v1468_v46, %v1467_v47  ;;  %v1488_v53 = vadd.f32 %v1487_v10, %v1486_v23  ;;  %v1431_v63 = vmul.f32 1.442695, %v1430_v54  ;;  %v4378_v31 = vld [vmem:[#allocation5 + $0xd8] sm:$0xff]  ;;  %v4384_v54 = vld [vmem:[#allocation5 + $0xe0] sm:$0xff] }
 0x100   :  { %v1450_v30 = vadd.f32 %v1449_v43, %v1448_v44  ;;  %v1508_v27 = vrot.slane %v1507_v32, 4  ;;  %6059 = vst [vmem:[#allocation39_spill] sm:$0xff] %v4378_v31  ;;  %v1543_v47 = vmul.f32 %v4368_v59, %v6041_v38  ;;  %v1544_v23 = vmul.f32 %v4370_v52, %v4019_v13 }
 0x101   :  { %v1261_v0 = vadd.f32 %v1260_v29, %v4359_v55  ;;  %v4376_v29 = vld [vmem:[#allocation5 + $0xd0] sm:$0xff]  ;;  %v1470_v11 = vrot.slane %v1469_v12, 1  ;;  %v1489_v15 = vrot.slane %v1488_v53, 2  ;;  %2825 = vpow2.f32 %v1431_v63  ;;  %6060 = vst [vmem:[#allocation31_spill] sm:$0xff] %v4384_v54 }
 0x102   :  { %6058 = vst [vmem:[#allocation74_spill] sm:$0xff] %v4376_v29  ;;  %v1451_v14 = vmul.f32 0.17677669, %v1450_v30  ;;  %v1509_v46 = vadd.f32 %v1508_v27, %v1507_v32  ;;  %v1527_v10 = vadd.f32 %v1526_v5, %v1524_v26  ;;  %v2824_v44 = vpop.eup %2823  ;;  %v1545_v43 = vmul.f32 %v4376_v29, %v6034_v2  ;;  %v4393_v30 = vld [vmem:[#allocation5 + $0xe8] sm:$0xff]  ;;  %v4395_v5 = vld [vmem:[#allocation5 + $0xf0] sm:$0xff] }
 0x103   :  { %v1471_v37 = vadd.f32 %v1470_v11, %v1469_v12  ;;  %v1490_v50 = vadd.f32 %v1489_v15, %v1488_v53  ;;  %v1546_v16 = vmul.f32 %v4378_v31, %v6038_v24  ;;  %v4391_v59 = vmul.f32 %v6061_v58, %v2824_v44  ;;  %6062 = vst [vmem:[#allocation45_spill] sm:$0xff] %v4393_v30  ;;  %v4400_v31 = vld [vmem:[#allocation5 + $0xf8] sm:$0xff] }
 0x104   :  { %v1452_v28 = vmul.f32 1.442695, %v1451_v14  ;;  %v1510_v52 = vrot.slane %v1509_v46, 2  ;;  %v1528_v63 = vadd.f32 %v1527_v10, %v1525_v22  ;;  %v1547_v27 = vadd.f32 %v1544_v23, %v1543_v47  ;;  %6063 = vst [vmem:[#allocation41_spill] sm:$0xff] %v4395_v5 }
 0x105   :  { %v1472_v32 = vmul.f32 0.17677669, %v1471_v37  ;;  %v1491_v26 = vrot.slane %v1490_v50, 1  ;;  %v1564_v12 = vmul.f32 %v4384_v54, %v6041_v38  ;;  %v1262_v53 = vadd.f32 %v1261_v0, %v4391_v59  ;;  %6064 = vst [vmem:[#allocation46_spill] sm:$0xff] %v4400_v31  ;;  %v4406_v54 = vld [vmem:[#allocation2 + $0xa0] sm:$0xff] }
 0x106   :  { %2827 = vpow2.f32 %v1452_v28  ;;  %v1511_v11 = vadd.f32 %v1510_v52, %v1509_v46  ;;  %v1529_v15 = vrot.slane %v1528_v63, 4  ;;  %v1548_v14 = vadd.f32 %v1547_v27, %v1545_v43  ;;  %6065 = vst [vmem:[#allocation36_spill] sm:$0xff] %v4406_v54  ;;  %v6066_v28 = vld [vmem:[#allocation35_spill] sm:$0xff] }
 0x107   :  { %v1473_v58 = vmul.f32 1.442695, %v1472_v32  ;;  %v1492_v44 = vadd.f32 %v1491_v26, %v1490_v50  ;;  %v1565_v22 = vmul.f32 %v4393_v30, %v4019_v13  ;;  %v2826_v10 = vpop.eup %2825  ;;  %v1263_v47 = vadd.f32 1e-08, %v1262_v53  ;;  %v4411_v50 = vld [vmem:[#allocation2 + $0xa8] sm:$0xff]  ;;  %v4413_v43 = vld [vmem:[#allocation2 + $0xb0] sm:$0xff] }
 0x108   :  { %v1512_v23 = vrot.slane %v1511_v11, 1  ;;  %v1530_v37 = vadd.f32 %v1529_v15, %v1528_v63  ;;  %v1566_v38 = vmul.f32 %v4395_v5, %v6034_v2  ;;  %v4409_v0 = vmul.f32 %v6066_v28, %v2826_v10  ;;  %6067 = vst [vmem:[#allocation32_spill] sm:$0xff] %v4411_v50  ;;  %v4417_v53 = vld [vmem:[#allocation2 + $0xb8] sm:$0xff]  ;;  %v6071_v10 = vld [vmem:[#allocation37_spill] sm:$0xff]  ;;  %v6086_v30 = vld [vmem:[#allocation51_spill] sm:$0xff] }
 0x109   :  { %2829 = vpow2.f32 %v1473_v58  ;;  %v1493_v52 = vmul.f32 0.17677669, %v1492_v44  ;;  %v1549_v46 = vadd.f32 %v1548_v14, %v1546_v16  ;;  %6068 = vst [vmem:[#allocation33_spill] sm:$0xff] %v4413_v43  ;;  %v1567_v63 = vmul.f32 %v4400_v31, %v6038_v24  ;;  %v6070_v15 = vld [vmem:[#allocation40_spill] sm:$0xff]  ;;  %v6075_v31 = vld [vmem:[#allocation42_spill] sm:$0xff] }
 0x10a   :  { %2831 = vrcp.f32 %v1263_v47  ;;  %v1513_v13 = vadd.f32 %v1512_v23, %v1511_v11  ;;  %v1531_v32 = vrot.slane %v1530_v37, 2  ;;  %v1568_v27 = vadd.f32 %v1565_v22, %v1564_v12  ;;  %6069 = vst [vmem:[#allocation34_spill] sm:$0xff] %v4417_v53  ;;  %v6072_v47 = vld [vmem:[#allocation38_spill] sm:$0xff]  ;;  %v6073_v23 = vld [vmem:[#allocation44_spill] sm:$0xff] }
 0x10b   :  { %v1494_v26 = vmul.f32 1.442695, %v1493_v52  ;;  %v1550_v2 = vrot.slane %v1549_v46, 4  ;;  %v1742_v58 = vmul.f32 %v4406_v54, %v6070_v15  ;;  %v1743_v28 = vmul.f32 %v4411_v50, %v6071_v10 }
 0x10c   :  { %v2828_v44 = vpop.eup %2827  ;;  %v1514_v16 = vmul.f32 0.17677669, %v1513_v13  ;;  %v1532_v14 = vadd.f32 %v1531_v32, %v1530_v37  ;;  %v1744_v11 = vmul.f32 %v4413_v43, %v6072_v47  ;;  %v1569_v12 = vadd.f32 %v1568_v27, %v1566_v38  ;;  %v6077_v47 = vld [vmem:[#allocation43_spill] sm:$0xff] }
 0x10d   :  { %v4426_v5 = vmul.f32 %v6073_v23, %v2828_v44  ;;  %2833 = vpow2.f32 %v1494_v26  ;;  %v4428_v24 = vadd.f32 %v1550_v2, %v1549_v46  ;;  %v4432_v15 = vmul.f32 %v4417_v53, %v6075_v31  ;;  %v6101_v43 = vld [vmem:[#allocation79_spill] sm:$0xff] }
 0x10e   :  { %v1515_v22 = vmul.f32 1.442695, %v1514_v16  ;;  %v1533_v52 = vrot.slane %v1532_v14, 1  ;;  %v1746_v37 = vadd.f32 %v1743_v28, %v1742_v58  ;;  %v4435_v10 = vadd.f32 %v1569_v12, %v1567_v63 }
 0x10f   :  { %6074 = vst [vmem:[#allocation35_spill] sm:$0xff] %v4426_v5  ;;  %v2830_v13 = vpop.eup %2829  ;;  %v4439_v44 = vmul.f32 %v4406_v54, %v6077_v47  ;;  %v4443_v46 = vmul.f32 %v4411_v50, %v4276_v45  ;;  %v6085_v47 = vld [vmem:[#allocation50_spill] sm:$0xff]  ;;  %v6095_v54 = vld [vmem:[#allocation19_spill] sm:$0xff] }
 0x110   :  { %6076 = vst [vmem:[#allocation40_spill] sm:$0xff] %v4432_v15  ;;  %v2832_v38 = vpop.eup %2831  ;;  %v4446_v26 = vmul.f32 %v4254_v56, %v2830_v13  ;;  %2835 = vpow2.f32 %v1515_v22  ;;  %v4448_v31 = vadd.f32 %v1533_v52, %v1532_v14  ;;  %v4450_v2 = vadd.f32 %v1746_v37, %v1744_v11  ;;  %v6083_v22 = vld [vmem:[#allocation48_spill] sm:$0xff]  ;;  %v6084_v37 = vld [vmem:[#allocation49_spill] sm:$0xff]  ;;  %v6103_v15 = vld [vmem:[#allocation75_spill] sm:$0xff] }
 0x111   :  { %6078 = vst [vmem:[#allocation37_spill] sm:$0xff] %v4439_v44  ;;  %v4453_v63 = vmul.f32 %v2832_v38, %v4013_v20  ;;  %v4456_v27 = vmul.f32 %v2832_v38, %v4052_v1  ;;  %v4459_v58 = vmul.f32 %v2832_v38, %v4258_v34  ;;  %v4462_v45 = vmul.f32 %v2832_v38, %v4263_v19 }
 0x112   :  { %6079 = vst [vmem:[#allocation38_spill] sm:$0xff] %v4443_v46  ;;  %v4465_v56 = vmul.f32 %v2832_v38, %v4299_v36  ;;  %v4468_v16 = vmul.f32 %v2832_v38, %v4329_v25  ;;  %v4471_v14 = vmul.f32 %v2832_v38, %v4359_v55  ;;  %v4474_v20 = vmul.f32 %v2832_v38, %v4391_v59  ;;  %v6082_v59 = vld [vmem:[#allocation47_spill] sm:$0xff] }
 0x113   :  { %6080 = vst [vmem:[#allocation44_spill] sm:$0xff] %v4446_v26  ;;  %v4476_v1 = vpop.eup %2833  ;;  %v1277_v34 = vperm.slane %v4453_v63, 0  ;;  %v1286_v28 = vperm.slane %v4456_v27, 0  ;;  %v1299_v19 = vperm.slane %v4459_v58, 0  ;;  %v1312_v36 = vperm.slane %v4462_v45, 0  ;;  %v6104_v26 = vld [vmem:[#allocation59_spill] sm:$0xff] }
 0x114   :  { %6081 = vst [vmem:[#allocation42_spill] sm:$0xff] %v4450_v2  ;;  %v1325_v11 = vperm.slane %v4465_v56, 0  ;;  %v1338_v25 = vperm.slane %v4468_v16, 0  ;;  %v1351_v55 = vperm.slane %v4471_v14, 0  ;;  %v1364_v23 = vperm.slane %v4474_v20, 0 }
 0x115   :  { %v1278_v12 = vmul.f32 %v1277_v34, %v6082_v59  ;;  %v1287_v52 = vmul.f32 %v1286_v28, %v6083_v22  ;;  %v1300_v13 = vmul.f32 %v1299_v19, %v6084_v37  ;;  %v1313_v38 = vmul.f32 %v1312_v36, %v6085_v47  ;;  %v6091_v59 = vld [vmem:[#allocation54_spill] sm:$0xff]  ;;  %v6092_v22 = vld [vmem:[#allocation25_spill] sm:$0xff]  ;;  %v6094_v47 = vld [vmem:[#allocation28_spill] sm:$0xff] }
 0x116   :  { %v4490_v32 = vpop.eup %2835  ;;  %v1326_v29 = vmul.f32 %v1325_v11, %v6086_v30  ;;  %v1339_v6 = vmul.f32 %v1338_v25, %v6087_v60  ;;  %v1352_v21 = vmul.f32 %v1351_v55, %v6088_v35  ;;  %v1365_v9 = vmul.f32 %v1364_v23, %v6089_v8  ;;  %v6093_v37 = vld [vmem:[#allocation29_spill] sm:$0xff]  ;;  %v6098_v8 = vld [vmem:[#allocation58_spill] sm:$0xff] }
 0x117   :  { %v1291_v39 = vadd.f32 %v1287_v52, %v1278_v12  ;;  %v1279_v51 = vmul.f32 %v1277_v34, %v6090_v40  ;;  %v1288_v4 = vmul.f32 %v1286_v28, %v6091_v59  ;;  %v1301_v41 = vmul.f32 %v1299_v19, %v6092_v22  ;;  %v6096_v30 = vld [vmem:[#allocation57_spill] sm:$0xff]  ;;  %v6099_v52 = vld [vmem:[#allocation18_spill] sm:$0xff] }
 0x118   :  { %v1314_v50 = vmul.f32 %v1312_v36, %v6093_v37  ;;  %v1327_v62 = vmul.f32 %v1325_v11, %v6094_v47  ;;  %v1340_v17 = vmul.f32 %v1338_v25, %v6095_v54  ;;  %v1353_v46 = vmul.f32 %v1351_v55, %v6096_v30  ;;  %v6097_v35 = vld [vmem:[#allocation77_spill] sm:$0xff] }
 0x119   :  { %v1304_v60 = vadd.f32 %v1300_v13, %v1291_v39  ;;  %v1292_v44 = vadd.f32 %v1288_v4, %v1279_v51  ;;  %v1366_v53 = vmul.f32 %v1364_v23, %v6097_v35  ;;  %v1280_v12 = vmul.f32 %v1277_v34, %v6098_v8  ;;  %v6105_v4 = vld [vmem:[#allocation76_spill] sm:$0xff]  ;;  %v6106_v35 = vld [vmem:[#allocation26_spill] sm:$0xff] }
 0x11a   :  { %v1289_v40 = vmul.f32 %v1286_v28, %v6099_v52  ;;  %v1302_v59 = vmul.f32 %v1299_v19, %v6100_v3  ;;  %v1315_v22 = vmul.f32 %v1312_v36, %v6101_v43  ;;  %v1328_v37 = vmul.f32 %v1325_v11, %v6102_v18 }
 0x11b   :  { %v1317_v2 = vadd.f32 %v1313_v38, %v1304_v60  ;;  %v1305_v47 = vadd.f32 %v1301_v41, %v1292_v44  ;;  %v1341_v54 = vmul.f32 %v1338_v25, %v6103_v15  ;;  %v1354_v30 = vmul.f32 %v1351_v55, %v6104_v26 }
 0x11c   :  { %v1293_v39 = vadd.f32 %v1289_v40, %v1280_v12  ;;  %v1367_v51 = vmul.f32 %v1364_v23, %v6105_v4  ;;  %v1281_v13 = vmul.f32 %v1277_v34, %v4200_v42  ;;  %v1290_v8 = vmul.f32 %v1286_v28, %v6106_v35  ;;  %v6109_v12 = vld [vmem:[#allocation35_spill] sm:$0xff]  ;;  %v6111_v4 = vld [vmem:[#allocation40_spill] sm:$0xff] }
 0x11d   :  { %v1330_v52 = vadd.f32 %v1326_v29, %v1317_v2  ;;  %v1318_v5 = vadd.f32 %v1314_v50, %v1305_v47  ;;  %v1303_v3 = vmul.f32 %v1299_v19, %v4211_v48  ;;  %v1316_v43 = vmul.f32 %v1312_v36, %v4213_v33 }
 0x11e   :  { %v1306_v18 = vadd.f32 %v1302_v59, %v1293_v39  ;;  %v1294_v38 = vadd.f32 %v1290_v8, %v1281_v13  ;;  %v1329_v41 = vmul.f32 %v1325_v11, %v4219_v7  ;;  %v1342_v15 = vmul.f32 %v1338_v25, %v4221_v49  ;;  %v6112_v13 = vld [vmem:[#allocation42_spill] sm:$0xff]  ;;  %v6113_v8 = vld [vmem:[#allocation27_spill] sm:$0xff] }
 0x11f   :  { %v1343_v44 = vadd.f32 %v1339_v6, %v1330_v52  ;;  %v1331_v26 = vadd.f32 %v1327_v62, %v1318_v5  ;;  %v1355_v60 = vmul.f32 %v1351_v55, %v4227_v61  ;;  %v1368_v42 = vmul.f32 %v1364_v23, %v4229_v57  ;;  %v6114_v52 = vld [vmem:[#allocation33_spill] sm:$0xff] }
 0x120   :  { %v1319_v34 = vadd.f32 %v1315_v22, %v1306_v18  ;;  %v1307_v28 = vadd.f32 %v1303_v3, %v1294_v38  ;;  %v1379_v29 = vrot.slane %v4456_v27, 7  ;;  %v1382_v48 = vrot.slane %v4459_v58, 6  ;;  %v6115_v18 = vld [vmem:[#allocation30_spill] sm:$0xff] }
 0x121   :  { %v1356_v50 = vadd.f32 %v1352_v21, %v1343_v44  ;;  %v1344_v33 = vadd.f32 %v1340_v17, %v1331_v26  ;;  %v1385_v2 = vrot.slane %v4462_v45, 5  ;;  %v1388_v7 = vrot.slane %v4465_v56, 4  ;;  %v4530_v45 = vld [vmem:[#allocation8 + $0x3] sm:$0x1]  ;;  %v6116_v38 = vld [vmem:[#allocation34_spill] sm:$0xff] }
 0x122   :  { %v1332_v19 = vadd.f32 %v1328_v37, %v1319_v34  ;;  %v1320_v49 = vadd.f32 %v1316_v43, %v1307_v28  ;;  %v1391_v62 = vrot.slane %v4468_v16, 3  ;;  %v1394_v61 = vrot.slane %v4471_v14, 2  ;;  %v6120_v34 = vld [vmem:[#allocation36_spill] sm:$0xff] }
 0x123   :  { %v1369_v6 = vadd.f32 %v1365_v9, %v1356_v50  ;;  %v1357_v57 = vadd.f32 %v1353_v46, %v1344_v33  ;;  %v1397_v5 = vrot.slane %v4474_v20, 1  ;;  %v1399_v27 = vsel %vm418_vm0, %v4453_v63, %v1379_v29  ;;  %v4537_v46 = vld [vmem:[#allocation8 + $0x4] sm:$0x1]  ;;  %v6121_v29 = vld [vmem:[#allocation20_spill] sm:$0xff] }
 0x124   :  { %v1345_v58 = vadd.f32 %v1341_v54, %v1332_v19  ;;  %v1333_v21 = vadd.f32 %v1329_v41, %v1320_v49  ;;  %v1400_v17 = vsel %vm420_vm1, %v1399_v27, %v1382_v48  ;;  %v4534_v56 = vmul.f32 %v4530_v45, %v4476_v1  ;;  %6107 = vst [vmem:[#allocation43_spill] sm:$0xff] %v4537_v46  ;;  %v6122_v48 = vld [vmem:[#allocation32_spill] sm:$0xff]  ;;  %v6123_v19 = vld [vmem:[#allocation61_spill] sm:$0xff] }
 0x125   :  { %1374 = vst [vmem:[#allocation10 + $0x60] sm:$0xff] %v1369_v6  ;;  %v1370_v16 = vadd.f32 %v1366_v53, %v1357_v57  ;;  %v1401_v9 = vsel %vm422_vm2, %v1400_v17, %v1385_v2  ;;  %v4541_v14 = vmul.f32 %v4537_v46, %v4490_v32  ;;  %v1535_v63 = vmul.f32 0.17677669, %v4448_v31  ;;  %v6124_v6 = vld [vmem:[#allocation21_spill] sm:$0xff]  ;;  %v6125_v17 = vld [vmem:[#allocation62_spill] sm:$0xff] }
 0x126   :  { %v1358_v20 = vadd.f32 %v1354_v30, %v1345_v58  ;;  %v1346_v36 = vadd.f32 %v1342_v15, %v1333_v21  ;;  %v1402_v11 = vsel %vm424_vm3, %v1401_v9, %v1388_v7  ;;  %v6108_v1 = vrot.slane %v4428_v24, 2  ;;  %v6117_v15 = vld [vmem:[#allocation37_spill] sm:$0xff]  ;;  %v6126_v9 = vld [vmem:[#allocation63_spill] sm:$0xff] }
 0x127   :  { %1375 = vst [vmem:[#allocation10 + $0x68] sm:$0xff] %v1370_v16  ;;  %v1403_v53 = vsel %vm426_vm4, %v1402_v11, %v1391_v62  ;;  %v1536_v55 = vmul.f32 1.442695, %v1535_v63  ;;  %v1571_v23 = vrot.slane %v4435_v10, 4  ;;  %v1581_v32 = vadd.f32 %v6109_v12, %v4409_v0 }
 0x128   :  { %v1553_v25 = vadd.f32 %v6108_v1, %v4428_v24  ;;  %v1371_v40 = vadd.f32 %v1367_v51, %v1358_v20  ;;  %v1359_v59 = vadd.f32 %v1355_v60, %v1346_v36  ;;  %v1404_v31 = vsel %vm428_vm5, %v1403_v53, %v1394_v61  ;;  %v6110_v24 = vld [vmem:[#allocation44_spill] sm:$0xff]  ;;  %v4578_v20 = vld [vmem:[#allocation8 + $0x5] sm:$0x1] }
 0x129   :  { %v1405_v37 = vsel %vm430_vm6, %v1404_v31, %v1397_v5  ;;  %2837 = vpow2.f32 %v1536_v55  ;;  %v1572_v47 = vadd.f32 %v1571_v23, %v4435_v10  ;;  %v1582_v54 = vadd.f32 %v1581_v32, %v6110_v24  ;;  %v6118_v10 = vld [vmem:[#allocation38_spill] sm:$0xff]  ;;  %6127 = vst [vmem:[#allocation47_spill] sm:$0xff] %v4578_v20  ;;  %v6128_v55 = vld [vmem:[#allocation64_spill] sm:$0xff]  ;;  %v6129_v32 = vld [vmem:[#allocation65_spill] sm:$0xff] }
 0x12a   :  { %v1554_v22 = vrot.slane %v1553_v25, 1  ;;  %1376 = vst [vmem:[#allocation10 + $0x70] sm:$0xff] %v1371_v40  ;;  %v1372_v30 = vadd.f32 %v1368_v42, %v1359_v59  ;;  %v1748_v35 = vadd.f32 %v6112_v13, %v6111_v4  ;;  %v1765_v51 = vmul.f32 %v6114_v52, %v6113_v8  ;;  %v6119_v42 = vld [vmem:[#allocation60_spill] sm:$0xff]  ;;  %v6131_v4 = vld [vmem:[#allocation67_spill] sm:$0xff] }
 0x12b   :  { %1407 = vst [vmem:[#allocation11 + $0x18] sm:$0xff] %v1405_v37  ;;  %v1573_v3 = vrot.slane %v1572_v47, 2  ;;  %v1583_v43 = vadd.f32 %v1582_v54, %v4534_v56  ;;  %v1766_v41 = vmul.f32 %v6116_v38, %v6115_v18  ;;  %v1767_v44 = vadd.f32 %v6118_v10, %v6117_v15  ;;  %v6133_v15 = vld [vmem:[#allocation69_spill] sm:$0xff] }
 0x12c   :  { %v1555_v39 = vadd.f32 %v1554_v22, %v1553_v25  ;;  %1377 = vst [vmem:[#allocation10 + $0x78] sm:$0xff] %v1372_v30  ;;  %v1749_v60 = vrot.slane %v1748_v35, 4  ;;  %v1784_v28 = vmul.f32 %v6120_v34, %v6119_v42  ;;  %v1785_v50 = vmul.f32 %v6122_v48, %v6121_v29  ;;  %v6130_v30 = vld [vmem:[#allocation66_spill] sm:$0xff] }
 0x12d   :  { %v1574_v33 = vadd.f32 %v1573_v3, %v1572_v47  ;;  %v1584_v2 = vadd.f32 %v1583_v43, %v4541_v14  ;;  %v1768_v7 = vadd.f32 %v1767_v44, %v1765_v51  ;;  %v1786_v49 = vmul.f32 %v6114_v52, %v6123_v19  ;;  %v6132_v3 = vld [vmem:[#allocation68_spill] sm:$0xff]  ;;  %v6134_v29 = vld [vmem:[#allocation22_spill] sm:$0xff] }
 0x12e   :  { %v1556_v26 = vmul.f32 0.17677669, %v1555_v39  ;;  %v1750_v61 = vadd.f32 %v1749_v60, %v1748_v35  ;;  %v1787_v57 = vmul.f32 %v6116_v38, %v6124_v6  ;;  %v1788_v5 = vadd.f32 %v1785_v50, %v1784_v28  ;;  %v6136_v6 = vld [vmem:[#allocation70_spill] sm:$0xff] }
 0x12f   :  { %v2838_v27 = vpop.eup %2837  ;;  %v1575_v58 = vrot.slane %v1574_v33, 1  ;;  %v1769_v21 = vadd.f32 %v1768_v7, %v1766_v41  ;;  %v1805_v16 = vmul.f32 %v6120_v34, %v6125_v17  ;;  %v1806_v63 = vmul.f32 %v6122_v48, %v6126_v9 }
 0x130   :  { %v1557_v62 = vmul.f32 1.442695, %v1556_v26  ;;  %v4581_v36 = vmul.f32 %v4578_v20, %v2838_v27  ;;  %v1751_v11 = vrot.slane %v1750_v61, 2  ;;  %v1789_v1 = vadd.f32 %v1788_v5, %v1786_v49 }
 0x131   :  { %v1576_v25 = vadd.f32 %v1575_v58, %v1574_v33  ;;  %v1770_v53 = vrot.slane %v1769_v21, 4  ;;  %v1807_v23 = vmul.f32 %v6114_v52, %v6128_v55  ;;  %v1808_v40 = vmul.f32 %v6116_v38, %v6129_v32  ;;  %v4598_v33 = vld [vmem:[#allocation8 + $0x6] sm:$0x1] }
 0x132   :  { %2839 = vpow2.f32 %v1557_v62  ;;  %v1585_v59 = vadd.f32 %v1584_v2, %v4581_v36  ;;  %v1752_v31 = vadd.f32 %v1751_v11, %v1750_v61  ;;  %v1790_v22 = vadd.f32 %v1789_v1, %v1787_v57  ;;  %6135 = vst [vmem:[#allocation48_spill] sm:$0xff] %v4598_v33  ;;  %v6138_v11 = vld [vmem:[#allocation23_spill] sm:$0xff] }
 0x133   :  { %v1809_v37 = vadd.f32 %v1806_v63, %v1805_v16  ;;  %v1577_v47 = vmul.f32 0.17677669, %v1576_v25  ;;  %v1771_v54 = vadd.f32 %v1770_v53, %v1769_v21  ;;  %v1826_v39 = vmul.f32 %v6120_v34, %v6130_v30  ;;  %v6137_v21 = vld [vmem:[#allocation71_spill] sm:$0xff] }
 0x134   :  { %v1827_v13 = vmul.f32 %v6122_v48, %v6131_v4  ;;  %v1753_v35 = vrot.slane %v1752_v31, 1  ;;  %v1791_v8 = vrot.slane %v1790_v22, 4  ;;  %v1828_v43 = vmul.f32 %v6114_v52, %v6132_v3  ;;  %v6143_v3 = vld [vmem:[#allocation39_spill] sm:$0xff] }
 0x135   :  { %v1810_v51 = vadd.f32 %v1809_v37, %v1807_v23  ;;  %v1578_v18 = vmul.f32 1.442695, %v1577_v47  ;;  %v1772_v41 = vrot.slane %v1771_v54, 2  ;;  %v1829_v10 = vmul.f32 %v6116_v38, %v6133_v15  ;;  %v6139_v23 = vld [vmem:[#allocation72_spill] sm:$0xff] }
 0x136   :  { %v1830_v44 = vadd.f32 %v1827_v13, %v1826_v39  ;;  %v1754_v60 = vadd.f32 %v1753_v35, %v1752_v31  ;;  %v1792_v42 = vadd.f32 %v1791_v8, %v1790_v22  ;;  %v1847_v50 = vmul.f32 %v6120_v34, %v6134_v29  ;;  %v6140_v31 = vld [vmem:[#allocation73_spill] sm:$0xff]  ;;  %v6141_v39 = vld [vmem:[#allocation74_spill] sm:$0xff] }
 0x137   :  { %v1811_v28 = vadd.f32 %v1810_v51, %v1808_v40  ;;  %2841 = vpow2.f32 %v1578_v18  ;;  %v1773_v7 = vadd.f32 %v1772_v41, %v1771_v54  ;;  %v1848_v57 = vmul.f32 %v6122_v48, %v6136_v6  ;;  %v4616_v13 = vld [vmem:[#allocation8 + $0x7] sm:$0x1] }
 0x138   :  { %v2840_v26 = vpop.eup %2839  ;;  %v1831_v19 = vadd.f32 %v1830_v44, %v1828_v43  ;;  %v1755_v49 = vmul.f32 0.17677669, %v1754_v60  ;;  %v1793_v62 = vrot.slane %v1792_v42, 2  ;;  %v1849_v17 = vmul.f32 %v6114_v52, %v6137_v21  ;;  %6142 = vst [vmem:[#allocation49_spill] sm:$0xff] %v4616_v13  ;;  %v6145_v6 = vld [vmem:[#allocation45_spill] sm:$0xff] }
 0x139   :  { %v4601_v2 = vmul.f32 %v4598_v33, %v2840_v26  ;;  %v1812_v61 = vrot.slane %v1811_v28, 4  ;;  %v1774_v27 = vrot.slane %v1773_v7, 1  ;;  %v1850_v1 = vmul.f32 %v6116_v38, %v6138_v11 }
 0x13a   :  { %v1832_v58 = vadd.f32 %v1831_v19, %v1829_v10  ;;  %v1756_v16 = vmul.f32 1.442695, %v1755_v49  ;;  %v1794_v9 = vadd.f32 %v1793_v62, %v1792_v42  ;;  %v1851_v55 = vadd.f32 %v1848_v57, %v1847_v50  ;;  %v6144_v42 = vld [vmem:[#allocation31_spill] sm:$0xff] }
 0x13b   :  { %v1586_v5 = vadd.f32 %v1585_v59, %v4601_v2  ;;  %v1813_v63 = vadd.f32 %v1812_v61, %v1811_v28  ;;  %v1775_v25 = vadd.f32 %v1774_v27, %v1773_v7  ;;  %v1868_v32 = vmul.f32 %v6120_v34, %v6139_v23  ;;  %v4628_v27 = vld [vmem:[#allocation2 + $0xc0] sm:$0xff]  ;;  %v4647_v23 = vld [vmem:[#allocation5 + $0x10] sm:$0xff] }
 0x13c   :  { %v1833_v53 = vrot.slane %v1832_v58, 4  ;;  %2843 = vpow2.f32 %v1756_v16  ;;  %v1795_v40 = vrot.slane %v1794_v9, 1  ;;  %v1869_v22 = vmul.f32 %v6122_v48, %v6140_v31  ;;  %6146 = vst [vmem:[#allocation50_spill] sm:$0xff] %v4628_v27  ;;  %v4635_v16 = vld [vmem:[#allocation2 + $0xc8] sm:$0xff]  ;;  %v4649_v31 = vld [vmem:[#allocation2 + $0xd8] sm:$0xff] }
 0x13d   :  { %v1814_v59 = vrot.slane %v1813_v63, 2  ;;  %v2842_v37 = vpop.eup %2841  ;;  %v1776_v47 = vmul.f32 0.17677669, %v1775_v25  ;;  %v1852_v30 = vadd.f32 %v1851_v55, %v1849_v17  ;;  %v1870_v4 = vmul.f32 %v6114_v52, %v6141_v39  ;;  %6148 = vst [vmem:[#allocation52_spill] sm:$0xff] %v4635_v16  ;;  %v6152_v25 = vld [vmem:[#allocation46_spill] sm:$0xff]  ;;  %v4645_v55 = vld [vmem:[#allocation2 + $0xd0] sm:$0xff] }
 0x13e   :  { %v1834_v54 = vadd.f32 %v1833_v53, %v1832_v58  ;;  %v4619_v35 = vmul.f32 %v4616_v13, %v2842_v37  ;;  %v1796_v8 = vadd.f32 %v1795_v40, %v1794_v9  ;;  %v1871_v43 = vmul.f32 %v6116_v38, %v6143_v3  ;;  %v4630_v58 = vld [vmem:[#allocation8] sm:$0x1]  ;;  %6153 = vst [vmem:[#allocation53_spill] sm:$0xff] %v4645_v55  ;;  %v4667_v3 = vld [vmem:[#allocation5 + $0x28] sm:$0xff] }
 0x13f   :  { %v1815_v51 = vadd.f32 %v1814_v59, %v1813_v63  ;;  %v1777_v18 = vmul.f32 1.442695, %v1776_v47  ;;  %v1853_v15 = vadd.f32 %v1852_v30, %v1850_v1  ;;  %v1872_v10 = vadd.f32 %v1869_v22, %v1868_v32  ;;  %6147 = vst [vmem:[#allocation51_spill] sm:$0xff] %v4630_v58  ;;  %v4637_v9 = vld [vmem:[#allocation5] sm:$0xff]  ;;  %v4639_v63 = vld [vmem:[#allocation5 + $0x8] sm:$0xff]  ;;  %v4651_v22 = vld [vmem:[#allocation5 + $0x18] sm:$0xff] }
 0x140   :  { %v1835_v41 = vrot.slane %v1834_v54, 2  ;;  %v1587_v44 = vadd.f32 %v1586_v5, %v4619_v35  ;;  %v1797_v26 = vmul.f32 0.17677669, %v1796_v8  ;;  %v1889_v28 = vmul.f32 %v6120_v34, %v6144_v42  ;;  %6149 = vst [vmem:[#allocation55_spill] sm:$0xff] %v4637_v9  ;;  %v6151_v1 = vld [vmem:[#allocation41_spill] sm:$0xff] }
 0x141   :  { %v1816_v60 = vrot.slane %v1815_v51, 1  ;;  %2845 = vpow2.f32 %v1777_v18  ;;  %v1854_v50 = vrot.slane %v1853_v15, 4  ;;  %v1873_v7 = vadd.f32 %v1872_v10, %v1870_v4  ;;  %6150 = vst [vmem:[#allocation56_spill] sm:$0xff] %v4639_v63  ;;  %v4671_v18 = vld [vmem:[#allocation8 + $0x1] sm:$0x1] }
 0x142   :  { %v1836_v29 = vadd.f32 %v1835_v41, %v1834_v54  ;;  %v2844_v19 = vpop.eup %2843  ;;  %v1588_v49 = vadd.f32 1e-08, %v1587_v44  ;;  %v1798_v62 = vmul.f32 1.442695, %v1797_v26  ;;  %v1890_v57 = vmul.f32 %v6122_v48, %v6145_v6  ;;  %6154 = vst [vmem:[#allocation54_spill] sm:$0xff] %v4647_v23 }
 0x143   :  { %v1817_v61 = vadd.f32 %v1816_v60, %v1815_v51  ;;  %v4633_v5 = vmul.f32 %v4630_v58, %v2844_v19  ;;  %v1855_v34 = vadd.f32 %v1854_v50, %v1853_v15  ;;  %v1874_v17 = vadd.f32 %v1873_v7, %v1871_v43  ;;  %6155 = vst [vmem:[#allocation25_spill] sm:$0xff] %v4651_v22  ;;  %v4665_v51 = vld [vmem:[#allocation5 + $0x20] sm:$0xff]  ;;  %v4669_v43 = vld [vmem:[#allocation5 + $0x30] sm:$0xff] }
 0x144   :  { %v1837_v21 = vrot.slane %v1836_v29, 1  ;;  %2847 = vrcp.f32 %v1588_v49  ;;  %v1891_v48 = vmul.f32 %v6114_v52, %v6151_v1  ;;  %v1892_v53 = vmul.f32 %v6116_v38, %v6152_v25  ;;  %6156 = vst [vmem:[#allocation29_spill] sm:$0xff] %v4665_v51  ;;  %v4734_v1 = vld [vmem:[#allocation7 + $0x80] sm:$0xff]  ;;  %v4738_v25 = vld [vmem:[#allocation7 + $0x8] sm:$0xff]  ;;  %v4804_v58 = vld [vmem:[#allocation7 + $0x50] sm:$0xff] }
 0x145   :  { %v1818_v11 = vmul.f32 0.17677669, %v1817_v61  ;;  %2849 = vpow2.f32 %v1798_v62  ;;  %v1856_v40 = vrot.slane %v1855_v34, 2  ;;  %v1875_v59 = vrot.slane %v1874_v17, 4  ;;  %6157 = vst [vmem:[#allocation28_spill] sm:$0xff] %v4667_v3 }
 0x146   :  { %v1838_v32 = vadd.f32 %v1837_v21, %v1836_v29  ;;  %v1893_v47 = vadd.f32 %v1890_v57, %v1889_v28  ;;  %v2067_v52 = vmul.f32 %v4637_v9, %v4628_v27  ;;  %v2068_v38 = vmul.f32 %v4639_v63, %v4635_v16  ;;  %6158 = vst [vmem:[#allocation19_spill] sm:$0xff] %v4669_v43  ;;  %v4714_v21 = vld [vmem:[#allocation7] sm:$0xff] }
 0x147   :  { %v1819_v37 = vmul.f32 1.442695, %v1818_v11  ;;  %v2846_v54 = vpop.eup %2845  ;;  %v4657_v39 = vadd.f32 %v1856_v40, %v1855_v34  ;;  %v4659_v4 = vadd.f32 %v1875_v59, %v1874_v17  ;;  %v4663_v8 = vmul.f32 %v4647_v23, %v4645_v55  ;;  %6159 = vst [vmem:[#allocation57_spill] sm:$0xff] %v4671_v18  ;;  %v4716_v34 = vld [vmem:[#allocation7 + $0x20] sm:$0xff]  ;;  %v4796_v23 = vld [vmem:[#allocation7 + $0x10] sm:$0xff] }
 0x148   :  { %v1839_v30 = vmul.f32 0.17677669, %v1838_v32  ;;  %v4674_v41 = vmul.f32 %v4671_v18, %v2846_v54  ;;  %v1894_v15 = vadd.f32 %v1893_v47, %v1891_v48  ;;  %v4678_v10 = vmul.f32 %v4651_v22, %v4649_v31  ;;  %6163 = vst [vmem:[#allocation78_spill] sm:$0xff] %v4714_v21  ;;  %v4718_v17 = vld [vmem:[#allocation7 + $0x40] sm:$0xff]  ;;  %v4768_v54 = vld [vmem:[#allocation7 + $0x48] sm:$0xff]  ;;  %v4798_v18 = vld [vmem:[#allocation7 + $0x30] sm:$0xff] }
 0x149   :  { %2851 = vpow2.f32 %v1819_v37  ;;  %v4684_v42 = vadd.f32 %v2068_v38, %v2067_v52  ;;  %v4690_v50 = vmul.f32 %v4665_v51, %v4628_v27  ;;  %v4694_v7 = vmul.f32 %v4667_v3, %v4635_v16  ;;  %6164 = vst [vmem:[#allocation79_spill] sm:$0xff] %v4716_v34  ;;  %v4736_v48 = vld [vmem:[#allocation7 + $0xa0] sm:$0xff]  ;;  %v4780_v3 = vld [vmem:[#allocation7 + $0xa8] sm:$0xff]  ;;  %v4825_v16 = vld [vmem:[#allocation7 + $0xf0] sm:$0xff] }
 0x14a   :  { %6160 = vst [vmem:[#allocation77_spill] sm:$0xff] %v4678_v10  ;;  %v4680_v44 = vmul.f32 1.442695, %v1839_v30  ;;  %v2848_v28 = vpop.eup %2847  ;;  %v4686_v29 = vadd.f32 %v1894_v15, %v1892_v53  ;;  %v4698_v19 = vmul.f32 %v4669_v43, %v4645_v55  ;;  %v4740_v53 = vld [vmem:[#allocation7 + $0x28] sm:$0xff]  ;;  %v4750_v32 = vld [vmem:[#allocation7 + $0xc0] sm:$0xff]  ;;  %v4846_v10 = vld [vmem:[#allocation7 + $0x98] sm:$0xff] }
 0x14b   :  { %6161 = vst [vmem:[#allocation58_spill] sm:$0xff] %v4694_v7  ;;  %v4700_v49 = vpop.eup %2849  ;;  %v4703_v62 = vmul.f32 %v2848_v28, %v4409_v0  ;;  %v4706_v61 = vmul.f32 %v2848_v28, %v6109_v12  ;;  %v4709_v6 = vmul.f32 %v2848_v28, %v6110_v24  ;;  %v4712_v57 = vmul.f32 %v2848_v28, %v4534_v56  ;;  %v4732_v56 = vld [vmem:[#allocation7 + $0x60] sm:$0xff]  ;;  %v4770_v30 = vld [vmem:[#allocation7 + $0x68] sm:$0xff] }
 0x14c   :  { %6162 = vst [vmem:[#allocation18_spill] sm:$0xff] %v4698_v19  ;;  %v4721_v11 = vmul.f32 %v2848_v28, %v4541_v14  ;;  %v4724_v0 = vmul.f32 %v2848_v28, %v4581_v36  ;;  %v4727_v12 = vmul.f32 %v2848_v28, %v4601_v2  ;;  %v4730_v24 = vmul.f32 %v2848_v28, %v4619_v35  ;;  %v4752_v40 = vld [vmem:[#allocation7 + $0xe0] sm:$0xff]  ;;  %v4778_v43 = vld [vmem:[#allocation7 + $0x88] sm:$0xff]  ;;  %v4829_v19 = vld [vmem:[#allocation7 + $0x38] sm:$0xff] }
 0x14d   :  { %6165 = vst [vmem:[#allocation24_spill] sm:$0xff] %v4718_v17  ;;  %v1602_v14 = vperm.slane %v4703_v62, 0  ;;  %v1611_v36 = vperm.slane %v4706_v61, 0  ;;  %v4745_v2 = vperm.slane %v4709_v6, 0  ;;  %v4748_v35 = vperm.slane %v4712_v57, 0  ;;  %v4782_v51 = vld [vmem:[#allocation7 + $0xc8] sm:$0xff] }
 0x14e   :  { %6166 = vst [vmem:[#allocation75_spill] sm:$0xff] %v4732_v56  ;;  %v4757_v37 = vperm.slane %v4721_v11, 0  ;;  %v4760_v47 = vperm.slane %v4724_v0, 0  ;;  %v4763_v52 = vperm.slane %v4727_v12, 0  ;;  %v4766_v38 = vperm.slane %v4730_v24, 0 }
 0x14f   :  { %6167 = vst [vmem:[#allocation59_spill] sm:$0xff] %v4734_v1  ;;  %v4754_v59 = vpop.eup %2851  ;;  %v1603_v15 = vmul.f32 %v1602_v14, %v4714_v21  ;;  %v1612_v28 = vmul.f32 %v1611_v36, %v4716_v34  ;;  %v1625_v60 = vmul.f32 %v4745_v2, %v4718_v17  ;;  %v1638_v26 = vmul.f32 %v4748_v35, %v4732_v56  ;;  %v4794_v56 = vld [vmem:[#allocation7 + $0xe8] sm:$0xff] }
 0x150   :  { %6168 = vst [vmem:[#allocation76_spill] sm:$0xff] %v4736_v48  ;;  %v1651_v22 = vmul.f32 %v4757_v37, %v4734_v1  ;;  %v1664_v21 = vmul.f32 %v4760_v47, %v4736_v48  ;;  %v1677_v34 = vmul.f32 %v4763_v52, %v4750_v32  ;;  %v4792_v17 = vmul.f32 %v4766_v38, %v4752_v40 }
 0x151   :  { %6169 = vst [vmem:[#allocation26_spill] sm:$0xff] %v4738_v25  ;;  %v1616_v63 = vadd.f32 %v1612_v28, %v1603_v15  ;;  %v1604_v9 = vmul.f32 %v1602_v14, %v4738_v25  ;;  %v1613_v1 = vmul.f32 %v1611_v36, %v4740_v53  ;;  %v1626_v48 = vmul.f32 %v4745_v2, %v4768_v54 }
 0x152   :  { %6170 = vst [vmem:[#allocation35_spill] sm:$0xff] %v4740_v53  ;;  %v1639_v13 = vmul.f32 %v4748_v35, %v4770_v30  ;;  %v1652_v33 = vmul.f32 %v4757_v37, %v4778_v43  ;;  %v1665_v15 = vmul.f32 %v4760_v47, %v4780_v3  ;;  %v1678_v28 = vmul.f32 %v4763_v52, %v4782_v51  ;;  %v4818_v53 = vld [vmem:[#allocation7 + $0xb0] sm:$0xff] }
 0x153   :  { %6171 = vst [vmem:[#allocation44_spill] sm:$0xff] %v4750_v32  ;;  %v4806_v32 = vld [vmem:[#allocation7 + $0x70] sm:$0xff]  ;;  %v1629_v25 = vadd.f32 %v1625_v60, %v1616_v63  ;;  %v1617_v20 = vadd.f32 %v1613_v1, %v1604_v9  ;;  %v1691_v55 = vmul.f32 %v4766_v38, %v4794_v56  ;;  %v4838_v60 = vld [vmem:[#allocation7 + $0x58] sm:$0xff]  ;;  %v1666_v27 = vmul.f32 %v4760_v47, %v4818_v53 }
 0x154   :  { %6172 = vst [vmem:[#allocation40_spill] sm:$0xff] %v4752_v40  ;;  %v4808_v40 = vld [vmem:[#allocation7 + $0x90] sm:$0xff]  ;;  %v1640_v63 = vmul.f32 %v4748_v35, %v4806_v32  ;;  %v4840_v1 = vld [vmem:[#allocation7 + $0x78] sm:$0xff]  ;;  %v1615_v7 = vmul.f32 %v1611_v36, %v4829_v19  ;;  %2853 = vpow2.f32 %v4680_v44  ;;  %v1906_v44 = vadd.f32 %v4674_v41, %v4633_v5 }
 0x155   :  { %6173 = vst [vmem:[#allocation42_spill] sm:$0xff] %v4768_v54  ;;  %v4820_v54 = vld [vmem:[#allocation7 + $0xd0] sm:$0xff]  ;;  %v1653_v9 = vmul.f32 %v4757_v37, %v4808_v40 }
 0x156   :  { %6174 = vst [vmem:[#allocation27_spill] sm:$0xff] %v4770_v30  ;;  %v1605_v30 = vmul.f32 %v1602_v14, %v4796_v23 }
 0x157   :  { %6175 = vst [vmem:[#allocation33_spill] sm:$0xff] %v4778_v43  ;;  %v4827_v43 = vld [vmem:[#allocation7 + $0x18] sm:$0xff] }
 0x158   :  { %6176 = vst [vmem:[#allocation30_spill] sm:$0xff] %v4780_v3  ;;  %v1614_v3 = vmul.f32 %v1611_v36, %v4798_v18  ;;  %v1606_v46 = vmul.f32 %v1602_v14, %v4827_v43 }
 0x159   :  { %6177 = vst [vmem:[#allocation34_spill] sm:$0xff] %v4782_v51  ;;  %v1627_v51 = vmul.f32 %v4745_v2, %v4804_v58 }
 0x15a   :  { %6178 = vst [vmem:[#allocation37_spill] sm:$0xff] %v4794_v56  ;;  %v1630_v56 = vadd.f32 %v1626_v48, %v1617_v20  ;;  %v4856_v20 = vld [vmem:[#allocation7 + $0xf8] sm:$0xff] }
 0x15b   :  { %6179 = vst [vmem:[#allocation38_spill] sm:$0xff] %v4796_v23  ;;  %v1642_v23 = vadd.f32 %v1638_v26, %v1629_v25  ;;  %v4854_v26 = vld [vmem:[#allocation7 + $0xd8] sm:$0xff] }
 0x15c   :  { %6180 = vst [vmem:[#allocation60_spill] sm:$0xff] %v4798_v18  ;;  %v1679_v18 = vmul.f32 %v4763_v52, %v4820_v54  ;;  %v1643_v25 = vadd.f32 %v1639_v13, %v1630_v56  ;;  %v1693_v13 = vmul.f32 %v4766_v38, %v4856_v20 }
 0x15d   :  { %6181 = vst [vmem:[#allocation36_spill] sm:$0xff] %v4804_v58  ;;  %v4848_v58 = vld [vmem:[#allocation7 + $0xb8] sm:$0xff]  ;;  %v1655_v48 = vadd.f32 %v1651_v22, %v1642_v23  ;;  %v1680_v23 = vmul.f32 %v4763_v52, %v4854_v26 }
 0x15e   :  { %6182 = vst [vmem:[#allocation20_spill] sm:$0xff] %v4806_v32  ;;  %v1618_v32 = vadd.f32 %v1614_v3, %v1605_v30  ;;  %v1619_v30 = vadd.f32 %v1615_v7, %v1606_v46  ;;  %v1667_v14 = vmul.f32 %v4760_v47, %v4848_v58  ;;  %v1707_v46 = vrot.slane %v4709_v6, 6 }
 0x15f   :  { %6183 = vst [vmem:[#allocation32_spill] sm:$0xff] %v4808_v40  ;;  %v1692_v40 = vmul.f32 %v4766_v38, %v4825_v16  ;;  %v1668_v36 = vadd.f32 %v1664_v21, %v1655_v48  ;;  %v1719_v47 = vrot.slane %v4727_v12, 2  ;;  %v4890_v12 = vmul.f32 %v4530_v45, %v4754_v59 }
 0x160   :  { %6184 = vst [vmem:[#allocation61_spill] sm:$0xff] %v4818_v53  ;;  %v1641_v53 = vmul.f32 %v4748_v35, %v4840_v1  ;;  %v1631_v3 = vadd.f32 %v1627_v51, %v1618_v32  ;;  %v1710_v35 = vrot.slane %v4712_v57, 5  ;;  %v1713_v32 = vrot.slane %v4721_v11, 4 }
 0x161   :  { %6185 = vst [vmem:[#allocation21_spill] sm:$0xff] %v4820_v54  ;;  %v1628_v54 = vmul.f32 %v4745_v2, %v4838_v60  ;;  %v1704_v2 = vrot.slane %v4706_v61, 7  ;;  %v1681_v51 = vadd.f32 %v1677_v34, %v1668_v36  ;;  %v4881_v34 = vld [vmem:[#allocation8 + $0x2] sm:$0x1]  ;;  %v1896_v45 = vrot.slane %v4686_v29, 4 }
 0x162   :  { %6186 = vst [vmem:[#allocation62_spill] sm:$0xff] %v4825_v16  ;;  %v1654_v16 = vmul.f32 %v4757_v37, %v4846_v10  ;;  %v1644_v22 = vadd.f32 %v1640_v63, %v1631_v3  ;;  %v1716_v37 = vrot.slane %v4724_v0, 3  ;;  %v4885_v11 = vmul.f32 %v4881_v34, %v4700_v49 }
 0x163   :  { %6187 = vst [vmem:[#allocation63_spill] sm:$0xff] %v4829_v19  ;;  %v1656_v19 = vadd.f32 %v1652_v33, %v1643_v25  ;;  %v1632_v56 = vadd.f32 %v1628_v54, %v1619_v30  ;;  %v1694_v52 = vadd.f32 %v4792_v17, %v1681_v51  ;;  %v1722_v54 = vrot.slane %v4730_v24, 1 }
 0x164   :  { %v1657_v21 = vadd.f32 %v1653_v9, %v1644_v22  ;;  %v1724_v61 = vsel %vm418_vm0, %v4703_v62, %v1704_v2  ;;  %v6188_v24 = vrot.slane %v4657_v39, 1  ;;  %v1897_v25 = vadd.f32 %v1896_v45, %v4686_v29  ;;  %v2854_v22 = vpop.eup %2853 }
 0x165   :  { %v1669_v7 = vadd.f32 %v1665_v15, %v1656_v19  ;;  %v1645_v33 = vadd.f32 %v1641_v53, %v1632_v56  ;;  %v1725_v57 = vsel %vm420_vm1, %v1724_v61, %v1707_v46  ;;  %1699 = vst [vmem:[#allocation10 + $0x80] sm:$0xff] %v1694_v52  ;;  %v1907_v3 = vadd.f32 %v1906_v44, %v4885_v11  ;;  %v6193_v46 = vld [vmem:[#allocation58_spill] sm:$0xff]  ;;  %v4934_v61 = vld [vmem:[#allocation5 + $0x60] sm:$0xff] }
 0x166   :  { %v1670_v6 = vadd.f32 %v1666_v27, %v1657_v21  ;;  %v1726_v17 = vsel %vm422_vm2, %v1725_v57, %v1710_v35  ;;  %v1859_v53 = vadd.f32 %v6188_v24, %v4657_v39  ;;  %v2072_v36 = vadd.f32 %v4684_v42, %v4663_v8  ;;  %v6196_v8 = vld [vmem:[#allocation43_spill] sm:$0xff]  ;;  %v6197_v35 = vld [vmem:[#allocation77_spill] sm:$0xff]  ;;  %v6198_v21 = vld [vmem:[#allocation50_spill] sm:$0xff]  ;;  %6201 = vst [vmem:[#allocation69_spill] sm:$0xff] %v4934_v61 }
 0x167   :  { %v1682_v38 = vadd.f32 %v1678_v28, %v1669_v7  ;;  %v1658_v19 = vadd.f32 %v1654_v16, %v1645_v33  ;;  %v1727_v62 = vsel %vm424_vm3, %v1726_v17, %v1713_v32  ;;  %v1898_v2 = vrot.slane %v1897_v25, 2  ;;  %v4921_v7 = vld [vmem:[#allocation5 + $0x50] sm:$0xff]  ;;  %v6199_v52 = vld [vmem:[#allocation18_spill] sm:$0xff]  ;;  %v6204_v17 = vld [vmem:[#allocation53_spill] sm:$0xff] }
 0x168   :  { %v1683_v27 = vadd.f32 %v1679_v18, %v1670_v6  ;;  %v1728_v49 = vsel %vm426_vm4, %v1727_v62, %v1716_v37  ;;  %v4904_v18 = vld [vmem:[#allocation5 + $0x38] sm:$0xff]  ;;  %v1860_v9 = vmul.f32 0.17677669, %v1859_v53  ;;  %v1908_v29 = vadd.f32 %v1907_v3, %v4890_v12  ;;  %6194 = vst [vmem:[#allocation67_spill] sm:$0xff] %v4921_v7  ;;  %v4936_v6 = vld [vmem:[#allocation5 + $0x68] sm:$0xff] }
 0x169   :  { %v1695_v0 = vadd.f32 %v1691_v55, %v1682_v38  ;;  %v1671_v16 = vadd.f32 %v1667_v14, %v1658_v19  ;;  %v6189_v55 = vrot.slane %v4659_v4, 2  ;;  %6190 = vst [vmem:[#allocation64_spill] sm:$0xff] %v4904_v18  ;;  %v1729_v63 = vsel %vm428_vm5, %v1728_v49, %v1719_v47  ;;  %v4938_v19 = vld [vmem:[#allocation5 + $0x70] sm:$0xff] }
 0x16a   :  { %v1696_v59 = vadd.f32 %v1692_v40, %v1683_v27  ;;  %v1730_v39 = vsel %vm430_vm6, %v1729_v63, %v1722_v54  ;;  %v1861_v14 = vmul.f32 1.442695, %v1860_v9  ;;  %v2091_v40 = vmul.f32 %v4904_v18, %v4649_v31  ;;  %v6200_v54 = vld [vmem:[#allocation52_spill] sm:$0xff]  ;;  %6202 = vst [vmem:[#allocation22_spill] sm:$0xff] %v4936_v6 }
 0x16b   :  { %1700 = vst [vmem:[#allocation10 + $0x88] sm:$0xff] %v1695_v0  ;;  %v1878_v15 = vadd.f32 %v6189_v55, %v4659_v4  ;;  %v1684_v28 = vadd.f32 %v1680_v23, %v1671_v16  ;;  %v4910_v4 = vld [vmem:[#allocation5 + $0x40] sm:$0xff]  ;;  %v4916_v23 = vld [vmem:[#allocation5 + $0x48] sm:$0xff]  ;;  %v2092_v51 = vadd.f32 %v6193_v46, %v4690_v50  ;;  %v4926_v42 = vmul.f32 %v6196_v8, %v2854_v22  ;;  %v4945_v55 = vld [vmem:[#allocation5 + $0x78] sm:$0xff] }
 0x16c   :  { %6191 = vst [vmem:[#allocation65_spill] sm:$0xff] %v4910_v4  ;;  %2855 = vpow2.f32 %v1861_v14  ;;  %v2073_v32 = vadd.f32 %v2072_v36, %v6197_v35  ;;  %v2109_v33 = vmul.f32 %v4910_v4, %v6198_v21  ;;  %v1899_v47 = vadd.f32 %v1898_v2, %v1897_v25  ;;  %v4957_v25 = vld [vmem:[#allocation5 + $0x90] sm:$0xff] }
 0x16d   :  { %v1879_v48 = vrot.slane %v1878_v15, 1  ;;  %1701 = vst [vmem:[#allocation10 + $0x90] sm:$0xff] %v1696_v59  ;;  %v1697_v30 = vadd.f32 %v1693_v13, %v1684_v28  ;;  %v4923_v13 = vld [vmem:[#allocation5 + $0x58] sm:$0xff]  ;;  %v2093_v38 = vadd.f32 %v2092_v51, %v6199_v52  ;;  %v2110_v50 = vmul.f32 %v4916_v23, %v6200_v54  ;;  %v6209_v22 = vld [vmem:[#allocation47_spill] sm:$0xff] }
 0x16e   :  { %6192 = vst [vmem:[#allocation66_spill] sm:$0xff] %v4916_v23  ;;  %v1909_v57 = vadd.f32 %v1908_v29, %v4926_v42  ;;  %v2074_v0 = vrot.slane %v2073_v32, 4  ;;  %v2111_v27 = vmul.f32 %v4921_v7, %v6204_v17  ;;  %v2112_v16 = vmul.f32 %v4923_v13, %v4649_v31  ;;  %v4966_v51 = vld [vmem:[#allocation5 + $0x98] sm:$0xff] }
 0x16f   :  { %1732 = vst [vmem:[#allocation11 + $0x20] sm:$0xff] %v1730_v39  ;;  %v1880_v56 = vadd.f32 %v1879_v48, %v1878_v15  ;;  %v1900_v24 = vrot.slane %v1899_v47, 1  ;;  %v2094_v53 = vadd.f32 %v2093_v38, %v2091_v40  ;;  %v2113_v49 = vadd.f32 %v2110_v50, %v2109_v33  ;;  %v4947_v15 = vld [vmem:[#allocation5 + $0x80] sm:$0xff]  ;;  %v4955_v48 = vld [vmem:[#allocation5 + $0x88] sm:$0xff] }
 0x170   :  { %6195 = vst [vmem:[#allocation68_spill] sm:$0xff] %v4923_v13  ;;  %v2075_v45 = vadd.f32 %v2074_v0, %v2073_v32  ;;  %v2130_v44 = vmul.f32 %v4934_v61, %v6198_v21  ;;  %v2131_v59 = vmul.f32 %v4936_v6, %v6200_v54  ;;  %v2132_v28 = vmul.f32 %v4938_v19, %v6204_v17  ;;  %v6251_v6 = vld [vmem:[#allocation26_spill] sm:$0xff]  ;;  %v6252_v13 = vld [vmem:[#allocation35_spill] sm:$0xff] }
 0x171   :  { %1702 = vst [vmem:[#allocation10 + $0x98] sm:$0xff] %v1697_v30  ;;  %v1881_v37 = vmul.f32 0.17677669, %v1880_v56  ;;  %v1901_v63 = vadd.f32 %v1900_v24, %v1899_v47  ;;  %v2095_v9 = vrot.slane %v2094_v53, 4  ;;  %v2114_v39 = vadd.f32 %v2113_v49, %v2111_v27  ;;  %v4977_v24 = vld [vmem:[#allocation5 + $0xa8] sm:$0xff] }
 0x172   :  { %6203 = vst [vmem:[#allocation70_spill] sm:$0xff] %v4938_v19  ;;  %v2856_v3 = vpop.eup %2855  ;;  %v2076_v30 = vrot.slane %v2075_v45, 2  ;;  %v2133_v14 = vmul.f32 %v4945_v55, %v4649_v31  ;;  %v2134_v36 = vadd.f32 %v2131_v59, %v2130_v44  ;;  %v2151_v40 = vmul.f32 %v4947_v15, %v6198_v21 }
 0x173   :  { %v1882_v62 = vmul.f32 1.442695, %v1881_v37  ;;  %6205 = vst [vmem:[#allocation71_spill] sm:$0xff] %v4945_v55  ;;  %v4964_v56 = vmul.f32 %v6209_v22, %v2856_v3  ;;  %v1902_v2 = vmul.f32 0.17677669, %v1901_v63  ;;  %v2096_v29 = vadd.f32 %v2095_v9, %v2094_v53  ;;  %v4972_v37 = vld [vmem:[#allocation5 + $0xa0] sm:$0xff] }
 0x174   :  { %6206 = vst [vmem:[#allocation23_spill] sm:$0xff] %v4947_v15  ;;  %v2115_v46 = vadd.f32 %v2114_v39, %v2112_v16  ;;  %v2077_v8 = vadd.f32 %v2076_v30, %v2075_v45  ;;  %v2135_v35 = vadd.f32 %v2134_v36, %v2132_v28  ;;  %v2152_v32 = vmul.f32 %v4955_v48, %v6200_v54  ;;  %v4979_v53 = vld [vmem:[#allocation5 + $0xb0] sm:$0xff]  ;;  %v4986_v3 = vld [vmem:[#allocation5 + $0xb8] sm:$0xff]  ;;  %v4992_v22 = vld [vmem:[#allocation5 + $0xc0] sm:$0xff] }
 0x175   :  { %2857 = vpow2.f32 %v1882_v62  ;;  %6207 = vst [vmem:[#allocation72_spill] sm:$0xff] %v4955_v48  ;;  %v2153_v33 = vmul.f32 %v4957_v25, %v6204_v17  ;;  %v1903_v47 = vmul.f32 1.442695, %v1902_v2  ;;  %v1910_v52 = vadd.f32 %v1909_v57, %v4964_v56  ;;  %v6214_v57 = vld [vmem:[#allocation48_spill] sm:$0xff] }
 0x176   :  { %6208 = vst [vmem:[#allocation73_spill] sm:$0xff] %v4957_v25  ;;  %v2097_v38 = vrot.slane %v2096_v29, 2  ;;  %v2116_v50 = vrot.slane %v2115_v46, 4  ;;  %v2078_v0 = vrot.slane %v2077_v8, 1  ;;  %v2136_v27 = vadd.f32 %v2135_v35, %v2133_v14  ;;  %v6249_v25 = vld [vmem:[#allocation44_spill] sm:$0xff] }
 0x177   :  { %6210 = vst [vmem:[#allocation74_spill] sm:$0xff] %v4966_v51  ;;  %v2154_v16 = vmul.f32 %v4966_v51, %v4649_v31  ;;  %v2155_v62 = vadd.f32 %v2152_v32, %v2151_v40  ;;  %2859 = vpow2.f32 %v1903_v47  ;;  %v2172_v59 = vmul.f32 %v4972_v37, %v6198_v21  ;;  %v6250_v15 = vld [vmem:[#allocation40_spill] sm:$0xff] }
 0x178   :  { %6211 = vst [vmem:[#allocation39_spill] sm:$0xff] %v4972_v37  ;;  %v2098_v45 = vadd.f32 %v2097_v38, %v2096_v29  ;;  %v2117_v44 = vadd.f32 %v2116_v50, %v2115_v46  ;;  %v2079_v63 = vadd.f32 %v2078_v0, %v2077_v8  ;;  %v2137_v9 = vrot.slane %v2136_v27, 4  ;;  %v4995_v8 = vld [vmem:[#allocation5 + $0xc8] sm:$0xff]  ;;  %v6248_v37 = vld [vmem:[#allocation76_spill] sm:$0xff] }
 0x179   :  { %6212 = vst [vmem:[#allocation31_spill] sm:$0xff] %v4977_v24  ;;  %v2156_v39 = vadd.f32 %v2155_v62, %v2153_v33  ;;  %v2173_v36 = vmul.f32 %v4977_v24, %v6200_v54  ;;  %v2174_v40 = vmul.f32 %v4979_v53, %v6204_v17  ;;  %v2175_v47 = vmul.f32 %v4986_v3, %v4649_v31 }
 0x17a   :  { %6213 = vst [vmem:[#allocation45_spill] sm:$0xff] %v4979_v53  ;;  %v2099_v30 = vrot.slane %v2098_v45, 1  ;;  %v2118_v14 = vrot.slane %v2117_v44, 2  ;;  %v2080_v29 = vmul.f32 0.17677669, %v2079_v63  ;;  %v2138_v46 = vadd.f32 %v2137_v9, %v2136_v27  ;;  %v5003_v9 = vld [vmem:[#allocation5 + $0xd8] sm:$0xff] }
 0x17b   :  { %v2858_v49 = vpop.eup %2857  ;;  %6215 = vst [vmem:[#allocation41_spill] sm:$0xff] %v4986_v3  ;;  %v2157_v35 = vadd.f32 %v2156_v39, %v2154_v16  ;;  %v2176_v38 = vadd.f32 %v2173_v36, %v2172_v59  ;;  %v6247_v53 = vld [vmem:[#allocation59_spill] sm:$0xff] }
 0x17c   :  { %v4984_v28 = vmul.f32 %v6214_v57, %v2858_v49  ;;  %6216 = vst [vmem:[#allocation46_spill] sm:$0xff] %v4992_v22  ;;  %v2100_v32 = vadd.f32 %v2099_v30, %v2098_v45  ;;  %v2119_v33 = vadd.f32 %v2118_v14, %v2117_v44  ;;  %v2081_v50 = vmul.f32 1.442695, %v2080_v29  ;;  %v4999_v49 = vld [vmem:[#allocation5 + $0xd0] sm:$0xff]  ;;  %v6220_v44 = vld [vmem:[#allocation49_spill] sm:$0xff] }
 0x17d   :  { %6217 = vst [vmem:[#allocation58_spill] sm:$0xff] %v4995_v8  ;;  %v2139_v0 = vrot.slane %v2138_v46, 2  ;;  %v2158_v62 = vrot.slane %v2157_v35, 4  ;;  %v2193_v57 = vmul.f32 %v4992_v22, %v6198_v21  ;;  %v2177_v16 = vadd.f32 %v2176_v38, %v2174_v40 }
 0x17e   :  { %v1911_v2 = vadd.f32 %v1910_v52, %v4984_v28  ;;  %6218 = vst [vmem:[#allocation43_spill] sm:$0xff] %v4999_v49  ;;  %v2860_v52 = vpop.eup %2859  ;;  %v2101_v63 = vmul.f32 0.17677669, %v2100_v32  ;;  %v2120_v27 = vrot.slane %v2119_v33, 1  ;;  %v2194_v45 = vmul.f32 %v4995_v8, %v6200_v54  ;;  %v5012_v32 = vld [vmem:[#allocation5 + $0xe0] sm:$0xff] }
 0x17f   :  { %6219 = vst [vmem:[#allocation77_spill] sm:$0xff] %v5003_v9  ;;  %v5008_v39 = vmul.f32 %v6220_v44, %v2860_v52  ;;  %2861 = vpow2.f32 %v2081_v50  ;;  %v2140_v59 = vadd.f32 %v2139_v0, %v2138_v46  ;;  %v2159_v30 = vadd.f32 %v2158_v62, %v2157_v35  ;;  %v5017_v52 = vld [vmem:[#allocation5 + $0xe8] sm:$0xff]  ;;  %v5023_v44 = vld [vmem:[#allocation5 + $0xf8] sm:$0xff] }
 0x180   :  { %v2102_v14 = vmul.f32 1.442695, %v2101_v63  ;;  %v2121_v36 = vadd.f32 %v2120_v27, %v2119_v33  ;;  %v2178_v29 = vadd.f32 %v2177_v16, %v2175_v47  ;;  %v2195_v22 = vmul.f32 %v4999_v49, %v6204_v17  ;;  %6221 = vst [vmem:[#allocation50_spill] sm:$0xff] %v5012_v32  ;;  %v5019_v33 = vld [vmem:[#allocation5 + $0xf0] sm:$0xff] }
 0x181   :  { %v1912_v40 = vadd.f32 %v1911_v2, %v5008_v39  ;;  %v2141_v38 = vrot.slane %v2140_v59, 1  ;;  %v2160_v3 = vrot.slane %v2159_v30, 2  ;;  %v2196_v8 = vmul.f32 %v5003_v9, %v4649_v31  ;;  %6222 = vst [vmem:[#allocation18_spill] sm:$0xff] %v5017_v52 }
 0x182   :  { %2863 = vpow2.f32 %v2102_v14  ;;  %v2122_v46 = vmul.f32 0.17677669, %v2121_v36  ;;  %v2179_v35 = vrot.slane %v2178_v29, 4  ;;  %v2197_v50 = vadd.f32 %v2194_v45, %v2193_v57  ;;  %6223 = vst [vmem:[#allocation52_spill] sm:$0xff] %v5019_v33 }
 0x183   :  { %v1913_v47 = vadd.f32 1e-08, %v1912_v40  ;;  %v2142_v0 = vadd.f32 %v2141_v38, %v2140_v59  ;;  %v2161_v62 = vadd.f32 %v2160_v3, %v2159_v30  ;;  %v2214_v63 = vmul.f32 %v5012_v32, %v6198_v21  ;;  %6224 = vst [vmem:[#allocation53_spill] sm:$0xff] %v5023_v44  ;;  %v5029_v59 = vld [vmem:[#allocation2 + $0xe0] sm:$0xff]  ;;  %v5031_v3 = vld [vmem:[#allocation2 + $0xe8] sm:$0xff]  ;;  %v6227_v21 = vld [vmem:[#allocation51_spill] sm:$0xff] }
 0x184   :  { %v2123_v2 = vmul.f32 1.442695, %v2122_v46  ;;  %v2180_v27 = vadd.f32 %v2179_v35, %v2178_v29  ;;  %v2198_v16 = vadd.f32 %v2197_v50, %v2195_v22  ;;  %v2215_v9 = vmul.f32 %v5017_v52, %v6200_v54  ;;  %6225 = vst [vmem:[#allocation47_spill] sm:$0xff] %v5029_v59  ;;  %v5038_v35 = vld [vmem:[#allocation2 + $0xf0] sm:$0xff]  ;;  %v5040_v50 = vld [vmem:[#allocation2 + $0xf8] sm:$0xff] }
 0x185   :  { %v2862_v14 = vpop.eup %2861  ;;  %2865 = vrcp.f32 %v1913_v47  ;;  %v2143_v36 = vmul.f32 0.17677669, %v2142_v0  ;;  %v2162_v57 = vrot.slane %v2161_v62, 1  ;;  %v2216_v45 = vmul.f32 %v5019_v33, %v6204_v17  ;;  %6226 = vst [vmem:[#allocation48_spill] sm:$0xff] %v5031_v3  ;;  %v6231_v33 = vld [vmem:[#allocation55_spill] sm:$0xff] }
 0x186   :  { %v5034_v30 = vmul.f32 %v6227_v21, %v2862_v14  ;;  %2867 = vpow2.f32 %v2123_v2  ;;  %v2181_v22 = vrot.slane %v2180_v27, 2  ;;  %v2199_v29 = vadd.f32 %v2198_v16, %v2196_v8  ;;  %6229 = vst [vmem:[#allocation51_spill] sm:$0xff] %v5038_v35  ;;  %v6232_v2 = vld [vmem:[#allocation56_spill] sm:$0xff]  ;;  %v6233_v16 = vld [vmem:[#allocation57_spill] sm:$0xff]  ;;  %v6246_v32 = vld [vmem:[#allocation75_spill] sm:$0xff] }
 0x187   :  { %v2144_v40 = vmul.f32 1.442695, %v2143_v36  ;;  %v2163_v38 = vadd.f32 %v2162_v57, %v2161_v62  ;;  %v2217_v54 = vmul.f32 %v5023_v44, %v4649_v31  ;;  %v2218_v46 = vadd.f32 %v2215_v9, %v2214_v63  ;;  %6230 = vst [vmem:[#allocation80_spill] sm:$0xff] %v5040_v50  ;;  %v6235_v57 = vld [vmem:[#allocation54_spill] sm:$0xff]  ;;  %v6237_v21 = vld [vmem:[#allocation25_spill] sm:$0xff]  ;;  %v6245_v44 = vld [vmem:[#allocation24_spill] sm:$0xff] }
 0x188   :  { %6228 = vst [vmem:[#allocation49_spill] sm:$0xff] %v5034_v30  ;;  %v2864_v17 = vpop.eup %2863  ;;  %v5042_v47 = vadd.f32 %v2181_v22, %v2180_v27  ;;  %v2200_v0 = vrot.slane %v2199_v29, 4  ;;  %v2392_v14 = vmul.f32 %v5029_v59, %v6231_v33  ;;  %v2393_v8 = vmul.f32 %v5031_v3, %v6232_v2  ;;  %v6262_v3 = vld [vmem:[#allocation20_spill] sm:$0xff]  ;;  %v6265_v30 = vld [vmem:[#allocation21_spill] sm:$0xff] }
 0x189   :  { %v5049_v62 = vmul.f32 %v6233_v16, %v2864_v17  ;;  %2869 = vpow2.f32 %v2144_v40  ;;  %v2164_v31 = vmul.f32 0.17677669, %v2163_v38  ;;  %v2219_v9 = vadd.f32 %v2218_v46, %v2216_v45  ;;  %v6241_v45 = vld [vmem:[#allocation29_spill] sm:$0xff] }
 0x18a   :  { %v5052_v36 = vadd.f32 %v2200_v0, %v2199_v29  ;;  %v5056_v27 = vmul.f32 %v5038_v35, %v6235_v57  ;;  %v5060_v33 = vmul.f32 %v5040_v50, %v6237_v21  ;;  %v5066_v40 = vadd.f32 %v2393_v8, %v2392_v14  ;;  %v6261_v35 = vld [vmem:[#allocation36_spill] sm:$0xff] }
 0x18b   :  { %6234 = vst [vmem:[#allocation55_spill] sm:$0xff] %v5049_v62  ;;  %v2866_v22 = vpop.eup %2865  ;;  %v5062_v2 = vmul.f32 1.442695, %v2164_v31  ;;  %v5064_v17 = vadd.f32 %v2219_v9, %v2217_v54  ;;  %v5070_v38 = vmul.f32 %v5029_v59, %v6241_v45  ;;  %v6244_v45 = vld [vmem:[#allocation79_spill] sm:$0xff]  ;;  %v6264_v62 = vld [vmem:[#allocation61_spill] sm:$0xff] }
 0x18c   :  { %6236 = vst [vmem:[#allocation56_spill] sm:$0xff] %v5056_v27  ;;  %v5072_v29 = vpop.eup %2867  ;;  %v5075_v46 = vmul.f32 %v2866_v22, %v4633_v5  ;;  %v5078_v0 = vmul.f32 %v2866_v22, %v4674_v41  ;;  %v5081_v16 = vmul.f32 %v2866_v22, %v4885_v11  ;;  %v5084_v54 = vmul.f32 %v2866_v22, %v4890_v12 }
 0x18d   :  { %6238 = vst [vmem:[#allocation57_spill] sm:$0xff] %v5060_v33  ;;  %v5087_v14 = vmul.f32 %v2866_v22, %v4926_v42  ;;  %v5090_v8 = vmul.f32 %v2866_v22, %v4964_v56  ;;  %v5093_v31 = vmul.f32 %v2866_v22, %v4984_v28  ;;  %v5096_v5 = vmul.f32 %v2866_v22, %v5008_v39  ;;  %v6243_v39 = vld [vmem:[#allocation78_spill] sm:$0xff] }
 0x18e   :  { %6239 = vst [vmem:[#allocation54_spill] sm:$0xff] %v5064_v17  ;;  %v1927_v41 = vperm.slane %v5075_v46, 0  ;;  %v1936_v11 = vperm.slane %v5078_v0, 0  ;;  %v1949_v9 = vperm.slane %v5081_v16, 0  ;;  %v1962_v12 = vperm.slane %v5084_v54, 0 }
 0x18f   :  { %6240 = vst [vmem:[#allocation25_spill] sm:$0xff] %v5066_v40  ;;  %v5102_v57 = vpop.eup %2869  ;;  %v1975_v42 = vperm.slane %v5087_v14, 0  ;;  %v1988_v56 = vperm.slane %v5090_v8, 0  ;;  %v2001_v28 = vperm.slane %v5093_v31, 0  ;;  %v2014_v21 = vperm.slane %v5096_v5, 0  ;;  %v6263_v40 = vld [vmem:[#allocation32_spill] sm:$0xff] }
 0x190   :  { %6242 = vst [vmem:[#allocation29_spill] sm:$0xff] %v5070_v38  ;;  %v1928_v22 = vmul.f32 %v1927_v41, %v6243_v39  ;;  %v1937_v63 = vmul.f32 %v1936_v11, %v6244_v45  ;;  %v1950_v52 = vmul.f32 %v1949_v9, %v6245_v44  ;;  %v1963_v49 = vmul.f32 %v1962_v12, %v6246_v32  ;;  %v6253_v39 = vld [vmem:[#allocation42_spill] sm:$0xff]  ;;  %v6254_v45 = vld [vmem:[#allocation27_spill] sm:$0xff]  ;;  %v6255_v44 = vld [vmem:[#allocation33_spill] sm:$0xff] }
 0x191   :  { %v1976_v24 = vmul.f32 %v1975_v42, %v6247_v53  ;;  %v1989_v51 = vmul.f32 %v1988_v56, %v6248_v37  ;;  %v2002_v48 = vmul.f32 %v2001_v28, %v6249_v25  ;;  %v2015_v55 = vmul.f32 %v2014_v21, %v6250_v15  ;;  %v6256_v32 = vld [vmem:[#allocation30_spill] sm:$0xff]  ;;  %v6258_v25 = vld [vmem:[#allocation37_spill] sm:$0xff] }
 0x192   :  { %v1941_v19 = vadd.f32 %v1937_v63, %v1928_v22  ;;  %v1929_v61 = vmul.f32 %v1927_v41, %v6251_v6  ;;  %v1938_v7 = vmul.f32 %v1936_v11, %v6252_v13  ;;  %v1951_v23 = vmul.f32 %v1949_v9, %v6253_v39  ;;  %v6257_v53 = vld [vmem:[#allocation34_spill] sm:$0xff]  ;;  %v6260_v22 = vld [vmem:[#allocation60_spill] sm:$0xff] }
 0x193   :  { %v1964_v59 = vmul.f32 %v1962_v12, %v6254_v45  ;;  %v1977_v4 = vmul.f32 %v1975_v42, %v6255_v44  ;;  %v1990_v38 = vmul.f32 %v1988_v56, %v6256_v32  ;;  %v2003_v50 = vmul.f32 %v2001_v28, %v6257_v53  ;;  %v6259_v15 = vld [vmem:[#allocation38_spill] sm:$0xff] }
 0x194   :  { %v1954_v37 = vadd.f32 %v1950_v52, %v1941_v19  ;;  %v1942_v18 = vadd.f32 %v1938_v7, %v1929_v61  ;;  %v2016_v33 = vmul.f32 %v2014_v21, %v6258_v25  ;;  %v1930_v63 = vmul.f32 %v1927_v41, %v6259_v15  ;;  %v6266_v7 = vld [vmem:[#allocation62_spill] sm:$0xff]  ;;  %v6267_v25 = vld [vmem:[#allocation63_spill] sm:$0xff] }
 0x195   :  { %v1939_v6 = vmul.f32 %v1936_v11, %v6260_v22  ;;  %v1952_v13 = vmul.f32 %v1949_v9, %v6261_v35  ;;  %v1965_v39 = vmul.f32 %v1962_v12, %v6262_v3  ;;  %v1978_v45 = vmul.f32 %v1975_v42, %v6263_v40 }
 0x196   :  { %v1967_v27 = vadd.f32 %v1963_v49, %v1954_v37  ;;  %v1955_v44 = vadd.f32 %v1951_v23, %v1942_v18  ;;  %v1991_v32 = vmul.f32 %v1988_v56, %v6264_v62  ;;  %v2004_v53 = vmul.f32 %v2001_v28, %v6265_v30 }
 0x197   :  { %v1943_v19 = vadd.f32 %v1939_v6, %v1930_v63  ;;  %v2017_v61 = vmul.f32 %v2014_v21, %v6266_v7  ;;  %v1931_v52 = vmul.f32 %v1927_v41, %v4827_v43  ;;  %v1940_v15 = vmul.f32 %v1936_v11, %v6267_v25  ;;  %v6273_v7 = vld [vmem:[#allocation25_spill] sm:$0xff]  ;;  %v6274_v25 = vld [vmem:[#allocation28_spill] sm:$0xff] }
 0x198   :  { %v1980_v22 = vadd.f32 %v1976_v24, %v1967_v27  ;;  %v1968_v17 = vadd.f32 %v1964_v59, %v1955_v44  ;;  %v1953_v35 = vmul.f32 %v1949_v9, %v4838_v60  ;;  %v1966_v3 = vmul.f32 %v1962_v12, %v4840_v1 }
 0x199   :  { %v1956_v40 = vadd.f32 %v1952_v13, %v1943_v19  ;;  %v1944_v49 = vadd.f32 %v1940_v15, %v1931_v52  ;;  %v1979_v18 = vmul.f32 %v1975_v42, %v4846_v10  ;;  %v1992_v23 = vmul.f32 %v1988_v56, %v4848_v58  ;;  %v6269_v42 = vld [vmem:[#allocation54_spill] sm:$0xff]  ;;  %v6272_v19 = vld [vmem:[#allocation56_spill] sm:$0xff] }
 0x19a   :  { %v1993_v30 = vadd.f32 %v1989_v51, %v1980_v22  ;;  %v1981_v62 = vadd.f32 %v1977_v4, %v1968_v17  ;;  %v2005_v37 = vmul.f32 %v2001_v28, %v4854_v26  ;;  %v2018_v43 = vmul.f32 %v2014_v21, %v4856_v20  ;;  %v6270_v28 = vld [vmem:[#allocation49_spill] sm:$0xff] }
 0x19b   :  { %v1969_v41 = vadd.f32 %v1965_v39, %v1956_v40  ;;  %v1957_v11 = vadd.f32 %v1953_v35, %v1944_v49  ;;  %v2029_v24 = vrot.slane %v5078_v0, 7  ;;  %v2032_v60 = vrot.slane %v5081_v16, 6  ;;  %v6277_v49 = vld [vmem:[#allocation51_spill] sm:$0xff] }
 0x19c   :  { %v2006_v59 = vadd.f32 %v2002_v48, %v1993_v30  ;;  %v1994_v1 = vadd.f32 %v1990_v38, %v1981_v62  ;;  %v2035_v27 = vrot.slane %v5084_v54, 5  ;;  %v2038_v10 = vrot.slane %v5087_v14, 4  ;;  %v6278_v62 = vld [vmem:[#allocation57_spill] sm:$0xff] }
 0x19d   :  { %v1982_v9 = vadd.f32 %v1978_v45, %v1969_v41  ;;  %v1970_v58 = vadd.f32 %v1966_v3, %v1957_v11  ;;  %v2041_v4 = vrot.slane %v5090_v8, 3  ;;  %v2044_v26 = vrot.slane %v5093_v31, 2  ;;  %v5155_v31 = vld [vmem:[#allocation8 + $0x3] sm:$0x1]  ;;  %v6280_v41 = vld [vmem:[#allocation80_spill] sm:$0xff] }
 0x19e   :  { %v2019_v51 = vadd.f32 %v2015_v55, %v2006_v59  ;;  %v2007_v20 = vadd.f32 %v2003_v50, %v1994_v1  ;;  %v2047_v17 = vrot.slane %v5096_v5, 1  ;;  %v2049_v0 = vsel %vm418_vm0, %v5075_v46, %v2029_v24  ;;  %v6281_v59 = vld [vmem:[#allocation29_spill] sm:$0xff] }
 0x19f   :  { %v1995_v16 = vadd.f32 %v1991_v32, %v1982_v9  ;;  %v1983_v48 = vadd.f32 %v1979_v18, %v1970_v58  ;;  %v2050_v38 = vsel %vm420_vm1, %v2049_v0, %v2032_v60  ;;  %v5152_v54 = vmul.f32 %v4881_v34, %v5072_v29 }
 0x1a0   :  { %2024 = vst [vmem:[#allocation10 + $0xa0] sm:$0xff] %v2019_v51  ;;  %v2020_v14 = vadd.f32 %v2016_v33, %v2007_v20  ;;  %v2051_v8 = vsel %vm422_vm2, %v2050_v38, %v2035_v27  ;;  %v5159_v55 = vmul.f32 %v5155_v31, %v5102_v57  ;;  %2871 = vpow2.f32 %v5062_v2  ;;  %v6271_v57 = vld [vmem:[#allocation55_spill] sm:$0xff]  ;;  %v6282_v27 = vld [vmem:[#allocation65_spill] sm:$0xff]  ;;  %v6286_v38 = vld [vmem:[#allocation68_spill] sm:$0xff] }
 0x1a1   :  { %v2008_v50 = vadd.f32 %v2004_v53, %v1995_v16  ;;  %v1996_v46 = vadd.f32 %v1992_v23, %v1983_v48  ;;  %v2052_v5 = vsel %vm424_vm3, %v2051_v8, %v2038_v10  ;;  %v6268_v34 = vrot.slane %v5042_v47, 1  ;;  %v5183_v23 = vld [vmem:[#allocation8 + $0x4] sm:$0x1]  ;;  %v6283_v10 = vld [vmem:[#allocation47_spill] sm:$0xff] }
 0x1a2   :  { %2025 = vst [vmem:[#allocation10 + $0xa8] sm:$0xff] %v2020_v14  ;;  %v2053_v33 = vsel %vm426_vm4, %v2052_v5, %v2041_v4  ;;  %v2202_v12 = vrot.slane %v5052_v36, 2  ;;  %v2221_v56 = vrot.slane %v6269_v42, 4  ;;  %v2231_v21 = vadd.f32 %v6271_v57, %v6270_v28  ;;  %v6285_v20 = vld [vmem:[#allocation67_spill] sm:$0xff] }
 0x1a3   :  { %v2184_v29 = vadd.f32 %v6268_v34, %v5042_v47  ;;  %v2021_v63 = vadd.f32 %v2017_v61, %v2008_v50  ;;  %v2009_v2 = vadd.f32 %v2005_v37, %v1996_v46  ;;  %v2054_v6 = vsel %vm428_vm5, %v2053_v33, %v2044_v26  ;;  %v6275_v61 = vld [vmem:[#allocation48_spill] sm:$0xff]  ;;  %v6284_v26 = vld [vmem:[#allocation66_spill] sm:$0xff]  ;;  %v6287_v46 = vld [vmem:[#allocation69_spill] sm:$0xff] }
 0x1a4   :  { %v2055_v39 = vsel %vm430_vm6, %v2054_v6, %v2047_v17  ;;  %v2203_v45 = vadd.f32 %v2202_v12, %v5052_v36  ;;  %v2222_v47 = vadd.f32 %v2221_v56, %v6269_v42  ;;  %v2232_v44 = vadd.f32 %v2231_v21, %v5152_v54  ;;  %v6276_v36 = vld [vmem:[#allocation19_spill] sm:$0xff]  ;;  %v6288_v34 = vld [vmem:[#allocation22_spill] sm:$0xff] }
 0x1a5   :  { %v2185_v13 = vmul.f32 0.17677669, %v2184_v29  ;;  %2026 = vst [vmem:[#allocation10 + $0xb0] sm:$0xff] %v2021_v63  ;;  %v2022_v32 = vadd.f32 %v2018_v43, %v2009_v2  ;;  %v2397_v52 = vadd.f32 %v6273_v7, %v6272_v19  ;;  %v2414_v15 = vmul.f32 %v6275_v61, %v6274_v25  ;;  %v6279_v43 = vld [vmem:[#allocation64_spill] sm:$0xff]  ;;  %v6289_v56 = vld [vmem:[#allocation70_spill] sm:$0xff]  ;;  %v6291_v25 = vld [vmem:[#allocation23_spill] sm:$0xff] }
 0x1a6   :  { %v2872_v22 = vpop.eup %2871  ;;  %2057 = vst [vmem:[#allocation11 + $0x28] sm:$0xff] %v2055_v39  ;;  %v2204_v35 = vrot.slane %v2203_v45, 1  ;;  %v2223_v3 = vrot.slane %v2222_v47, 2  ;;  %v2233_v40 = vadd.f32 %v2232_v44, %v5159_v55  ;;  %v2415_v18 = vmul.f32 %v6277_v49, %v6276_v36 }
 0x1a7   :  { %v2186_v53 = vmul.f32 1.442695, %v2185_v13  ;;  %2027 = vst [vmem:[#allocation10 + $0xb8] sm:$0xff] %v2022_v32  ;;  %v5186_v30 = vmul.f32 %v5183_v23, %v2872_v22  ;;  %v2398_v37 = vadd.f32 %v2397_v52, %v6278_v62  ;;  %v2416_v11 = vmul.f32 %v6280_v41, %v6279_v43  ;;  %v6290_v13 = vld [vmem:[#allocation71_spill] sm:$0xff]  ;;  %v6293_v43 = vld [vmem:[#allocation73_spill] sm:$0xff] }
 0x1a8   :  { %v2205_v24 = vadd.f32 %v2204_v35, %v2203_v45  ;;  %v2224_v60 = vadd.f32 %v2223_v3, %v2222_v47  ;;  %v2417_v1 = vadd.f32 %v2414_v15, %v6281_v59  ;;  %v2434_v9 = vmul.f32 %v6283_v10, %v6282_v27  ;;  %v5209_v47 = vld [vmem:[#allocation8 + $0x5] sm:$0x1] }
 0x1a9   :  { %2873 = vpow2.f32 %v2186_v53  ;;  %v2234_v58 = vadd.f32 %v2233_v40, %v5186_v30  ;;  %v2399_v4 = vrot.slane %v2398_v37, 4  ;;  %v2435_v51 = vmul.f32 %v6275_v61, %v6284_v26  ;;  %v6292_v40 = vld [vmem:[#allocation72_spill] sm:$0xff] }
 0x1aa   :  { %v2436_v17 = vmul.f32 %v6277_v49, %v6285_v20  ;;  %v2206_v0 = vmul.f32 0.17677669, %v2205_v24  ;;  %v2225_v16 = vrot.slane %v2224_v60, 1  ;;  %v2418_v48 = vadd.f32 %v2417_v1, %v2415_v18 }
 0x1ab   :  { %v2437_v14 = vmul.f32 %v6280_v41, %v6286_v38  ;;  %v2400_v8 = vadd.f32 %v2399_v4, %v2398_v37  ;;  %v2438_v50 = vadd.f32 %v2435_v51, %v2434_v9  ;;  %v2455_v5 = vmul.f32 %v6283_v10, %v6287_v46 }
 0x1ac   :  { %v2456_v29 = vmul.f32 %v6275_v61, %v6288_v34  ;;  %v2207_v33 = vmul.f32 1.442695, %v2206_v0  ;;  %v2226_v12 = vadd.f32 %v2225_v16, %v2224_v60  ;;  %v2419_v42 = vadd.f32 %v2418_v48, %v2416_v11  ;;  %v6294_v60 = vld [vmem:[#allocation74_spill] sm:$0xff]  ;;  %v6296_v0 = vld [vmem:[#allocation31_spill] sm:$0xff]  ;;  %v6297_v48 = vld [vmem:[#allocation45_spill] sm:$0xff] }
 0x1ad   :  { %v2457_v21 = vmul.f32 %v6277_v49, %v6289_v56  ;;  %v2401_v2 = vrot.slane %v2400_v8, 2  ;;  %v2439_v6 = vadd.f32 %v2438_v50, %v2436_v17  ;;  %v2458_v39 = vmul.f32 %v6280_v41, %v6290_v13 }
 0x1ae   :  { %v2459_v45 = vadd.f32 %v2456_v29, %v2455_v5  ;;  %2875 = vpow2.f32 %v2207_v33  ;;  %v2227_v32 = vmul.f32 0.17677669, %v2226_v12  ;;  %v2420_v53 = vrot.slane %v2419_v42, 4  ;;  %v6298_v33 = vld [vmem:[#allocation41_spill] sm:$0xff] }
 0x1af   :  { %v2874_v63 = vpop.eup %2873  ;;  %v2402_v19 = vadd.f32 %v2401_v2, %v2400_v8  ;;  %v2440_v7 = vadd.f32 %v2439_v6, %v2437_v14  ;;  %v2476_v15 = vmul.f32 %v6283_v10, %v6291_v25  ;;  %v2477_v36 = vmul.f32 %v6275_v61, %v6292_v40  ;;  %v5229_v14 = vld [vmem:[#allocation8 + $0x6] sm:$0x1] }
 0x1b0   :  { %v5212_v44 = vmul.f32 %v5209_v47, %v2874_v63  ;;  %v2460_v52 = vadd.f32 %v2459_v45, %v2457_v21  ;;  %v2228_v22 = vmul.f32 1.442695, %v2227_v32  ;;  %v2421_v3 = vadd.f32 %v2420_v53, %v2419_v42  ;;  %v6299_v32 = vld [vmem:[#allocation46_spill] sm:$0xff] }
 0x1b1   :  { %v2403_v18 = vrot.slane %v2402_v19, 1  ;;  %v2441_v62 = vrot.slane %v2440_v7, 4  ;;  %v2478_v11 = vmul.f32 %v6277_v49, %v6293_v43  ;;  %v2479_v59 = vmul.f32 %v6280_v41, %v6294_v60 }
 0x1b2   :  { %v2235_v35 = vadd.f32 %v2234_v58, %v5212_v44  ;;  %v2461_v37 = vadd.f32 %v2460_v52, %v2458_v39  ;;  %2877 = vpow2.f32 %v2228_v22  ;;  %v2422_v24 = vrot.slane %v2421_v3, 2  ;;  %v6295_v58 = vld [vmem:[#allocation39_spill] sm:$0xff] }
 0x1b3   :  { %v2480_v1 = vadd.f32 %v2477_v36, %v2476_v15  ;;  %v2404_v27 = vadd.f32 %v2403_v18, %v2402_v19  ;;  %v2442_v9 = vadd.f32 %v2441_v62, %v2440_v7  ;;  %v2497_v26 = vmul.f32 %v6283_v10, %v6295_v58  ;;  %v5239_v19 = vld [vmem:[#allocation8 + $0x7] sm:$0x1] }
 0x1b4   :  { %v2462_v4 = vrot.slane %v2461_v37, 4  ;;  %v2876_v51 = vpop.eup %2875  ;;  %v2423_v20 = vadd.f32 %v2422_v24, %v2421_v3  ;;  %v2498_v16 = vmul.f32 %v6275_v61, %v6296_v0  ;;  %v2499_v38 = vmul.f32 %v6277_v49, %v6297_v48  ;;  %v6300_v3 = vld [vmem:[#allocation58_spill] sm:$0xff] }
 0x1b5   :  { %v2481_v17 = vadd.f32 %v2480_v1, %v2478_v11  ;;  %v5232_v8 = vmul.f32 %v5229_v14, %v2876_v51  ;;  %v2405_v50 = vmul.f32 0.17677669, %v2404_v27  ;;  %v2443_v46 = vrot.slane %v2442_v9, 2 }
 0x1b6   :  { %v2463_v5 = vadd.f32 %v2462_v4, %v2461_v37  ;;  %v2424_v34 = vrot.slane %v2423_v20, 1  ;;  %v2500_v12 = vmul.f32 %v6280_v41, %v6298_v33  ;;  %v2501_v42 = vadd.f32 %v2498_v16, %v2497_v26  ;;  %v6301_v37 = vld [vmem:[#allocation43_spill] sm:$0xff] }
 0x1b7   :  { %v2482_v29 = vadd.f32 %v2481_v17, %v2479_v59  ;;  %v2236_v56 = vadd.f32 %v2235_v35, %v5232_v8  ;;  %v2406_v21 = vmul.f32 1.442695, %v2405_v50  ;;  %v2444_v63 = vadd.f32 %v2443_v46, %v2442_v9  ;;  %v6302_v59 = vld [vmem:[#allocation77_spill] sm:$0xff] }
 0x1b8   :  { %v2464_v2 = vrot.slane %v2463_v5, 2  ;;  %v2878_v6 = vpop.eup %2877  ;;  %v2425_v13 = vadd.f32 %v2424_v34, %v2423_v20  ;;  %v2502_v45 = vadd.f32 %v2501_v42, %v2499_v38  ;;  %v2518_v53 = vmul.f32 %v6283_v10, %v6299_v32  ;;  %v6303_v20 = vld [vmem:[#allocation50_spill] sm:$0xff] }
 0x1b9   :  { %v2483_v39 = vrot.slane %v2482_v29, 4  ;;  %v2230_v7 = vmul.f32 %v5239_v19, %v2878_v6  ;;  %2879 = vpow2.f32 %v2406_v21  ;;  %v2445_v52 = vrot.slane %v2444_v63, 1  ;;  %v6306_v6 = vld [vmem:[#allocation53_spill] sm:$0xff] }
 0x1ba   :  { %v2465_v25 = vadd.f32 %v2464_v2, %v2463_v5  ;;  %v2426_v15 = vmul.f32 0.17677669, %v2425_v13  ;;  %v2503_v35 = vadd.f32 %v2502_v45, %v2500_v12  ;;  %v2519_v40 = vmul.f32 %v6275_v61, %v6300_v3  ;;  %v6304_v5 = vld [vmem:[#allocation18_spill] sm:$0xff]  ;;  %v6305_v12 = vld [vmem:[#allocation52_spill] sm:$0xff] }
 0x1bb   :  { %v2484_v22 = vadd.f32 %v2483_v39, %v2482_v29  ;;  %v2237_v36 = vadd.f32 %v2236_v56, %v2230_v7  ;;  %v2446_v18 = vadd.f32 %v2445_v52, %v2444_v63  ;;  %v2520_v43 = vmul.f32 %v6277_v49, %v6301_v37  ;;  %v2920_v63 = vld [vmem:[#allocation8] sm:$0x1] }
 0x1bc   :  { %v2466_v62 = vrot.slane %v2465_v25, 1  ;;  %v2427_v11 = vmul.f32 1.442695, %v2426_v15  ;;  %v2504_v60 = vrot.slane %v2503_v35, 4  ;;  %v2521_v1 = vmul.f32 %v6280_v41, %v6302_v59  ;;  %v5279_v15 = vld [vmem:[#allocation7] sm:$0xff] }
 0x1bd   :  { %v2485_v24 = vrot.slane %v2484_v22, 2  ;;  %v2238_v27 = vadd.f32 1e-08, %v2237_v36  ;;  %v2447_v9 = vmul.f32 0.17677669, %v2446_v18  ;;  %v2522_v58 = vadd.f32 %v2519_v40, %v2518_v53  ;;  %v5298_v36 = vld [vmem:[#allocation7 + $0x8] sm:$0xff] }
 0x1be   :  { %v2467_v4 = vadd.f32 %v2466_v62, %v2465_v25  ;;  %v2505_v51 = vadd.f32 %v2504_v60, %v2503_v35  ;;  %v2539_v17 = vmul.f32 %v6283_v10, %v6303_v20  ;;  %v2540_v34 = vmul.f32 %v6275_v61, %v6304_v5  ;;  %6310 = vst [vmem:[#allocation75_spill] sm:$0xff] %v5298_v36  ;;  %v5300_v18 = vld [vmem:[#allocation7 + $0x28] sm:$0xff]  ;;  %v5316_v37 = vld [vmem:[#allocation7 + $0xa0] sm:$0xff]  ;;  %v5360_v5 = vld [vmem:[#allocation7 + $0x10] sm:$0xff] }
 0x1bf   :  { %v2486_v26 = vadd.f32 %v2485_v24, %v2484_v22  ;;  %v2880_v0 = vpop.eup %2879  ;;  %2881 = vrcp.f32 %v2238_v27  ;;  %v2448_v16 = vmul.f32 1.442695, %v2447_v9  ;;  %v2523_v38 = vadd.f32 %v2522_v58, %v2520_v43  ;;  %v5281_v22 = vld [vmem:[#allocation7 + $0x20] sm:$0xff]  ;;  %6311 = vst [vmem:[#allocation59_spill] sm:$0xff] %v5300_v18  ;;  %v5334_v27 = vld [vmem:[#allocation7 + $0x68] sm:$0xff] }
 0x1c0   :  { %v2468_v48 = vmul.f32 0.17677669, %v2467_v4  ;;  %v2506_v46 = vrot.slane %v2505_v51, 2  ;;  %2883 = vpow2.f32 %v2427_v11  ;;  %v2541_v42 = vmul.f32 %v6277_v49, %v6305_v12  ;;  %6307 = vst [vmem:[#allocation78_spill] sm:$0xff] %v5281_v22  ;;  %v5346_v20 = vld [vmem:[#allocation7 + $0xe0] sm:$0xff] }
 0x1c1   :  { %v2487_v50 = vrot.slane %v2486_v26, 1  ;;  %v2524_v33 = vadd.f32 %v2523_v38, %v2521_v1  ;;  %v2543_v10 = vadd.f32 %v2540_v34, %v2539_v17  ;;  %2885 = vpow2.f32 %v2448_v16  ;;  %6313 = vst [vmem:[#allocation44_spill] sm:$0xff] %v5316_v37  ;;  %v5332_v1 = vld [vmem:[#allocation7 + $0x48] sm:$0xff]  ;;  %v5362_v34 = vld [vmem:[#allocation7 + $0x30] sm:$0xff] }
 0x1c2   :  { %v2469_v29 = vmul.f32 1.442695, %v2468_v48  ;;  %v5254_v21 = vadd.f32 %v2506_v46, %v2505_v51  ;;  %v5256_v2 = vmul.f32 %v2920_v63, %v2880_v0  ;;  %v5260_v13 = vmul.f32 %v6280_v41, %v6306_v6  ;;  %6314 = vst [vmem:[#allocation40_spill] sm:$0xff] %v5332_v1  ;;  %v5344_v51 = vld [vmem:[#allocation7 + $0xc0] sm:$0xff]  ;;  %v5348_v17 = vld [vmem:[#allocation7 + $0x88] sm:$0xff] }
 0x1c3   :  { %v2488_v56 = vadd.f32 %v2487_v50, %v2486_v26  ;;  %v2525_v32 = vrot.slane %v2524_v33, 4  ;;  %v5265_v49 = vadd.f32 %v2543_v10, %v2541_v42  ;;  %6315 = vst [vmem:[#allocation26_spill] sm:$0xff] %v5334_v27  ;;  %v2921_v0 = vld [vmem:[#allocation8 + $0x1] sm:$0x1]  ;;  %v5358_v46 = vld [vmem:[#allocation7 + $0xa8] sm:$0xff] }
 0x1c4   :  { %2887 = vpow2.f32 %v2469_v29  ;;  %6316 = vst [vmem:[#allocation35_spill] sm:$0xff] %v5344_v51  ;;  %v5372_v63 = vld [vmem:[#allocation7 + $0xc8] sm:$0xff] }
 0x1c5   :  { %v2882_v61 = vpop.eup %2881  ;;  %v5262_v39 = vmul.f32 0.17677669, %v2488_v56  ;;  %6317 = vst [vmem:[#allocation42_spill] sm:$0xff] %v5346_v20  ;;  %v5364_v29 = vadd.f32 %v2525_v32, %v2524_v33  ;;  %v5374_v6 = vld [vmem:[#allocation7 + $0xe8] sm:$0xff] }
 0x1c6   :  { %v5268_v53 = vmul.f32 %v2882_v61, %v6270_v28  ;;  %v5271_v52 = vmul.f32 %v2882_v61, %v6271_v57  ;;  %v5274_v25 = vmul.f32 %v2882_v61, %v5152_v54  ;;  %v5277_v41 = vmul.f32 %v2882_v61, %v5159_v55  ;;  %v2884_v35 = vpop.eup %2883  ;;  %v5294_v54 = vld [vmem:[#allocation7 + $0x40] sm:$0xff]  ;;  %6318 = vst [vmem:[#allocation27_spill] sm:$0xff] %v5348_v17 }
 0x1c7   :  { %v5284_v3 = vmul.f32 %v2882_v61, %v5186_v30  ;;  %v5287_v28 = vmul.f32 %v2882_v61, %v5212_v44  ;;  %v5290_v57 = vmul.f32 %v2882_v61, %v5232_v8  ;;  %v5292_v40 = vmul.f32 %v2882_v61, %v2230_v7  ;;  %6308 = vst [vmem:[#allocation79_spill] sm:$0xff] %v5294_v54  ;;  %v5296_v55 = vld [vmem:[#allocation7 + $0x60] sm:$0xff]  ;;  %v5318_v43 = vpop.eup %2885  ;;  %v5376_v61 = vld [vmem:[#allocation7 + $0x50] sm:$0xff] }
 0x1c8   :  { %6309 = vst [vmem:[#allocation24_spill] sm:$0xff] %v5296_v55  ;;  %v5303_v62 = vperm.slane %v5268_v53, 0  ;;  %v5306_v30 = vperm.slane %v5271_v52, 0  ;;  %v5309_v44 = vperm.slane %v5274_v25, 0  ;;  %v5312_v8 = vperm.slane %v5277_v41, 0  ;;  %v5314_v7 = vld [vmem:[#allocation7 + $0x80] sm:$0xff] }
 0x1c9   :  { %6312 = vst [vmem:[#allocation76_spill] sm:$0xff] %v5314_v7  ;;  %v5321_v11 = vperm.slane %v5284_v3, 0  ;;  %v5324_v24 = vperm.slane %v5287_v28, 0  ;;  %v5327_v60 = vperm.slane %v5290_v57, 0  ;;  %v5330_v59 = vperm.slane %v5292_v40, 0 }
 0x1ca   :  { %v5336_v9 = vpop.eup %2887  ;;  %v2253_v4 = vmul.f32 %v5303_v62, %v5279_v15  ;;  %v2262_v58 = vmul.f32 %v5306_v30, %v5281_v22  ;;  %v2275_v26 = vmul.f32 %v5309_v44, %v5294_v54  ;;  %v5350_v16 = vmul.f32 %v2921_v0, %v2884_v35  ;;  %6319 = vst [vmem:[#allocation33_spill] sm:$0xff] %v5358_v46  ;;  %v5388_v0 = vld [vmem:[#allocation7 + $0x90] sm:$0xff] }
 0x1cb   :  { %v2288_v48 = vmul.f32 %v5312_v8, %v5296_v55  ;;  %v2301_v38 = vmul.f32 %v5321_v11, %v5314_v7  ;;  %v2314_v50 = vmul.f32 %v5324_v24, %v5316_v37  ;;  %6320 = vst [vmem:[#allocation30_spill] sm:$0xff] %v5360_v5  ;;  %v2254_v42 = vmul.f32 %v5303_v62, %v5298_v36  ;;  %v5416_v55 = vld [vmem:[#allocation7 + $0xf0] sm:$0xff] }
 0x1cc   :  { %6321 = vst [vmem:[#allocation34_spill] sm:$0xff] %v5362_v34  ;;  %v2266_v12 = vadd.f32 %v2262_v58, %v2253_v4  ;;  %v2263_v56 = vmul.f32 %v5306_v30, %v5300_v18  ;;  %v2276_v10 = vmul.f32 %v5309_v44, %v5332_v1  ;;  %v2327_v33 = vmul.f32 %v5327_v60, %v5344_v51  ;;  %v5386_v58 = vld [vmem:[#allocation7 + $0x70] sm:$0xff] }
 0x1cd   :  { %6322 = vst [vmem:[#allocation37_spill] sm:$0xff] %v5372_v63  ;;  %v2340_v32 = vmul.f32 %v5330_v59, %v5346_v20  ;;  %v2289_v35 = vmul.f32 %v5312_v8, %v5334_v27  ;;  %v2302_v4 = vmul.f32 %v5321_v11, %v5348_v17  ;;  %v2315_v1 = vmul.f32 %v5324_v24, %v5358_v46  ;;  %v5394_v18 = vld [vmem:[#allocation7 + $0xb0] sm:$0xff]  ;;  %v5396_v20 = vld [vmem:[#allocation7 + $0x18] sm:$0xff] }
 0x1ce   :  { %6323 = vst [vmem:[#allocation38_spill] sm:$0xff] %v5374_v6  ;;  %v2279_v45 = vadd.f32 %v2275_v26, %v2266_v12  ;;  %v2267_v37 = vadd.f32 %v2263_v56, %v2254_v42  ;;  %v2255_v51 = vmul.f32 %v5303_v62, %v5360_v5  ;;  %v5398_v27 = vld [vmem:[#allocation7 + $0x38] sm:$0xff]  ;;  %v2328_v17 = vmul.f32 %v5327_v60, %v5372_v63  ;;  %v5408_v42 = vld [vmem:[#allocation7 + $0xd0] sm:$0xff] }
 0x1cf   :  { %6324 = vst [vmem:[#allocation60_spill] sm:$0xff] %v5376_v61  ;;  %v2341_v36 = vmul.f32 %v5330_v59, %v5374_v6  ;;  %v2264_v26 = vmul.f32 %v5306_v30, %v5362_v34  ;;  %v2277_v12 = vmul.f32 %v5309_v44, %v5376_v61  ;;  %v5410_v56 = vld [vmem:[#allocation7 + $0x58] sm:$0xff]  ;;  %v2290_v7 = vmul.f32 %v5312_v8, %v5386_v58 }
 0x1d0   :  { %6325 = vst [vmem:[#allocation36_spill] sm:$0xff] %v5386_v58  ;;  %v2292_v46 = vadd.f32 %v2288_v48, %v2279_v45  ;;  %v2280_v5 = vadd.f32 %v2276_v10, %v2267_v37  ;;  %v2303_v63 = vmul.f32 %v5321_v11, %v5388_v0  ;;  %v5418_v6 = vld [vmem:[#allocation7 + $0x78] sm:$0xff]  ;;  %v2316_v61 = vmul.f32 %v5324_v24, %v5394_v18 }
 0x1d1   :  { %6326 = vst [vmem:[#allocation20_spill] sm:$0xff] %v5388_v0  ;;  %v2268_v34 = vadd.f32 %v2264_v26, %v2255_v51  ;;  %v2256_v54 = vmul.f32 %v5303_v62, %v5396_v20  ;;  %v2265_v45 = vmul.f32 %v5306_v30, %v5398_v27  ;;  %v5426_v37 = vld [vmem:[#allocation7 + $0x98] sm:$0xff]  ;;  %v2329_v58 = vmul.f32 %v5327_v60, %v5408_v42 }
 0x1d2   :  { %6327 = vst [vmem:[#allocation32_spill] sm:$0xff] %v5394_v18  ;;  %v5428_v48 = vld [vmem:[#allocation7 + $0xb8] sm:$0xff]  ;;  %v2305_v10 = vadd.f32 %v2301_v38, %v2292_v46  ;;  %v2293_v0 = vadd.f32 %v2289_v35, %v2280_v5  ;;  %v2278_v51 = vmul.f32 %v5309_v44, %v5410_v56  ;;  %v2342_v18 = vmul.f32 %v5330_v59, %v5416_v55 }
 0x1d3   :  { %6328 = vst [vmem:[#allocation61_spill] sm:$0xff] %v5396_v20  ;;  %v2281_v26 = vadd.f32 %v2277_v12, %v2268_v34  ;;  %v2269_v62 = vadd.f32 %v2265_v45, %v2256_v54  ;;  %v2291_v30 = vmul.f32 %v5312_v8, %v5418_v6  ;;  %v2304_v38 = vmul.f32 %v5321_v11, %v5426_v37  ;;  %v5444_v5 = vld [vmem:[#allocation7 + $0xf8] sm:$0xff] }
 0x1d4   :  { %6329 = vst [vmem:[#allocation21_spill] sm:$0xff] %v5398_v27  ;;  %v5438_v27 = vld [vmem:[#allocation7 + $0xd8] sm:$0xff]  ;;  %v2318_v20 = vadd.f32 %v2314_v50, %v2305_v10  ;;  %v2306_v22 = vadd.f32 %v2302_v4, %v2293_v0  ;;  %v2317_v46 = vmul.f32 %v5324_v24, %v5428_v48  ;;  %v2354_v35 = vrot.slane %v5271_v52, 7 }
 0x1d5   :  { %v2294_v44 = vadd.f32 %v2290_v7, %v2281_v26  ;;  %v2282_v34 = vadd.f32 %v2278_v51, %v2269_v62  ;;  %v2357_v54 = vrot.slane %v5274_v25, 6  ;;  %v2330_v50 = vmul.f32 %v5327_v60, %v5438_v27 }
 0x1d6   :  { %v2331_v12 = vadd.f32 %v2327_v33, %v2318_v20  ;;  %v2319_v8 = vadd.f32 %v2315_v1, %v2306_v22  ;;  %v2360_v4 = vrot.slane %v5277_v41, 5  ;;  %v2343_v24 = vmul.f32 %v5330_v59, %v5444_v5 }
 0x1d7   :  { %v2307_v0 = vadd.f32 %v2303_v63, %v2294_v44  ;;  %v2295_v11 = vadd.f32 %v2291_v30, %v2282_v34  ;;  %v2363_v45 = vrot.slane %v5284_v3, 4  ;;  %v2366_v52 = vrot.slane %v5287_v28, 3 }
 0x1d8   :  { %v2344_v7 = vadd.f32 %v2340_v32, %v2331_v12  ;;  %v2332_v10 = vadd.f32 %v2328_v17, %v2319_v8  ;;  %v2374_v25 = vsel %vm418_vm0, %v5268_v53, %v2354_v35  ;;  %v2369_v60 = vrot.slane %v5290_v57, 2 }
 0x1d9   :  { %v2320_v22 = vadd.f32 %v2316_v61, %v2307_v0  ;;  %v2308_v1 = vadd.f32 %v2304_v38, %v2295_v11  ;;  %v2375_v41 = vsel %vm420_vm1, %v2374_v25, %v2357_v54  ;;  %v2372_v63 = vrot.slane %v5292_v40, 1  ;;  %v2922_v38 = vld [vmem:[#allocation8 + $0x2] sm:$0x1] }
 0x1da   :  { %2349 = vst [vmem:[#allocation10 + $0xc0] sm:$0xff] %v2344_v7  ;;  %v2345_v20 = vadd.f32 %v2341_v36, %v2332_v10  ;;  %v2376_v59 = vsel %vm422_vm2, %v2375_v41, %v2360_v4  ;;  %v2490_v3 = vmul.f32 1.442695, %v5262_v39  ;;  %v6330_v53 = vrot.slane %v5254_v21, 1 }
 0x1db   :  { %v2333_v17 = vadd.f32 %v2329_v58, %v2320_v22  ;;  %v2321_v33 = vadd.f32 %v2317_v46, %v2308_v1  ;;  %v2377_v28 = vsel %vm424_vm3, %v2376_v59, %v2363_v45  ;;  %v2527_v32 = vrot.slane %v5364_v29, 2 }
 0x1dc   :  { %v2509_v61 = vadd.f32 %v6330_v53, %v5254_v21  ;;  %2350 = vst [vmem:[#allocation10 + $0xc8] sm:$0xff] %v2345_v20  ;;  %v2378_v57 = vsel %vm426_vm4, %v2377_v28, %v2366_v52  ;;  %v2545_v40 = vadd.f32 %v5265_v49, %v5260_v13  ;;  %2889 = vpow2.f32 %v2490_v3 }
 0x1dd   :  { %v2346_v36 = vadd.f32 %v2342_v18, %v2333_v17  ;;  %v2334_v51 = vadd.f32 %v2330_v50, %v2321_v33  ;;  %v2379_v39 = vsel %vm428_vm5, %v2378_v57, %v2369_v60  ;;  %v2528_v62 = vadd.f32 %v2527_v32, %v5364_v29 }
 0x1de   :  { %v2510_v58 = vmul.f32 0.17677669, %v2509_v61  ;;  %v2380_v26 = vsel %vm430_vm6, %v2379_v39, %v2372_v63  ;;  %v2546_v30 = vrot.slane %v2545_v40, 4  ;;  %v2450_v46 = vmul.f32 %v2922_v38, %v5318_v43  ;;  %v6331_v39 = vld [vmem:[#allocation78_spill] sm:$0xff]  ;;  %v6334_v38 = vld [vmem:[#allocation76_spill] sm:$0xff] }
 0x1df   :  { %2351 = vst [vmem:[#allocation10 + $0xd0] sm:$0xff] %v2346_v36  ;;  %v2347_v21 = vadd.f32 %v2343_v24, %v2334_v51  ;;  %v2556_v13 = vadd.f32 %v5350_v16, %v5256_v2  ;;  %v2529_v49 = vrot.slane %v2528_v62, 1  ;;  %v2471_v29 = vmul.f32 %v5155_v31, %v5336_v9 }
 0x1e0   :  { %v2511_v44 = vmul.f32 1.442695, %v2510_v58  ;;  %2382 = vst [vmem:[#allocation11 + $0x30] sm:$0xff] %v2380_v26  ;;  %v2547_v18 = vadd.f32 %v2546_v30, %v2545_v40  ;;  %v6332_v26 = vld [vmem:[#allocation79_spill] sm:$0xff]  ;;  %v6333_v30 = vld [vmem:[#allocation24_spill] sm:$0xff] }
 0x1e1   :  { %2352 = vst [vmem:[#allocation10 + $0xd8] sm:$0xff] %v2347_v21  ;;  %v2530_v34 = vadd.f32 %v2529_v49, %v2528_v62  ;;  %v2557_v54 = vadd.f32 %v2556_v13, %v2450_v46  ;;  %v6335_v13 = vld [vmem:[#allocation75_spill] sm:$0xff] }
 0x1e2   :  { %2891 = vpow2.f32 %v2511_v44  ;;  %v2548_v35 = vrot.slane %v2547_v18, 2  ;;  %v2890_v12 = vpop.eup %2889 }
 0x1e3   :  { %v2531_v8 = vmul.f32 0.17677669, %v2530_v34  ;;  %v2492_v0 = vmul.f32 %v5183_v23, %v2890_v12  ;;  %v2558_v11 = vadd.f32 %v2557_v54, %v2471_v29  ;;  %v6338_v54 = vld [vmem:[#allocation44_spill] sm:$0xff] }
 0x1e4   :  { %v2549_v50 = vadd.f32 %v2548_v35, %v2547_v18  ;;  %v6336_v18 = vld [vmem:[#allocation59_spill] sm:$0xff]  ;;  %v6337_v35 = vld [vmem:[#allocation40_spill] sm:$0xff] }
 0x1e5   :  { %v2532_v4 = vmul.f32 1.442695, %v2531_v8  ;;  %v2559_v52 = vadd.f32 %v2558_v11, %v2492_v0  ;;  %v6339_v8 = vld [vmem:[#allocation35_spill] sm:$0xff] }
 0x1e6   :  { %v2550_v43 = vrot.slane %v2549_v50, 1 }
 0x1e7   :  { %2893 = vpow2.f32 %v2532_v4 }
 0x1e8   :  { %v2892_v24 = vpop.eup %2891  ;;  %v2551_v45 = vadd.f32 %v2550_v43, %v2549_v50  ;;  %v6341_v43 = vld [vmem:[#allocation26_spill] sm:$0xff] }
 0x1e9   :  { %v2513_v10 = vmul.f32 %v5209_v47, %v2892_v24 }
 0x1ea   :  { %v2552_v7 = vmul.f32 0.17677669, %v2551_v45  ;;  %v6342_v45 = vld [vmem:[#allocation27_spill] sm:$0xff] }
 0x1eb   :  { %v2560_v9 = vadd.f32 %v2559_v52, %v2513_v10 }
 0x1ec   :  { %v2553_v25 = vmul.f32 1.442695, %v2552_v7 }
 0x1ed   :  { %v2894_v22 = vpop.eup %2893 }
 0x1ee   :  { %2895 = vpow2.f32 %v2553_v25  ;;  %v2534_v31 = vmul.f32 %v5229_v14, %v2894_v22  ;;  %v6344_v25 = vld [vmem:[#allocation33_spill] sm:$0xff] }
 0x1f0   :  { %v2561_v1 = vadd.f32 %v2560_v9, %v2534_v31 }
 0x1f4   :  { %v2896_v60 = vpop.eup %2895 }
 0x1f5   :  { %v2555_v41 = vmul.f32 %v5239_v19, %v2896_v60 }
 0x1f7   :  { %v2562_v20 = vadd.f32 %v2561_v1, %v2555_v41  ;;  %v6346_v1 = vld [vmem:[#allocation34_spill] sm:$0xff] }
 0x1f9   :  { %v2563_v23 = vadd.f32 1e-08, %v2562_v20 }
 0x1fb   :  { %2897 = vrcp.f32 %v2563_v23 }
 0x201   :  { %v2898_v63 = vpop.eup %2897 }
 0x202   :  { %v5483_v59 = vmul.f32 %v2898_v63, %v5256_v2  ;;  %v5486_v47 = vmul.f32 %v2898_v63, %v5350_v16  ;;  %v5488_v3 = vmul.f32 %v2898_v63, %v2450_v46  ;;  %v5490_v17 = vmul.f32 %v2898_v63, %v2471_v29 }
 0x203   :  { %v5492_v14 = vmul.f32 %v2898_v63, %v2492_v0  ;;  %v5494_v33 = vmul.f32 %v2898_v63, %v2513_v10  ;;  %v5496_v28 = vmul.f32 %v2898_v63, %v2534_v31  ;;  %v5498_v19 = vmul.f32 %v2898_v63, %v2555_v41  ;;  %v6343_v10 = vld [vmem:[#allocation30_spill] sm:$0xff]  ;;  %v6345_v31 = vld [vmem:[#allocation37_spill] sm:$0xff]  ;;  %v6347_v41 = vld [vmem:[#allocation60_spill] sm:$0xff] }
 0x204   :  { %v2577_v53 = vperm.slane %v5483_v59, 0  ;;  %v2586_v2 = vperm.slane %v5486_v47, 0  ;;  %v2599_v61 = vperm.slane %v5488_v3, 0  ;;  %v2612_v16 = vperm.slane %v5490_v17, 0 }
 0x205   :  { %v2625_v57 = vperm.slane %v5492_v14, 0  ;;  %v2638_v32 = vperm.slane %v5494_v33, 0  ;;  %v2651_v40 = vperm.slane %v5496_v28, 0  ;;  %v5508_v36 = vperm.slane %v5498_v19, 0 }
 0x206   :  { %v2578_v51 = vmul.f32 %v2577_v53, %v5279_v15  ;;  %v2587_v58 = vmul.f32 %v2586_v2, %v6331_v39  ;;  %v2600_v62 = vmul.f32 %v2599_v61, %v6332_v26  ;;  %v2613_v21 = vmul.f32 %v2612_v16, %v6333_v30  ;;  %v6340_v15 = vld [vmem:[#allocation42_spill] sm:$0xff]  ;;  %v6350_v30 = vld [vmem:[#allocation20_spill] sm:$0xff] }
 0x207   :  { %v2626_v46 = vmul.f32 %v2625_v57, %v6334_v38  ;;  %v2579_v49 = vmul.f32 %v2577_v53, %v6335_v13  ;;  %v2588_v34 = vmul.f32 %v2586_v2, %v6336_v18  ;;  %v2601_v29 = vmul.f32 %v2599_v61, %v6337_v35 }
 0x208   :  { %v2591_v44 = vadd.f32 %v2587_v58, %v2578_v51  ;;  %v2639_v12 = vmul.f32 %v2638_v32, %v6338_v54  ;;  %v2652_v50 = vmul.f32 %v2651_v40, %v6339_v8  ;;  %v2665_v4 = vmul.f32 %v5508_v36, %v6340_v15  ;;  %v6348_v51 = vld [vmem:[#allocation38_spill] sm:$0xff]  ;;  %v6349_v58 = vld [vmem:[#allocation36_spill] sm:$0xff] }
 0x209   :  { %v2614_v0 = vmul.f32 %v2612_v16, %v6341_v43  ;;  %v2592_v24 = vadd.f32 %v2588_v34, %v2579_v49  ;;  %v2627_v7 = vmul.f32 %v2625_v57, %v6342_v45  ;;  %v2580_v52 = vmul.f32 %v2577_v53, %v6343_v10  ;;  %v6352_v49 = vld [vmem:[#allocation21_spill] sm:$0xff]  ;;  %v6353_v54 = vld [vmem:[#allocation32_spill] sm:$0xff] }
 0x20a   :  { %v2604_v11 = vadd.f32 %v2600_v62, %v2591_v44  ;;  %v2640_v22 = vmul.f32 %v2638_v32, %v6344_v25  ;;  %v2653_v9 = vmul.f32 %v2651_v40, %v6345_v31  ;;  %v2589_v60 = vmul.f32 %v2586_v2, %v6346_v1  ;;  %v6351_v44 = vld [vmem:[#allocation61_spill] sm:$0xff] }
 0x20b   :  { %v2602_v20 = vmul.f32 %v2599_v61, %v6347_v41  ;;  %v2605_v63 = vadd.f32 %v2601_v29, %v2592_v24  ;;  %v2666_v39 = vmul.f32 %v5508_v36, %v6348_v51  ;;  %v2615_v26 = vmul.f32 %v2612_v16, %v6349_v58 }
 0x20c   :  { %v2617_v23 = vadd.f32 %v2613_v21, %v2604_v11  ;;  %v2593_v62 = vadd.f32 %v2589_v60, %v2580_v52  ;;  %v2628_v38 = vmul.f32 %v2625_v57, %v6350_v30  ;;  %v2581_v13 = vmul.f32 %v2577_v53, %v6351_v44 }
 0x20d   :  { %v2590_v18 = vmul.f32 %v2586_v2, %v6352_v49  ;;  %v2618_v35 = vadd.f32 %v2614_v0, %v2605_v63  ;;  %v2641_v8 = vmul.f32 %v2638_v32, %v6353_v54  ;;  %v2603_v15 = vmul.f32 %v2599_v61, %v5410_v56 }
 0x20e   :  { %v2630_v34 = vadd.f32 %v2626_v46, %v2617_v23  ;;  %v2606_v21 = vadd.f32 %v2602_v20, %v2593_v62  ;;  %v2654_v29 = vmul.f32 %v2651_v40, %v5408_v42  ;;  %v2616_v11 = vmul.f32 %v2612_v16, %v5418_v6 }
 0x20f   :  { %v2594_v43 = vadd.f32 %v2590_v18, %v2581_v13  ;;  %v2631_v45 = vadd.f32 %v2627_v7, %v2618_v35  ;;  %v2667_v10 = vmul.f32 %v5508_v36, %v5416_v55  ;;  %v2629_v53 = vmul.f32 %v2625_v57, %v5426_v37 }
 0x210   :  { %v2643_v24 = vadd.f32 %v2639_v12, %v2630_v34  ;;  %v2619_v2 = vadd.f32 %v2615_v26, %v2606_v21  ;;  %v2679_v0 = vrot.slane %v5486_v47, 7  ;;  %v2682_v52 = vrot.slane %v5488_v3, 6 }
 0x211   :  { %v2607_v46 = vadd.f32 %v2603_v15, %v2594_v43  ;;  %v2644_v61 = vadd.f32 %v2640_v22, %v2631_v45  ;;  %v2642_v42 = vmul.f32 %v2638_v32, %v5428_v48  ;;  %v2685_v25 = vrot.slane %v5490_v17, 5 }
 0x212   :  { %v2656_v56 = vadd.f32 %v2652_v50, %v2643_v24  ;;  %v2632_v6 = vadd.f32 %v2628_v38, %v2619_v2  ;;  %v2655_v12 = vmul.f32 %v2651_v40, %v5438_v27  ;;  %v2688_v55 = vrot.slane %v5492_v14, 4 }
 0x213   :  { %v2620_v16 = vadd.f32 %v2616_v11, %v2607_v46  ;;  %v2657_v37 = vadd.f32 %v2653_v9, %v2644_v61  ;;  %v2691_v57 = vrot.slane %v5494_v33, 3  ;;  %v2699_v47 = vsel %vm418_vm0, %v5483_v59, %v2679_v0 }
 0x214   :  { %v2669_v7 = vadd.f32 %v2665_v4, %v2656_v56  ;;  %v2645_v3 = vadd.f32 %v2641_v8, %v2632_v6  ;;  %v2694_v22 = vrot.slane %v5496_v28, 2  ;;  %v2700_v48 = vsel %vm420_vm1, %v2699_v47, %v2682_v52 }
 0x215   :  { %v2633_v50 = vadd.f32 %v2629_v53, %v2620_v16  ;;  %v2670_v17 = vadd.f32 %v2666_v39, %v2657_v37  ;;  %v2697_v32 = vrot.slane %v5498_v19, 1  ;;  %v2701_v27 = vsel %vm422_vm2, %v2700_v48, %v2685_v25 }
 0x216   :  { %2674 = vst [vmem:[#allocation10 + $0xe0] sm:$0xff] %v2669_v7  ;;  %v2658_v14 = vadd.f32 %v2654_v29, %v2645_v3  ;;  %v2668_v33 = vmul.f32 %v5508_v36, %v5444_v5  ;;  %v2702_v4 = vsel %vm424_vm3, %v2701_v27, %v2688_v55 }
 0x217   :  { %v2646_v40 = vadd.f32 %v2642_v42, %v2633_v50  ;;  %2675 = vst [vmem:[#allocation10 + $0xe8] sm:$0xff] %v2670_v17  ;;  %v2703_v59 = vsel %vm426_vm4, %v2702_v4, %v2691_v57 }
 0x218   :  { %v2671_v28 = vadd.f32 %v2667_v10, %v2658_v14  ;;  %v2704_v5 = vsel %vm428_vm5, %v2703_v59, %v2694_v22 }
 0x219   :  { %v2659_v19 = vadd.f32 %v2655_v12, %v2646_v40  ;;  %v2705_v36 = vsel %vm430_vm6, %v2704_v5, %v2697_v32 }
 0x21a   :  { %2676 = vst [vmem:[#allocation10 + $0xf0] sm:$0xff] %v2671_v28 }
 0x21b   :  { %v2672_v31 = vadd.f32 %v2668_v33, %v2659_v19  ;;  %2707 = vst [vmem:[#allocation11 + $0x38] sm:$0xff] %v2705_v36 }
 0x21c   :  { %2733 = dma.vmem_to_hbm [thread:$0]  %s2726_s12, 1024, %s2728_s15, [#allocation12], %s3078_s26, %s3078_s26, %s3079_s27  }
 0x21d   :  { %2677 = vst [vmem:[#allocation10 + $0xf8] sm:$0xff] %v2672_v31 }
 0x21e   :  { %2720 = dma.vmem_to_hbm [thread:$0]  %s2713_s17, 4096, %s2715_s20, [#allocation4], %s3078_s26, %s3078_s26, %s3079_s27  }
 0x21f   :  { %3073 = dma.done.wait [#allocation4], 4096  }
 0x220   :  { %3074 = vsyncadd [#allocation4], 4294963200 }
 0x221   :  { %3075 = dma.done.wait [#allocation12], 1024  }
 0x222   :  { %3076 = vsyncadd [#allocation12], 4294966272 }
 0x223   :  { %2742 = vsyncpa [#allocation3], 1 }
 0x224   :  { %2743 = vsyncpa [#allocation6], 1 }
 0x225   :  { %2744 = vsyncpa [#allocation9], 1 }
 0x226   :  { %2745 = vsyncpa [#allocation4], 1 }
 0x227   :  { %2746 = vsyncpa [#allocation12], 1 }

</bundles_post_ra>
